<compile_context>
chip_gen: v7x
topology: tpu7x:2x2x1
jax: 0.10.0
libtpu: 0.0.40
codegen_flags: <defaults>
</compile_context>

<pallas_src>
import jax
import jax.numpy as jnp
from jax.experimental import pallas as pl
from jax.experimental.pallas import tpu as pltpu


def _head_kernel(feat_ref, w1_ref, w2_ref, b2_ref, out_ref, acc_ref):
    """Fused avg-pool + (Linear+BN folded) + Linear head.

    Grid = (nb_blocks [parallel], n_k [arbitrary / channel reduction]).

    feat_ref : (B, TK, HW) bf16   channel tile of the backbone feature map
    w1_ref   : (TK, NBj)   bf16   matching tile of the bottleneck weight
    w2_ref   : (NBj, NC)   bf16   folded classifier weight (column block j)
    b2_ref   : (1, NC)     f32    folded classifier bias
    out_ref  : (1, B, NC)  f32    partial logits for bottleneck block j
    acc_ref  : (B, NBj)    f32    bottleneck accumulator, resident across k
    """
    j = pl.program_id(0)
    k = pl.program_id(1)

    @pl.when(k == 0)
    def _():
        acc_ref[...] = jnp.zeros_like(acc_ref)

    # Global average pool over spatial positions (lane axis) for this channel tile,
    # accumulated in f32, then a bf16 x bf16 -> f32 partial bottleneck matmul.
    pooled = jnp.mean(feat_ref[...].astype(jnp.float32), axis=-1)        # (B, TK) f32
    acc_ref[...] += jnp.dot(pooled.astype(jnp.bfloat16), w1_ref[...],
                            preferred_element_type=jnp.float32)          # (B, NBj)

    @pl.when(k == pl.num_programs(1) - 1)
    def _():
        # BatchNorm1d(eval) + Linear bias already folded into w2/b2.
        # Dropout(p=0.5) is identity in eval mode.
        h = acc_ref[...].astype(jnp.bfloat16)                            # (B, NBj)
        logits = jnp.dot(h, w2_ref[...],
                         preferred_element_type=jnp.float32)             # (B, NC)
        # Add the folded bias exactly once (only the j == 0 bottleneck block).
        logits = jnp.where(j == 0, logits + b2_ref[...], logits)
        out_ref[0] = logits.astype(out_ref.dtype)


def fold_head_params(params, *, eps=1e-5, dtype=jnp.bfloat16):
    """Fold Linear bias + BatchNorm1d(eval) into the classifier weight/bias.

        h   = pooled @ w1 + b1
        hbn = (h - rmean) / sqrt(rvar + eps) * gamma + beta
        out = hbn @ w2 + b2
      ==> out = pooled @ w1 @ w2' + b2'
        w2' = (gamma / sqrt(rvar + eps))[:, None] * w2
        b2' = ((b1 - rmean) * gamma / sqrt(rvar + eps) + beta) @ w2 + b2
    """
    inv_std = jax.lax.rsqrt(params["rvar"] + eps)                        # (1, NB)
    scale = params["gamma"] * inv_std                                    # (1, NB)
    w2f = scale.reshape(-1, 1) * params["w2"]                            # (NB, NC)
    b2f = ((params["b1"] - params["rmean"]) * scale + params["beta"]) \
        @ params["w2"] + params["b2"]                                    # (1, NC)
    return params["w1"].astype(dtype), w2f.astype(dtype), b2f.astype(jnp.float32)


def _pick_tk(C, target_steps):
    """Largest-step channel tile that divides C and keeps the sublane dim % 8 == 0."""
    for s in range(target_steps, 0, -1):
        if C % s == 0 and (C // s) % 8 == 0:
            return C // s
    return C


def ft_net_nas_head(features_nchw, params, *, nb_blocks=1, k_steps=2, eps=1e-5):
    """avg-pool + ClassBlock (eval mode) on backbone features, in one Pallas kernel.

    features_nchw : (B, 4032, H, W) float32   (stubbed backbone output)
    nb_blocks     : split of the 512 bottleneck columns across the parallel grid
                    axis. Use 2 on v7x (two TensorCores); 1 on v5e/v6e.
    returns       : (B, class_num) float32 logits
    """
    B, C, H, W = features_nchw.shape
    HW = H * W

    w1, w2f, b2f = fold_head_params(params, eps=eps)   # bf16, bf16, f32
    NB, NC = w2f.shape[0], w2f.shape[1]
    assert NB % nb_blocks == 0 and (NB // nb_blocks) % 128 == 0, \
        "bottleneck split must keep lane-aligned (multiple of 128) column blocks"
    nbj = NB // nb_blocks

    tk = _pick_tk(C, k_steps)
    n_k = C // tk

    # NCHW -> (B, C, HW): a pure reshape (no transpose / pad / extra HBM pass).
    # Channels tile along sublanes; the pooled HW axis stays lane-dense.
    feat = features_nchw.reshape(B, C, HW).astype(jnp.bfloat16)

    grid_spec = pltpu.PrefetchScalarGridSpec(
        num_scalar_prefetch=0,
        grid=(nb_blocks, n_k),
        in_specs=[
            pl.BlockSpec((B, tk, HW), lambda j, k: (0, k, 0)),   # feature channel tile
            pl.BlockSpec((tk, nbj), lambda j, k: (k, j)),        # w1 tile
            pl.BlockSpec((nbj, NC), lambda j, k: (j, 0)),        # folded w2 column block
            pl.BlockSpec((1, NC), lambda j, k: (0, 0)),          # folded bias
        ],
        out_specs=pl.BlockSpec((1, B, NC), lambda j, k: (j, 0, 0)),  # resident over k
        scratch_shapes=[pltpu.VMEM((B, nbj), jnp.float32)],
    )

    partial_logits = pl.pallas_call(
        _head_kernel,
        out_shape=jax.ShapeDtypeStruct((nb_blocks, B, NC), jnp.float32),
        grid_spec=grid_spec,
        compiler_params=pltpu.CompilerParams(
            # j axis: independent bottleneck column blocks (megacore on v7x);
            # k axis: channel reduction with a resident accumulator.
            dimension_semantics=("parallel", "arbitrary"),
            # No explicit vmem_limit_bytes: total usage is ~7 MiB, far below every
            # generation's scoped default (16/32/32 MiB on v5e/v6e/v7x).
        ),
    )(feat, w1, w2f, b2f)

    return partial_logits.sum(axis=0)                            # (B, NC) f32


def init_params(key, input_dim=4032, num_bottleneck=512, class_num=751):
    """Deterministic init mirroring weights_init_kaiming / weights_init_classifier."""
    k1, k2, k3 = jax.random.split(key, 3)
    # Linear(4032 -> 512): kaiming_normal_, mode='fan_out' => std = sqrt(2 / out_features)
    std1 = (2.0 / num_bottleneck) ** 0.5
    w1 = jax.random.normal(k1, (input_dim, num_bottleneck), jnp.float32) * std1
    b1 = jnp.zeros((1, num_bottleneck), jnp.float32)
    # BatchNorm1d(512): weight ~ N(1.0, 0.02), bias = 0, running stats = (0, 1)
    gamma = 1.0 + 0.02 * jax.random.normal(k2, (1, num_bottleneck), jnp.float32)
    beta = jnp.zeros((1, num_bottleneck), jnp.float32)
    rmean = jnp.zeros((1, num_bottleneck), jnp.float32)
    rvar = jnp.ones((1, num_bottleneck), jnp.float32)
    # classifier Linear(512 -> class_num): weight ~ N(0, 0.001), bias = 0
    w2 = 0.001 * jax.random.normal(k3, (num_bottleneck, class_num), jnp.float32)
    b2 = jnp.zeros((1, class_num), jnp.float32)
    return dict(w1=w1, b1=b1, gamma=gamma, beta=beta, rmean=rmean, rvar=rvar,
                w2=w2, b2=b2)


def reference_head(features_nchw, params, eps=1e-5):
    """Pure-JAX f32 reference for the post-backbone path (eval semantics)."""
    pooled = jnp.mean(features_nchw, axis=(2, 3))                      # (B, C)
    h = pooled @ params["w1"] + params["b1"]                           # (B, 512)
    h = (h - params["rmean"]) * jax.lax.rsqrt(params["rvar"] + eps) \
        * params["gamma"] + params["beta"]
    return h @ params["w2"] + params["b2"]                             # (B, NC)


if __name__ == "__main__":
    key = jax.random.PRNGKey(0)
    k_feat, k_params = jax.random.split(key)

    B, C, H, W = 2, 4032, 8, 8
    class_num = 751

    # TODO(synk): synthetic stand-in for NASNet-A-Large `model.features(x)` output.
    features = jax.random.normal(k_feat, (B, C, H, W), jnp.float32)
    params = init_params(k_params, input_dim=C, class_num=class_num)

    ref = reference_head(features, params)

    run_1tc = jax.jit(lambda f, p: ft_net_nas_head(f, p, nb_blocks=1))  # v5e / v6e
    run_2tc = jax.jit(lambda f, p: ft_net_nas_head(f, p, nb_blocks=2))  # v7x (2 TCs)

    out1 = jax.block_until_ready(run_1tc(features, params))
    out2 = jax.block_until_ready(run_2tc(features, params))

    assert out1.shape == (B, class_num) and out2.shape == (B, class_num)
    # bf16 weights/activations with f32 accumulation vs. pure-f32 reference.
    assert jnp.allclose(out1, ref, atol=2e-3, rtol=2e-2), "nb_blocks=1 mismatch vs reference"
    assert jnp.allclose(out2, ref, atol=2e-3, rtol=2e-2), "nb_blocks=2 mismatch vs reference"

    print("KERNEL_OK")
</pallas_src>

<mosaic_0001>
module attributes {stable_mosaic.version = 11 : i64} {
  func.func @_head_kernel(%arg0: i32, %arg1: i32, %arg2: memref<2x2016x64xbf16, #tpu.memory_space<vmem>>, %arg3: memref<2016x512xbf16, #tpu.memory_space<vmem>>, %arg4: memref<512x751xbf16, #tpu.memory_space<vmem>>, %arg5: memref<1x751xf32, #tpu.memory_space<vmem>>, %arg6: memref<1x2x751xf32, #tpu.memory_space<vmem>>, %arg7: memref<2x512xf32, #tpu.memory_space<vmem>>) attributes {dimension_semantics = [#tpu.dimension_semantics<parallel>, #tpu.dimension_semantics<arbitrary>], iteration_bounds = array<i64: 1, 2>, scalar_prefetch = 0 : i64, scratch_operands = 1 : i64, tpu.core_type = #tpu.core_type<tc>, window_params = [{transform_indices = @transform_0, window_bounds = array<i64: 2, 2016, 64>}, {transform_indices = @transform_1, window_bounds = array<i64: 2016, 512>}, {transform_indices = @transform_2, window_bounds = array<i64: 512, 751>}, {pipeline_mode = #tpu.pipeline_mode<synchronous>, transform_indices = @transform_3, window_bounds = array<i64: 1, 751>}, {transform_indices = @transform_4, window_bounds = array<i64: 1, 2, 751>}]} {
    %c0_i32 = arith.constant 0 : i32
    %0 = arith.cmpi eq, %arg1, %c0_i32 : i32
    %1 = arith.extui %0 : i1 to i32
    %c0_i32_0 = arith.constant 0 : i32
    %2 = arith.cmpi ne, %1, %c0_i32_0 : i32
    scf.if %2 {
      %cst_12 = arith.constant 0.000000e+00 : f32
      %17 = vector.broadcast %cst_12 : f32 to vector<2x512xf32>
      %c0_13 = arith.constant 0 : index
      %c0_14 = arith.constant 0 : index
      %18 = vector.load %arg7[%c0_13, %c0_14] : memref<2x512xf32, #tpu.memory_space<vmem>>, vector<2x512xf32>
      tpu.vector_store %arg7[%c0_13, %c0_14], %17 {strides = array<i32>} : memref<2x512xf32, #tpu.memory_space<vmem>>, vector<2x512xf32>,
    } else {
    }
    %c0 = arith.constant 0 : index
    %c0_1 = arith.constant 0 : index
    %c0_2 = arith.constant 0 : index
    %3 = vector.load %arg2[%c0, %c0_1, %c0_2] : memref<2x2016x64xbf16, #tpu.memory_space<vmem>>, vector<2x2016x64xbf16>
    %4 = arith.extf %3 : vector<2x2016x64xbf16> to vector<2x2016x64xf32>
    %cst = arith.constant dense<0.000000e+00> : vector<2x2016xf32>
    %5 = vector.multi_reduction <add>, %4, %cst [2] : vector<2x2016x64xf32> to vector<2x2016xf32>
    %cst_3 = arith.constant 6.400000e+01 : f32
    %6 = vector.broadcast %cst_3 : f32 to vector<2x2016xf32>
    %7 = arith.divf %5, %6 : vector<2x2016xf32>
    %c0_4 = arith.constant 0 : index
    %c0_5 = arith.constant 0 : index
    %8 = vector.load %arg7[%c0_4, %c0_5] : memref<2x512xf32, #tpu.memory_space<vmem>>, vector<2x512xf32>
    %9 = arith.truncf %7 : vector<2x2016xf32> to vector<2x2016xbf16>
    %c0_6 = arith.constant 0 : index
    %c0_7 = arith.constant 0 : index
    %10 = vector.load %arg3[%c0_6, %c0_7] : memref<2016x512xbf16, #tpu.memory_space<vmem>>, vector<2016x512xbf16>
    %cst_8 = arith.constant dense<0.000000e+00> : vector<2x512xf32>
    %11 = tpu.matmul %9, %10, %cst_8 {dimension_numbers = #tpu.dot_dimension_numbers<[1], [0], [0], [1], [0, 0, 1, 1], [], []>} : vector<2x2016xbf16>, vector<2016x512xbf16>, vector<2x512xf32> -> vector<2x512xf32>
    %12 = arith.addf %8, %11 : vector<2x512xf32>
    %c0_9 = arith.constant 0 : index
    %c0_10 = arith.constant 0 : index
    %13 = vector.load %arg7[%c0_9, %c0_10] : memref<2x512xf32, #tpu.memory_space<vmem>>, vector<2x512xf32>
    tpu.vector_store %arg7[%c0_9, %c0_10], %12 {strides = array<i32>} : memref<2x512xf32, #tpu.memory_space<vmem>>, vector<2x512xf32>,
    %c1_i32 = arith.constant 1 : i32
    %14 = arith.cmpi eq, %arg1, %c1_i32 : i32
    %15 = arith.extui %14 : i1 to i32
    %c0_i32_11 = arith.constant 0 : i32
    %16 = arith.cmpi ne, %15, %c0_i32_11 : i32
    scf.if %16 {
      %c0_12 = arith.constant 0 : index
      %c0_13 = arith.constant 0 : index
      %17 = vector.load %arg7[%c0_12, %c0_13] : memref<2x512xf32, #tpu.memory_space<vmem>>, vector<2x512xf32>
      %18 = arith.truncf %17 : vector<2x512xf32> to vector<2x512xbf16>
      %c0_14 = arith.constant 0 : index
      %c0_15 = arith.constant 0 : index
      %19 = vector.load %arg4[%c0_14, %c0_15] : memref<512x751xbf16, #tpu.memory_space<vmem>>, vector<512x751xbf16>
      %cst_16 = arith.constant dense<0.000000e+00> : vector<2x751xf32>
      %20 = tpu.matmul %18, %19, %cst_16 {dimension_numbers = #tpu.dot_dimension_numbers<[1], [0], [0], [1], [0, 0, 1, 1], [], []>} : vector<2x512xbf16>, vector<512x751xbf16>, vector<2x751xf32> -> vector<2x751xf32>
      %c0_i32_17 = arith.constant 0 : i32
      %21 = arith.cmpi eq, %arg0, %c0_i32_17 : i32
      %c0_18 = arith.constant 0 : index
      %c0_19 = arith.constant 0 : index
      %22 = vector.load %arg5[%c0_18, %c0_19] : memref<1x751xf32, #tpu.memory_space<vmem>>, vector<1x751xf32>
      %23 = vector.broadcast %22 : vector<1x751xf32> to vector<2x751xf32>
      %24 = arith.addf %20, %23 : vector<2x751xf32>
      %25 = arith.select %21, %24, %20 : vector<2x751xf32>
      %c0_20 = arith.constant 0 : index
      %c0_21 = arith.constant 0 : index
      %c0_22 = arith.constant 0 : index
      %26 = vector.load %arg6[%c0_20, %c0_21, %c0_22] : memref<1x2x751xf32, #tpu.memory_space<vmem>>, vector<1x2x751xf32>
      %27 = vector.shape_cast %26 : vector<1x2x751xf32> to vector<2x751xf32>
      %28 = vector.shape_cast %25 : vector<2x751xf32> to vector<1x2x751xf32>
      tpu.vector_store %arg6[%c0_20, %c0_21, %c0_22], %28 {strides = array<i32>} : memref<1x2x751xf32, #tpu.memory_space<vmem>>, vector<1x2x751xf32>,
    } else {
    }
    return
  }
  func.func @transform_0(%arg0: i32, %arg1: i32) -> (i32, i32, i32) {
    %c0_i32 = arith.constant 0 : i32
    %c0_i32_0 = arith.constant 0 : i32
    %c0_i32_1 = arith.constant 0 : i32
    return %c0_i32, %arg1, %c0_i32_0 : i32, i32, i32
  }
  func.func @transform_1(%arg0: i32, %arg1: i32) -> (i32, i32) {
    %c0_i32 = arith.constant 0 : i32
    return %arg1, %arg0 : i32, i32
  }
  func.func @transform_2(%arg0: i32, %arg1: i32) -> (i32, i32) {
    %c0_i32 = arith.constant 0 : i32
    %c0_i32_0 = arith.constant 0 : i32
    return %arg0, %c0_i32 : i32, i32
  }
  func.func @transform_3(%arg0: i32, %arg1: i32) -> (i32, i32) {
    %c0_i32 = arith.constant 0 : i32
    %c0_i32_0 = arith.constant 0 : i32
    %c0_i32_1 = arith.constant 0 : i32
    return %c0_i32, %c0_i32_0 : i32, i32
  }
  func.func @transform_4(%arg0: i32, %arg1: i32) -> (i32, i32, i32) {
    %c0_i32 = arith.constant 0 : i32
    %c0_i32_0 = arith.constant 0 : i32
    %c0_i32_1 = arith.constant 0 : i32
    return %arg0, %c0_i32, %c0_i32_0 : i32, i32, i32
  }
}

</mosaic_0001>

<bundles_post_ra>
// kernel: _lambda_.1
= control target key start
LH: loop header
LB: loop body
LE: loop exit
PB: predicated region body
PF: predicated region fallthrough
CT: control target
= control target key end

     0   :  { %9 = vsyncpa [#allocation5], 0  ;;  %s17477_s15 = smov 0   ;;  %s17479_s16 = smov 0   ;;  %s22160_s0 = inlined_call_operand.vmem [shape: bf16[2,4032,64], index: 0, kind: input, shape index: {}]   ;;  %s22161_s1 = inlined_call_operand.vmem [shape: bf16[4032,512], index: 1, kind: input, shape index: {}]   ;;  %s22162_s2 = inlined_call_operand.vmem [shape: bf16[512,751], index: 2, kind: input, shape index: {}]   ;;  %s22163_s3 = inlined_call_operand.vmem [shape: f32[1,751], index: 3, kind: input, shape index: {}]   ;;  %s22164_s4 = inlined_call_operand.hbm [shape: f32[1,2,751], index: 4, kind: output, shape index: {}]  }
   0x1   :  { %s17481_s17 = smov 0   ;;  %s17483_s18 = smov 0  }
   0x2   :  { %s17485_s19 = smov 0  }
   0x3 LB: > { %s14253_s20 = sadd.s32 4294967295, %s17447_s19   ;;  %s24_s21 = sadd.s32 1, %s17443_s18  ;;  %s17447_s19 = sphi %s17485_s19, %s15_s19   ;;  %s17443_s18 = sphi %s17483_s18, %s22320_s18   ;;  %s17439_s17 = sphi %s17481_s17, %s22319_s17   ;;  %s17435_s16 = sphi %s17479_s16, %s22318_s16   ;;  %s17431_s15 = sphi %s17477_s15, %s22317_s15  }
   0x4   : > { %p25_p0 = scmp.ge.s32.totalorder %s24_s21, 2  ;;  %p41_p1 = scmp.ne.s32.totalorder %s17435_s16, %s17431_s15 }
   0x5   : > { %p42_p2 = scmp.eq.s32.totalorder %s17447_s19, 0  ;;  %s34_s23 = sadd.s32 1, %s17435_s16 }
   0x6   : > { %s22322_s21 = smov (%p25_p0, %s24_s21), 0  ;;  %p14256_p5 = scmp.ge.s32.totalorder %s17447_s19, 2 }
   0x7   : > { %p43_p3 = por %p42_p2, %p41_p1  ;;  %s31_s22 = ssub.s32 %s17443_s18, %s22322_s21 }
   0x8   : > { %p32_p4 = scmp.eq.s32.totalorder %s31_s22, 0  ;;  %181 = sbr.rel (%p14256_p5) target bundleno = 146 (0x92), region = 24 }
   0xa   : > { %s17513_s24 = scalar_select %p32_p4, %s17435_s16, %s34_s23  }
   0xf   : > { %184 = sbr.rel (!%p43_p3) target bundleno = 146 (0x92), region = 28  ;;  %s186_s25 = sand.u32 (%p43_p3), 1, %s17435_s16  }
  0x10   : > { %s14965_s26 = smul.u32 (%p43_p3), 1008, %s17443_s18 }
  0x11   : > { %s16282_s27 = smul.u32 (%p43_p3), 2016, %s186_s25 }
  0x12   : > { %s17521_s30 = scalar_lea.vmem (%p43_p3), %s22160_s0, %s14965_s26 }
  0x13   : > { %v207_v0 = vld [vmem:[%s17521_s30] sm:$0xff] (%p43_p3)   ;;  %v211_v1 = vld [vmem:[%s17521_s30 + $0x8] sm:$0xff] (%p43_p3)   ;;  %v215_v2 = vld [vmem:[%s17521_s30 + $0x10] sm:$0xff] (%p43_p3)   ;;  %s17526_s5 = scalar_lea.vmem (%p43_p3), [#allocation3], %s16282_s27 }
  0x14   : > { %208 = vst [vmem:[%s17526_s5] sm:$0xff] (%p43_p3), %v207_v0   ;;  %212 = vst [vmem:[%s17526_s5 + $0x8] sm:$0xff] (%p43_p3), %v211_v1   ;;  %v219_v3 = vld [vmem:[%s17521_s30 + $0x18] sm:$0xff] (%p43_p3)   ;;  %v223_v4 = vld [vmem:[%s17521_s30 + $0x20] sm:$0xff] (%p43_p3)  }
  0x15   : > { %216 = vst [vmem:[%s17526_s5 + $0x10] sm:$0xff] (%p43_p3), %v215_v2   ;;  %v227_v5 = vld [vmem:[%s17521_s30 + $0x28] sm:$0xff] (%p43_p3)   ;;  %220 = vst [vmem:[%s17526_s5 + $0x18] sm:$0xff] (%p43_p3), %v219_v3   ;;  %v231_v6 = vld [vmem:[%s17521_s30 + $0x30] sm:$0xff] (%p43_p3)  }
  0x16   : > { %224 = vst [vmem:[%s17526_s5 + $0x20] sm:$0xff] %v223_v4   ;;  %228 = vst [vmem:[%s17526_s5 + $0x28] sm:$0xff] %v227_v5   ;;  %v235_v7 = vld [vmem:[%s17521_s30 + $0x38] sm:$0xff]   ;;  %v239_v8 = vld [vmem:[%s17521_s30 + $0x40] sm:$0xff]  }
  0x17   : > { %232 = vst [vmem:[%s17526_s5 + $0x30] sm:$0xff] %v231_v6   ;;  %236 = vst [vmem:[%s17526_s5 + $0x38] sm:$0xff] %v235_v7   ;;  %v243_v9 = vld [vmem:[%s17521_s30 + $0x48] sm:$0xff]   ;;  %v247_v10 = vld [vmem:[%s17521_s30 + $0x50] sm:$0xff]  }
  0x18   : > { %240 = vst [vmem:[%s17526_s5 + $0x40] sm:$0xff] %v239_v8   ;;  %v251_v11 = vld [vmem:[%s17521_s30 + $0x58] sm:$0xff]   ;;  %244 = vst [vmem:[%s17526_s5 + $0x48] sm:$0xff] %v243_v9   ;;  %v255_v12 = vld [vmem:[%s17521_s30 + $0x60] sm:$0xff]  }
  0x19   : > { %248 = vst [vmem:[%s17526_s5 + $0x50] sm:$0xff] %v247_v10   ;;  %252 = vst [vmem:[%s17526_s5 + $0x58] sm:$0xff] %v251_v11   ;;  %v259_v13 = vld [vmem:[%s17521_s30 + $0x68] sm:$0xff]   ;;  %v263_v14 = vld [vmem:[%s17521_s30 + $0x70] sm:$0xff]  }
  0x1a   : > { %256 = vst [vmem:[%s17526_s5 + $0x60] sm:$0xff] %v255_v12   ;;  %260 = vst [vmem:[%s17526_s5 + $0x68] sm:$0xff] %v259_v13   ;;  %v267_v15 = vld [vmem:[%s17521_s30 + $0x78] sm:$0xff]   ;;  %v271_v16 = vld [vmem:[%s17521_s30 + $0x80] sm:$0xff]  }
  0x1b   : > { %264 = vst [vmem:[%s17526_s5 + $0x70] sm:$0xff] %v263_v14   ;;  %v275_v17 = vld [vmem:[%s17521_s30 + $0x88] sm:$0xff]   ;;  %268 = vst [vmem:[%s17526_s5 + $0x78] sm:$0xff] %v267_v15   ;;  %v279_v18 = vld [vmem:[%s17521_s30 + $0x90] sm:$0xff]  }
  0x1c   : > { %272 = vst [vmem:[%s17526_s5 + $0x80] sm:$0xff] %v271_v16   ;;  %276 = vst [vmem:[%s17526_s5 + $0x88] sm:$0xff] %v275_v17   ;;  %v283_v19 = vld [vmem:[%s17521_s30 + $0x98] sm:$0xff]   ;;  %v287_v20 = vld [vmem:[%s17521_s30 + $0xa0] sm:$0xff]  }
  0x1d   : > { %280 = vst [vmem:[%s17526_s5 + $0x90] sm:$0xff] %v279_v18   ;;  %284 = vst [vmem:[%s17526_s5 + $0x98] sm:$0xff] %v283_v19   ;;  %v291_v21 = vld [vmem:[%s17521_s30 + $0xa8] sm:$0xff]   ;;  %v295_v22 = vld [vmem:[%s17521_s30 + $0xb0] sm:$0xff]  }
  0x1e   : > { %288 = vst [vmem:[%s17526_s5 + $0xa0] sm:$0xff] %v287_v20   ;;  %v299_v23 = vld [vmem:[%s17521_s30 + $0xb8] sm:$0xff]   ;;  %292 = vst [vmem:[%s17526_s5 + $0xa8] sm:$0xff] %v291_v21   ;;  %v303_v24 = vld [vmem:[%s17521_s30 + $0xc0] sm:$0xff]  }
  0x1f   : > { %296 = vst [vmem:[%s17526_s5 + $0xb0] sm:$0xff] %v295_v22   ;;  %300 = vst [vmem:[%s17526_s5 + $0xb8] sm:$0xff] %v299_v23   ;;  %v307_v25 = vld [vmem:[%s17521_s30 + $0xc8] sm:$0xff]   ;;  %v311_v26 = vld [vmem:[%s17521_s30 + $0xd0] sm:$0xff]  }
  0x20   : > { %304 = vst [vmem:[%s17526_s5 + $0xc0] sm:$0xff] %v303_v24   ;;  %308 = vst [vmem:[%s17526_s5 + $0xc8] sm:$0xff] %v307_v25   ;;  %v315_v27 = vld [vmem:[%s17521_s30 + $0xd8] sm:$0xff]   ;;  %v319_v28 = vld [vmem:[%s17521_s30 + $0xe0] sm:$0xff]  }
  0x21   : > { %312 = vst [vmem:[%s17526_s5 + $0xd0] sm:$0xff] %v311_v26   ;;  %v323_v29 = vld [vmem:[%s17521_s30 + $0xe8] sm:$0xff]   ;;  %316 = vst [vmem:[%s17526_s5 + $0xd8] sm:$0xff] %v315_v27   ;;  %v327_v30 = vld [vmem:[%s17521_s30 + $0xf0] sm:$0xff]  }
  0x22   : > { %320 = vst [vmem:[%s17526_s5 + $0xe0] sm:$0xff] %v319_v28   ;;  %324 = vst [vmem:[%s17526_s5 + $0xe8] sm:$0xff] %v323_v29   ;;  %v331_v31 = vld [vmem:[%s17521_s30 + $0xf8] sm:$0xff]   ;;  %v335_v32 = vld [vmem:[%s17521_s30 + $0x100] sm:$0xff]  }
  0x23   : > { %328 = vst [vmem:[%s17526_s5 + $0xf0] sm:$0xff] %v327_v30   ;;  %332 = vst [vmem:[%s17526_s5 + $0xf8] sm:$0xff] %v331_v31   ;;  %v339_v33 = vld [vmem:[%s17521_s30 + $0x108] sm:$0xff]   ;;  %v343_v34 = vld [vmem:[%s17521_s30 + $0x110] sm:$0xff]  }
  0x24   : > { %336 = vst [vmem:[%s17526_s5 + $0x100] sm:$0xff] %v335_v32   ;;  %v347_v35 = vld [vmem:[%s17521_s30 + $0x118] sm:$0xff]   ;;  %340 = vst [vmem:[%s17526_s5 + $0x108] sm:$0xff] %v339_v33   ;;  %v351_v36 = vld [vmem:[%s17521_s30 + $0x120] sm:$0xff]  }
  0x25   : > { %344 = vst [vmem:[%s17526_s5 + $0x110] sm:$0xff] %v343_v34   ;;  %348 = vst [vmem:[%s17526_s5 + $0x118] sm:$0xff] %v347_v35   ;;  %v355_v37 = vld [vmem:[%s17521_s30 + $0x128] sm:$0xff]   ;;  %v359_v38 = vld [vmem:[%s17521_s30 + $0x130] sm:$0xff]  }
  0x26   : > { %352 = vst [vmem:[%s17526_s5 + $0x120] sm:$0xff] %v351_v36   ;;  %356 = vst [vmem:[%s17526_s5 + $0x128] sm:$0xff] %v355_v37   ;;  %v363_v39 = vld [vmem:[%s17521_s30 + $0x138] sm:$0xff]   ;;  %v367_v40 = vld [vmem:[%s17521_s30 + $0x140] sm:$0xff]  }
  0x27   : > { %360 = vst [vmem:[%s17526_s5 + $0x130] sm:$0xff] %v359_v38   ;;  %v371_v41 = vld [vmem:[%s17521_s30 + $0x148] sm:$0xff]   ;;  %364 = vst [vmem:[%s17526_s5 + $0x138] sm:$0xff] %v363_v39   ;;  %v375_v42 = vld [vmem:[%s17521_s30 + $0x150] sm:$0xff]  }
  0x28   : > { %368 = vst [vmem:[%s17526_s5 + $0x140] sm:$0xff] %v367_v40   ;;  %372 = vst [vmem:[%s17526_s5 + $0x148] sm:$0xff] %v371_v41   ;;  %v379_v43 = vld [vmem:[%s17521_s30 + $0x158] sm:$0xff]   ;;  %v383_v44 = vld [vmem:[%s17521_s30 + $0x160] sm:$0xff]  }
  0x29   : > { %376 = vst [vmem:[%s17526_s5 + $0x150] sm:$0xff] %v375_v42   ;;  %380 = vst [vmem:[%s17526_s5 + $0x158] sm:$0xff] %v379_v43   ;;  %v387_v45 = vld [vmem:[%s17521_s30 + $0x168] sm:$0xff]   ;;  %v391_v46 = vld [vmem:[%s17521_s30 + $0x170] sm:$0xff]  }
  0x2a   : > { %384 = vst [vmem:[%s17526_s5 + $0x160] sm:$0xff] %v383_v44   ;;  %v395_v47 = vld [vmem:[%s17521_s30 + $0x178] sm:$0xff]   ;;  %388 = vst [vmem:[%s17526_s5 + $0x168] sm:$0xff] %v387_v45   ;;  %v399_v48 = vld [vmem:[%s17521_s30 + $0x180] sm:$0xff]  }
  0x2b   : > { %392 = vst [vmem:[%s17526_s5 + $0x170] sm:$0xff] %v391_v46   ;;  %396 = vst [vmem:[%s17526_s5 + $0x178] sm:$0xff] %v395_v47   ;;  %v403_v49 = vld [vmem:[%s17521_s30 + $0x188] sm:$0xff]   ;;  %v407_v50 = vld [vmem:[%s17521_s30 + $0x190] sm:$0xff]  }
  0x2c   : > { %400 = vst [vmem:[%s17526_s5 + $0x180] sm:$0xff] %v399_v48   ;;  %404 = vst [vmem:[%s17526_s5 + $0x188] sm:$0xff] %v403_v49   ;;  %v411_v51 = vld [vmem:[%s17521_s30 + $0x198] sm:$0xff]   ;;  %v415_v52 = vld [vmem:[%s17521_s30 + $0x1a0] sm:$0xff]  }
  0x2d   : > { %408 = vst [vmem:[%s17526_s5 + $0x190] sm:$0xff] %v407_v50   ;;  %v419_v53 = vld [vmem:[%s17521_s30 + $0x1a8] sm:$0xff]   ;;  %412 = vst [vmem:[%s17526_s5 + $0x198] sm:$0xff] %v411_v51   ;;  %v423_v54 = vld [vmem:[%s17521_s30 + $0x1b0] sm:$0xff]  }
  0x2e   : > { %416 = vst [vmem:[%s17526_s5 + $0x1a0] sm:$0xff] %v415_v52   ;;  %420 = vst [vmem:[%s17526_s5 + $0x1a8] sm:$0xff] %v419_v53   ;;  %v427_v55 = vld [vmem:[%s17521_s30 + $0x1b8] sm:$0xff]   ;;  %v431_v56 = vld [vmem:[%s17521_s30 + $0x1c0] sm:$0xff]  }
  0x2f   : > { %424 = vst [vmem:[%s17526_s5 + $0x1b0] sm:$0xff] %v423_v54   ;;  %428 = vst [vmem:[%s17526_s5 + $0x1b8] sm:$0xff] %v427_v55   ;;  %v435_v57 = vld [vmem:[%s17521_s30 + $0x1c8] sm:$0xff]   ;;  %v439_v58 = vld [vmem:[%s17521_s30 + $0x1d0] sm:$0xff]  }
  0x30   : > { %432 = vst [vmem:[%s17526_s5 + $0x1c0] sm:$0xff] %v431_v56   ;;  %v443_v59 = vld [vmem:[%s17521_s30 + $0x1d8] sm:$0xff]   ;;  %436 = vst [vmem:[%s17526_s5 + $0x1c8] sm:$0xff] %v435_v57   ;;  %v447_v60 = vld [vmem:[%s17521_s30 + $0x1e0] sm:$0xff]  }
  0x31   : > { %440 = vst [vmem:[%s17526_s5 + $0x1d0] sm:$0xff] %v439_v58   ;;  %444 = vst [vmem:[%s17526_s5 + $0x1d8] sm:$0xff] %v443_v59   ;;  %v451_v61 = vld [vmem:[%s17521_s30 + $0x1e8] sm:$0xff]   ;;  %v455_v62 = vld [vmem:[%s17521_s30 + $0x1f0] sm:$0xff]  }
  0x32   : > { %448 = vst [vmem:[%s17526_s5 + $0x1e0] sm:$0xff] %v447_v60   ;;  %452 = vst [vmem:[%s17526_s5 + $0x1e8] sm:$0xff] %v451_v61   ;;  %v459_v63 = vld [vmem:[%s17521_s30 + $0x1f8] sm:$0xff]   ;;  %v463_v0 = vld [vmem:[%s17521_s30 + $0x200] sm:$0xff]  }
  0x33   : > { %456 = vst [vmem:[%s17526_s5 + $0x1f0] sm:$0xff] %v455_v62   ;;  %v467_v1 = vld [vmem:[%s17521_s30 + $0x208] sm:$0xff]   ;;  %460 = vst [vmem:[%s17526_s5 + $0x1f8] sm:$0xff] %v459_v63   ;;  %v471_v2 = vld [vmem:[%s17521_s30 + $0x210] sm:$0xff]  }
  0x34   : > { %464 = vst [vmem:[%s17526_s5 + $0x200] sm:$0xff] %v463_v0   ;;  %468 = vst [vmem:[%s17526_s5 + $0x208] sm:$0xff] %v467_v1   ;;  %v475_v3 = vld [vmem:[%s17521_s30 + $0x218] sm:$0xff]   ;;  %v479_v4 = vld [vmem:[%s17521_s30 + $0x220] sm:$0xff]  }
  0x35   : > { %472 = vst [vmem:[%s17526_s5 + $0x210] sm:$0xff] %v471_v2   ;;  %476 = vst [vmem:[%s17526_s5 + $0x218] sm:$0xff] %v475_v3   ;;  %v483_v5 = vld [vmem:[%s17521_s30 + $0x228] sm:$0xff]   ;;  %v487_v6 = vld [vmem:[%s17521_s30 + $0x230] sm:$0xff]  }
  0x36   : > { %480 = vst [vmem:[%s17526_s5 + $0x220] sm:$0xff] %v479_v4   ;;  %v491_v7 = vld [vmem:[%s17521_s30 + $0x238] sm:$0xff]   ;;  %484 = vst [vmem:[%s17526_s5 + $0x228] sm:$0xff] %v483_v5   ;;  %v495_v8 = vld [vmem:[%s17521_s30 + $0x240] sm:$0xff]  }
  0x37   : > { %488 = vst [vmem:[%s17526_s5 + $0x230] sm:$0xff] %v487_v6   ;;  %492 = vst [vmem:[%s17526_s5 + $0x238] sm:$0xff] %v491_v7   ;;  %v499_v9 = vld [vmem:[%s17521_s30 + $0x248] sm:$0xff]   ;;  %v503_v10 = vld [vmem:[%s17521_s30 + $0x250] sm:$0xff]  }
  0x38   : > { %496 = vst [vmem:[%s17526_s5 + $0x240] sm:$0xff] %v495_v8   ;;  %500 = vst [vmem:[%s17526_s5 + $0x248] sm:$0xff] %v499_v9   ;;  %v507_v11 = vld [vmem:[%s17521_s30 + $0x258] sm:$0xff]   ;;  %v511_v12 = vld [vmem:[%s17521_s30 + $0x260] sm:$0xff]  }
  0x39   : > { %504 = vst [vmem:[%s17526_s5 + $0x250] sm:$0xff] %v503_v10   ;;  %v515_v13 = vld [vmem:[%s17521_s30 + $0x268] sm:$0xff]   ;;  %508 = vst [vmem:[%s17526_s5 + $0x258] sm:$0xff] %v507_v11   ;;  %v519_v14 = vld [vmem:[%s17521_s30 + $0x270] sm:$0xff]  }
  0x3a   : > { %512 = vst [vmem:[%s17526_s5 + $0x260] sm:$0xff] %v511_v12   ;;  %516 = vst [vmem:[%s17526_s5 + $0x268] sm:$0xff] %v515_v13   ;;  %v523_v15 = vld [vmem:[%s17521_s30 + $0x278] sm:$0xff]   ;;  %v527_v16 = vld [vmem:[%s17521_s30 + $0x280] sm:$0xff]  }
  0x3b   : > { %520 = vst [vmem:[%s17526_s5 + $0x270] sm:$0xff] %v519_v14   ;;  %524 = vst [vmem:[%s17526_s5 + $0x278] sm:$0xff] %v523_v15   ;;  %v531_v17 = vld [vmem:[%s17521_s30 + $0x288] sm:$0xff]   ;;  %v535_v18 = vld [vmem:[%s17521_s30 + $0x290] sm:$0xff]  }
  0x3c   : > { %528 = vst [vmem:[%s17526_s5 + $0x280] sm:$0xff] %v527_v16   ;;  %v539_v19 = vld [vmem:[%s17521_s30 + $0x298] sm:$0xff]   ;;  %532 = vst [vmem:[%s17526_s5 + $0x288] sm:$0xff] %v531_v17   ;;  %v543_v20 = vld [vmem:[%s17521_s30 + $0x2a0] sm:$0xff]  }
  0x3d   : > { %536 = vst [vmem:[%s17526_s5 + $0x290] sm:$0xff] %v535_v18   ;;  %540 = vst [vmem:[%s17526_s5 + $0x298] sm:$0xff] %v539_v19   ;;  %v547_v21 = vld [vmem:[%s17521_s30 + $0x2a8] sm:$0xff]   ;;  %v551_v22 = vld [vmem:[%s17521_s30 + $0x2b0] sm:$0xff]  }
  0x3e   : > { %544 = vst [vmem:[%s17526_s5 + $0x2a0] sm:$0xff] %v543_v20   ;;  %548 = vst [vmem:[%s17526_s5 + $0x2a8] sm:$0xff] %v547_v21   ;;  %v555_v23 = vld [vmem:[%s17521_s30 + $0x2b8] sm:$0xff]   ;;  %v559_v24 = vld [vmem:[%s17521_s30 + $0x2c0] sm:$0xff]  }
  0x3f   : > { %552 = vst [vmem:[%s17526_s5 + $0x2b0] sm:$0xff] %v551_v22   ;;  %v563_v25 = vld [vmem:[%s17521_s30 + $0x2c8] sm:$0xff]   ;;  %556 = vst [vmem:[%s17526_s5 + $0x2b8] sm:$0xff] %v555_v23   ;;  %v567_v26 = vld [vmem:[%s17521_s30 + $0x2d0] sm:$0xff]  }
  0x40   : > { %560 = vst [vmem:[%s17526_s5 + $0x2c0] sm:$0xff] %v559_v24   ;;  %564 = vst [vmem:[%s17526_s5 + $0x2c8] sm:$0xff] %v563_v25   ;;  %v571_v27 = vld [vmem:[%s17521_s30 + $0x2d8] sm:$0xff]   ;;  %v575_v28 = vld [vmem:[%s17521_s30 + $0x2e0] sm:$0xff]  }
  0x41   : > { %568 = vst [vmem:[%s17526_s5 + $0x2d0] sm:$0xff] %v567_v26   ;;  %572 = vst [vmem:[%s17526_s5 + $0x2d8] sm:$0xff] %v571_v27   ;;  %v579_v29 = vld [vmem:[%s17521_s30 + $0x2e8] sm:$0xff]   ;;  %v583_v30 = vld [vmem:[%s17521_s30 + $0x2f0] sm:$0xff]  }
  0x42   : > { %576 = vst [vmem:[%s17526_s5 + $0x2e0] sm:$0xff] %v575_v28   ;;  %v587_v31 = vld [vmem:[%s17521_s30 + $0x2f8] sm:$0xff]   ;;  %580 = vst [vmem:[%s17526_s5 + $0x2e8] sm:$0xff] %v579_v29   ;;  %v591_v32 = vld [vmem:[%s17521_s30 + $0x300] sm:$0xff]  }
  0x43   : > { %584 = vst [vmem:[%s17526_s5 + $0x2f0] sm:$0xff] %v583_v30   ;;  %588 = vst [vmem:[%s17526_s5 + $0x2f8] sm:$0xff] %v587_v31   ;;  %v595_v33 = vld [vmem:[%s17521_s30 + $0x308] sm:$0xff]   ;;  %v599_v34 = vld [vmem:[%s17521_s30 + $0x310] sm:$0xff]  }
  0x44   : > { %592 = vst [vmem:[%s17526_s5 + $0x300] sm:$0xff] %v591_v32   ;;  %596 = vst [vmem:[%s17526_s5 + $0x308] sm:$0xff] %v595_v33   ;;  %v603_v35 = vld [vmem:[%s17521_s30 + $0x318] sm:$0xff]   ;;  %v607_v36 = vld [vmem:[%s17521_s30 + $0x320] sm:$0xff]  }
  0x45   : > { %600 = vst [vmem:[%s17526_s5 + $0x310] sm:$0xff] %v599_v34   ;;  %v611_v37 = vld [vmem:[%s17521_s30 + $0x328] sm:$0xff]   ;;  %604 = vst [vmem:[%s17526_s5 + $0x318] sm:$0xff] %v603_v35   ;;  %v615_v38 = vld [vmem:[%s17521_s30 + $0x330] sm:$0xff]  }
  0x46   : > { %608 = vst [vmem:[%s17526_s5 + $0x320] sm:$0xff] %v607_v36   ;;  %612 = vst [vmem:[%s17526_s5 + $0x328] sm:$0xff] %v611_v37   ;;  %v619_v39 = vld [vmem:[%s17521_s30 + $0x338] sm:$0xff]   ;;  %v623_v40 = vld [vmem:[%s17521_s30 + $0x340] sm:$0xff]  }
  0x47   : > { %616 = vst [vmem:[%s17526_s5 + $0x330] sm:$0xff] %v615_v38   ;;  %620 = vst [vmem:[%s17526_s5 + $0x338] sm:$0xff] %v619_v39   ;;  %v627_v41 = vld [vmem:[%s17521_s30 + $0x348] sm:$0xff]   ;;  %v631_v42 = vld [vmem:[%s17521_s30 + $0x350] sm:$0xff]  }
  0x48   : > { %624 = vst [vmem:[%s17526_s5 + $0x340] sm:$0xff] %v623_v40   ;;  %v635_v43 = vld [vmem:[%s17521_s30 + $0x358] sm:$0xff]   ;;  %628 = vst [vmem:[%s17526_s5 + $0x348] sm:$0xff] %v627_v41   ;;  %v639_v44 = vld [vmem:[%s17521_s30 + $0x360] sm:$0xff]  }
  0x49   : > { %632 = vst [vmem:[%s17526_s5 + $0x350] sm:$0xff] %v631_v42   ;;  %636 = vst [vmem:[%s17526_s5 + $0x358] sm:$0xff] %v635_v43   ;;  %v643_v45 = vld [vmem:[%s17521_s30 + $0x368] sm:$0xff]   ;;  %v647_v46 = vld [vmem:[%s17521_s30 + $0x370] sm:$0xff]  }
  0x4a   : > { %640 = vst [vmem:[%s17526_s5 + $0x360] sm:$0xff] %v639_v44   ;;  %644 = vst [vmem:[%s17526_s5 + $0x368] sm:$0xff] %v643_v45   ;;  %v651_v47 = vld [vmem:[%s17521_s30 + $0x378] sm:$0xff]   ;;  %v655_v48 = vld [vmem:[%s17521_s30 + $0x380] sm:$0xff]  }
  0x4b   : > { %648 = vst [vmem:[%s17526_s5 + $0x370] sm:$0xff] %v647_v46   ;;  %v659_v49 = vld [vmem:[%s17521_s30 + $0x388] sm:$0xff]   ;;  %652 = vst [vmem:[%s17526_s5 + $0x378] sm:$0xff] %v651_v47   ;;  %v663_v50 = vld [vmem:[%s17521_s30 + $0x390] sm:$0xff]  }
  0x4c   : > { %656 = vst [vmem:[%s17526_s5 + $0x380] sm:$0xff] %v655_v48   ;;  %660 = vst [vmem:[%s17526_s5 + $0x388] sm:$0xff] %v659_v49   ;;  %v667_v51 = vld [vmem:[%s17521_s30 + $0x398] sm:$0xff]   ;;  %v671_v52 = vld [vmem:[%s17521_s30 + $0x3a0] sm:$0xff]  }
  0x4d   : > { %664 = vst [vmem:[%s17526_s5 + $0x390] sm:$0xff] %v663_v50   ;;  %668 = vst [vmem:[%s17526_s5 + $0x398] sm:$0xff] %v667_v51   ;;  %v675_v53 = vld [vmem:[%s17521_s30 + $0x3a8] sm:$0xff]   ;;  %v679_v54 = vld [vmem:[%s17521_s30 + $0x3b0] sm:$0xff]  }
  0x4e   : > { %672 = vst [vmem:[%s17526_s5 + $0x3a0] sm:$0xff] %v671_v52   ;;  %v683_v55 = vld [vmem:[%s17521_s30 + $0x3b8] sm:$0xff]   ;;  %676 = vst [vmem:[%s17526_s5 + $0x3a8] sm:$0xff] %v675_v53   ;;  %v687_v56 = vld [vmem:[%s17521_s30 + $0x3c0] sm:$0xff]  }
  0x4f   : > { %680 = vst [vmem:[%s17526_s5 + $0x3b0] sm:$0xff] %v679_v54   ;;  %684 = vst [vmem:[%s17526_s5 + $0x3b8] sm:$0xff] %v683_v55   ;;  %v691_v57 = vld [vmem:[%s17521_s30 + $0x3c8] sm:$0xff]   ;;  %v695_v58 = vld [vmem:[%s17521_s30 + $0x3d0] sm:$0xff]  }
  0x50   : > { %688 = vst [vmem:[%s17526_s5 + $0x3c0] sm:$0xff] %v687_v56   ;;  %692 = vst [vmem:[%s17526_s5 + $0x3c8] sm:$0xff] %v691_v57   ;;  %v699_v59 = vld [vmem:[%s17521_s30 + $0x3d8] sm:$0xff]   ;;  %v703_v60 = vld [vmem:[%s17521_s30 + $0x3e0] sm:$0xff]  }
  0x51   : > { %696 = vst [vmem:[%s17526_s5 + $0x3d0] sm:$0xff] %v695_v58   ;;  %v707_v61 = vld [vmem:[%s17521_s30 + $0x3e8] sm:$0xff]   ;;  %700 = vst [vmem:[%s17526_s5 + $0x3d8] sm:$0xff] %v699_v59   ;;  %v711_v62 = vld [vmem:[%s17521_s30 + $0x7e0] sm:$0xff]  }
  0x52   : > { %704 = vst [vmem:[%s17526_s5 + $0x3e0] sm:$0xff] %v703_v60   ;;  %708 = vst [vmem:[%s17526_s5 + $0x3e8] sm:$0xff] %v707_v61   ;;  %v715_v63 = vld [vmem:[%s17521_s30 + $0x7e8] sm:$0xff]   ;;  %v719_v0 = vld [vmem:[%s17521_s30 + $0x7f0] sm:$0xff]  }
  0x53   : > { %712 = vst [vmem:[%s17526_s5 + $0x3f0] sm:$0xff] %v711_v62   ;;  %716 = vst [vmem:[%s17526_s5 + $0x3f8] sm:$0xff] %v715_v63   ;;  %v723_v1 = vld [vmem:[%s17521_s30 + $0x7f8] sm:$0xff]   ;;  %v727_v2 = vld [vmem:[%s17521_s30 + $0x800] sm:$0xff]  }
  0x54   : > { %720 = vst [vmem:[%s17526_s5 + $0x400] sm:$0xff] %v719_v0   ;;  %v731_v3 = vld [vmem:[%s17521_s30 + $0x808] sm:$0xff]   ;;  %724 = vst [vmem:[%s17526_s5 + $0x408] sm:$0xff] %v723_v1   ;;  %v735_v4 = vld [vmem:[%s17521_s30 + $0x810] sm:$0xff]  }
  0x55   : > { %728 = vst [vmem:[%s17526_s5 + $0x410] sm:$0xff] %v727_v2   ;;  %732 = vst [vmem:[%s17526_s5 + $0x418] sm:$0xff] %v731_v3   ;;  %v739_v5 = vld [vmem:[%s17521_s30 + $0x818] sm:$0xff]   ;;  %v743_v6 = vld [vmem:[%s17521_s30 + $0x820] sm:$0xff]  }
  0x56   : > { %736 = vst [vmem:[%s17526_s5 + $0x420] sm:$0xff] %v735_v4   ;;  %740 = vst [vmem:[%s17526_s5 + $0x428] sm:$0xff] %v739_v5   ;;  %v747_v7 = vld [vmem:[%s17521_s30 + $0x828] sm:$0xff]   ;;  %v751_v8 = vld [vmem:[%s17521_s30 + $0x830] sm:$0xff]  }
  0x57   : > { %744 = vst [vmem:[%s17526_s5 + $0x430] sm:$0xff] %v743_v6   ;;  %v755_v9 = vld [vmem:[%s17521_s30 + $0x838] sm:$0xff]   ;;  %748 = vst [vmem:[%s17526_s5 + $0x438] sm:$0xff] %v747_v7   ;;  %v759_v10 = vld [vmem:[%s17521_s30 + $0x840] sm:$0xff]  }
  0x58   : > { %752 = vst [vmem:[%s17526_s5 + $0x440] sm:$0xff] %v751_v8   ;;  %756 = vst [vmem:[%s17526_s5 + $0x448] sm:$0xff] %v755_v9   ;;  %v763_v11 = vld [vmem:[%s17521_s30 + $0x848] sm:$0xff]   ;;  %v767_v12 = vld [vmem:[%s17521_s30 + $0x850] sm:$0xff]  }
  0x59   : > { %760 = vst [vmem:[%s17526_s5 + $0x450] sm:$0xff] %v759_v10   ;;  %764 = vst [vmem:[%s17526_s5 + $0x458] sm:$0xff] %v763_v11   ;;  %v771_v13 = vld [vmem:[%s17521_s30 + $0x858] sm:$0xff]   ;;  %v775_v14 = vld [vmem:[%s17521_s30 + $0x860] sm:$0xff]  }
  0x5a   : > { %768 = vst [vmem:[%s17526_s5 + $0x460] sm:$0xff] %v767_v12   ;;  %v779_v15 = vld [vmem:[%s17521_s30 + $0x868] sm:$0xff]   ;;  %772 = vst [vmem:[%s17526_s5 + $0x468] sm:$0xff] %v771_v13   ;;  %v783_v16 = vld [vmem:[%s17521_s30 + $0x870] sm:$0xff]  }
  0x5b   : > { %776 = vst [vmem:[%s17526_s5 + $0x470] sm:$0xff] %v775_v14   ;;  %780 = vst [vmem:[%s17526_s5 + $0x478] sm:$0xff] %v779_v15   ;;  %v787_v17 = vld [vmem:[%s17521_s30 + $0x878] sm:$0xff]   ;;  %v791_v18 = vld [vmem:[%s17521_s30 + $0x880] sm:$0xff]  }
  0x5c   : > { %784 = vst [vmem:[%s17526_s5 + $0x480] sm:$0xff] %v783_v16   ;;  %788 = vst [vmem:[%s17526_s5 + $0x488] sm:$0xff] %v787_v17   ;;  %v795_v19 = vld [vmem:[%s17521_s30 + $0x888] sm:$0xff]   ;;  %v799_v20 = vld [vmem:[%s17521_s30 + $0x890] sm:$0xff]  }
  0x5d   : > { %792 = vst [vmem:[%s17526_s5 + $0x490] sm:$0xff] %v791_v18   ;;  %v803_v21 = vld [vmem:[%s17521_s30 + $0x898] sm:$0xff]   ;;  %796 = vst [vmem:[%s17526_s5 + $0x498] sm:$0xff] %v795_v19   ;;  %v807_v22 = vld [vmem:[%s17521_s30 + $0x8a0] sm:$0xff]  }
  0x5e   : > { %800 = vst [vmem:[%s17526_s5 + $0x4a0] sm:$0xff] %v799_v20   ;;  %804 = vst [vmem:[%s17526_s5 + $0x4a8] sm:$0xff] %v803_v21   ;;  %v811_v23 = vld [vmem:[%s17521_s30 + $0x8a8] sm:$0xff]   ;;  %v815_v24 = vld [vmem:[%s17521_s30 + $0x8b0] sm:$0xff]  }
  0x5f   : > { %808 = vst [vmem:[%s17526_s5 + $0x4b0] sm:$0xff] %v807_v22   ;;  %812 = vst [vmem:[%s17526_s5 + $0x4b8] sm:$0xff] %v811_v23   ;;  %v819_v25 = vld [vmem:[%s17521_s30 + $0x8b8] sm:$0xff]   ;;  %v823_v26 = vld [vmem:[%s17521_s30 + $0x8c0] sm:$0xff]  }
  0x60   : > { %816 = vst [vmem:[%s17526_s5 + $0x4c0] sm:$0xff] %v815_v24   ;;  %v827_v27 = vld [vmem:[%s17521_s30 + $0x8c8] sm:$0xff]   ;;  %820 = vst [vmem:[%s17526_s5 + $0x4c8] sm:$0xff] %v819_v25   ;;  %v831_v28 = vld [vmem:[%s17521_s30 + $0x8d0] sm:$0xff]  }
  0x61   : > { %824 = vst [vmem:[%s17526_s5 + $0x4d0] sm:$0xff] %v823_v26   ;;  %828 = vst [vmem:[%s17526_s5 + $0x4d8] sm:$0xff] %v827_v27   ;;  %v835_v29 = vld [vmem:[%s17521_s30 + $0x8d8] sm:$0xff]   ;;  %v839_v30 = vld [vmem:[%s17521_s30 + $0x8e0] sm:$0xff]  }
  0x62   : > { %832 = vst [vmem:[%s17526_s5 + $0x4e0] sm:$0xff] %v831_v28   ;;  %836 = vst [vmem:[%s17526_s5 + $0x4e8] sm:$0xff] %v835_v29   ;;  %v843_v31 = vld [vmem:[%s17521_s30 + $0x8e8] sm:$0xff]   ;;  %v847_v32 = vld [vmem:[%s17521_s30 + $0x8f0] sm:$0xff]  }
  0x63   : > { %840 = vst [vmem:[%s17526_s5 + $0x4f0] sm:$0xff] %v839_v30   ;;  %v851_v33 = vld [vmem:[%s17521_s30 + $0x8f8] sm:$0xff]   ;;  %844 = vst [vmem:[%s17526_s5 + $0x4f8] sm:$0xff] %v843_v31   ;;  %v855_v34 = vld [vmem:[%s17521_s30 + $0x900] sm:$0xff]  }
  0x64   : > { %848 = vst [vmem:[%s17526_s5 + $0x500] sm:$0xff] %v847_v32   ;;  %852 = vst [vmem:[%s17526_s5 + $0x508] sm:$0xff] %v851_v33   ;;  %v859_v35 = vld [vmem:[%s17521_s30 + $0x908] sm:$0xff]   ;;  %v863_v36 = vld [vmem:[%s17521_s30 + $0x910] sm:$0xff]  }
  0x65   : > { %856 = vst [vmem:[%s17526_s5 + $0x510] sm:$0xff] %v855_v34   ;;  %860 = vst [vmem:[%s17526_s5 + $0x518] sm:$0xff] %v859_v35   ;;  %v867_v37 = vld [vmem:[%s17521_s30 + $0x918] sm:$0xff]   ;;  %v871_v38 = vld [vmem:[%s17521_s30 + $0x920] sm:$0xff]  }
  0x66   : > { %864 = vst [vmem:[%s17526_s5 + $0x520] sm:$0xff] %v863_v36   ;;  %v875_v39 = vld [vmem:[%s17521_s30 + $0x928] sm:$0xff]   ;;  %868 = vst [vmem:[%s17526_s5 + $0x528] sm:$0xff] %v867_v37   ;;  %v879_v40 = vld [vmem:[%s17521_s30 + $0x930] sm:$0xff]  }
  0x67   : > { %872 = vst [vmem:[%s17526_s5 + $0x530] sm:$0xff] %v871_v38   ;;  %876 = vst [vmem:[%s17526_s5 + $0x538] sm:$0xff] %v875_v39   ;;  %v883_v41 = vld [vmem:[%s17521_s30 + $0x938] sm:$0xff]   ;;  %v887_v42 = vld [vmem:[%s17521_s30 + $0x940] sm:$0xff]  }
  0x68   : > { %880 = vst [vmem:[%s17526_s5 + $0x540] sm:$0xff] %v879_v40   ;;  %884 = vst [vmem:[%s17526_s5 + $0x548] sm:$0xff] %v883_v41   ;;  %v891_v43 = vld [vmem:[%s17521_s30 + $0x948] sm:$0xff]   ;;  %v895_v44 = vld [vmem:[%s17521_s30 + $0x950] sm:$0xff]  }
  0x69   : > { %888 = vst [vmem:[%s17526_s5 + $0x550] sm:$0xff] %v887_v42   ;;  %v899_v45 = vld [vmem:[%s17521_s30 + $0x958] sm:$0xff]   ;;  %892 = vst [vmem:[%s17526_s5 + $0x558] sm:$0xff] %v891_v43   ;;  %v903_v46 = vld [vmem:[%s17521_s30 + $0x960] sm:$0xff]  }
  0x6a   : > { %896 = vst [vmem:[%s17526_s5 + $0x560] sm:$0xff] %v895_v44   ;;  %900 = vst [vmem:[%s17526_s5 + $0x568] sm:$0xff] %v899_v45   ;;  %v907_v47 = vld [vmem:[%s17521_s30 + $0x968] sm:$0xff]   ;;  %v911_v48 = vld [vmem:[%s17521_s30 + $0x970] sm:$0xff]  }
  0x6b   : > { %904 = vst [vmem:[%s17526_s5 + $0x570] sm:$0xff] %v903_v46   ;;  %908 = vst [vmem:[%s17526_s5 + $0x578] sm:$0xff] %v907_v47   ;;  %v915_v49 = vld [vmem:[%s17521_s30 + $0x978] sm:$0xff]   ;;  %v919_v50 = vld [vmem:[%s17521_s30 + $0x980] sm:$0xff]  }
  0x6c   : > { %912 = vst [vmem:[%s17526_s5 + $0x580] sm:$0xff] %v911_v48   ;;  %v923_v51 = vld [vmem:[%s17521_s30 + $0x988] sm:$0xff]   ;;  %916 = vst [vmem:[%s17526_s5 + $0x588] sm:$0xff] %v915_v49   ;;  %v927_v52 = vld [vmem:[%s17521_s30 + $0x990] sm:$0xff]  }
  0x6d   : > { %920 = vst [vmem:[%s17526_s5 + $0x590] sm:$0xff] %v919_v50   ;;  %924 = vst [vmem:[%s17526_s5 + $0x598] sm:$0xff] %v923_v51   ;;  %v931_v53 = vld [vmem:[%s17521_s30 + $0x998] sm:$0xff]   ;;  %v935_v54 = vld [vmem:[%s17521_s30 + $0x9a0] sm:$0xff]  }
  0x6e   : > { %928 = vst [vmem:[%s17526_s5 + $0x5a0] sm:$0xff] %v927_v52   ;;  %932 = vst [vmem:[%s17526_s5 + $0x5a8] sm:$0xff] %v931_v53   ;;  %v939_v55 = vld [vmem:[%s17521_s30 + $0x9a8] sm:$0xff]   ;;  %v943_v56 = vld [vmem:[%s17521_s30 + $0x9b0] sm:$0xff]  }
  0x6f   : > { %936 = vst [vmem:[%s17526_s5 + $0x5b0] sm:$0xff] %v935_v54   ;;  %v947_v57 = vld [vmem:[%s17521_s30 + $0x9b8] sm:$0xff]   ;;  %940 = vst [vmem:[%s17526_s5 + $0x5b8] sm:$0xff] %v939_v55   ;;  %v951_v58 = vld [vmem:[%s17521_s30 + $0x9c0] sm:$0xff]  }
  0x70   : > { %944 = vst [vmem:[%s17526_s5 + $0x5c0] sm:$0xff] %v943_v56   ;;  %948 = vst [vmem:[%s17526_s5 + $0x5c8] sm:$0xff] %v947_v57   ;;  %v955_v59 = vld [vmem:[%s17521_s30 + $0x9c8] sm:$0xff]   ;;  %v959_v60 = vld [vmem:[%s17521_s30 + $0x9d0] sm:$0xff]  }
  0x71   : > { %952 = vst [vmem:[%s17526_s5 + $0x5d0] sm:$0xff] %v951_v58   ;;  %956 = vst [vmem:[%s17526_s5 + $0x5d8] sm:$0xff] %v955_v59   ;;  %v963_v61 = vld [vmem:[%s17521_s30 + $0x9d8] sm:$0xff]   ;;  %v967_v62 = vld [vmem:[%s17521_s30 + $0x9e0] sm:$0xff]  }
  0x72   : > { %960 = vst [vmem:[%s17526_s5 + $0x5e0] sm:$0xff] %v959_v60   ;;  %v971_v63 = vld [vmem:[%s17521_s30 + $0x9e8] sm:$0xff]   ;;  %964 = vst [vmem:[%s17526_s5 + $0x5e8] sm:$0xff] %v963_v61   ;;  %v975_v0 = vld [vmem:[%s17521_s30 + $0x9f0] sm:$0xff]  }
  0x73   : > { %968 = vst [vmem:[%s17526_s5 + $0x5f0] sm:$0xff] %v967_v62   ;;  %972 = vst [vmem:[%s17526_s5 + $0x5f8] sm:$0xff] %v971_v63   ;;  %v979_v1 = vld [vmem:[%s17521_s30 + $0x9f8] sm:$0xff]   ;;  %v983_v2 = vld [vmem:[%s17521_s30 + $0xa00] sm:$0xff]  }
  0x74   : > { %976 = vst [vmem:[%s17526_s5 + $0x600] sm:$0xff] %v975_v0   ;;  %980 = vst [vmem:[%s17526_s5 + $0x608] sm:$0xff] %v979_v1   ;;  %v987_v3 = vld [vmem:[%s17521_s30 + $0xa08] sm:$0xff]   ;;  %v991_v4 = vld [vmem:[%s17521_s30 + $0xa10] sm:$0xff]  }
  0x75   : > { %984 = vst [vmem:[%s17526_s5 + $0x610] sm:$0xff] %v983_v2   ;;  %v995_v5 = vld [vmem:[%s17521_s30 + $0xa18] sm:$0xff]   ;;  %988 = vst [vmem:[%s17526_s5 + $0x618] sm:$0xff] %v987_v3   ;;  %v999_v6 = vld [vmem:[%s17521_s30 + $0xa20] sm:$0xff]  }
  0x76   : > { %992 = vst [vmem:[%s17526_s5 + $0x620] sm:$0xff] %v991_v4   ;;  %996 = vst [vmem:[%s17526_s5 + $0x628] sm:$0xff] %v995_v5   ;;  %v1003_v7 = vld [vmem:[%s17521_s30 + $0xa28] sm:$0xff]   ;;  %v1007_v8 = vld [vmem:[%s17521_s30 + $0xa30] sm:$0xff]  }
  0x77   : > { %1000 = vst [vmem:[%s17526_s5 + $0x630] sm:$0xff] %v999_v6   ;;  %1004 = vst [vmem:[%s17526_s5 + $0x638] sm:$0xff] %v1003_v7   ;;  %v1011_v9 = vld [vmem:[%s17521_s30 + $0xa38] sm:$0xff]   ;;  %v1015_v10 = vld [vmem:[%s17521_s30 + $0xa40] sm:$0xff]  }
  0x78   : > { %1008 = vst [vmem:[%s17526_s5 + $0x640] sm:$0xff] %v1007_v8   ;;  %v1019_v11 = vld [vmem:[%s17521_s30 + $0xa48] sm:$0xff]   ;;  %1012 = vst [vmem:[%s17526_s5 + $0x648] sm:$0xff] %v1011_v9   ;;  %v1023_v12 = vld [vmem:[%s17521_s30 + $0xa50] sm:$0xff]  }
  0x79   : > { %1016 = vst [vmem:[%s17526_s5 + $0x650] sm:$0xff] %v1015_v10   ;;  %1020 = vst [vmem:[%s17526_s5 + $0x658] sm:$0xff] %v1019_v11   ;;  %v1027_v13 = vld [vmem:[%s17521_s30 + $0xa58] sm:$0xff]   ;;  %v1031_v14 = vld [vmem:[%s17521_s30 + $0xa60] sm:$0xff]  }
  0x7a   : > { %1024 = vst [vmem:[%s17526_s5 + $0x660] sm:$0xff] %v1023_v12   ;;  %1028 = vst [vmem:[%s17526_s5 + $0x668] sm:$0xff] %v1027_v13   ;;  %v1035_v15 = vld [vmem:[%s17521_s30 + $0xa68] sm:$0xff]   ;;  %v1039_v16 = vld [vmem:[%s17521_s30 + $0xa70] sm:$0xff]  }
  0x7b   : > { %1032 = vst [vmem:[%s17526_s5 + $0x670] sm:$0xff] %v1031_v14   ;;  %v1043_v17 = vld [vmem:[%s17521_s30 + $0xa78] sm:$0xff]   ;;  %1036 = vst [vmem:[%s17526_s5 + $0x678] sm:$0xff] %v1035_v15   ;;  %v1047_v18 = vld [vmem:[%s17521_s30 + $0xa80] sm:$0xff]  }
  0x7c   : > { %1040 = vst [vmem:[%s17526_s5 + $0x680] sm:$0xff] %v1039_v16   ;;  %1044 = vst [vmem:[%s17526_s5 + $0x688] sm:$0xff] %v1043_v17   ;;  %v1051_v19 = vld [vmem:[%s17521_s30 + $0xa88] sm:$0xff]   ;;  %v1055_v20 = vld [vmem:[%s17521_s30 + $0xa90] sm:$0xff]  }
  0x7d   : > { %1048 = vst [vmem:[%s17526_s5 + $0x690] sm:$0xff] %v1047_v18   ;;  %1052 = vst [vmem:[%s17526_s5 + $0x698] sm:$0xff] %v1051_v19   ;;  %v1059_v21 = vld [vmem:[%s17521_s30 + $0xa98] sm:$0xff]   ;;  %v1063_v22 = vld [vmem:[%s17521_s30 + $0xaa0] sm:$0xff]  }
  0x7e   : > { %1056 = vst [vmem:[%s17526_s5 + $0x6a0] sm:$0xff] %v1055_v20   ;;  %v1067_v23 = vld [vmem:[%s17521_s30 + $0xaa8] sm:$0xff]   ;;  %1060 = vst [vmem:[%s17526_s5 + $0x6a8] sm:$0xff] %v1059_v21   ;;  %v1071_v24 = vld [vmem:[%s17521_s30 + $0xab0] sm:$0xff]  }
  0x7f   : > { %1064 = vst [vmem:[%s17526_s5 + $0x6b0] sm:$0xff] %v1063_v22   ;;  %1068 = vst [vmem:[%s17526_s5 + $0x6b8] sm:$0xff] %v1067_v23   ;;  %v1075_v25 = vld [vmem:[%s17521_s30 + $0xab8] sm:$0xff]   ;;  %v1079_v26 = vld [vmem:[%s17521_s30 + $0xac0] sm:$0xff]  }
  0x80   : > { %1072 = vst [vmem:[%s17526_s5 + $0x6c0] sm:$0xff] %v1071_v24   ;;  %1076 = vst [vmem:[%s17526_s5 + $0x6c8] sm:$0xff] %v1075_v25   ;;  %v1083_v27 = vld [vmem:[%s17521_s30 + $0xac8] sm:$0xff]   ;;  %v1087_v28 = vld [vmem:[%s17521_s30 + $0xad0] sm:$0xff]  }
  0x81   : > { %1080 = vst [vmem:[%s17526_s5 + $0x6d0] sm:$0xff] %v1079_v26   ;;  %v1091_v29 = vld [vmem:[%s17521_s30 + $0xad8] sm:$0xff]   ;;  %1084 = vst [vmem:[%s17526_s5 + $0x6d8] sm:$0xff] %v1083_v27   ;;  %v1095_v30 = vld [vmem:[%s17521_s30 + $0xae0] sm:$0xff]  }
  0x82   : > { %1088 = vst [vmem:[%s17526_s5 + $0x6e0] sm:$0xff] %v1087_v28   ;;  %1092 = vst [vmem:[%s17526_s5 + $0x6e8] sm:$0xff] %v1091_v29   ;;  %v1099_v31 = vld [vmem:[%s17521_s30 + $0xae8] sm:$0xff]   ;;  %v1103_v32 = vld [vmem:[%s17521_s30 + $0xaf0] sm:$0xff]  }
  0x83   : > { %1096 = vst [vmem:[%s17526_s5 + $0x6f0] sm:$0xff] %v1095_v30   ;;  %1100 = vst [vmem:[%s17526_s5 + $0x6f8] sm:$0xff] %v1099_v31   ;;  %v1107_v33 = vld [vmem:[%s17521_s30 + $0xaf8] sm:$0xff]   ;;  %v1111_v34 = vld [vmem:[%s17521_s30 + $0xb00] sm:$0xff]  }
  0x84   : > { %1104 = vst [vmem:[%s17526_s5 + $0x700] sm:$0xff] %v1103_v32   ;;  %v1115_v35 = vld [vmem:[%s17521_s30 + $0xb08] sm:$0xff]   ;;  %1108 = vst [vmem:[%s17526_s5 + $0x708] sm:$0xff] %v1107_v33   ;;  %v1119_v36 = vld [vmem:[%s17521_s30 + $0xb10] sm:$0xff]  }
  0x85   : > { %1112 = vst [vmem:[%s17526_s5 + $0x710] sm:$0xff] %v1111_v34   ;;  %1116 = vst [vmem:[%s17526_s5 + $0x718] sm:$0xff] %v1115_v35   ;;  %v1123_v37 = vld [vmem:[%s17521_s30 + $0xb18] sm:$0xff]   ;;  %v1127_v38 = vld [vmem:[%s17521_s30 + $0xb20] sm:$0xff]  }
  0x86   : > { %1120 = vst [vmem:[%s17526_s5 + $0x720] sm:$0xff] %v1119_v36   ;;  %1124 = vst [vmem:[%s17526_s5 + $0x728] sm:$0xff] %v1123_v37   ;;  %v1131_v39 = vld [vmem:[%s17521_s30 + $0xb28] sm:$0xff]   ;;  %v1135_v40 = vld [vmem:[%s17521_s30 + $0xb30] sm:$0xff]  }
  0x87   : > { %1128 = vst [vmem:[%s17526_s5 + $0x730] sm:$0xff] %v1127_v38   ;;  %v1139_v41 = vld [vmem:[%s17521_s30 + $0xb38] sm:$0xff]   ;;  %1132 = vst [vmem:[%s17526_s5 + $0x738] sm:$0xff] %v1131_v39   ;;  %v1143_v42 = vld [vmem:[%s17521_s30 + $0xb40] sm:$0xff]  }
  0x88   : > { %1136 = vst [vmem:[%s17526_s5 + $0x740] sm:$0xff] %v1135_v40   ;;  %1140 = vst [vmem:[%s17526_s5 + $0x748] sm:$0xff] %v1139_v41   ;;  %v1147_v43 = vld [vmem:[%s17521_s30 + $0xb48] sm:$0xff]   ;;  %v1151_v44 = vld [vmem:[%s17521_s30 + $0xb50] sm:$0xff]  }
  0x89   : > { %1144 = vst [vmem:[%s17526_s5 + $0x750] sm:$0xff] %v1143_v42   ;;  %1148 = vst [vmem:[%s17526_s5 + $0x758] sm:$0xff] %v1147_v43   ;;  %v1155_v45 = vld [vmem:[%s17521_s30 + $0xb58] sm:$0xff]   ;;  %v1159_v46 = vld [vmem:[%s17521_s30 + $0xb60] sm:$0xff]  }
  0x8a   : > { %1152 = vst [vmem:[%s17526_s5 + $0x760] sm:$0xff] %v1151_v44   ;;  %v1163_v47 = vld [vmem:[%s17521_s30 + $0xb68] sm:$0xff]   ;;  %1156 = vst [vmem:[%s17526_s5 + $0x768] sm:$0xff] %v1155_v45   ;;  %v1167_v48 = vld [vmem:[%s17521_s30 + $0xb70] sm:$0xff]  }
  0x8b   : > { %1160 = vst [vmem:[%s17526_s5 + $0x770] sm:$0xff] %v1159_v46   ;;  %1164 = vst [vmem:[%s17526_s5 + $0x778] sm:$0xff] %v1163_v47   ;;  %v1171_v49 = vld [vmem:[%s17521_s30 + $0xb78] sm:$0xff]   ;;  %v1175_v50 = vld [vmem:[%s17521_s30 + $0xb80] sm:$0xff]  }
  0x8c   : > { %1168 = vst [vmem:[%s17526_s5 + $0x780] sm:$0xff] %v1167_v48   ;;  %1172 = vst [vmem:[%s17526_s5 + $0x788] sm:$0xff] %v1171_v49   ;;  %v1179_v51 = vld [vmem:[%s17521_s30 + $0xb88] sm:$0xff]   ;;  %v1183_v52 = vld [vmem:[%s17521_s30 + $0xb90] sm:$0xff]  }
  0x8d   : > { %1176 = vst [vmem:[%s17526_s5 + $0x790] sm:$0xff] %v1175_v50   ;;  %v1187_v53 = vld [vmem:[%s17521_s30 + $0xb98] sm:$0xff]   ;;  %1180 = vst [vmem:[%s17526_s5 + $0x798] sm:$0xff] %v1179_v51   ;;  %v1191_v54 = vld [vmem:[%s17521_s30 + $0xba0] sm:$0xff]  }
  0x8e   : > { %1184 = vst [vmem:[%s17526_s5 + $0x7a0] sm:$0xff] %v1183_v52   ;;  %1188 = vst [vmem:[%s17526_s5 + $0x7a8] sm:$0xff] %v1187_v53   ;;  %v1195_v55 = vld [vmem:[%s17521_s30 + $0xba8] sm:$0xff]   ;;  %v1199_v56 = vld [vmem:[%s17521_s30 + $0xbb0] sm:$0xff]  }
  0x8f   : > { %1192 = vst [vmem:[%s17526_s5 + $0x7b0] sm:$0xff] %v1191_v54   ;;  %1196 = vst [vmem:[%s17526_s5 + $0x7b8] sm:$0xff] %v1195_v55   ;;  %v1203_v57 = vld [vmem:[%s17521_s30 + $0xbb8] sm:$0xff]   ;;  %v1207_v58 = vld [vmem:[%s17521_s30 + $0xbc0] sm:$0xff]  }
  0x90   : > { %1200 = vst [vmem:[%s17526_s5 + $0x7c0] sm:$0xff] %v1199_v56   ;;  %v1211_v59 = vld [vmem:[%s17521_s30 + $0xbc8] sm:$0xff]   ;;  %1204 = vst [vmem:[%s17526_s5 + $0x7c8] sm:$0xff] %v1203_v57  }
  0x91   : > { %1208 = vst [vmem:[%s17526_s5 + $0x7d0] sm:$0xff] %v1207_v58   ;;  %1212 = vst [vmem:[%s17526_s5 + $0x7d8] sm:$0xff] %v1211_v59  }
  0x92 PF: > { %p14258_p6 = scmp.ge.s32.totalorder %s17447_s19, 1  ;;  %p2259_p7 = scmp.lt.s32.totalorder %s17447_s19, 3 }
  0x94   : > { %p2260_p8 = pnand %p14258_p6, %p2259_p7 }
  0x96   : > { %2263 = sbr.rel (%p2260_p8) target bundleno = 1947 (0x79b), region = 73 }
  0x9d   : > { %s2266_s6 = sand.u32 1, %s17431_s15   ;;  %s2303_s7 = smul.u32 252, %s17439_s17 }
  0x9e   : > { %s16283_s8 = smul.u32 2016, %s2266_s6  ;;  %p14261_p10 = scmp.ne.s32.totalorder %s17439_s17, 0 }
  0x9f   : > { %p2305_p9 = scmp.lt.s32.totalorder %s2303_s7, 503  ;;  %v17449_v60 = vmov (!%p14261_p10), 0.0  }
  0xa0   : > { %s18038_s13 = scalar_lea.vmem [#allocation3], %s16283_s8  ;;  %2326 = sbr.rel (%p14261_p10) target bundleno = 167 (0xa7), region = 81  ;;  %2327 = vst [vmem:[#allocation2] sm:$0xff] (!%p14261_p10), %v17449_v60 }
  0xa1   : > { %s22324_s7 = smov (!%p2305_p9, %s2303_s7), 503 }
  0xa2   : > { %s14966_s9 = sshll.u32 %s22324_s7, 4 }
  0xa3   : > { %s18036_s12 = scalar_lea.vmem %s22161_s1, %s14966_s9 }
  0xa7 PF: > { %v15975_v61 = vld [vmem:[%s18038_s13 + $0x8] sm:$0xff]   ;;  %vm3336_vm0 = vcmask 523264   ;;  %v14968_v62 = vld [vmem:[%s18038_s13] sm:$0xff]   ;;  %v15976_v3 = vld [vmem:[%s18038_s13 + $0x10] sm:$0xff]   ;;  %vm6878_vm1 = vcmask 130112   ;;  %vm6885_vm2 = vcmask 195712  }
  0xa8   : > { %v14973_v63 = vunpack.c.l.bf16 %v15975_v61  ;;  %v14969_v0 = vunpack.c.l.bf16 %v14968_v62  ;;  %v14974_v1 = vunpack.c.h.bf16 %v15975_v61  ;;  %v14970_v2 = vunpack.c.h.bf16 %v14968_v62  ;;  %v15977_v10 = vld [vmem:[%s18038_s13 + $0x18] sm:$0xff]   ;;  %v15978_v15 = vld [vmem:[%s18038_s13 + $0x20] sm:$0xff]   ;;  %v15979_v20 = vld [vmem:[%s18038_s13 + $0x28] sm:$0xff]   ;;  %p14768_p11 = scmp.ne.s32.totalorder %s17439_s17, 1 }
  0xa9   : > { %v14978_v8 = vunpack.c.h.bf16 %v15976_v3  ;;  %v14977_v9 = vunpack.c.l.bf16 %v15976_v3  ;;  %v14982_v13 = vunpack.c.h.bf16 %v15977_v10  ;;  %v14981_v14 = vunpack.c.l.bf16 %v15977_v10  ;;  %v15980_v21 = vld [vmem:[%s18038_s13 + $0x30] sm:$0xff]   ;;  %v15981_v26 = vld [vmem:[%s18038_s13 + $0x38] sm:$0xff]   ;;  %v15982_v35 = vld [vmem:[%s18038_s13 + $0x40] sm:$0xff]  }
  0xaa   : > { %v3343_v4 = vsel %vm3336_vm0, %v14973_v63, 0.0  ;;  %v3337_v5 = vsel %vm3336_vm0, %v14969_v0, 0.0  ;;  %v3346_v6 = vsel %vm3336_vm0, %v14974_v1, 0.0  ;;  %v3340_v7 = vsel %vm3336_vm0, %v14970_v2, 0.0  ;;  %v15983_v40 = vld [vmem:[%s18038_s13 + $0x48] sm:$0xff]   ;;  %v15984_v45 = vld [vmem:[%s18038_s13 + $0x50] sm:$0xff]  }
  0xab   : > { %3344 = vadd.xlane.f32.xlu1 %v3343_v4  ;;  %3338 = vadd.xlane.f32.xlu0 %v3337_v5  ;;  %v3352_v11 = vsel %vm3336_vm0, %v14978_v8, 0.0  ;;  %v3349_v12 = vsel %vm3336_vm0, %v14977_v9, 0.0  ;;  %v3358_v16 = vsel %vm3336_vm0, %v14982_v13, 0.0  ;;  %v3355_v17 = vsel %vm3336_vm0, %v14981_v14, 0.0  ;;  %v15985_v50 = vld [vmem:[%s18038_s13 + $0x58] sm:$0xff]   ;;  %v15986_v55 = vld [vmem:[%s18038_s13 + $0x60] sm:$0xff]  }
  0xac   : > { %v14986_v18 = vunpack.c.h.bf16 %v15978_v15  ;;  %v14985_v19 = vunpack.c.l.bf16 %v15978_v15  ;;  %v14990_v24 = vunpack.c.h.bf16 %v15979_v20  ;;  %v14989_v25 = vunpack.c.l.bf16 %v15979_v20  ;;  %v15987_v60 = vld [vmem:[%s18038_s13 + $0x68] sm:$0xff]   ;;  %v15988_v1 = vld [vmem:[%s18038_s13 + $0x70] sm:$0xff]  }
  0xad   : > { %v14994_v29 = vunpack.c.h.bf16 %v15980_v21  ;;  %v14993_v30 = vunpack.c.l.bf16 %v15980_v21  ;;  %v14998_v33 = vunpack.c.h.bf16 %v15981_v26  ;;  %v14997_v34 = vunpack.c.l.bf16 %v15981_v26  ;;  %v15992_v21 = vld [vmem:[%s18038_s13 + $0x90] sm:$0xff]   ;;  %v15993_v26 = vld [vmem:[%s18038_s13 + $0x98] sm:$0xff]  }
  0xae   : > { %v3364_v22 = vsel %vm3336_vm0, %v14986_v18, 0.0  ;;  %v3361_v23 = vsel %vm3336_vm0, %v14985_v19, 0.0  ;;  %v3370_v27 = vsel %vm3336_vm0, %v14990_v24, 0.0  ;;  %v3367_v28 = vsel %vm3336_vm0, %v14989_v25, 0.0 }
  0xaf   : > { %3347 = vadd.xlane.f32.xlu1 %v3346_v6  ;;  %3341 = vadd.xlane.f32.xlu0 %v3340_v7  ;;  %v3376_v31 = vsel %vm3336_vm0, %v14994_v29, 0.0  ;;  %v3373_v32 = vsel %vm3336_vm0, %v14993_v30, 0.0  ;;  %v3382_v36 = vsel %vm3336_vm0, %v14998_v33, 0.0  ;;  %v3379_v37 = vsel %vm3336_vm0, %v14997_v34, 0.0  ;;  %v15989_v6 = vld [vmem:[%s18038_s13 + $0x78] sm:$0xff]  }
  0xb0   : > { %v15002_v38 = vunpack.c.h.bf16 %v15982_v35  ;;  %v15001_v39 = vunpack.c.l.bf16 %v15982_v35  ;;  %v15006_v43 = vunpack.c.h.bf16 %v15983_v40  ;;  %v15005_v44 = vunpack.c.l.bf16 %v15983_v40 }
  0xb1   : > { %v15010_v48 = vunpack.c.h.bf16 %v15984_v45  ;;  %v15009_v49 = vunpack.c.l.bf16 %v15984_v45  ;;  %v15014_v53 = vunpack.c.h.bf16 %v15985_v50  ;;  %v15013_v54 = vunpack.c.l.bf16 %v15985_v50 }
  0xb2   : > { %v3388_v41 = vsel %vm3336_vm0, %v15002_v38, 0.0  ;;  %v3385_v42 = vsel %vm3336_vm0, %v15001_v39, 0.0  ;;  %v3394_v46 = vsel %vm3336_vm0, %v15006_v43, 0.0  ;;  %v3391_v47 = vsel %vm3336_vm0, %v15005_v44, 0.0 }
  0xb3   : > { %3353 = vadd.xlane.f32.xlu1 %v3352_v11  ;;  %3350 = vadd.xlane.f32.xlu0 %v3349_v12  ;;  %v3400_v51 = vsel %vm3336_vm0, %v15010_v48, 0.0  ;;  %v3397_v52 = vsel %vm3336_vm0, %v15009_v49, 0.0  ;;  %v3406_v56 = vsel %vm3336_vm0, %v15014_v53, 0.0  ;;  %v3403_v57 = vsel %vm3336_vm0, %v15013_v54, 0.0  ;;  %v15990_v11 = vld [vmem:[%s18038_s13 + $0x80] sm:$0xff]  }
  0xb4   : > { %v15018_v58 = vunpack.c.h.bf16 %v15986_v55  ;;  %v15017_v59 = vunpack.c.l.bf16 %v15986_v55  ;;  %v15022_v63 = vunpack.c.h.bf16 %v15987_v60  ;;  %v15021_v0 = vunpack.c.l.bf16 %v15987_v60 }
  0xb5   : > { %v15026_v4 = vunpack.c.h.bf16 %v15988_v1  ;;  %v15025_v5 = vunpack.c.l.bf16 %v15988_v1  ;;  %v15030_v9 = vunpack.c.h.bf16 %v15989_v6  ;;  %v15029_v10 = vunpack.c.l.bf16 %v15989_v6 }
  0xb6   : > { %v3412_v61 = vsel %vm3336_vm0, %v15018_v58, 0.0  ;;  %v3409_v62 = vsel %vm3336_vm0, %v15017_v59, 0.0  ;;  %v3418_v2 = vsel %vm3336_vm0, %v15022_v63, 0.0  ;;  %v3415_v3 = vsel %vm3336_vm0, %v15021_v0, 0.0 }
  0xb7   : > { %3359 = vadd.xlane.f32.xlu1 %v3358_v16  ;;  %3356 = vadd.xlane.f32.xlu0 %v3355_v17  ;;  %v3424_v7 = vsel %vm3336_vm0, %v15026_v4, 0.0  ;;  %v3421_v8 = vsel %vm3336_vm0, %v15025_v5, 0.0  ;;  %v3430_v12 = vsel %vm3336_vm0, %v15030_v9, 0.0  ;;  %v3427_v13 = vsel %vm3336_vm0, %v15029_v10, 0.0  ;;  %v15991_v16 = vld [vmem:[%s18038_s13 + $0x88] sm:$0xff]  }
  0xb8   : > { %v15034_v14 = vunpack.c.h.bf16 %v15990_v11  ;;  %v15033_v15 = vunpack.c.l.bf16 %v15990_v11  ;;  %v15038_v19 = vunpack.c.h.bf16 %v15991_v16  ;;  %v15037_v20 = vunpack.c.l.bf16 %v15991_v16 }
  0xb9   : > { %v15042_v24 = vunpack.c.h.bf16 %v15992_v21  ;;  %v15041_v25 = vunpack.c.l.bf16 %v15992_v21  ;;  %v15046_v29 = vunpack.c.h.bf16 %v15993_v26  ;;  %v15045_v30 = vunpack.c.l.bf16 %v15993_v26 }
  0xba   : > { %v3436_v17 = vsel %vm3336_vm0, %v15034_v14, 0.0  ;;  %v3433_v18 = vsel %vm3336_vm0, %v15033_v15, 0.0  ;;  %vm22199_vm3 = vcmask 261312   ;;  %vm22185_vm4 = vcmask 326912  }
  0xbb   : > { %3365 = vadd.xlane.f32.xlu1 %v3364_v22  ;;  %3362 = vadd.xlane.f32.xlu0 %v3361_v23  ;;  %v3442_v22 = vsel %vm3336_vm0, %v15038_v19, 0.0  ;;  %v3439_v23 = vsel %vm3336_vm0, %v15037_v20, 0.0  ;;  %v3451_v33 = vsel %vm3336_vm0, %v15045_v30, 0.0  ;;  %vm22184_vm5 = vcmask 392512  }
  0xbc   : > { %vm22183_vm6 = vcmask 458112   ;;  %vm22168_vm7 = vcmask 523712   ;;  %vm6927_vm8 = vcmask 589312   ;;  %vm6934_vm9 = vcmask 654912  }
  0xbd   : > { %vm22167_vm10 = vcmask 720512   ;;  %vm6948_vm11 = vcmask 786112   ;;  %vm6955_vm12 = vcmask 851712   ;;  %vm6962_vm13 = vcmask 917312  }
  0xbe   : > { %vm6969_vm14 = vcmask 982912   ;;  %vm6976_vm15 = vcmask 1048512  }
  0xbf   : > { %3371 = vadd.xlane.f32.xlu1 %v3370_v27  ;;  %3368 = vadd.xlane.f32.xlu0 %v3367_v28  ;;  %v3448_v27 = vsel %vm3336_vm0, %v15042_v24, 0.0  ;;  %v3445_v28 = vsel %vm3336_vm0, %v15041_v25, 0.0 }
  0xc3   : > { %3377 = vadd.xlane.f32.xlu1 %v3376_v31  ;;  %3374 = vadd.xlane.f32.xlu0 %v3373_v32  ;;  %v15994_v31 = vld [vmem:[%s18038_s13 + $0xa0] sm:$0xff]   ;;  %v3454_v32 = vsel %vm3336_vm0, %v15046_v29, 0.0 }
  0xc4   : > { %v15050_v34 = vunpack.c.h.bf16 %v15994_v31  ;;  %v15049_v35 = vunpack.c.l.bf16 %v15994_v31 }
  0xc6   : > { %v3457_v38 = vsel %vm3336_vm0, %v15049_v35, 0.0 }
  0xc7   : > { %3383 = vadd.xlane.f32.xlu1 %v3382_v36  ;;  %3380 = vadd.xlane.f32.xlu0 %v3379_v37  ;;  %v15995_v36 = vld [vmem:[%s18038_s13 + $0xa8] sm:$0xff]   ;;  %v3460_v37 = vsel %vm3336_vm0, %v15050_v34, 0.0 }
  0xc8   : > { %v15054_v39 = vunpack.c.h.bf16 %v15995_v36  ;;  %v15053_v40 = vunpack.c.l.bf16 %v15995_v36 }
  0xca   : > { %v3463_v43 = vsel %vm3336_vm0, %v15053_v40, 0.0 }
  0xcb   : > { %3389 = vadd.xlane.f32.xlu1 %v3388_v41  ;;  %3386 = vadd.xlane.f32.xlu0 %v3385_v42  ;;  %v15996_v41 = vld [vmem:[%s18038_s13 + $0xb0] sm:$0xff]   ;;  %v3466_v42 = vsel %vm3336_vm0, %v15054_v39, 0.0 }
  0xcc   : > { %v15058_v44 = vunpack.c.h.bf16 %v15996_v41  ;;  %v15057_v45 = vunpack.c.l.bf16 %v15996_v41 }
  0xce   : > { %v3469_v48 = vsel %vm3336_vm0, %v15057_v45, 0.0 }
  0xcf   : > { %3395 = vadd.xlane.f32.xlu1 %v3394_v46  ;;  %3392 = vadd.xlane.f32.xlu0 %v3391_v47  ;;  %v15997_v46 = vld [vmem:[%s18038_s13 + $0xb8] sm:$0xff]   ;;  %v3472_v47 = vsel %vm3336_vm0, %v15058_v44, 0.0 }
  0xd0   : > { %v15062_v49 = vunpack.c.h.bf16 %v15997_v46  ;;  %v15061_v50 = vunpack.c.l.bf16 %v15997_v46 }
  0xd2   : > { %v3475_v53 = vsel %vm3336_vm0, %v15061_v50, 0.0 }
  0xd3   : > { %3401 = vadd.xlane.f32.xlu1 %v3400_v51  ;;  %3398 = vadd.xlane.f32.xlu0 %v3397_v52  ;;  %v15998_v51 = vld [vmem:[%s18038_s13 + $0xc0] sm:$0xff]   ;;  %v3478_v52 = vsel %vm3336_vm0, %v15062_v49, 0.0  ;;  %v16011_v49 = vld [vmem:[%s18038_s13 + $0x128] sm:$0xff]  }
  0xd4   : > { %v15066_v54 = vunpack.c.h.bf16 %v15998_v51  ;;  %v15065_v55 = vunpack.c.l.bf16 %v15998_v51 }
  0xd6   : > { %v3481_v58 = vsel %vm3336_vm0, %v15065_v55, 0.0  ;;  %v16012_v55 = vld [vmem:[%s18038_s13 + $0x130] sm:$0xff]  }
  0xd7   : > { %3407 = vadd.xlane.f32.xlu1 %v3406_v56  ;;  %3404 = vadd.xlane.f32.xlu0 %v3403_v57  ;;  %v15999_v56 = vld [vmem:[%s18038_s13 + $0xc8] sm:$0xff]   ;;  %v3484_v57 = vsel %vm3336_vm0, %v15066_v54, 0.0 }
  0xd8   : > { %v15070_v59 = vunpack.c.h.bf16 %v15999_v56  ;;  %v15069_v60 = vunpack.c.l.bf16 %v15999_v56  ;;  %v15118_v56 = vunpack.c.h.bf16 %v16011_v49 }
  0xda   : > { %v3487_v63 = vsel %vm3336_vm0, %v15069_v60, 0.0 }
  0xdb   : > { %3413 = vadd.xlane.f32.xlu1 %v3412_v61  ;;  %3410 = vadd.xlane.f32.xlu0 %v3409_v62  ;;  %v16000_v61 = vld [vmem:[%s18038_s13 + $0xd0] sm:$0xff]   ;;  %v3490_v62 = vsel %vm3336_vm0, %v15070_v59, 0.0 }
  0xdc   : > { %v15074_v0 = vunpack.c.h.bf16 %v16000_v61  ;;  %v15073_v1 = vunpack.c.l.bf16 %v16000_v61 }
  0xde   : > { %v3493_v4 = vsel %vm3336_vm0, %v15073_v1, 0.0 }
  0xdf   : > { %3419 = vadd.xlane.f32.xlu1 %v3418_v2  ;;  %3416 = vadd.xlane.f32.xlu0 %v3415_v3  ;;  %v16001_v2 = vld [vmem:[%s18038_s13 + $0xd8] sm:$0xff]   ;;  %v3496_v3 = vsel %vm3336_vm0, %v15074_v0, 0.0 }
  0xe0   : > { %v15078_v5 = vunpack.c.h.bf16 %v16001_v2  ;;  %v15077_v6 = vunpack.c.l.bf16 %v16001_v2  ;;  %v18162_v2 = vld [vmem:[%s18038_s13 + $0x138] sm:$0xff]  }
  0xe2   : > { %v3499_v9 = vsel %vm3336_vm0, %v15077_v6, 0.0  ;;  %v15122_v6 = vunpack.c.h.bf16 %v16012_v55 }
  0xe3   : > { %3425 = vadd.xlane.f32.xlu1 %v3424_v7  ;;  %3422 = vadd.xlane.f32.xlu0 %v3421_v8  ;;  %v16002_v7 = vld [vmem:[%s18038_s13 + $0xe0] sm:$0xff]   ;;  %v3502_v8 = vsel %vm3336_vm0, %v15078_v5, 0.0 }
  0xe4   : > { %v15082_v10 = vunpack.c.h.bf16 %v16002_v7  ;;  %v15081_v11 = vunpack.c.l.bf16 %v16002_v7 }
  0xe6   : > { %v3505_v14 = vsel %vm3336_vm0, %v15081_v11, 0.0 }
  0xe7   : > { %3431 = vadd.xlane.f32.xlu1 %v3430_v12  ;;  %3428 = vadd.xlane.f32.xlu0 %v3427_v13  ;;  %v16003_v12 = vld [vmem:[%s18038_s13 + $0xe8] sm:$0xff]   ;;  %v3508_v13 = vsel %vm3336_vm0, %v15082_v10, 0.0 }
  0xe8   : > { %v15086_v15 = vunpack.c.h.bf16 %v16003_v12  ;;  %v15085_v16 = vunpack.c.l.bf16 %v16003_v12 }
  0xea   : > { %v3511_v19 = vsel %vm3336_vm0, %v15085_v16, 0.0 }
  0xeb   : > { %3437 = vadd.xlane.f32.xlu1 %v3436_v17  ;;  %3434 = vadd.xlane.f32.xlu0 %v3433_v18  ;;  %v16004_v17 = vld [vmem:[%s18038_s13 + $0xf0] sm:$0xff]   ;;  %v3514_v18 = vsel %vm3336_vm0, %v15086_v15, 0.0 }
  0xec   : > { %v15090_v20 = vunpack.c.h.bf16 %v16004_v17  ;;  %v15089_v21 = vunpack.c.l.bf16 %v16004_v17 }
  0xee   : > { %v3517_v24 = vsel %vm3336_vm0, %v15089_v21, 0.0  ;;  %v16014_v21 = vld [vmem:[%s18038_s13 + $0x140] sm:$0xff]  }
  0xef   : > { %3443 = vadd.xlane.f32.xlu1 %v3442_v22  ;;  %3440 = vadd.xlane.f32.xlu0 %v3439_v23  ;;  %v16005_v22 = vld [vmem:[%s18038_s13 + $0xf8] sm:$0xff]   ;;  %v3520_v23 = vsel %vm3336_vm0, %v15090_v20, 0.0 }
  0xf0   : > { %v15094_v25 = vunpack.c.h.bf16 %v16005_v22  ;;  %v15093_v26 = vunpack.c.l.bf16 %v16005_v22 }
  0xf2   : > { %v3523_v29 = vsel %vm3336_vm0, %v15093_v26, 0.0 }
  0xf3   : > { %3449 = vadd.xlane.f32.xlu1 %v3448_v27  ;;  %3446 = vadd.xlane.f32.xlu0 %v3445_v28  ;;  %v16006_v27 = vld [vmem:[%s18038_s13 + $0x100] sm:$0xff]   ;;  %v3526_v28 = vsel %vm3336_vm0, %v15094_v25, 0.0  ;;  %v15126_v25 = vunpack.c.h.bf16 %v18162_v2 }
  0xf4   : > { %v15098_v30 = vunpack.c.h.bf16 %v16006_v27  ;;  %v15097_v31 = vunpack.c.l.bf16 %v16006_v27 }
  0xf6   : > { %v3529_v34 = vsel %vm3336_vm0, %v15097_v31, 0.0 }
  0xf7   : > { %3455 = vadd.xlane.f32.xlu1 %v3454_v32  ;;  %3452 = vadd.xlane.f32.xlu0 %v3451_v33  ;;  %v16007_v32 = vld [vmem:[%s18038_s13 + $0x108] sm:$0xff]   ;;  %v3532_v33 = vsel %vm3336_vm0, %v15098_v30, 0.0 }
  0xf8   : > { %v15102_v35 = vunpack.c.h.bf16 %v16007_v32  ;;  %v15101_v36 = vunpack.c.l.bf16 %v16007_v32 }
  0xfa   : > { %v3535_v39 = vsel %vm3336_vm0, %v15101_v36, 0.0 }
  0xfb   : > { %3461 = vadd.xlane.f32.xlu1 %v3460_v37  ;;  %3458 = vadd.xlane.f32.xlu0 %v3457_v38  ;;  %v16008_v37 = vld [vmem:[%s18038_s13 + $0x110] sm:$0xff]   ;;  %v3538_v38 = vsel %vm3336_vm0, %v15102_v35, 0.0 }
  0xfc   : > { %v15106_v40 = vunpack.c.h.bf16 %v16008_v37  ;;  %v15105_v41 = vunpack.c.l.bf16 %v16008_v37 }
  0xfe   : > { %v3544_v44 = vsel %vm3336_vm0, %v15106_v40, 0.0  ;;  %v3541_v45 = vsel %vm3336_vm0, %v15105_v41, 0.0 }
  0xff   : > { %3467 = vadd.xlane.f32.xlu1 %v3466_v42  ;;  %3464 = vadd.xlane.f32.xlu0 %v3463_v43  ;;  %v16009_v42 = vld [vmem:[%s18038_s13 + $0x118] sm:$0xff]  }
 0x100   : > { %v15110_v43 = vunpack.c.h.bf16 %v16009_v42  ;;  %v15109_v46 = vunpack.c.l.bf16 %v16009_v42  ;;  %v3574_v42 = vsel %vm3336_vm0, %v15126_v25, 0.0 }
 0x102   : > { %v3550_v50 = vsel %vm3336_vm0, %v15110_v43, 0.0  ;;  %v3547_v51 = vsel %vm3336_vm0, %v15109_v46, 0.0  ;;  %v15130_v43 = vunpack.c.h.bf16 %v16014_v21 }
 0x103   : > { %3473 = vadd.xlane.f32.xlu1 %v3472_v47  ;;  %3470 = vadd.xlane.f32.xlu0 %v3469_v48  ;;  %v16010_v47 = vld [vmem:[%s18038_s13 + $0x120] sm:$0xff]   ;;  %v6867_v48 = vlaneseq }
 0x105   : > { %v18151_v54 = vand.u32 127, %v6867_v48 }
 0x107   : > { %3479 = vadd.xlane.f32.xlu1 %v3478_v52  ;;  %3476 = vadd.xlane.f32.xlu0 %v3475_v53  ;;  %v15114_v52 = vunpack.c.h.bf16 %v16010_v47  ;;  %v15113_v53 = vunpack.c.l.bf16 %v16010_v47  ;;  %v6887_v0 = vadd.s32 4294967272, %v18151_v54  ;;  %v6873_v1 = vadd.s32 4294967288, %v18151_v54 }
 0x108   : > { %v6901_v5 = vadd.s32 4294967256, %v18151_v54  ;;  %v6908_v10 = vadd.s32 4294967248, %v18151_v54  ;;  %v6915_v16 = vadd.s32 4294967240, %v18151_v54  ;;  %v6929_v35 = vadd.s32 4294967224, %v18151_v54 }
 0x109   : > { %v3556_v61 = vsel %vm3336_vm0, %v15114_v52, 0.0  ;;  %v15129_v47 = vunpack.c.l.bf16 %v16014_v21  ;;  %v6950_v25 = vadd.s32 4294967200, %v18151_v54 }
 0x10b   : > { %3485 = vadd.xlane.f32.xlu1 %v3484_v57  ;;  %3482 = vadd.xlane.f32.xlu0 %v3481_v58  ;;  %v18154_v57 = vshrl.u32 %v6867_v48, 7  ;;  %v15117_v58 = vunpack.c.l.bf16 %v16011_v49 }
 0x10d   : > { %22200 = vst [vmem:[#allocation7_spill] sm:$0xff] %v18154_v57  ;;  %v18169_v7 = vsub.s32 %v18151_v54, %v18154_v57  ;;  %v18197_v32 = vsub.s32 %v6915_v16, %v18154_v57 }
 0x10f   : > { %3491 = vadd.xlane.f32.xlu1 %v3490_v62  ;;  %3488 = vadd.xlane.f32.xlu0 %v3487_v63  ;;  %v3553_v62 = vsel %vm3336_vm0, %v15113_v53, 0.0  ;;  %v6880_v63 = vadd.s32 4294967280, %v18151_v54  ;;  %22201 = vst [vmem:[#allocation8_spill] sm:$0xff] %v18169_v7  ;;  %v18211_v53 = vsub.s32 %v6929_v35, %v18154_v57 }
 0x111   : > { %v18174_v12 = vsub.s32 %v6880_v63, %v18154_v57 }
 0x113   : > { %3497 = vadd.xlane.f32.xlu1 %v3496_v3  ;;  %3494 = vadd.xlane.f32.xlu0 %v3493_v4  ;;  %v3562_v3 = vsel %vm3336_vm0, %v15118_v56, 0.0  ;;  %v6894_v4 = vadd.s32 4294967264, %v18151_v54  ;;  %22202 = vst [vmem:[#allocation9_spill] sm:$0xff] %v18174_v12 }
 0x115   : > { %v18185_v22 = vsub.s32 %v6894_v4, %v18154_v57  ;;  %v3577_v4 = vsel %vm3336_vm0, %v15129_v47, 0.0 }
 0x117   : > { %3503 = vadd.xlane.f32.xlu1 %v3502_v8  ;;  %3500 = vadd.xlane.f32.xlu0 %v3499_v9  ;;  %v3559_v8 = vsel %vm3336_vm0, %v15117_v58, 0.0  ;;  %v15121_v9 = vunpack.c.l.bf16 %v16012_v55  ;;  %22205 = vst [vmem:[#allocation12_spill] sm:$0xff] %v18185_v22  ;;  %v16015_v55 = vld [vmem:[%s18038_s13 + $0x148] sm:$0xff]  }
 0x11b   : > { %3509 = vadd.xlane.f32.xlu1 %v3508_v13  ;;  %3506 = vadd.xlane.f32.xlu0 %v3505_v14  ;;  %v18177_v13 = vsub.s32 %v6887_v0, %v18154_v57  ;;  %v6936_v0 = vadd.s32 4294967216, %v18151_v54 }
 0x11d   : > { %22203 = vst [vmem:[#allocation10_spill] sm:$0xff] %v18177_v13  ;;  %v18226_v21 = vsub.s32 %v6936_v0, %v18154_v57 }
 0x11f   : > { %3515 = vadd.xlane.f32.xlu1 %v3514_v18  ;;  %3512 = vadd.xlane.f32.xlu0 %v3511_v19  ;;  %v18181_v19 = vsub.s32 %v6873_v1, %v18154_v57 }
 0x121   : > { %22204 = vst [vmem:[#allocation11_spill] sm:$0xff] %v18181_v19 }
 0x123   : > { %3521 = vadd.xlane.f32.xlu1 %v3520_v23  ;;  %3518 = vadd.xlane.f32.xlu0 %v3517_v24  ;;  %v18188_v23 = vsub.s32 %v6901_v5, %v18154_v57  ;;  %v3568_v24 = vsel %vm3336_vm0, %v15122_v6, 0.0 }
 0x125   : > { %22206 = vst [vmem:[#allocation13_spill] sm:$0xff] %v18188_v23 }
 0x127   : > { %3527 = vadd.xlane.f32.xlu1 %v3526_v28  ;;  %3524 = vadd.xlane.f32.xlu0 %v3523_v29  ;;  %v3565_v28 = vsel %vm3336_vm0, %v15121_v9, 0.0  ;;  %v18194_v29 = vsub.s32 %v6908_v10, %v18154_v57  ;;  %v15134_v10 = vunpack.c.h.bf16 %v16015_v55 }
 0x12b   : > { %3533 = vadd.xlane.f32.xlu1 %v3532_v33  ;;  %3530 = vadd.xlane.f32.xlu0 %v3529_v34  ;;  %v15125_v33 = vunpack.c.l.bf16 %v18162_v2  ;;  %v6922_v34 = vadd.s32 4294967232, %v18151_v54 }
 0x12d   : > { %v18208_v52 = vsub.s32 %v6922_v34, %v18154_v57  ;;  %v3586_v34 = vsel %vm3336_vm0, %v15134_v10, 0.0 }
 0x12f   : > { %3539 = vadd.xlane.f32.xlu1 %v3538_v38  ;;  %3536 = vadd.xlane.f32.xlu0 %v3535_v39 }
 0x133   : > { %3545 = vadd.xlane.f32.xlu1 %v3544_v44  ;;  %3542 = vadd.xlane.f32.xlu0 %v3541_v45 }
 0x137   : > { %3551 = vadd.xlane.f32.xlu1 %v3550_v50  ;;  %3548 = vadd.xlane.f32.xlu0 %v3547_v51  ;;  %v3571_v51 = vsel %vm3336_vm0, %v15125_v33, 0.0 }
 0x138   : > { %v3345_v59 = vpop.xlane.xlu1 %3344  ;;  %v3339_v60 = vpop.xlane.xlu0 %3338 }
 0x139   : > { %v4852_v11 = vmul.f32 0.015625, %v3345_v59  ;;  %v4850_v17 = vmul.f32 0.015625, %v3339_v60 }
 0x13b   : > { %3557 = vadd.xlane.f32.xlu1 %v3556_v61  ;;  %3554 = vadd.xlane.f32.xlu0 %v3553_v62 }
 0x13c   : > { %v3348_v14 = vpop.xlane.xlu1 %3347  ;;  %v3342_v15 = vpop.xlane.xlu0 %3341 }
 0x13d   : > { %v4853_v18 = vmul.f32 0.015625, %v3348_v14  ;;  %v4851_v20 = vmul.f32 0.015625, %v3342_v15  ;;  %v16016_v14 = vld [vmem:[%s18038_s13 + $0x150] sm:$0xff]  }
 0x13f   : > { %v5356_v26 = vpack.c.bf16 %v4853_v18, %v4852_v11  ;;  %v5355_v27 = vpack.c.bf16 %v4851_v20, %v4850_v17  ;;  %3563 = vadd.xlane.f32.xlu1 %v3562_v3  ;;  %3560 = vadd.xlane.f32.xlu0 %v3559_v8  ;;  %v3580_v3 = vsel %vm3336_vm0, %v15130_v43, 0.0  ;;  %v15133_v11 = vunpack.c.l.bf16 %v16015_v55 }
 0x140   : > { %v3354_v30 = vpop.xlane.xlu1 %3353  ;;  %v3351_v31 = vpop.xlane.xlu0 %3350 }
 0x141   : > { %v6365_v36 = vunpack.c.l.b16 %v5356_v26  ;;  %v6366_v37 = vunpack.c.h.b16 %v5356_v26  ;;  %v6363_v38 = vunpack.c.l.b16 %v5355_v27  ;;  %v6364_v39 = vunpack.c.h.b16 %v5355_v27 }
 0x142   : > { %v4855_v40 = vmul.f32 0.015625, %v3354_v30  ;;  %v4854_v41 = vmul.f32 0.015625, %v3351_v31  ;;  %v3583_v35 = vsel %vm3336_vm0, %v15133_v11, 0.0 }
 0x143   : > { %v6884_v44 = vrot.slane %v6365_v36, %v18174_v12  ;;  %v6872_v45 = vrot.slane %v6363_v38, %v18169_v7  ;;  %v6877_v46 = vrot.slane %v6364_v39, %v18181_v19  ;;  %3569 = vadd.xlane.f32.xlu1 %v3568_v24  ;;  %3566 = vadd.xlane.f32.xlu0 %v3565_v28  ;;  %v6943_v24 = vadd.s32 4294967208, %v18151_v54  ;;  %v16017_v38 = vld [vmem:[%s18038_s13 + $0x158] sm:$0xff]  }
 0x144   : > { %v5357_v48 = vpack.c.bf16 %v4855_v40, %v4854_v41  ;;  %v3360_v49 = vpop.xlane.xlu1 %3359  ;;  %v3357_v50 = vpop.xlane.xlu0 %3356  ;;  %v6891_v56 = vrot.slane %v6366_v37, %v18177_v13  ;;  %v15138_v36 = vunpack.c.h.bf16 %v16016_v14  ;;  %v15137_v37 = vunpack.c.l.bf16 %v16016_v14 }
 0x145   : > { %v6879_v58 = vsel %vm6878_vm1, %v6877_v46, %v6872_v45  ;;  %v4857_v59 = vmul.f32 0.015625, %v3360_v49  ;;  %v4856_v60 = vmul.f32 0.015625, %v3357_v50  ;;  %v6957_v46 = vadd.s32 4294967192, %v18151_v54 }
 0x146   : > { %v6886_v61 = vsel %vm6885_vm2, %v6884_v44, %v6879_v58  ;;  %v6367_v62 = vunpack.c.l.b16 %v5357_v48  ;;  %v6368_v63 = vunpack.c.h.b16 %v5357_v48  ;;  %v18239_v44 = vsub.s32 %v6943_v24, %v18154_v57 }
 0x147   : > { %v6893_v1 = vsel %vm22199_vm3, %v6891_v56, %v6886_v61  ;;  %v5358_v2 = vpack.c.bf16 %v4857_v59, %v4856_v60  ;;  %3575 = vadd.xlane.f32.xlu1 %v3574_v42  ;;  %3572 = vadd.xlane.f32.xlu0 %v3571_v51  ;;  %v18245_v49 = vsub.s32 %v6950_v25, %v18154_v57  ;;  %v15142_v50 = vunpack.c.h.bf16 %v16017_v38  ;;  %v16018_v61 = vld [vmem:[%s18038_s13 + $0x160] sm:$0xff]  }
 0x148   : > { %v6898_v5 = vrot.slane %v6367_v62, %v18185_v22  ;;  %v6905_v6 = vrot.slane %v6368_v63, %v18188_v23  ;;  %v3366_v8 = vpop.xlane.xlu1 %3365  ;;  %v3363_v9 = vpop.xlane.xlu0 %3362  ;;  %v3592_v58 = vsel %vm3336_vm0, %v15138_v36, 0.0  ;;  %v6964_v59 = vadd.s32 4294967184, %v18151_v54 }
 0x149   : > { %v6369_v15 = vunpack.c.l.b16 %v5358_v2  ;;  %v6370_v16 = vunpack.c.h.b16 %v5358_v2  ;;  %v4859_v17 = vmul.f32 0.015625, %v3366_v8  ;;  %v4858_v18 = vmul.f32 0.015625, %v3363_v9  ;;  %22207 = vst [vmem:[#allocation14_spill] sm:$0xff] %v18245_v49 }
 0x14a   : > { %v6900_v20 = vsel %vm22185_vm4, %v6898_v5, %v6893_v1  ;;  %v15141_v60 = vunpack.c.l.bf16 %v16017_v38  ;;  %v3589_v1 = vsel %vm3336_vm0, %v15137_v37, 0.0  ;;  %v6971_v5 = vadd.s32 4294967176, %v18151_v54 }
 0x14b   : > { %v6907_v26 = vsel %vm22184_vm5, %v6905_v6, %v6900_v20  ;;  %v6912_v27 = vrot.slane %v6369_v15, %v18194_v29  ;;  %v6919_v28 = vrot.slane %v6370_v16, %v18197_v32  ;;  %v5359_v30 = vpack.c.bf16 %v4859_v17, %v4858_v18  ;;  %3581 = vadd.xlane.f32.xlu1 %v3580_v3  ;;  %v16019_v20 = vld [vmem:[%s18038_s13 + $0x168] sm:$0xff]  }
 0x14c   : > { %3578 = vadd.xlane.f32.xlu0 %v3577_v4  ;;  %v3372_v31 = vpop.xlane.xlu1 %3371  ;;  %v3369_v33 = vpop.xlane.xlu0 %3368  ;;  %v18255_v6 = vsub.s32 %v6957_v46, %v18154_v57  ;;  %v3598_v9 = vsel %vm3336_vm0, %v15142_v50, 0.0  ;;  %v15146_v10 = vunpack.c.h.bf16 %v16018_v61  ;;  %v3595_v17 = vsel %vm3336_vm0, %v15141_v60, 0.0 }
 0x14d   : > { %v6914_v39 = vsel %vm22183_vm6, %v6912_v27, %v6907_v26  ;;  %v6371_v40 = vunpack.c.l.b16 %v5359_v30  ;;  %v6372_v41 = vunpack.c.h.b16 %v5359_v30  ;;  %v4861_v42 = vmul.f32 0.015625, %v3372_v31 }
 0x14e   : > { %v6921_v43 = vsel %vm22168_vm7, %v6919_v28, %v6914_v39  ;;  %v4860_v45 = vmul.f32 0.015625, %v3369_v33  ;;  %22208 = vst [vmem:[#allocation15_spill] sm:$0xff] %v18255_v6  ;;  %v15145_v18 = vunpack.c.l.bf16 %v16018_v61  ;;  %v18264_v28 = vsub.s32 %v6964_v59, %v18154_v57 }
 0x14f   : > { %v6926_v47 = vrot.slane %v6371_v40, %v18208_v52  ;;  %v6933_v48 = vrot.slane %v6372_v41, %v18211_v53  ;;  %3587 = vadd.xlane.f32.xlu1 %v3586_v34  ;;  %v18267_v30 = vsub.s32 %v6971_v5, %v18154_v57  ;;  %v3604_v38 = vsel %vm3336_vm0, %v15146_v10, 0.0 }
 0x150   : > { %v5360_v51 = vpack.c.bf16 %v4861_v42, %v4860_v45  ;;  %3584 = vadd.xlane.f32.xlu0 %v3583_v35  ;;  %v3378_v55 = vpop.xlane.xlu1 %3377  ;;  %v3375_v56 = vpop.xlane.xlu0 %3374  ;;  %22209 = vst [vmem:[#allocation16_spill] sm:$0xff] %v18264_v28  ;;  %v3601_v39 = vsel %vm3336_vm0, %v15145_v18, 0.0  ;;  %v15150_v40 = vunpack.c.h.bf16 %v16019_v20  ;;  %v15149_v41 = vunpack.c.l.bf16 %v16019_v20  ;;  %v16020_v42 = vld [vmem:[%s18038_s13 + $0x170] sm:$0xff]  }
 0x151   : > { %v6928_v62 = vsel %vm6927_vm8, %v6926_v47, %v6921_v43  ;;  %v4863_v63 = vmul.f32 0.015625, %v3378_v55  ;;  %v4862_v0 = vmul.f32 0.015625, %v3375_v56  ;;  %22210 = vst [vmem:[#allocation17_spill] sm:$0xff] %v18267_v30  ;;  %v15154_v56 = vunpack.c.h.bf16 %v16020_v42 }
 0x152   : > { %v6935_v2 = vsel %vm6934_vm9, %v6933_v48, %v6928_v62  ;;  %v6373_v3 = vunpack.c.l.b16 %v5360_v51  ;;  %v6374_v4 = vunpack.c.h.b16 %v5360_v51  ;;  %v3610_v61 = vsel %vm3336_vm0, %v15150_v40, 0.0 }
 0x153   : > { %v5361_v8 = vpack.c.bf16 %v4863_v63, %v4862_v0  ;;  %3593 = vadd.xlane.f32.xlu1 %v3592_v58  ;;  %v15153_v62 = vunpack.c.l.bf16 %v16020_v42  ;;  %v16021_v63 = vld [vmem:[%s18038_s13 + $0x178] sm:$0xff]   ;;  %v16023_v42 = vld [vmem:[%s18038_s13 + $0x188] sm:$0xff]  }
 0x154   : > { %v6940_v11 = vrot.slane %v6373_v3, %v18226_v21  ;;  %v6947_v14 = vrot.slane %v6374_v4, %v18239_v44  ;;  %3590 = vadd.xlane.f32.xlu0 %v3589_v1  ;;  %v3384_v15 = vpop.xlane.xlu1 %3383  ;;  %v3381_v16 = vpop.xlane.xlu0 %3380  ;;  %v15158_v10 = vunpack.c.h.bf16 %v16021_v63  ;;  %v15157_v20 = vunpack.c.l.bf16 %v16021_v63  ;;  %v16024_v63 = vld [vmem:[%s18038_s13 + $0x190] sm:$0xff]  }
 0x155   : > { %v6375_v54 = vunpack.c.l.b16 %v5361_v8  ;;  %v6376_v24 = vunpack.c.h.b16 %v5361_v8  ;;  %v4865_v25 = vmul.f32 0.015625, %v3384_v15  ;;  %v4864_v26 = vmul.f32 0.015625, %v3381_v16 }
 0x156   : > { %v6942_v27 = vsel %vm22167_vm10, %v6940_v11, %v6935_v2  ;;  %v3607_v2 = vsel %vm3336_vm0, %v15149_v41, 0.0  ;;  %v3613_v18 = vsel %vm3336_vm0, %v15153_v62, 0.0 }
 0x157   : > { %v6949_v31 = vsel %vm6948_vm11, %v6947_v14, %v6942_v27  ;;  %v6954_v33 = vrot.slane %v6375_v54, %v18245_v49  ;;  %v6961_v34 = vrot.slane %v6376_v24, %v18255_v6  ;;  %v5362_v35 = vpack.c.bf16 %v4865_v25, %v4864_v26  ;;  %3599 = vadd.xlane.f32.xlu1 %v3598_v9  ;;  %v16022_v54 = vld [vmem:[%s18038_s13 + $0x180] sm:$0xff]  }
 0x158   : > { %3596 = vadd.xlane.f32.xlu0 %v3595_v17  ;;  %v3390_v36 = vpop.xlane.xlu1 %3389  ;;  %v3387_v37 = vpop.xlane.xlu0 %3386  ;;  %v3616_v9 = vsel %vm3336_vm0, %v15154_v56, 0.0  ;;  %v15162_v40 = vunpack.c.h.bf16 %v16022_v54  ;;  %v15161_v41 = vunpack.c.l.bf16 %v16022_v54  ;;  %v15166_v56 = vunpack.c.h.bf16 %v16023_v42 }
 0x159   : > { %v6956_v43 = vsel %vm6955_vm12, %v6954_v33, %v6949_v31  ;;  %v6377_v45 = vunpack.c.l.b16 %v5362_v35  ;;  %v6378_v46 = vunpack.c.h.b16 %v5362_v35  ;;  %v4867_v47 = vmul.f32 0.015625, %v3390_v36 }
 0x15a   : > { %v4866_v48 = vmul.f32 0.015625, %v3387_v37  ;;  %v6963_v50 = vsel %vm6962_vm13, %v6961_v34, %v6956_v43  ;;  %v3622_v35 = vsel %vm3336_vm0, %v15158_v10, 0.0  ;;  %v3628_v62 = vsel %vm3336_vm0, %v15162_v40, 0.0 }
 0x15b   : > { %v6968_v51 = vrot.slane %v6377_v45, %v18264_v28  ;;  %v6975_v55 = vrot.slane %v6378_v46, %v18267_v30  ;;  %3605 = vadd.xlane.f32.xlu1 %v3604_v38  ;;  %v3634_v10 = vsel %vm3336_vm0, %v15166_v56, 0.0  ;;  %v15169_v54 = vunpack.c.l.bf16 %v16024_v63 }
 0x15c   : > { %v5363_v58 = vpack.c.bf16 %v4867_v47, %v4866_v48  ;;  %3602 = vadd.xlane.f32.xlu0 %v3601_v39  ;;  %v3396_v59 = vpop.xlane.xlu1 %3395  ;;  %v3393_v60 = vpop.xlane.xlu0 %3392  ;;  %v3619_v39 = vsel %vm3336_vm0, %v15157_v20, 0.0  ;;  %v15170_v20 = vunpack.c.h.bf16 %v16024_v63 }
 0x15d   : > { %v4869_v0 = vmul.f32 0.015625, %v3396_v59  ;;  %v4868_v1 = vmul.f32 0.015625, %v3393_v60  ;;  %v6970_v5 = vsel %vm6969_vm14, %v6968_v51, %v6963_v50 }
 0x15e   : > { %v6379_v3 = vunpack.c.l.b16 %v5363_v58  ;;  %v6380_v4 = vunpack.c.h.b16 %v5363_v58  ;;  %v18285_v11 = vsel %vm6976_vm15, %v6975_v55, %v6970_v5  ;;  %v15165_v58 = vunpack.c.l.bf16 %v16023_v42 }
 0x15f   : > { %v5364_v8 = vpack.c.bf16 %v4869_v0, %v4868_v1  ;;  %3611 = vadd.xlane.f32.xlu1 %v3610_v61  ;;  %v3640_v40 = vsel %vm3336_vm0, %v15170_v20, 0.0 }
 0x160   : > { %v6981_v14 = vrot.slane %v6379_v3, %v18169_v7  ;;  %v6985_v15 = vrot.slane %v6380_v4, %v18181_v19  ;;  %3608 = vadd.xlane.f32.xlu0 %v3607_v2  ;;  %v3402_v16 = vpop.xlane.xlu1 %3401  ;;  %v3399_v17 = vpop.xlane.xlu0 %3398  ;;  %v3625_v3 = vsel %vm3336_vm0, %v15161_v41, 0.0  ;;  %v3637_v41 = vsel %vm3336_vm0, %v15169_v54, 0.0 }
 0x161   : > { %v6381_v24 = vunpack.c.l.b16 %v5364_v8  ;;  %v6382_v25 = vunpack.c.h.b16 %v5364_v8  ;;  %v4871_v26 = vmul.f32 0.015625, %v3402_v16  ;;  %v4870_v27 = vmul.f32 0.015625, %v3399_v17 }
 0x162   : > { %v6986_v36 = vsel %vm6878_vm1, %v6985_v15, %v6981_v14  ;;  %v3631_v14 = vsel %vm3336_vm0, %v15165_v58, 0.0 }
 0x163   : > { %v6990_v31 = vrot.slane %v6381_v24, %v18174_v12  ;;  %v6995_v33 = vrot.slane %v6382_v25, %v18177_v13  ;;  %v5365_v34 = vpack.c.bf16 %v4871_v26, %v4870_v27  ;;  %3617 = vadd.xlane.f32.xlu1 %v3616_v9  ;;  %v16025_v24 = vld [vmem:[%s18038_s13 + $0x198] sm:$0xff]  }
 0x164   : > { %3614 = vadd.xlane.f32.xlu0 %v3613_v18  ;;  %v3408_v37 = vpop.xlane.xlu1 %3407  ;;  %v3405_v38 = vpop.xlane.xlu0 %3404  ;;  %v15174_v42 = vunpack.c.h.bf16 %v16025_v24 }
 0x165   : > { %v6991_v43 = vsel %vm6885_vm2, %v6990_v31, %v6986_v36  ;;  %v6383_v45 = vunpack.c.l.b16 %v5365_v34  ;;  %v6384_v46 = vunpack.c.h.b16 %v5365_v34  ;;  %v4873_v47 = vmul.f32 0.015625, %v3408_v37 }
 0x166   : > { %v6996_v48 = vsel %vm22199_vm3, %v6995_v33, %v6991_v43  ;;  %v4872_v50 = vmul.f32 0.015625, %v3405_v38  ;;  %v15173_v43 = vunpack.c.l.bf16 %v16025_v24 }
 0x167   : > { %v7000_v51 = vrot.slane %v6383_v45, %v18185_v22  ;;  %v7005_v55 = vrot.slane %v6384_v46, %v18188_v23  ;;  %3623 = vadd.xlane.f32.xlu1 %v3622_v35  ;;  %v16026_v45 = vld [vmem:[%s18038_s13 + $0x1a0] sm:$0xff]  }
 0x168   : > { %v5366_v59 = vpack.c.bf16 %v4873_v47, %v4872_v50  ;;  %3620 = vadd.xlane.f32.xlu0 %v3619_v39  ;;  %v3414_v60 = vpop.xlane.xlu1 %3413  ;;  %v3411_v61 = vpop.xlane.xlu0 %3410 }
 0x169   : > { %v7001_v0 = vsel %vm22185_vm4, %v7000_v51, %v6996_v48  ;;  %v4875_v1 = vmul.f32 0.015625, %v3414_v60  ;;  %v4874_v2 = vmul.f32 0.015625, %v3411_v61  ;;  %v15177_v60 = vunpack.c.l.bf16 %v16026_v45 }
 0x16a   : > { %v7006_v4 = vsel %vm22184_vm5, %v7005_v55, %v7001_v0  ;;  %v6385_v5 = vunpack.c.l.b16 %v5366_v59  ;;  %v6386_v8 = vunpack.c.h.b16 %v5366_v59  ;;  %v15178_v59 = vunpack.c.h.bf16 %v16026_v45 }
 0x16b   : > { %v5367_v9 = vpack.c.bf16 %v4875_v1, %v4874_v2  ;;  %3629 = vadd.xlane.f32.xlu1 %v3628_v62  ;;  %v3646_v0 = vsel %vm3336_vm0, %v15174_v42, 0.0 }
 0x16c   : > { %v7010_v15 = vrot.slane %v6385_v5, %v18194_v29  ;;  %v7015_v16 = vrot.slane %v6386_v8, %v18197_v32  ;;  %3626 = vadd.xlane.f32.xlu0 %v3625_v3  ;;  %v3420_v17 = vpop.xlane.xlu1 %3419  ;;  %v3417_v18 = vpop.xlane.xlu0 %3416  ;;  %v16027_v5 = vld [vmem:[%s18038_s13 + $0x1a8] sm:$0xff]  }
 0x16d   : > { %v6387_v25 = vunpack.c.l.b16 %v5367_v9  ;;  %v6388_v26 = vunpack.c.h.b16 %v5367_v9  ;;  %v4877_v27 = vmul.f32 0.015625, %v3420_v17  ;;  %v4876_v31 = vmul.f32 0.015625, %v3417_v18  ;;  %v16028_v17 = vld [vmem:[%s18038_s13 + $0x1b0] sm:$0xff]  }
 0x16e   : > { %v7011_v33 = vsel %vm22183_vm6, %v7010_v15, %v7006_v4  ;;  %v3643_v4 = vsel %vm3336_vm0, %v15173_v43, 0.0  ;;  %v3652_v15 = vsel %vm3336_vm0, %v15178_v59, 0.0 }
 0x16f   : > { %v7016_v34 = vsel %vm22168_vm7, %v7015_v16, %v7011_v33  ;;  %v7020_v35 = vrot.slane %v6387_v25, %v18208_v52  ;;  %v7025_v36 = vrot.slane %v6388_v26, %v18211_v53  ;;  %v5368_v37 = vpack.c.bf16 %v4877_v27, %v4876_v31  ;;  %3635 = vadd.xlane.f32.xlu1 %v3634_v10 }
 0x170   : > { %3632 = vadd.xlane.f32.xlu0 %v3631_v14  ;;  %v3426_v38 = vpop.xlane.xlu1 %3425  ;;  %v3423_v39 = vpop.xlane.xlu0 %3422  ;;  %v3649_v16 = vsel %vm3336_vm0, %v15177_v60, 0.0  ;;  %v15182_v25 = vunpack.c.h.bf16 %v16027_v5  ;;  %v15181_v26 = vunpack.c.l.bf16 %v16027_v5 }
 0x171   : > { %v7021_v46 = vsel %vm6927_vm8, %v7020_v35, %v7016_v34  ;;  %v6389_v47 = vunpack.c.l.b16 %v5368_v37  ;;  %v6390_v48 = vunpack.c.h.b16 %v5368_v37  ;;  %v4879_v50 = vmul.f32 0.015625, %v3426_v38 }
 0x172   : > { %v7026_v51 = vsel %vm6934_vm9, %v7025_v36, %v7021_v46  ;;  %v4878_v55 = vmul.f32 0.015625, %v3423_v39  ;;  %v15186_v35 = vunpack.c.h.bf16 %v16028_v17  ;;  %v3658_v43 = vsel %vm3336_vm0, %v15182_v25, 0.0 }
 0x173   : > { %v7030_v56 = vrot.slane %v6389_v47, %v18226_v21  ;;  %v7035_v58 = vrot.slane %v6390_v48, %v18239_v44  ;;  %3641 = vadd.xlane.f32.xlu1 %v3640_v40  ;;  %v3655_v45 = vsel %vm3336_vm0, %v15181_v26, 0.0  ;;  %v15185_v46 = vunpack.c.l.bf16 %v16028_v17 }
 0x174   : > { %v5369_v61 = vpack.c.bf16 %v4879_v50, %v4878_v55  ;;  %3638 = vadd.xlane.f32.xlu0 %v3637_v41  ;;  %v3432_v62 = vpop.xlane.xlu1 %3431  ;;  %v3429_v63 = vpop.xlane.xlu0 %3428  ;;  %v16029_v55 = vld [vmem:[%s18038_s13 + $0x1b8] sm:$0xff]   ;;  %v3664_v59 = vsel %vm3336_vm0, %v15186_v35, 0.0 }
 0x175   : > { %v7031_v1 = vsel %vm22167_vm10, %v7030_v56, %v7026_v51  ;;  %v4881_v2 = vmul.f32 0.015625, %v3432_v62  ;;  %v4880_v3 = vmul.f32 0.015625, %v3429_v63 }
 0x176   : > { %v7036_v8 = vsel %vm6948_vm11, %v7035_v58, %v7031_v1  ;;  %v6391_v9 = vunpack.c.l.b16 %v5369_v61  ;;  %v6392_v10 = vunpack.c.h.b16 %v5369_v61  ;;  %v3661_v1 = vsel %vm3336_vm0, %v15185_v46, 0.0 }
 0x177   : > { %v5370_v14 = vpack.c.bf16 %v4881_v2, %v4880_v3  ;;  %3647 = vadd.xlane.f32.xlu1 %v3646_v0  ;;  %v15190_v2 = vunpack.c.h.bf16 %v16029_v55  ;;  %v16030_v3 = vld [vmem:[%s18038_s13 + $0x1c0] sm:$0xff]  }
 0x178   : > { %v7040_v18 = vrot.slane %v6391_v9, %v18245_v49  ;;  %v7045_v20 = vrot.slane %v6392_v10, %v18255_v6  ;;  %3644 = vadd.xlane.f32.xlu0 %v3643_v4  ;;  %v3438_v54 = vpop.xlane.xlu1 %3437  ;;  %v3435_v24 = vpop.xlane.xlu0 %3434  ;;  %v15189_v9 = vunpack.c.l.bf16 %v16029_v55  ;;  %v15193_v17 = vunpack.c.l.bf16 %v16030_v3 }
 0x179   : > { %v6393_v27 = vunpack.c.l.b16 %v5370_v14  ;;  %v6394_v31 = vunpack.c.h.b16 %v5370_v14  ;;  %v4883_v33 = vmul.f32 0.015625, %v3438_v54  ;;  %v4882_v34 = vmul.f32 0.015625, %v3435_v24 }
 0x17a   : > { %v7041_v36 = vsel %vm6955_vm12, %v7040_v18, %v7036_v8  ;;  %v3670_v25 = vsel %vm3336_vm0, %v15190_v2, 0.0 }
 0x17b   : > { %v7050_v37 = vrot.slane %v6393_v27, %v18264_v28  ;;  %v7055_v38 = vrot.slane %v6394_v31, %v18267_v30  ;;  %v5371_v39 = vpack.c.bf16 %v4883_v33, %v4882_v34  ;;  %3653 = vadd.xlane.f32.xlu1 %v3652_v15  ;;  %v7046_v40 = vsel %vm6962_vm13, %v7045_v20, %v7041_v36  ;;  %v16031_v34 = vld [vmem:[%s18038_s13 + $0x1c8] sm:$0xff]  }
 0x17c   : > { %3650 = vadd.xlane.f32.xlu0 %v3649_v16  ;;  %v3444_v41 = vpop.xlane.xlu1 %3443  ;;  %v3441_v42 = vpop.xlane.xlu0 %3440  ;;  %v15194_v16 = vunpack.c.h.bf16 %v16030_v3  ;;  %v3667_v33 = vsel %vm3336_vm0, %v15189_v9, 0.0  ;;  %v15198_v46 = vunpack.c.h.bf16 %v16031_v34 }
 0x17d   : > { %v6395_v47 = vunpack.c.l.b16 %v5371_v39  ;;  %v6396_v48 = vunpack.c.h.b16 %v5371_v39  ;;  %v4885_v50 = vmul.f32 0.015625, %v3444_v41  ;;  %v4884_v51 = vmul.f32 0.015625, %v3441_v42 }
 0x17e   : > { %v7051_v56 = vsel %vm6969_vm14, %v7050_v37, %v7046_v40  ;;  %v3676_v39 = vsel %vm3336_vm0, %v15194_v16, 0.0  ;;  %v3673_v40 = vsel %vm3336_vm0, %v15193_v17, 0.0  ;;  %v3682_v2 = vsel %vm3336_vm0, %v15198_v46, 0.0 }
 0x17f   : > { %v5372_v58 = vpack.c.bf16 %v4885_v50, %v4884_v51  ;;  %3659 = vadd.xlane.f32.xlu1 %v3658_v43  ;;  %v18342_v60 = vsel %vm6976_vm15, %v7055_v38, %v7051_v56  ;;  %v7060_v61 = vrot.slane %v6395_v47, %v18169_v7  ;;  %v7064_v62 = vrot.slane %v6396_v48, %v18181_v19  ;;  %v16032_v56 = vld [vmem:[%s18038_s13 + $0x1d0] sm:$0xff]  }
 0x180   : > { %3656 = vadd.xlane.f32.xlu0 %v3655_v45  ;;  %v3450_v63 = vpop.xlane.xlu1 %3449  ;;  %v3447_v0 = vpop.xlane.xlu0 %3446  ;;  %v15197_v47 = vunpack.c.l.bf16 %v16031_v34 }
 0x181   : > { %v6397_v4 = vunpack.c.l.b16 %v5372_v58  ;;  %v6398_v5 = vunpack.c.h.b16 %v5372_v58  ;;  %v4887_v8 = vmul.f32 0.015625, %v3450_v63  ;;  %v4886_v10 = vmul.f32 0.015625, %v3447_v0 }
 0x182   : > { %v7065_v18 = vsel %vm6878_vm1, %v7064_v62, %v7060_v61  ;;  %v3679_v3 = vsel %vm3336_vm0, %v15197_v47, 0.0 }
 0x183   : > { %v7069_v14 = vrot.slane %v6397_v4, %v18174_v12  ;;  %v7074_v15 = vrot.slane %v6398_v5, %v18177_v13  ;;  %3665 = vadd.xlane.f32.xlu1 %v3664_v59  ;;  %v5373_v20 = vpack.c.bf16 %v4887_v8, %v4886_v10  ;;  %v15202_v4 = vunpack.c.h.bf16 %v16032_v56  ;;  %v16033_v8 = vld [vmem:[%s18038_s13 + $0x1d8] sm:$0xff]  }
 0x184   : > { %3662 = vadd.xlane.f32.xlu0 %v3661_v1  ;;  %v3456_v54 = vpop.xlane.xlu1 %3455  ;;  %v3453_v24 = vpop.xlane.xlu0 %3452  ;;  %v15201_v5 = vunpack.c.l.bf16 %v16032_v56 }
 0x185   : > { %v7070_v26 = vsel %vm6885_vm2, %v7069_v14, %v7065_v18  ;;  %v4889_v27 = vmul.f32 0.015625, %v3456_v54  ;;  %v4888_v31 = vmul.f32 0.015625, %v3453_v24  ;;  %v6399_v36 = vunpack.c.l.b16 %v5373_v20 }
 0x186   : > { %v7075_v35 = vsel %vm22199_vm3, %v7074_v15, %v7070_v26  ;;  %v6400_v37 = vunpack.c.h.b16 %v5373_v20  ;;  %v15206_v54 = vunpack.c.h.bf16 %v16033_v8  ;;  %v15205_v24 = vunpack.c.l.bf16 %v16033_v8 }
 0x187   : > { %v5374_v38 = vpack.c.bf16 %v4889_v27, %v4888_v31  ;;  %3671 = vadd.xlane.f32.xlu1 %v3670_v25  ;;  %v7079_v41 = vrot.slane %v6399_v36, %v18185_v22  ;;  %v3688_v31 = vsel %vm3336_vm0, %v15202_v4, 0.0  ;;  %v3685_v36 = vsel %vm3336_vm0, %v15201_v5, 0.0 }
 0x188   : > { %v7084_v42 = vrot.slane %v6400_v37, %v18188_v23  ;;  %3668 = vadd.xlane.f32.xlu0 %v3667_v33  ;;  %v3462_v43 = vpop.xlane.xlu1 %3461  ;;  %v3459_v45 = vpop.xlane.xlu0 %3458  ;;  %v16034_v37 = vld [vmem:[%s18038_s13 + $0x1e0] sm:$0xff]  }
 0x189   : > { %v6401_v48 = vunpack.c.l.b16 %v5374_v38  ;;  %v6402_v50 = vunpack.c.h.b16 %v5374_v38  ;;  %v4891_v51 = vmul.f32 0.015625, %v3462_v43  ;;  %v4890_v55 = vmul.f32 0.015625, %v3459_v45 }
 0x18a   : > { %v7080_v58 = vsel %vm22185_vm4, %v7079_v41, %v7075_v35  ;;  %v3691_v43 = vsel %vm3336_vm0, %v15205_v24, 0.0 }
 0x18b   : > { %v7085_v59 = vsel %vm22184_vm5, %v7084_v42, %v7080_v58  ;;  %v7089_v61 = vrot.slane %v6401_v48, %v18194_v29  ;;  %v7094_v62 = vrot.slane %v6402_v50, %v18197_v32  ;;  %v5375_v63 = vpack.c.bf16 %v4891_v51, %v4890_v55  ;;  %3677 = vadd.xlane.f32.xlu1 %v3676_v39 }
 0x18c   : > { %3674 = vadd.xlane.f32.xlu0 %v3673_v40  ;;  %v3468_v0 = vpop.xlane.xlu1 %3467  ;;  %v3465_v1 = vpop.xlane.xlu0 %3464  ;;  %v3694_v42 = vsel %vm3336_vm0, %v15206_v54, 0.0  ;;  %v15210_v50 = vunpack.c.h.bf16 %v16034_v37  ;;  %v15209_v51 = vunpack.c.l.bf16 %v16034_v37  ;;  %v16100_v37 = vld [vmem:[%s18038_s13 + $0x3f0] sm:$0xff]  }
 0x18d   : > { %v7090_v9 = vsel %vm22183_vm6, %v7089_v61, %v7085_v59  ;;  %v6403_v10 = vunpack.c.l.b16 %v5375_v63  ;;  %v6404_v14 = vunpack.c.h.b16 %v5375_v63  ;;  %v4893_v15 = vmul.f32 0.015625, %v3468_v0  ;;  %v16035_v61 = vld [vmem:[%s18038_s13 + $0x1e8] sm:$0xff]  }
 0x18e   : > { %v7095_v16 = vsel %vm22168_vm7, %v7094_v62, %v7090_v9  ;;  %v4892_v17 = vmul.f32 0.015625, %v3465_v1  ;;  %v3700_v5 = vsel %vm3336_vm0, %v15210_v50, 0.0  ;;  %v3697_v8 = vsel %vm3336_vm0, %v15209_v51, 0.0 }
 0x18f   : > { %v7099_v18 = vrot.slane %v6403_v10, %v18208_v52  ;;  %v7104_v20 = vrot.slane %v6404_v14, %v18211_v53  ;;  %3683 = vadd.xlane.f32.xlu1 %v3682_v2  ;;  %v15214_v9 = vunpack.c.h.bf16 %v16035_v61  ;;  %v15213_v10 = vunpack.c.l.bf16 %v16035_v61  ;;  %v16108_v14 = vld [vmem:[%s18038_s13 + $0x430] sm:$0xff]  }
 0x190   : > { %v5376_v25 = vpack.c.bf16 %v4893_v15, %v4892_v17  ;;  %3680 = vadd.xlane.f32.xlu0 %v3679_v3  ;;  %v3474_v26 = vpop.xlane.xlu1 %3473  ;;  %v3471_v27 = vpop.xlane.xlu0 %3470 }
 0x191   : > { %v7100_v33 = vsel %vm6927_vm8, %v7099_v18, %v7095_v16  ;;  %v4895_v34 = vmul.f32 0.015625, %v3474_v26  ;;  %v4894_v35 = vmul.f32 0.015625, %v3471_v27  ;;  %v15505_v27 = vunpack.c.l.bf16 %v16108_v14 }
 0x192   : > { %v7105_v38 = vsel %vm6934_vm9, %v7104_v20, %v7100_v33  ;;  %v6405_v39 = vunpack.c.l.b16 %v5376_v25  ;;  %v6406_v40 = vunpack.c.h.b16 %v5376_v25  ;;  %v16036_v20 = vld [vmem:[%s18038_s13 + $0x1f0] sm:$0xff]  }
 0x193   : > { %v5377_v41 = vpack.c.bf16 %v4895_v34, %v4894_v35  ;;  %3689 = vadd.xlane.f32.xlu1 %v3688_v31  ;;  %v3706_v35 = vsel %vm3336_vm0, %v15214_v9, 0.0 }
 0x194   : > { %v7109_v45 = vrot.slane %v6405_v39, %v18226_v21  ;;  %v7114_v46 = vrot.slane %v6406_v40, %v18239_v44  ;;  %3686 = vadd.xlane.f32.xlu0 %v3685_v36  ;;  %v3480_v47 = vpop.xlane.xlu1 %3479  ;;  %v3477_v48 = vpop.xlane.xlu0 %3476  ;;  %v15217_v36 = vunpack.c.l.bf16 %v16036_v20  ;;  %v3703_v40 = vsel %vm3336_vm0, %v15213_v10, 0.0 }
 0x195   : > { %v6407_v55 = vunpack.c.l.b16 %v5377_v41  ;;  %v6408_v56 = vunpack.c.h.b16 %v5377_v41  ;;  %v4897_v58 = vmul.f32 0.015625, %v3480_v47  ;;  %v4896_v59 = vmul.f32 0.015625, %v3477_v48 }
 0x196   : > { %v7110_v62 = vsel %vm22167_vm10, %v7109_v45, %v7105_v38  ;;  %v15473_v47 = vunpack.c.l.bf16 %v16100_v37 }
 0x197   : > { %v7115_v63 = vsel %vm6948_vm11, %v7114_v46, %v7110_v62  ;;  %v7119_v0 = vrot.slane %v6407_v55, %v18245_v49  ;;  %v7124_v1 = vrot.slane %v6408_v56, %v18255_v6  ;;  %v5378_v2 = vpack.c.bf16 %v4897_v58, %v4896_v59  ;;  %3695 = vadd.xlane.f32.xlu1 %v3694_v42 }
 0x198   : > { %3692 = vadd.xlane.f32.xlu0 %v3691_v43  ;;  %v3486_v3 = vpop.xlane.xlu1 %3485  ;;  %v3483_v4 = vpop.xlane.xlu0 %3482  ;;  %v4141_v46 = vsel %vm3336_vm0, %v15505_v27, 0.0  ;;  %v3709_v58 = vsel %vm3336_vm0, %v15217_v36, 0.0  ;;  %v15506_v59 = vunpack.c.h.bf16 %v16108_v14 }
 0x199   : > { %v7120_v15 = vsel %vm6955_vm12, %v7119_v0, %v7115_v63  ;;  %v6409_v16 = vunpack.c.l.b16 %v5378_v2  ;;  %v6410_v17 = vunpack.c.h.b16 %v5378_v2  ;;  %v4899_v18 = vmul.f32 0.015625, %v3486_v3 }
 0x19a   : > { %v7125_v54 = vsel %vm6962_vm13, %v7124_v1, %v7120_v15  ;;  %v4898_v24 = vmul.f32 0.015625, %v3483_v4  ;;  %v16109_v1 = vld [vmem:[%s18038_s13 + $0x438] sm:$0xff]   ;;  %v4144_v14 = vsel %vm3336_vm0, %v15506_v59, 0.0 }
 0x19b   : > { %v7129_v25 = vrot.slane %v6409_v16, %v18264_v28  ;;  %v7134_v26 = vrot.slane %v6410_v17, %v18267_v30  ;;  %3701 = vadd.xlane.f32.xlu1 %v3700_v5  ;;  %v4093_v5 = vsel %vm3336_vm0, %v15473_v47, 0.0  ;;  %v15509_v15 = vunpack.c.l.bf16 %v16109_v1  ;;  %v16101_v17 = vld [vmem:[%s18038_s13 + $0x3f8] sm:$0xff]  }
 0x19c   : > { %v5379_v31 = vpack.c.bf16 %v4899_v18, %v4898_v24  ;;  %3698 = vadd.xlane.f32.xlu0 %v3697_v8  ;;  %v3492_v33 = vpop.xlane.xlu1 %3491  ;;  %v3489_v34 = vpop.xlane.xlu0 %3488  ;;  %v15474_v16 = vunpack.c.h.bf16 %v16100_v37 }
 0x19d   : > { %v4901_v38 = vmul.f32 0.015625, %v3492_v33  ;;  %v4900_v39 = vmul.f32 0.015625, %v3489_v34  ;;  %v7130_v43 = vsel %vm6969_vm14, %v7129_v25, %v7125_v54  ;;  %v15477_v33 = vunpack.c.l.bf16 %v16101_v17 }
 0x19e   : > { %v6411_v41 = vunpack.c.l.b16 %v5379_v31  ;;  %v6412_v42 = vunpack.c.h.b16 %v5379_v31  ;;  %v18400_v48 = vsel %vm6976_vm15, %v7134_v26, %v7130_v43  ;;  %v15510_v34 = vunpack.c.h.bf16 %v16109_v1  ;;  %v16110_v43 = vld [vmem:[%s18038_s13 + $0x440] sm:$0xff]  }
 0x19f   : > { %v5380_v45 = vpack.c.bf16 %v4901_v38, %v4900_v39  ;;  %3707 = vadd.xlane.f32.xlu1 %v3706_v35  ;;  %v4147_v38 = vsel %vm3336_vm0, %v15509_v15, 0.0 }
 0x1a0   : > { %v7139_v50 = vrot.slane %v6411_v41, %v18169_v7  ;;  %v7143_v51 = vrot.slane %v6412_v42, %v18181_v19  ;;  %3704 = vadd.xlane.f32.xlu0 %v3703_v40  ;;  %v3498_v55 = vpop.xlane.xlu1 %3497  ;;  %v3495_v56 = vpop.xlane.xlu0 %3494  ;;  %v4096_v42 = vsel %vm3336_vm0, %v15474_v16, 0.0 }
 0x1a1   : > { %v6413_v61 = vunpack.c.l.b16 %v5380_v45  ;;  %v6414_v62 = vunpack.c.h.b16 %v5380_v45  ;;  %v4903_v63 = vmul.f32 0.015625, %v3498_v55  ;;  %v4902_v0 = vmul.f32 0.015625, %v3495_v56 }
 0x1a2   : > { %v7144_v8 = vsel %vm6878_vm1, %v7143_v51, %v7139_v50  ;;  %v4099_v51 = vsel %vm3336_vm0, %v15477_v33, 0.0  ;;  %v4150_v55 = vsel %vm3336_vm0, %v15510_v34, 0.0 }
 0x1a3   : > { %v7148_v2 = vrot.slane %v6413_v61, %v18174_v12  ;;  %v7153_v3 = vrot.slane %v6414_v62, %v18177_v13  ;;  %v5381_v4 = vpack.c.bf16 %v4903_v63, %v4902_v0  ;;  %4142 = vadd.xlane.f32.xlu1 %v4141_v46  ;;  %v15513_v62 = vunpack.c.l.bf16 %v16110_v43 }
 0x1a4   : > { %3710 = vadd.xlane.f32.xlu0 %v3709_v58  ;;  %v3504_v9 = vpop.xlane.xlu1 %3503  ;;  %v3501_v10 = vpop.xlane.xlu0 %3500  ;;  %v15478_v63 = vunpack.c.h.bf16 %v16101_v17 }
 0x1a5   : > { %v7149_v18 = vsel %vm6885_vm2, %v7148_v2, %v7144_v8  ;;  %v6415_v20 = vunpack.c.l.b16 %v5381_v4  ;;  %v6416_v54 = vunpack.c.h.b16 %v5381_v4  ;;  %v4905_v24 = vmul.f32 0.015625, %v3504_v9  ;;  %v16102_v4 = vld [vmem:[%s18038_s13 + $0x400] sm:$0xff]  }
 0x1a6   : > { %v7154_v25 = vsel %vm22199_vm3, %v7153_v3, %v7149_v18  ;;  %v4904_v26 = vmul.f32 0.015625, %v3501_v10  ;;  %v4153_v17 = vsel %vm3336_vm0, %v15513_v62, 0.0  ;;  %v4102_v18 = vsel %vm3336_vm0, %v15478_v63, 0.0 }
 0x1a7   : > { %v7158_v27 = vrot.slane %v6415_v20, %v18185_v22  ;;  %v7163_v31 = vrot.slane %v6416_v54, %v18188_v23  ;;  %4094 = vadd.xlane.f32.xlu1 %v4093_v5  ;;  %v15481_v20 = vunpack.c.l.bf16 %v16102_v4  ;;  %v15514_v54 = vunpack.c.h.bf16 %v16110_v43 }
 0x1a8   : > { %v5382_v35 = vpack.c.bf16 %v4905_v24, %v4904_v26  ;;  %4145 = vadd.xlane.f32.xlu0 %v4144_v14  ;;  %v3510_v36 = vpop.xlane.xlu1 %3509  ;;  %v3507_v37 = vpop.xlane.xlu0 %3506  ;;  %v16111_v24 = vld [vmem:[%s18038_s13 + $0x448] sm:$0xff]  }
 0x1a9   : > { %v7159_v39 = vsel %vm22185_vm4, %v7158_v27, %v7154_v25  ;;  %v4907_v40 = vmul.f32 0.015625, %v3510_v36  ;;  %v4906_v41 = vmul.f32 0.015625, %v3507_v37  ;;  %v15517_v37 = vunpack.c.l.bf16 %v16111_v24 }
 0x1aa   : > { %v7164_v45 = vsel %vm22184_vm5, %v7163_v31, %v7159_v39  ;;  %v6417_v46 = vunpack.c.l.b16 %v5382_v35  ;;  %v6418_v47 = vunpack.c.h.b16 %v5382_v35 }
 0x1ab   : > { %v5383_v50 = vpack.c.bf16 %v4907_v40, %v4906_v41  ;;  %4148 = vadd.xlane.f32.xlu1 %v4147_v38  ;;  %v15482_v38 = vunpack.c.h.bf16 %v16102_v4  ;;  %v18447_v4 = vld [vmem:[%s18038_s13 + $0x450] sm:$0xff]  }
 0x1ac   : > { %v7168_v56 = vrot.slane %v6417_v46, %v18194_v29  ;;  %v7173_v58 = vrot.slane %v6418_v47, %v18197_v32  ;;  %4097 = vadd.xlane.f32.xlu0 %v4096_v42  ;;  %v3516_v59 = vpop.xlane.xlu1 %3515  ;;  %v3513_v61 = vpop.xlane.xlu0 %3512  ;;  %v4105_v42 = vsel %vm3336_vm0, %v15481_v20, 0.0  ;;  %v4156_v47 = vsel %vm3336_vm0, %v15514_v54, 0.0 }
 0x1ad   : > { %v6419_v0 = vunpack.c.l.b16 %v5383_v50  ;;  %v6420_v1 = vunpack.c.h.b16 %v5383_v50  ;;  %v4909_v2 = vmul.f32 0.015625, %v3516_v59  ;;  %v4908_v3 = vmul.f32 0.015625, %v3513_v61  ;;  %v16103_v50 = vld [vmem:[%s18038_s13 + $0x408] sm:$0xff]  }
 0x1ae   : > { %v7169_v5 = vsel %vm22183_vm6, %v7168_v56, %v7164_v45  ;;  %v4159_v59 = vsel %vm3336_vm0, %v15517_v37, 0.0  ;;  %v4108_v61 = vsel %vm3336_vm0, %v15482_v38, 0.0  ;;  %v16333_v37 = vld [vmem:[%s18036_s12 + $0x4] ss:$16 sps:$4 sm:$0xff]   ;;  %v16335_v38 = vld [vmem:[%s18036_s12 + $0xc] ss:$16 sps:$4 sm:$0xff]  }
 0x1af   : > { %v7174_v8 = vsel %vm22168_vm7, %v7173_v58, %v7169_v5  ;;  %v7178_v9 = vrot.slane %v6419_v0, %v18208_v52  ;;  %v7183_v10 = vrot.slane %v6420_v1, %v18211_v53  ;;  %v5384_v14 = vpack.c.bf16 %v4909_v2, %v4908_v3  ;;  %4100 = vadd.xlane.f32.xlu1 %v4099_v51 }
 0x1b0   : > { %4151 = vadd.xlane.f32.xlu0 %v4150_v55  ;;  %v3522_v15 = vpop.xlane.xlu1 %3521  ;;  %v3519_v16 = vpop.xlane.xlu0 %3518  ;;  %v15485_v2 = vunpack.c.l.bf16 %v16103_v50  ;;  %v15518_v3 = vunpack.c.h.bf16 %v16111_v24  ;;  %11959 = vmatprep.subr.bf16.mxu0 %v16333_v37  ;;  %v16350_v37 = vld [vmem:[%s18036_s12 + $0x48] ss:$16 sps:$4 sm:$0xff]  }
 0x1b1   : > { %v7179_v25 = vsel %vm6927_vm8, %v7178_v9, %v7174_v8  ;;  %v6421_v26 = vunpack.c.l.b16 %v5384_v14  ;;  %v6422_v27 = vunpack.c.h.b16 %v5384_v14  ;;  %v4911_v31 = vmul.f32 0.015625, %v3522_v15  ;;  %12287 = vmatprep.subr.bf16.mxu1 %v16335_v38 }
 0x1b2   : > { %v7184_v33 = vsel %vm6934_vm9, %v7183_v10, %v7179_v25  ;;  %v4910_v34 = vmul.f32 0.015625, %v3519_v16  ;;  %v4111_v25 = vsel %vm3336_vm0, %v15485_v2, 0.0 }
 0x1b3   : > { %v7188_v35 = vrot.slane %v6421_v26, %v18226_v21  ;;  %v7193_v36 = vrot.slane %v6422_v27, %v18239_v44  ;;  %4154 = vadd.xlane.f32.xlu1 %v4153_v17  ;;  %v15521_v17 = vunpack.c.l.bf16 %v18447_v4  ;;  %v4162_v26 = vsel %vm3336_vm0, %v15518_v3, 0.0  ;;  %v16343_v3 = vld [vmem:[%s18036_s12 + $0x20] ss:$16 sps:$4 sm:$0xff]  }
 0x1b4   : > { %v5385_v39 = vpack.c.bf16 %v4911_v31, %v4910_v34  ;;  %4103 = vadd.xlane.f32.xlu0 %v4102_v18  ;;  %v3528_v40 = vpop.xlane.xlu1 %3527  ;;  %v3525_v41 = vpop.xlane.xlu0 %3524  ;;  %v15486_v27 = vunpack.c.h.bf16 %v16103_v50  ;;  %v18457_v31 = vld [vmem:[%s18038_s13 + $0x410] sm:$0xff]  }
 0x1b5   : > { %v7189_v43 = vsel %vm22167_vm10, %v7188_v35, %v7184_v33  ;;  %v4913_v45 = vmul.f32 0.015625, %v3528_v40  ;;  %v4912_v46 = vmul.f32 0.015625, %v3525_v41  ;;  %v16338_v40 = vld [vmem:[%s18036_s12 + $0x8] ss:$16 sps:$4 sm:$0xff]  }
 0x1b6   : > { %v7194_v51 = vsel %vm6948_vm11, %v7193_v36, %v7189_v43  ;;  %v6423_v55 = vunpack.c.l.b16 %v5385_v39  ;;  %v6424_v56 = vunpack.c.h.b16 %v5385_v39  ;;  %v16337_v39 = vld [vmem:[%s18036_s12] ss:$16 sps:$4 sm:$0xff]   ;;  %v4165_v43 = vsel %vm3336_vm0, %v15521_v17, 0.0  ;;  %12288 = vmatpush1.bf16.msra.mxu1 %v16338_v40 }
 0x1b7   : > { %v5386_v58 = vpack.c.bf16 %v4913_v45, %v4912_v46  ;;  %4106 = vadd.xlane.f32.xlu1 %v4105_v42  ;;  %v15489_v45 = vunpack.c.l.bf16 %v18457_v31  ;;  %11960 = vmatpush1.bf16.msra.mxu0 %v16337_v39 }
 0x1b8   : > { %v7198_v62 = vrot.slane %v6423_v55, %v18245_v49  ;;  %v7203_v63 = vrot.slane %v6424_v56, %v18255_v6  ;;  %4157 = vadd.xlane.f32.xlu0 %v4156_v47  ;;  %v3534_v0 = vpop.xlane.xlu1 %3533  ;;  %v3531_v1 = vpop.xlane.xlu0 %3530  ;;  %v15522_v55 = vunpack.c.h.bf16 %v18447_v4  ;;  %v18470_v56 = vld [vmem:[%s18038_s13 + $0x458] sm:$0xff]  }
 0x1b9   : > { %v6425_v5 = vunpack.c.l.b16 %v5386_v58  ;;  %v6426_v8 = vunpack.c.h.b16 %v5386_v58  ;;  %v4915_v9 = vmul.f32 0.015625, %v3534_v0  ;;  %v4914_v10 = vmul.f32 0.015625, %v3531_v1  ;;  %v16339_v0 = vld [vmem:[%s18036_s12 + $0x24] ss:$16 sps:$4 sm:$0xff]   ;;  %v16341_v1 = vld [vmem:[%s18036_s12 + $0x2c] ss:$16 sps:$4 sm:$0xff]  }
 0x1ba   : > { %v7199_v14 = vsel %vm6955_vm12, %v7198_v62, %v7194_v51  ;;  %11961 = vmatprep.subr.bf16.mxu0 %v16339_v0  ;;  %12289 = vmatprep.subr.bf16.mxu1 %v16341_v1  ;;  %v16355_v1 = vld [vmem:[%s18036_s12 + $0x60] ss:$16 sps:$4 sm:$0xff]  }
 0x1bb   : > { %v7208_v15 = vrot.slane %v6425_v5, %v18264_v28  ;;  %v5387_v16 = vpack.c.bf16 %v4915_v9, %v4914_v10  ;;  %4160 = vadd.xlane.f32.xlu1 %v4159_v59  ;;  %v7204_v18 = vsel %vm6962_vm13, %v7203_v63, %v7199_v14  ;;  %v7213_v20 = vrot.slane %v6426_v8, %v18267_v30  ;;  %v16344_v5 = vld [vmem:[%s18036_s12 + $0x28] ss:$16 sps:$4 sm:$0xff]  }
 0x1bc   : > { %4109 = vadd.xlane.f32.xlu0 %v4108_v61  ;;  %v3540_v54 = vpop.xlane.xlu1 %3539  ;;  %v3537_v24 = vpop.xlane.xlu0 %3536  ;;  %v4114_v63 = vsel %vm3336_vm0, %v15486_v27, 0.0  ;;  %v15525_v9 = vunpack.c.l.bf16 %v18470_v56  ;;  %v15490_v10 = vunpack.c.h.bf16 %v18457_v31  ;;  %11962 = vmatpush1.bf16.msra.mxu0 %v16343_v3  ;;  %v16345_v27 = vld [vmem:[%s18036_s12 + $0x44] ss:$16 sps:$4 sm:$0xff]   ;;  %v16347_v31 = vld [vmem:[%s18036_s12 + $0x4c] ss:$16 sps:$4 sm:$0xff]  }
 0x1bd   : > { %v6427_v33 = vunpack.c.l.b16 %v5387_v16  ;;  %v6428_v34 = vunpack.c.h.b16 %v5387_v16  ;;  %v4917_v35 = vmul.f32 0.015625, %v3540_v54  ;;  %v4916_v36 = vmul.f32 0.015625, %v3537_v24  ;;  %v18488_v54 = vld [vmem:[%s18038_s13 + $0x418] sm:$0xff]   ;;  %12290 = vmatpush1.bf16.msra.mxu1 %v16344_v5  ;;  %11963 = vmatprep.subr.bf16.mxu0 %v16345_v27  ;;  %v16359_v27 = vld [vmem:[%s18036_s12 + $0x8c] ss:$16 sps:$4 sm:$0xff]  }
 0x1be   : > { %v7209_v41 = vsel %vm6969_vm14, %v7208_v15, %v7204_v18  ;;  %v4117_v18 = vsel %vm3336_vm0, %v15489_v45, 0.0  ;;  %v4171_v39 = vsel %vm3336_vm0, %v15525_v9, 0.0  ;;  %v4120_v40 = vsel %vm3336_vm0, %v15490_v10, 0.0  ;;  %12291 = vmatprep.subr.bf16.mxu1 %v16347_v31 }
 0x1bf   : > { %v5388_v42 = vpack.c.bf16 %v4917_v35, %v4916_v36  ;;  %4112 = vadd.xlane.f32.xlu1 %v4111_v25  ;;  %v7218_v46 = vrot.slane %v6427_v33, %v18169_v7  ;;  %v7222_v47 = vrot.slane %v6428_v34, %v18181_v19  ;;  %v18473_v58 = vsel %vm6976_vm15, %v7213_v20, %v7209_v41  ;;  %v16349_v36 = vld [vmem:[%s18036_s12 + $0x40] ss:$16 sps:$4 sm:$0xff]  }
 0x1c0   : > { %4163 = vadd.xlane.f32.xlu0 %v4162_v26  ;;  %v3546_v50 = vpop.xlane.xlu1 %3545  ;;  %v3543_v51 = vpop.xlane.xlu0 %3542  ;;  %v4168_v20 = vsel %vm3336_vm0, %v15522_v55, 0.0  ;;  %11964 = vmatpush1.bf16.msra.mxu0 %v16349_v36 }
 0x1c1   : > { %v6429_v59 = vunpack.c.l.b16 %v5388_v42  ;;  %v6430_v61 = vunpack.c.h.b16 %v5388_v42  ;;  %v4919_v62 = vmul.f32 0.015625, %v3546_v50  ;;  %v4918_v2 = vmul.f32 0.015625, %v3543_v51  ;;  %v18503_v50 = vld [vmem:[%s18038_s13 + $0x460] sm:$0xff]   ;;  %12292 = vmatpush1.bf16.msra.mxu1 %v16350_v37 }
 0x1c2   : > { %v7223_v14 = vsel %vm6878_vm1, %v7222_v47, %v7218_v46  ;;  %v15493_v46 = vunpack.c.l.bf16 %v18488_v54  ;;  %v15526_v47 = vunpack.c.h.bf16 %v18470_v56 }
 0x1c3   : > { %v7227_v4 = vrot.slane %v6429_v59, %v18174_v12  ;;  %v7232_v8 = vrot.slane %v6430_v61, %v18177_v13  ;;  %4166 = vadd.xlane.f32.xlu1 %v4165_v43  ;;  %v5389_v15 = vpack.c.bf16 %v4919_v62, %v4918_v2  ;;  %v16351_v62 = vld [vmem:[%s18036_s12 + $0x64] ss:$16 sps:$4 sm:$0xff]   ;;  %v16356_v2 = vld [vmem:[%s18036_s12 + $0x68] ss:$16 sps:$4 sm:$0xff]  }
 0x1c4   : > { %4115 = vadd.xlane.f32.xlu0 %v4114_v63  ;;  %v3552_v16 = vpop.xlane.xlu1 %3551  ;;  %v3549_v17 = vpop.xlane.xlu0 %3548  ;;  %v16353_v63 = vld [vmem:[%s18036_s12 + $0x6c] ss:$16 sps:$4 sm:$0xff]   ;;  %v4123_v10 = vsel %vm3336_vm0, %v15493_v46, 0.0  ;;  %11965 = vmatprep.subr.bf16.mxu0 %v16351_v62  ;;  %v15530_v46 = vunpack.c.h.bf16 %v18503_v50 }
 0x1c5   : > { %v7228_v24 = vsel %vm6885_vm2, %v7227_v4, %v7223_v14  ;;  %v4921_v25 = vmul.f32 0.015625, %v3552_v16  ;;  %v4920_v26 = vmul.f32 0.015625, %v3549_v17  ;;  %v6431_v34 = vunpack.c.l.b16 %v5389_v15  ;;  %v18518_v17 = vld [vmem:[%s18038_s13 + $0x420] sm:$0xff]   ;;  %12293 = vmatprep.subr.bf16.mxu1 %v16353_v63  ;;  %11966 = vmatpush1.bf16.msra.mxu0 %v16355_v1 }
 0x1c6   : > { %v7233_v33 = vsel %vm22199_vm3, %v7232_v8, %v7228_v24  ;;  %v6432_v35 = vunpack.c.h.b16 %v5389_v15  ;;  %v4174_v14 = vsel %vm3336_vm0, %v15526_v47, 0.0  ;;  %v15529_v15 = vunpack.c.l.bf16 %v18503_v50  ;;  %12294 = vmatpush1.bf16.msra.mxu1 %v16356_v2  ;;  %v18534_v47 = vld [vmem:[%s18038_s13 + $0x468] sm:$0xff]   ;;  %v16368_v1 = vld [vmem:[%s18036_s12 + $0xa8] ss:$16 sps:$4 sm:$0xff]  }
 0x1c7   : > { %v5390_v38 = vpack.c.bf16 %v4921_v25, %v4920_v26  ;;  %4118 = vadd.xlane.f32.xlu1 %v4117_v18  ;;  %v7237_v41 = vrot.slane %v6431_v34, %v18185_v22  ;;  %v15494_v16 = vunpack.c.h.bf16 %v18488_v54  ;;  %v16357_v26 = vld [vmem:[%s18036_s12 + $0x84] ss:$16 sps:$4 sm:$0xff]   ;;  %v16361_v34 = vld [vmem:[%s18036_s12 + $0x80] ss:$16 sps:$4 sm:$0xff]   ;;  %v15497_v37 = vunpack.c.l.bf16 %v18518_v17  ;;  %12295 = vmatprep.subr.bf16.mxu1 %v16359_v27 }
 0x1c8   : > { %v7242_v42 = vrot.slane %v6432_v35, %v18188_v23  ;;  %4169 = vadd.xlane.f32.xlu0 %v4168_v20  ;;  %v3558_v43 = vpop.xlane.xlu1 %3557  ;;  %v3555_v45 = vpop.xlane.xlu0 %3554  ;;  %v16362_v35 = vld [vmem:[%s18036_s12 + $0x88] ss:$16 sps:$4 sm:$0xff]   ;;  %11967 = vmatprep.subr.bf16.mxu0 %v16357_v26  ;;  %v16373_v27 = vld [vmem:[%s18036_s12 + $0xc0] ss:$16 sps:$4 sm:$0xff]  }
 0x1c9   : > { %v6433_v51 = vunpack.c.l.b16 %v5390_v38  ;;  %v6434_v55 = vunpack.c.h.b16 %v5390_v38  ;;  %v4923_v59 = vmul.f32 0.015625, %v3558_v43  ;;  %v4922_v61 = vmul.f32 0.015625, %v3555_v45  ;;  %11968 = vmatpush1.bf16.msra.mxu0 %v16361_v34 }
 0x1ca   : > { %v7238_v0 = vsel %vm22185_vm4, %v7237_v41, %v7233_v33  ;;  %v4126_v41 = vsel %vm3336_vm0, %v15494_v16, 0.0  ;;  %12296 = vmatpush1.bf16.msra.mxu1 %v16362_v35  ;;  %v4129_v2 = vsel %vm3336_vm0, %v15497_v37, 0.0  ;;  %v16369_v16 = vld [vmem:[%s18036_s12 + $0xc4] ss:$16 sps:$4 sm:$0xff]  }
 0x1cb   : > { %v7243_v3 = vsel %vm22184_vm5, %v7242_v42, %v7238_v0  ;;  %v7247_v56 = vrot.slane %v6433_v51, %v18194_v29  ;;  %v7252_v5 = vrot.slane %v6434_v55, %v18197_v32  ;;  %v5391_v4 = vpack.c.bf16 %v4923_v59, %v4922_v61  ;;  %4172 = vadd.xlane.f32.xlu1 %v4171_v39  ;;  %v16363_v51 = vld [vmem:[%s18036_s12 + $0xa4] ss:$16 sps:$4 sm:$0xff]   ;;  %v16365_v55 = vld [vmem:[%s18036_s12 + $0xac] ss:$16 sps:$4 sm:$0xff]   ;;  %v16367_v0 = vld [vmem:[%s18036_s12 + $0xa0] ss:$16 sps:$4 sm:$0xff]  }
 0x1cc   : > { %4121 = vadd.xlane.f32.xlu0 %v4120_v40  ;;  %v3564_v8 = vpop.xlane.xlu1 %3563  ;;  %v3561_v9 = vpop.xlane.xlu0 %3560  ;;  %v4177_v40 = vsel %vm3336_vm0, %v15529_v15, 0.0  ;;  %11969 = vmatprep.subr.bf16.mxu0 %v16363_v51  ;;  %v15498_v15 = vunpack.c.h.bf16 %v18518_v17 }
 0x1cd   : > { %v7248_v18 = vsel %vm22183_vm6, %v7247_v56, %v7243_v3  ;;  %v6435_v20 = vunpack.c.l.b16 %v5391_v4  ;;  %v6436_v24 = vunpack.c.h.b16 %v5391_v4  ;;  %v4925_v25 = vmul.f32 0.015625, %v3564_v8  ;;  %v18546_v8 = vld [vmem:[%s18038_s13 + $0x428] sm:$0xff]   ;;  %12297 = vmatprep.subr.bf16.mxu1 %v16365_v55  ;;  %11970 = vmatpush1.bf16.msra.mxu0 %v16367_v0 }
 0x1ce   : > { %v7253_v31 = vsel %vm22168_vm7, %v7252_v5, %v7248_v18  ;;  %v4924_v33 = vmul.f32 0.015625, %v3561_v9  ;;  %v15533_v4 = vunpack.c.l.bf16 %v18534_v47  ;;  %v16371_v18 = vld [vmem:[%s18036_s12 + $0xcc] ss:$16 sps:$4 sm:$0xff]   ;;  %12298 = vmatpush1.bf16.msra.mxu1 %v16368_v1  ;;  %v15501_v34 = vunpack.c.l.bf16 %v18546_v8  ;;  %11971 = vmatprep.subr.bf16.mxu0 %v16369_v16 }
 0x1cf   : > { %v7257_v54 = vrot.slane %v6435_v20, %v18208_v52  ;;  %v7262_v36 = vrot.slane %v6436_v24, %v18211_v53  ;;  %4124 = vadd.xlane.f32.xlu1 %v4123_v10  ;;  %12299 = vmatprep.subr.bf16.mxu1 %v16371_v18 }
 0x1d0   : > { %v5392_v38 = vpack.c.bf16 %v4925_v25, %v4924_v33  ;;  %4175 = vadd.xlane.f32.xlu0 %v4174_v14  ;;  %v3570_v39 = vpop.xlane.xlu1 %3569  ;;  %v3567_v45 = vpop.xlane.xlu0 %3566  ;;  %v4180_v14 = vsel %vm3336_vm0, %v15530_v46, 0.0  ;;  %v4183_v37 = vsel %vm3336_vm0, %v15533_v4, 0.0  ;;  %v4135_v0 = vsel %vm3336_vm0, %v15501_v34, 0.0 }
 0x1d1   : > { %v7258_v42 = vsel %vm6927_vm8, %v7257_v54, %v7253_v31  ;;  %v4927_v43 = vmul.f32 0.015625, %v3570_v39  ;;  %v4926_v63 = vmul.f32 0.015625, %v3567_v45  ;;  %v16374_v31 = vld [vmem:[%s18036_s12 + $0xc8] ss:$16 sps:$4 sm:$0xff]   ;;  %11972 = vmatpush1.bf16.msra.mxu0 %v16373_v27  ;;  %v16377_v45 = vld [vmem:[%s18036_s12 + $0xec] ss:$16 sps:$4 sm:$0xff]  }
 0x1d2   : > { %v7263_v59 = vsel %vm6934_vm9, %v7262_v36, %v7258_v42  ;;  %v6437_v61 = vunpack.c.l.b16 %v5392_v38  ;;  %v6438_v62 = vunpack.c.h.b16 %v5392_v38  ;;  %v18561_v38 = vld [vmem:[%s18038_s13 + $0x4b0] sm:$0xff]   ;;  %v15534_v42 = vunpack.c.h.bf16 %v18534_v47  ;;  %12300 = vmatpush1.bf16.msra.mxu1 %v16374_v31 }
 0x1d3   : > { %4178 = vadd.xlane.f32.xlu1 %v4177_v40  ;;  %v5393_v56 = vpack.c.bf16 %v4927_v43, %v4926_v63  ;;  %v16375_v43 = vld [vmem:[%s18036_s12 + $0xe4] ss:$16 sps:$4 sm:$0xff]   ;;  %v15569_v47 = vunpack.c.l.bf16 %v18561_v38  ;;  %12301 = vmatprep.subr.bf16.mxu1 %v16377_v45 }
 0x1d4   : > { %v7267_v50 = vrot.slane %v6437_v61, %v18226_v21  ;;  %v7272_v3 = vrot.slane %v6438_v62, %v18239_v44  ;;  %4127 = vadd.xlane.f32.xlu0 %v4126_v41  ;;  %v3576_v5 = vpop.xlane.xlu1 %3575  ;;  %v3573_v10 = vpop.xlane.xlu0 %3572  ;;  %v4132_v41 = vsel %vm3336_vm0, %v15498_v15, 0.0  ;;  %v16379_v61 = vld [vmem:[%s18036_s12 + $0xe0] ss:$16 sps:$4 sm:$0xff]   ;;  %v16380_v62 = vld [vmem:[%s18036_s12 + $0xe8] ss:$16 sps:$4 sm:$0xff]   ;;  %11973 = vmatprep.subr.bf16.mxu0 %v16375_v43 }
 0x1d5   : > { %v4929_v9 = vmul.f32 0.015625, %v3576_v5  ;;  %v6439_v24 = vunpack.c.l.b16 %v5393_v56  ;;  %v6440_v25 = vunpack.c.h.b16 %v5393_v56  ;;  %v4928_v26 = vmul.f32 0.015625, %v3573_v10  ;;  %v18577_v5 = vld [vmem:[%s18038_s13 + $0x470] sm:$0xff]   ;;  %11974 = vmatpush1.bf16.msra.mxu0 %v16379_v61 }
 0x1d6   : > { %v7268_v20 = vsel %vm22167_vm10, %v7267_v50, %v7263_v59  ;;  %v15502_v56 = vunpack.c.h.bf16 %v18546_v8  ;;  %v4186_v10 = vsel %vm3336_vm0, %v15534_v42, 0.0  ;;  %v16383_v15 = vld [vmem:[%s18036_s12 + $0x10c] ss:$16 sps:$4 sm:$0xff]   ;;  %12302 = vmatpush1.bf16.msra.mxu1 %v16380_v62  ;;  %v15537_v8 = vunpack.c.l.bf16 %v18577_v5 }
 0x1d7   : > { %v7273_v33 = vsel %vm6948_vm11, %v7272_v3, %v7268_v20  ;;  %4130 = vadd.xlane.f32.xlu1 %v4129_v2  ;;  %v7277_v17 = vrot.slane %v6439_v24, %v18245_v49  ;;  %v7282_v35 = vrot.slane %v6440_v25, %v18255_v6  ;;  %v5394_v54 = vpack.c.bf16 %v4929_v9, %v4928_v26  ;;  %v16385_v24 = vld [vmem:[%s18036_s12 + $0x100] ss:$16 sps:$4 sm:$0xff]   ;;  %v16386_v25 = vld [vmem:[%s18036_s12 + $0x108] ss:$16 sps:$4 sm:$0xff]   ;;  %v16389_v42 = vld [vmem:[%s18036_s12 + $0x12c] ss:$16 sps:$4 sm:$0xff]  }
 0x1d8   : > { %4181 = vadd.xlane.f32.xlu0 %v4180_v14  ;;  %v3582_v36 = vpop.xlane.xlu1 %3581  ;;  %v16381_v14 = vld [vmem:[%s18036_s12 + $0x104] ss:$16 sps:$4 sm:$0xff]   ;;  %v4237_v34 = vsel %vm3336_vm0, %v15569_v47, 0.0  ;;  %12303 = vmatprep.subr.bf16.mxu1 %v16383_v15 }
 0x1d9   : > { %v4931_v39 = vmul.f32 0.015625, %v3582_v36  ;;  %v3579_v40 = vpop.xlane.xlu0 %3578  ;;  %v7278_v46 = vsel %vm6955_vm12, %v7277_v17, %v7273_v33  ;;  %v6441_v51 = vunpack.c.l.b16 %v5394_v54  ;;  %v6442_v55 = vunpack.c.h.b16 %v5394_v54  ;;  %11975 = vmatprep.subr.bf16.mxu0 %v16381_v14  ;;  %v18606_v47 = vld [vmem:[%s18038_s13 + $0x478] sm:$0xff]  }
 0x1da   : > { %v4930_v59 = vmul.f32 0.015625, %v3579_v40  ;;  %v7283_v63 = vsel %vm6962_vm13, %v7282_v35, %v7278_v46  ;;  %v4138_v17 = vsel %vm3336_vm0, %v15502_v56, 0.0  ;;  %v18595_v40 = vld [vmem:[%s18038_s13 + $0x4b8] sm:$0xff]   ;;  %11976 = vmatpush1.bf16.msra.mxu0 %v16385_v24  ;;  %12304 = vmatpush1.bf16.msra.mxu1 %v16386_v25  ;;  %v15538_v56 = vunpack.c.h.bf16 %v18577_v5 }
 0x1db   : > { %4184 = vadd.xlane.f32.xlu1 %v4183_v37  ;;  %v7287_v1 = vrot.slane %v6441_v51, %v18264_v28  ;;  %v7292_v2 = vrot.slane %v6442_v55, %v18267_v30  ;;  %v16391_v51 = vld [vmem:[%s18036_s12 + $0x120] ss:$16 sps:$4 sm:$0xff]   ;;  %v16392_v55 = vld [vmem:[%s18036_s12 + $0x128] ss:$16 sps:$4 sm:$0xff]   ;;  %12305 = vmatprep.subr.bf16.mxu1 %v16389_v42  ;;  %v15541_v25 = vunpack.c.l.bf16 %v18606_v47 }
 0x1dc   : > { %v5395_v50 = vpack.c.bf16 %v4931_v39, %v4930_v59  ;;  %4133 = vadd.xlane.f32.xlu0 %v4132_v41  ;;  %v3588_v3 = vpop.xlane.xlu1 %3587  ;;  %v15570_v39 = vunpack.c.h.bf16 %v18561_v38  ;;  %v16387_v41 = vld [vmem:[%s18036_s12 + $0x124] ss:$16 sps:$4 sm:$0xff]   ;;  %v4189_v59 = vsel %vm3336_vm0, %v15537_v8, 0.0 }
 0x1dd   : > { %v4933_v4 = vmul.f32 0.015625, %v3588_v3  ;;  %v3585_v9 = vpop.xlane.xlu0 %3584  ;;  %v7288_v26 = vsel %vm6969_vm14, %v7287_v1, %v7283_v63  ;;  %11977 = vmatprep.subr.bf16.mxu0 %v16387_v41 }
 0x1de   : > { %v6443_v16 = vunpack.c.l.b16 %v5395_v50  ;;  %v6444_v18 = vunpack.c.h.b16 %v5395_v50  ;;  %v4932_v20 = vmul.f32 0.015625, %v3585_v9  ;;  %v18587_v27 = vsel %vm6976_vm15, %v7292_v2, %v7288_v26  ;;  %11978 = vmatpush1.bf16.msra.mxu0 %v16391_v51  ;;  %v16395_v9 = vld [vmem:[%s18036_s12 + $0x14c] ss:$16 sps:$4 sm:$0xff]   ;;  %12306 = vmatpush1.bf16.msra.mxu1 %v16392_v55  ;;  %v16404_v51 = vld [vmem:[%s18036_s12 + $0x168] ss:$16 sps:$4 sm:$0xff]  }
 0x1df   : > { %4136 = vadd.xlane.f32.xlu1 %v4135_v0  ;;  %v15573_v0 = vunpack.c.l.bf16 %v18595_v40  ;;  %v4240_v3 = vsel %vm3336_vm0, %v15570_v39, 0.0  ;;  %12307 = vmatprep.subr.bf16.mxu1 %v16395_v9  ;;  %v16401_v39 = vld [vmem:[%s18036_s12 + $0x16c] ss:$16 sps:$4 sm:$0xff]  }
 0x1e0   : > { %v5396_v31 = vpack.c.bf16 %v4933_v4, %v4932_v20  ;;  %4187 = vadd.xlane.f32.xlu0 %v4186_v10  ;;  %v3594_v33 = vpop.xlane.xlu1 %3593  ;;  %v7297_v35 = vrot.slane %v6443_v16, %v18169_v7  ;;  %v7301_v54 = vrot.slane %v6444_v18, %v18181_v19  ;;  %v16393_v4 = vld [vmem:[%s18036_s12 + $0x144] ss:$16 sps:$4 sm:$0xff]   ;;  %v16397_v18 = vld [vmem:[%s18036_s12 + $0x140] ss:$16 sps:$4 sm:$0xff]   ;;  %v16398_v20 = vld [vmem:[%s18036_s12 + $0x148] ss:$16 sps:$4 sm:$0xff]  }
 0x1e1   : > { %v4935_v36 = vmul.f32 0.015625, %v3594_v33  ;;  %v3591_v37 = vpop.xlane.xlu0 %3590  ;;  %11979 = vmatprep.subr.bf16.mxu0 %v16393_v4  ;;  %v4243_v33 = vsel %vm3336_vm0, %v15573_v0, 0.0  ;;  %v15542_v0 = vunpack.c.h.bf16 %v18606_v47  ;;  %v16407_v4 = vld [vmem:[%s18036_s12 + $0x18c] ss:$16 sps:$4 sm:$0xff]  }
 0x1e2   : > { %v6445_v43 = vunpack.c.l.b16 %v5396_v31  ;;  %v6446_v45 = vunpack.c.h.b16 %v5396_v31  ;;  %v4934_v46 = vmul.f32 0.015625, %v3591_v37  ;;  %v7302_v1 = vsel %vm6878_vm1, %v7301_v54, %v7297_v35  ;;  %11980 = vmatpush1.bf16.msra.mxu0 %v16397_v18  ;;  %v16399_v37 = vld [vmem:[%s18036_s12 + $0x164] ss:$16 sps:$4 sm:$0xff]   ;;  %12308 = vmatpush1.bf16.msra.mxu1 %v16398_v20  ;;  %v16410_v18 = vld [vmem:[%s18036_s12 + $0x188] ss:$16 sps:$4 sm:$0xff]  }
 0x1e3   : > { %4238 = vadd.xlane.f32.xlu1 %v4237_v34  ;;  %v18622_v34 = vld [vmem:[%s18038_s13 + $0x4c0] sm:$0xff]   ;;  %v4192_v54 = vsel %vm3336_vm0, %v15538_v56, 0.0  ;;  %11981 = vmatprep.subr.bf16.mxu0 %v16399_v37  ;;  %v16405_v56 = vld [vmem:[%s18036_s12 + $0x184] ss:$16 sps:$4 sm:$0xff]  }
 0x1e4   : > { %v7306_v38 = vrot.slane %v6445_v43, %v18174_v12  ;;  %v7311_v61 = vrot.slane %v6446_v45, %v18177_v13  ;;  %v5397_v62 = vpack.c.bf16 %v4935_v36, %v4934_v46  ;;  %4139 = vadd.xlane.f32.xlu0 %v4138_v17  ;;  %v3600_v63 = vpop.xlane.xlu1 %3599  ;;  %v15574_v36 = vunpack.c.h.bf16 %v18595_v40  ;;  %v16403_v46 = vld [vmem:[%s18036_s12 + $0x160] ss:$16 sps:$4 sm:$0xff]   ;;  %12309 = vmatprep.subr.bf16.mxu1 %v16401_v39  ;;  %v16413_v37 = vld [vmem:[%s18036_s12 + $0x1ac] ss:$16 sps:$4 sm:$0xff]  }
 0x1e5   : > { %v4937_v2 = vmul.f32 0.015625, %v3600_v63  ;;  %v3597_v50 = vpop.xlane.xlu0 %3596  ;;  %v15577_v40 = vunpack.c.l.bf16 %v18622_v34 }
 0x1e6   : > { %v7307_v10 = vsel %vm6885_vm2, %v7306_v38, %v7302_v1  ;;  %v6447_v14 = vunpack.c.l.b16 %v5397_v62  ;;  %v6448_v15 = vunpack.c.h.b16 %v5397_v62  ;;  %v4936_v16 = vmul.f32 0.015625, %v3597_v50  ;;  %v18638_v1 = vld [vmem:[%s18038_s13 + $0x480] sm:$0xff]   ;;  %11982 = vmatpush1.bf16.msra.mxu0 %v16403_v46  ;;  %12310 = vmatpush1.bf16.msra.mxu1 %v16404_v51 }
 0x1e7   : > { %v7312_v24 = vsel %vm22199_vm3, %v7311_v61, %v7307_v10  ;;  %4190 = vadd.xlane.f32.xlu1 %v4189_v59  ;;  %v4195_v59 = vsel %vm3336_vm0, %v15541_v25, 0.0  ;;  %v4249_v20 = vsel %vm3336_vm0, %v15577_v40, 0.0  ;;  %11983 = vmatprep.subr.bf16.mxu0 %v16405_v56  ;;  %v16416_v46 = vld [vmem:[%s18036_s12 + $0x1a8] ss:$16 sps:$4 sm:$0xff]   ;;  %v16419_v56 = vld [vmem:[%s18036_s12 + $0x1cc] ss:$16 sps:$4 sm:$0xff]  }
 0x1e8   : > { %v7316_v5 = vrot.slane %v6447_v14, %v18185_v22  ;;  %v7321_v26 = vrot.slane %v6448_v15, %v18188_v23  ;;  %v5398_v8 = vpack.c.bf16 %v4937_v2, %v4936_v16  ;;  %4241 = vadd.xlane.f32.xlu0 %v4240_v3  ;;  %v3606_v31 = vpop.xlane.xlu1 %3605  ;;  %v4246_v3 = vsel %vm3336_vm0, %v15574_v36, 0.0  ;;  %v16409_v16 = vld [vmem:[%s18036_s12 + $0x180] ss:$16 sps:$4 sm:$0xff]   ;;  %12311 = vmatprep.subr.bf16.mxu1 %v16407_v4  ;;  %v16411_v36 = vld [vmem:[%s18036_s12 + $0x1a4] ss:$16 sps:$4 sm:$0xff]  }
 0x1e9   : > { %v4939_v17 = vmul.f32 0.015625, %v3606_v31  ;;  %v3603_v35 = vpop.xlane.xlu0 %3602  ;;  %v4198_v31 = vsel %vm3336_vm0, %v15542_v0, 0.0 }
 0x1ea   : > { %v7317_v41 = vsel %vm22185_vm4, %v7316_v5, %v7312_v24  ;;  %v6449_v42 = vunpack.c.l.b16 %v5398_v8  ;;  %v6450_v43 = vunpack.c.h.b16 %v5398_v8  ;;  %v4938_v45 = vmul.f32 0.015625, %v3603_v35  ;;  %11984 = vmatpush1.bf16.msra.mxu0 %v16409_v16  ;;  %12312 = vmatpush1.bf16.msra.mxu1 %v16410_v18  ;;  %v16422_v16 = vld [vmem:[%s18036_s12 + $0x1c8] ss:$16 sps:$4 sm:$0xff]  }
 0x1eb   : > { %v7322_v55 = vsel %vm22184_vm5, %v7321_v26, %v7317_v41  ;;  %4244 = vadd.xlane.f32.xlu1 %v4243_v33  ;;  %v15545_v24 = vunpack.c.l.bf16 %v18638_v1  ;;  %v15578_v35 = vunpack.c.h.bf16 %v18622_v34  ;;  %11985 = vmatprep.subr.bf16.mxu0 %v16411_v36  ;;  %v16425_v36 = vld [vmem:[%s18036_s12 + $0x1ec] ss:$16 sps:$4 sm:$0xff]  }
 0x1ec   : > { %v7326_v38 = vrot.slane %v6449_v42, %v18194_v29  ;;  %v7331_v61 = vrot.slane %v6450_v43, %v18197_v32  ;;  %v5399_v62 = vpack.c.bf16 %v4939_v17, %v4938_v45  ;;  %4193 = vadd.xlane.f32.xlu0 %v4192_v54  ;;  %v3612_v63 = vpop.xlane.xlu1 %3611  ;;  %v18654_v54 = vld [vmem:[%s18038_s13 + $0x4c8] sm:$0xff]   ;;  %12313 = vmatprep.subr.bf16.mxu1 %v16413_v37 }
 0x1ed   : > { %v4941_v2 = vmul.f32 0.015625, %v3612_v63  ;;  %v3609_v50 = vpop.xlane.xlu0 %3608  ;;  %v16415_v45 = vld [vmem:[%s18036_s12 + $0x1a0] ss:$16 sps:$4 sm:$0xff]   ;;  %v4201_v34 = vsel %vm3336_vm0, %v15545_v24, 0.0 }
 0x1ee   : > { %v7327_v9 = vsel %vm22183_vm6, %v7326_v38, %v7322_v55  ;;  %v6451_v10 = vunpack.c.l.b16 %v5399_v62  ;;  %v6452_v14 = vunpack.c.h.b16 %v5399_v62  ;;  %v4940_v15 = vmul.f32 0.015625, %v3609_v50  ;;  %v18667_v62 = vld [vmem:[%s18038_s13 + $0x488] sm:$0xff]   ;;  %11986 = vmatpush1.bf16.msra.mxu0 %v16415_v45  ;;  %12314 = vmatpush1.bf16.msra.mxu1 %v16416_v46  ;;  %v16428_v45 = vld [vmem:[%s18036_s12 + $0x1e8] ss:$16 sps:$4 sm:$0xff]  }
 0x1ef   : > { %v7332_v47 = vsel %vm22168_vm7, %v7331_v61, %v7327_v9  ;;  %4196 = vadd.xlane.f32.xlu1 %v4195_v59  ;;  %v15581_v61 = vunpack.c.l.bf16 %v18654_v54  ;;  %v15546_v50 = vunpack.c.h.bf16 %v18638_v1  ;;  %12315 = vmatprep.subr.bf16.mxu1 %v16419_v56 }
 0x1f0   : > { %v7336_v25 = vrot.slane %v6451_v10, %v18208_v52  ;;  %v7341_v5 = vrot.slane %v6452_v14, %v18211_v53  ;;  %v5400_v26 = vpack.c.bf16 %v4941_v2, %v4940_v15  ;;  %4247 = vadd.xlane.f32.xlu0 %v4246_v3  ;;  %v3618_v8 = vpop.xlane.xlu1 %3617  ;;  %v4252_v2 = vsel %vm3336_vm0, %v15578_v35, 0.0  ;;  %v16417_v3 = vld [vmem:[%s18036_s12 + $0x1c4] ss:$16 sps:$4 sm:$0xff]   ;;  %v16421_v15 = vld [vmem:[%s18036_s12 + $0x1c0] ss:$16 sps:$4 sm:$0xff]  }
 0x1f1   : > { %v4943_v33 = vmul.f32 0.015625, %v3618_v8  ;;  %v3615_v17 = vpop.xlane.xlu0 %3614  ;;  %11987 = vmatprep.subr.bf16.mxu0 %v16417_v3  ;;  %v16423_v35 = vld [vmem:[%s18036_s12 + $0x1e4] ss:$16 sps:$4 sm:$0xff]  }
 0x1f2   : > { %v7337_v39 = vsel %vm6927_vm8, %v7336_v25, %v7332_v47  ;;  %v6453_v41 = vunpack.c.l.b16 %v5400_v26  ;;  %v6454_v42 = vunpack.c.h.b16 %v5400_v26  ;;  %v4942_v43 = vmul.f32 0.015625, %v3615_v17  ;;  %v18682_v26 = vld [vmem:[%s18038_s13 + $0x4d0] sm:$0xff]   ;;  %11988 = vmatpush1.bf16.msra.mxu0 %v16421_v15  ;;  %12316 = vmatpush1.bf16.msra.mxu1 %v16422_v16 }
 0x1f3   : > { %v7342_v51 = vsel %vm6934_vm9, %v7341_v5, %v7337_v39  ;;  %4250 = vadd.xlane.f32.xlu1 %v4249_v20  ;;  %v15549_v47 = vunpack.c.l.bf16 %v18667_v62  ;;  %v4255_v5 = vsel %vm3336_vm0, %v15581_v61, 0.0  ;;  %v15582_v17 = vunpack.c.h.bf16 %v18654_v54  ;;  %11989 = vmatprep.subr.bf16.mxu0 %v16423_v35  ;;  %v16120_v61 = vld [vmem:[%s18038_s13 + $0x490] sm:$0xff]  }
 0x1f4   : > { %v7346_v55 = vrot.slane %v6453_v41, %v18226_v21  ;;  %v7351_v59 = vrot.slane %v6454_v42, %v18239_v44  ;;  %v5401_v40 = vpack.c.bf16 %v4943_v33, %v4942_v43  ;;  %4199 = vadd.xlane.f32.xlu0 %v4198_v31  ;;  %v3624_v38 = vpop.xlane.xlu1 %3623  ;;  %v4204_v33 = vsel %vm3336_vm0, %v15546_v50, 0.0  ;;  %v16427_v43 = vld [vmem:[%s18036_s12 + $0x1e0] ss:$16 sps:$4 sm:$0xff]   ;;  %12317 = vmatprep.subr.bf16.mxu1 %v16425_v36 }
 0x1f5   : > { %v4945_v63 = vmul.f32 0.015625, %v3624_v38  ;;  %v3621_v0 = vpop.xlane.xlu0 %3620  ;;  %v4207_v46 = vsel %vm3336_vm0, %v15549_v47, 0.0  ;;  %v15550_v38 = vunpack.c.h.bf16 %v18667_v62 }
 0x1f6   : > { %v7347_v4 = vsel %vm22167_vm10, %v7346_v55, %v7342_v51  ;;  %v6455_v9 = vunpack.c.l.b16 %v5401_v40  ;;  %v6456_v10 = vunpack.c.h.b16 %v5401_v40  ;;  %v4944_v14 = vmul.f32 0.015625, %v3621_v0  ;;  %11990 = vmatpush1.bf16.msra.mxu0 %v16427_v43  ;;  %12318 = vmatpush1.bf16.msra.mxu1 %v16428_v45  ;;  %v16121_v43 = vld [vmem:[%s18038_s13 + $0x498] sm:$0xff]  }
 0x1f7   : > { %v7352_v18 = vsel %vm6948_vm11, %v7351_v59, %v7347_v4  ;;  %4202 = vadd.xlane.f32.xlu1 %v4201_v34  ;;  %v15585_v51 = vunpack.c.l.bf16 %v18682_v26  ;;  %v4210_v47 = vsel %vm3336_vm0, %v15550_v38, 0.0 }
 0x1f8   : > { %v7356_v1 = vrot.slane %v6455_v9, %v18245_v49  ;;  %v7361_v20 = vrot.slane %v6456_v10, %v18255_v6  ;;  %v5402_v24 = vpack.c.bf16 %v4945_v63, %v4944_v14  ;;  %4253 = vadd.xlane.f32.xlu0 %v4252_v2  ;;  %v3630_v25 = vpop.xlane.xlu1 %3629  ;;  %v4258_v2 = vsel %vm3336_vm0, %v15582_v17, 0.0  ;;  %v16431_v10 = vld [vmem:[%s18036_s12 + $0x204] ss:$16 sps:$4 sm:$0xff]   ;;  %v16434_v14 = vld [vmem:[%s18036_s12 + $0x20c] ss:$16 sps:$4 sm:$0xff]  }
 0x1f9   : > { %v4947_v8 = vmul.f32 0.015625, %v3630_v25  ;;  %v3627_v31 = vpop.xlane.xlu0 %3626  ;;  %v15553_v9 = vunpack.c.l.bf16 %v16120_v61  ;;  %12000 = vmatprep.subr.bf16.mxu0 %v16431_v10  ;;  %12328 = vmatprep.subr.bf16.mxu1 %v16434_v14  ;;  %v16130_v14 = vld [vmem:[%s18038_s13 + $0x4e0] sm:$0xff]  }
 0x1fa   : > { %v7357_v37 = vsel %vm6955_vm12, %v7356_v1, %v7352_v18  ;;  %v6457_v39 = vunpack.c.l.b16 %v5402_v24  ;;  %v6458_v41 = vunpack.c.h.b16 %v5402_v24  ;;  %v4946_v42 = vmul.f32 0.015625, %v3627_v31 }
 0x1fb   : > { %4256 = vadd.xlane.f32.xlu1 %v4255_v5  ;;  %v7362_v54 = vsel %vm6962_vm13, %v7361_v20, %v7357_v37  ;;  %v4261_v18 = vsel %vm3336_vm0, %v15585_v51, 0.0  ;;  %v15586_v5 = vunpack.c.h.bf16 %v18682_v26  ;;  %v4213_v35 = vsel %vm3336_vm0, %v15553_v9, 0.0 }
 0x1fc   : > { %v7366_v34 = vrot.slane %v6457_v39, %v18264_v28  ;;  %v7371_v55 = vrot.slane %v6458_v41, %v18267_v30  ;;  %v5403_v59 = vpack.c.bf16 %v4947_v8, %v4946_v42  ;;  %4205 = vadd.xlane.f32.xlu0 %v4204_v33  ;;  %v3636_v40 = vpop.xlane.xlu1 %3635  ;;  %v16129_v8 = vld [vmem:[%s18038_s13 + $0x4d8] sm:$0xff]  }
 0x1fd   : > { %v4949_v63 = vmul.f32 0.015625, %v3636_v40  ;;  %v3633_v0 = vpop.xlane.xlu0 %3632  ;;  %v15589_v42 = vunpack.c.l.bf16 %v16129_v8  ;;  %v4264_v51 = vsel %vm3336_vm0, %v15586_v5, 0.0  ;;  %v15590_v10 = vunpack.c.h.bf16 %v16129_v8  ;;  %v16122_v8 = vld [vmem:[%s18038_s13 + $0x4a0] sm:$0xff]  }
 0x1fe   : > { %v6459_v50 = vunpack.c.l.b16 %v5403_v59  ;;  %v6460_v3 = vunpack.c.h.b16 %v5403_v59  ;;  %v4948_v56 = vmul.f32 0.015625, %v3633_v0  ;;  %v7367_v4 = vsel %vm6969_vm14, %v7366_v34, %v7362_v54 }
 0x1ff   : > { %4208 = vadd.xlane.f32.xlu1 %v4207_v46  ;;  %v18703_v62 = vsel %vm6976_vm15, %v7371_v55, %v7367_v4  ;;  %v15554_v54 = vunpack.c.h.bf16 %v16120_v61 }
 0x200   : > { %v5404_v15 = vpack.c.bf16 %v4949_v63, %v4948_v56  ;;  %4259 = vadd.xlane.f32.xlu0 %v4258_v2  ;;  %v3642_v16 = vpop.xlane.xlu1 %3641  ;;  %v7376_v1 = vrot.slane %v6459_v50, %v18169_v7  ;;  %v7380_v20 = vrot.slane %v6460_v3, %v18181_v19  ;;  %v15557_v63 = vunpack.c.l.bf16 %v16121_v43 }
 0x201   : > { %v4951_v24 = vmul.f32 0.015625, %v3642_v16  ;;  %v3639_v25 = vpop.xlane.xlu0 %3638  ;;  %v4267_v56 = vsel %vm3336_vm0, %v15589_v42, 0.0  ;;  %v4216_v9 = vsel %vm3336_vm0, %v15554_v54, 0.0 }
 0x202   : > { %v6461_v31 = vunpack.c.l.b16 %v5404_v15  ;;  %v6462_v33 = vunpack.c.h.b16 %v5404_v15  ;;  %v4950_v17 = vmul.f32 0.015625, %v3639_v25  ;;  %v7381_v26 = vsel %vm6878_vm1, %v7380_v20, %v7376_v1 }
 0x203   : > { %4262 = vadd.xlane.f32.xlu1 %v4261_v18  ;;  %v4219_v20 = vsel %vm3336_vm0, %v15557_v63, 0.0  ;;  %v15594_v63 = vunpack.c.h.bf16 %v16130_v14 }
 0x204   : > { %v7385_v36 = vrot.slane %v6461_v31, %v18174_v12  ;;  %v7390_v37 = vrot.slane %v6462_v33, %v18177_v13  ;;  %v5405_v39 = vpack.c.bf16 %v4951_v24, %v4950_v17  ;;  %4211 = vadd.xlane.f32.xlu0 %v4210_v47  ;;  %v3648_v41 = vpop.xlane.xlu1 %3647  ;;  %v15593_v33 = vunpack.c.l.bf16 %v16130_v14  ;;  %v16123_v14 = vld [vmem:[%s18038_s13 + $0x4a8] sm:$0xff]  }
 0x205   : > { %v4953_v45 = vmul.f32 0.015625, %v3648_v41  ;;  %v3645_v46 = vpop.xlane.xlu0 %3644 }
 0x206   : > { %v7386_v34 = vsel %vm6885_vm2, %v7385_v36, %v7381_v26  ;;  %v6463_v55 = vunpack.c.l.b16 %v5405_v39  ;;  %v6464_v59 = vunpack.c.h.b16 %v5405_v39  ;;  %v4952_v40 = vmul.f32 0.015625, %v3645_v46 }
 0x207   : > { %v7391_v38 = vsel %vm22199_vm3, %v7390_v37, %v7386_v34  ;;  %4214 = vadd.xlane.f32.xlu1 %v4213_v35  ;;  %v4270_v36 = vsel %vm3336_vm0, %v15590_v10, 0.0  ;;  %v15558_v37 = vunpack.c.h.bf16 %v16121_v43  ;;  %v15561_v46 = vunpack.c.l.bf16 %v16122_v8 }
 0x208   : > { %v7395_v0 = vrot.slane %v6463_v55, %v18185_v22  ;;  %v7400_v2 = vrot.slane %v6464_v59, %v18188_v23  ;;  %v5406_v50 = vpack.c.bf16 %v4953_v45, %v4952_v40  ;;  %4265 = vadd.xlane.f32.xlu0 %v4264_v51  ;;  %v3654_v3 = vpop.xlane.xlu1 %3653  ;;  %v4273_v59 = vsel %vm3336_vm0, %v15593_v33, 0.0 }
 0x209   : > { %v4955_v61 = vmul.f32 0.015625, %v3654_v3  ;;  %v3651_v4 = vpop.xlane.xlu0 %3650 }
 0x20a   : > { %v7396_v15 = vsel %vm22185_vm4, %v7395_v0, %v7391_v38  ;;  %v6465_v16 = vunpack.c.l.b16 %v5406_v50  ;;  %v6466_v18 = vunpack.c.h.b16 %v5406_v50  ;;  %v4954_v47 = vmul.f32 0.015625, %v3651_v4  ;;  %v16131_v0 = vld [vmem:[%s18038_s13 + $0x4e8] sm:$0xff]  }
 0x20b   : > { %v7401_v1 = vsel %vm22184_vm5, %v7400_v2, %v7396_v15  ;;  %4268 = vadd.xlane.f32.xlu1 %v4267_v56  ;;  %v4222_v38 = vsel %vm3336_vm0, %v15558_v37, 0.0  ;;  %v4225_v4 = vsel %vm3336_vm0, %v15561_v46, 0.0 }
 0x20c   : > { %v7405_v24 = vrot.slane %v6465_v16, %v18194_v29  ;;  %v7410_v25 = vrot.slane %v6466_v18, %v18197_v32  ;;  %v5407_v5 = vpack.c.bf16 %v4955_v61, %v4954_v47  ;;  %4217 = vadd.xlane.f32.xlu0 %v4216_v9  ;;  %v3660_v31 = vpop.xlane.xlu1 %3659  ;;  %v15597_v18 = vunpack.c.l.bf16 %v16131_v0 }
 0x20d   : > { %v4957_v17 = vmul.f32 0.015625, %v3660_v31  ;;  %v3657_v35 = vpop.xlane.xlu0 %3656 }
 0x20e   : > { %v7406_v39 = vsel %vm22183_vm6, %v7405_v24, %v7401_v1  ;;  %v6467_v41 = vunpack.c.l.b16 %v5407_v5  ;;  %v6468_v42 = vunpack.c.h.b16 %v5407_v5  ;;  %v4956_v26 = vmul.f32 0.015625, %v3657_v35 }
 0x20f   : > { %v7411_v45 = vsel %vm22168_vm7, %v7410_v25, %v7406_v39  ;;  %4220 = vadd.xlane.f32.xlu1 %v4219_v20  ;;  %v4276_v20 = vsel %vm3336_vm0, %v15594_v63, 0.0  ;;  %v15562_v24 = vunpack.c.h.bf16 %v16122_v8  ;;  %v15565_v35 = vunpack.c.l.bf16 %v16123_v14 }
 0x210   : > { %v7415_v51 = vrot.slane %v6467_v41, %v18208_v52  ;;  %v7420_v54 = vrot.slane %v6468_v42, %v18211_v53  ;;  %v5408_v34 = vpack.c.bf16 %v4957_v17, %v4956_v26  ;;  %4271 = vadd.xlane.f32.xlu0 %v4270_v36  ;;  %v3666_v55 = vpop.xlane.xlu1 %3665  ;;  %v4279_v42 = vsel %vm3336_vm0, %v15597_v18, 0.0  ;;  %v16140_v26 = vld [vmem:[%s18038_s13 + $0x530] sm:$0xff]  }
 0x211   : > { %v4959_v43 = vmul.f32 0.015625, %v3666_v55  ;;  %v3663_v40 = vpop.xlane.xlu0 %3662  ;;  %v4228_v46 = vsel %vm3336_vm0, %v15562_v24, 0.0 }
 0x212   : > { %v7416_v2 = vsel %vm6927_vm8, %v7415_v51, %v7411_v45  ;;  %v6469_v50 = vunpack.c.l.b16 %v5408_v34  ;;  %v6470_v3 = vunpack.c.h.b16 %v5408_v34  ;;  %v4958_v56 = vmul.f32 0.015625, %v3663_v40 }
 0x213   : > { %v7421_v61 = vsel %vm6934_vm9, %v7420_v54, %v7416_v2  ;;  %4274 = vadd.xlane.f32.xlu1 %v4273_v59  ;;  %v15598_v51 = vunpack.c.h.bf16 %v16131_v0  ;;  %v4231_v40 = vsel %vm3336_vm0, %v15565_v35, 0.0  ;;  %v15566_v0 = vunpack.c.h.bf16 %v16123_v14 }
 0x214   : > { %v7425_v9 = vrot.slane %v6469_v50, %v18226_v21  ;;  %v7430_v10 = vrot.slane %v6470_v3, %v18239_v44  ;;  %v5409_v15 = vpack.c.bf16 %v4959_v43, %v4958_v56  ;;  %4223 = vadd.xlane.f32.xlu0 %v4222_v38  ;;  %v3672_v16 = vpop.xlane.xlu1 %3671  ;;  %v15633_v38 = vunpack.c.l.bf16 %v16140_v26 }
 0x215   : > { %v4961_v47 = vmul.f32 0.015625, %v3672_v16  ;;  %v3669_v1 = vpop.xlane.xlu0 %3668  ;;  %v4234_v24 = vsel %vm3336_vm0, %v15566_v0, 0.0 }
 0x216   : > { %v7426_v25 = vsel %vm22167_vm10, %v7425_v9, %v7421_v61  ;;  %v6471_v5 = vunpack.c.l.b16 %v5409_v15  ;;  %v6472_v31 = vunpack.c.h.b16 %v5409_v15  ;;  %v4960_v33 = vmul.f32 0.015625, %v3669_v1  ;;  %v16132_v9 = vld [vmem:[%s18038_s13 + $0x4f0] sm:$0xff]  }
 0x217   : > { %v7431_v17 = vsel %vm6948_vm11, %v7430_v10, %v7426_v25  ;;  %4226 = vadd.xlane.f32.xlu1 %v4225_v4  ;;  %v4282_v4 = vsel %vm3336_vm0, %v15598_v51, 0.0  ;;  %v4333_v14 = vsel %vm3336_vm0, %v15633_v38, 0.0  ;;  %v15601_v25 = vunpack.c.l.bf16 %v16132_v9 }
 0x218   : > { %v7435_v36 = vrot.slane %v6471_v5, %v18245_v49  ;;  %v7440_v37 = vrot.slane %v6472_v31, %v18255_v6  ;;  %v5410_v39 = vpack.c.bf16 %v4961_v47, %v4960_v33  ;;  %4277 = vadd.xlane.f32.xlu0 %v4276_v20  ;;  %v3678_v41 = vpop.xlane.xlu1 %3677  ;;  %v16141_v5 = vld [vmem:[%s18038_s13 + $0x538] sm:$0xff]  }
 0x219   : > { %v4963_v8 = vmul.f32 0.015625, %v3678_v41  ;;  %v3675_v45 = vpop.xlane.xlu0 %3674 }
 0x21a   : > { %v7436_v54 = vsel %vm6955_vm12, %v7435_v36, %v7431_v17  ;;  %v6473_v34 = vunpack.c.l.b16 %v5410_v39  ;;  %v6474_v55 = vunpack.c.h.b16 %v5410_v39  ;;  %v4962_v59 = vmul.f32 0.015625, %v3675_v45 }
 0x21b   : > { %v7441_v43 = vsel %vm6962_vm13, %v7440_v37, %v7436_v54  ;;  %4280 = vadd.xlane.f32.xlu1 %v4279_v42  ;;  %v15634_v36 = vunpack.c.h.bf16 %v16140_v26  ;;  %v15637_v42 = vunpack.c.l.bf16 %v16141_v5  ;;  %v4285_v54 = vsel %vm3336_vm0, %v15601_v25, 0.0 }
 0x21c   : > { %v7445_v63 = vrot.slane %v6473_v34, %v18264_v28  ;;  %v7450_v2 = vrot.slane %v6474_v55, %v18267_v30  ;;  %v5411_v50 = vpack.c.bf16 %v4963_v8, %v4962_v59  ;;  %4229 = vadd.xlane.f32.xlu0 %v4228_v46  ;;  %v3684_v3 = vpop.xlane.xlu1 %3683 }
 0x21d   : > { %v4965_v56 = vmul.f32 0.015625, %v3684_v3  ;;  %v3681_v61 = vpop.xlane.xlu0 %3680  ;;  %v4336_v26 = vsel %vm3336_vm0, %v15634_v36, 0.0  ;;  %v4339_v0 = vsel %vm3336_vm0, %v15637_v42, 0.0 }
 0x21e   : > { %v6475_v10 = vunpack.c.l.b16 %v5411_v50  ;;  %v6476_v15 = vunpack.c.h.b16 %v5411_v50  ;;  %v4964_v16 = vmul.f32 0.015625, %v3681_v61  ;;  %v7446_v18 = vsel %vm6969_vm14, %v7445_v63, %v7441_v43 }
 0x21f   : > { %4232 = vadd.xlane.f32.xlu1 %v4231_v40  ;;  %v18761_v47 = vsel %vm6976_vm15, %v7450_v2, %v7446_v18  ;;  %v15602_v43 = vunpack.c.h.bf16 %v16132_v9  ;;  %v16133_v40 = vld [vmem:[%s18038_s13 + $0x4f8] sm:$0xff]   ;;  %v16142_v9 = vld [vmem:[%s18038_s13 + $0x540] sm:$0xff]  }
 0x220   : > { %22211 = vst [vmem:[#allocation18_spill] sm:$0xff] %v18761_v47  ;;  %v5412_v1 = vpack.c.bf16 %v4965_v56, %v4964_v16  ;;  %4283 = vadd.xlane.f32.xlu0 %v4282_v4  ;;  %v3690_v20 = vpop.xlane.xlu1 %3689  ;;  %v7455_v31 = vrot.slane %v6475_v10, %v18169_v7  ;;  %v7459_v33 = vrot.slane %v6476_v15, %v18181_v19  ;;  %v15605_v15 = vunpack.c.l.bf16 %v16133_v40 }
 0x221   : > { %v4967_v17 = vmul.f32 0.015625, %v3690_v20  ;;  %v3687_v35 = vpop.xlane.xlu0 %3686  ;;  %v15638_v20 = vunpack.c.h.bf16 %v16141_v5 }
 0x222   : > { %v6477_v37 = vunpack.c.l.b16 %v5412_v1  ;;  %v6478_v39 = vunpack.c.h.b16 %v5412_v1  ;;  %v4966_v41 = vmul.f32 0.015625, %v3687_v35  ;;  %v7460_v34 = vsel %vm6878_vm1, %v7459_v33, %v7455_v31 }
 0x223   : > { %4334 = vadd.xlane.f32.xlu1 %v4333_v14  ;;  %v4288_v1 = vsel %vm3336_vm0, %v15602_v43, 0.0 }
 0x224   : > { %v7464_v8 = vrot.slane %v6477_v37, %v18174_v12  ;;  %v7469_v45 = vrot.slane %v6478_v39, %v18177_v13  ;;  %v5413_v46 = vpack.c.bf16 %v4967_v17, %v4966_v41  ;;  %4235 = vadd.xlane.f32.xlu0 %v4234_v24  ;;  %v3696_v51 = vpop.xlane.xlu1 %3695  ;;  %v15641_v17 = vunpack.c.l.bf16 %v16142_v9 }
 0x225   : > { %v4969_v55 = vmul.f32 0.015625, %v3696_v51  ;;  %v3693_v59 = vpop.xlane.xlu0 %3692  ;;  %v4291_v41 = vsel %vm3336_vm0, %v15605_v15, 0.0 }
 0x226   : > { %v7465_v38 = vsel %vm6885_vm2, %v7464_v8, %v7460_v34  ;;  %v6479_v63 = vunpack.c.l.b16 %v5413_v46  ;;  %v6480_v2 = vunpack.c.h.b16 %v5413_v46  ;;  %v4968_v50 = vmul.f32 0.015625, %v3693_v59  ;;  %v16134_v46 = vld [vmem:[%s18038_s13 + $0x500] sm:$0xff]  }
 0x227   : > { %v7470_v3 = vsel %vm22199_vm3, %v7469_v45, %v7465_v38  ;;  %4286 = vadd.xlane.f32.xlu1 %v4285_v54  ;;  %v4342_v8 = vsel %vm3336_vm0, %v15638_v20, 0.0  ;;  %v15606_v45 = vunpack.c.h.bf16 %v16133_v40  ;;  %v15609_v40 = vunpack.c.l.bf16 %v16134_v46 }
 0x228   : > { %v7474_v56 = vrot.slane %v6479_v63, %v18185_v22  ;;  %v7479_v61 = vrot.slane %v6480_v2, %v18188_v23  ;;  %v5414_v4 = vpack.c.bf16 %v4969_v55, %v4968_v50  ;;  %4337 = vadd.xlane.f32.xlu0 %v4336_v26  ;;  %v3702_v10 = vpop.xlane.xlu1 %3701  ;;  %v4345_v26 = vsel %vm3336_vm0, %v15641_v17, 0.0 }
 0x229   : > { %v4971_v16 = vmul.f32 0.015625, %v3702_v10  ;;  %v3699_v18 = vpop.xlane.xlu0 %3698  ;;  %v4297_v20 = vsel %vm3336_vm0, %v15609_v40, 0.0 }
 0x22a   : > { %v7475_v14 = vsel %vm22185_vm4, %v7474_v56, %v7470_v3  ;;  %v6481_v24 = vunpack.c.l.b16 %v5414_v4  ;;  %v6482_v25 = vunpack.c.h.b16 %v5414_v4  ;;  %v4970_v31 = vmul.f32 0.015625, %v3699_v18  ;;  %v16143_v56 = vld [vmem:[%s18038_s13 + $0x548] sm:$0xff]  }
 0x22b   : > { %v7480_v33 = vsel %vm22184_vm5, %v7479_v61, %v7475_v14  ;;  %4340 = vadd.xlane.f32.xlu1 %v4339_v0  ;;  %v4294_v3 = vsel %vm3336_vm0, %v15606_v45, 0.0  ;;  %v15642_v0 = vunpack.c.h.bf16 %v16142_v9  ;;  %v15645_v9 = vunpack.c.l.bf16 %v16143_v56 }
 0x22c   : > { %v7484_v35 = vrot.slane %v6481_v24, %v18194_v29  ;;  %v7489_v36 = vrot.slane %v6482_v25, %v18197_v32  ;;  %v5415_v37 = vpack.c.bf16 %v4971_v16, %v4970_v31  ;;  %4289 = vadd.xlane.f32.xlu0 %v4288_v1  ;;  %v3708_v39 = vpop.xlane.xlu1 %3707  ;;  %v15610_v25 = vunpack.c.h.bf16 %v16134_v46  ;;  %v16135_v31 = vld [vmem:[%s18038_s13 + $0x508] sm:$0xff]  }
 0x22d   : > { %v4973_v5 = vmul.f32 0.015625, %v3708_v39  ;;  %v3705_v42 = vpop.xlane.xlu0 %3704  ;;  %v4348_v24 = vsel %vm3336_vm0, %v15642_v0, 0.0 }
 0x22e   : > { %v7485_v51 = vsel %vm22183_vm6, %v7484_v35, %v7480_v33  ;;  %v6483_v54 = vunpack.c.l.b16 %v5415_v37  ;;  %v6484_v34 = vunpack.c.h.b16 %v5415_v37  ;;  %v4972_v55 = vmul.f32 0.015625, %v3705_v42  ;;  %v16144_v42 = vld [vmem:[%s18038_s13 + $0x550] sm:$0xff]  }
 0x22f   : > { %v7490_v59 = vsel %vm22168_vm7, %v7489_v36, %v7485_v51  ;;  %4292 = vadd.xlane.f32.xlu1 %v4291_v41  ;;  %v4351_v36 = vsel %vm3336_vm0, %v15645_v9, 0.0  ;;  %v15613_v37 = vunpack.c.l.bf16 %v16135_v31  ;;  %v4300_v41 = vsel %vm3336_vm0, %v15610_v25, 0.0 }
 0x230   : > { %v7494_v43 = vrot.slane %v6483_v54, %v18208_v52  ;;  %v7499_v38 = vrot.slane %v6484_v34, %v18211_v53  ;;  %v5416_v63 = vpack.c.bf16 %v4973_v5, %v4972_v55  ;;  %4343 = vadd.xlane.f32.xlu0 %v4342_v8  ;;  %v4143_v2 = vpop.xlane.xlu1 %4142  ;;  %v15646_v5 = vunpack.c.h.bf16 %v16143_v56  ;;  %v16136_v55 = vld [vmem:[%s18038_s13 + $0x510] sm:$0xff]  }
 0x231   : > { %v18793_v50 = vpop.xlane.xlu0 %3710  ;;  %v4303_v45 = vsel %vm3336_vm0, %v15613_v37, 0.0  ;;  %v15649_v46 = vunpack.c.l.bf16 %v16144_v42  ;;  %v15614_v34 = vunpack.c.h.bf16 %v16135_v31  ;;  %v15650_v40 = vunpack.c.h.bf16 %v16144_v42 }
 0x232   : > { %v7495_v61 = vsel %vm6927_vm8, %v7494_v43, %v7490_v59  ;;  %v6485_v4 = vunpack.c.l.b16 %v5416_v63  ;;  %v6486_v10 = vunpack.c.h.b16 %v5416_v63  ;;  %v4354_v54 = vsel %vm3336_vm0, %v15646_v5, 0.0 }
 0x233   : > { %v7500_v15 = vsel %vm6934_vm9, %v7499_v38, %v7495_v61  ;;  %4346 = vadd.xlane.f32.xlu1 %v4345_v26  ;;  %v4357_v26 = vsel %vm3336_vm0, %v15649_v46, 0.0  ;;  %v15617_v43 = vunpack.c.l.bf16 %v16136_v55  ;;  %v4306_v63 = vsel %vm3336_vm0, %v15614_v34, 0.0  ;;  %v16147_v46 = vld [vmem:[%s18038_s13 + $0x568] sm:$0xff]  }
 0x234   : > { %v7504_v16 = vrot.slane %v6485_v4, %v18226_v21  ;;  %v7509_v18 = vrot.slane %v6486_v10, %v18239_v44  ;;  %4295 = vadd.xlane.f32.xlu0 %v4294_v3  ;;  %v18801_v1 = vpop.xlane.xlu1 %4094  ;;  %v16145_v3 = vld [vmem:[%s18038_s13 + $0x558] sm:$0xff]   ;;  %v4360_v10 = vsel %vm3336_vm0, %v15650_v40, 0.0  ;;  %v5118_v9 = vmul.f32 0.015625, %v4143_v2 }
 0x235   : > { %v4146_v14 = vpop.xlane.xlu0 %4145  ;;  %v4309_v56 = vsel %vm3336_vm0, %v15617_v43, 0.0  ;;  %v15653_v61 = vunpack.c.l.bf16 %v16145_v3  ;;  %v15661_v40 = vunpack.c.l.bf16 %v16147_v46 }
 0x236   : > { %v7505_v33 = vsel %vm22167_vm10, %v7504_v16, %v7500_v15  ;;  %v15618_v15 = vunpack.c.h.bf16 %v16136_v55  ;;  %v16137_v16 = vld [vmem:[%s18038_s13 + $0x518] sm:$0xff]  }
 0x237   : > { %v18808_v17 = vsel %vm6948_vm11, %v7509_v18, %v7505_v33  ;;  %4298 = vadd.xlane.f32.xlu1 %v4297_v20  ;;  %v5119_v18 = vmul.f32 0.015625, %v4146_v14  ;;  %v16146_v20 = vld [vmem:[%s18038_s13 + $0x560] sm:$0xff]   ;;  %v4363_v25 = vsel %vm3336_vm0, %v15653_v61, 0.0  ;;  %v15621_v31 = vunpack.c.l.bf16 %v16137_v16 }
 0x238   : > { %4349 = vadd.xlane.f32.xlu0 %v4348_v24  ;;  %v4149_v35 = vpop.xlane.xlu1 %4148  ;;  %v15654_v33 = vunpack.c.h.bf16 %v16145_v3  ;;  %v4312_v5 = vsel %vm3336_vm0, %v15618_v15, 0.0  ;;  %v15657_v42 = vunpack.c.l.bf16 %v16146_v20  ;;  %v15658_v55 = vunpack.c.h.bf16 %v16146_v20  ;;  %v18840_v20 = vld [vmem:[%s18038_s13 + $0x5b0] sm:$0xff]  }
 0x239   : > { %v4098_v39 = vpop.xlane.xlu0 %4097  ;;  %v5120_v14 = vmul.f32 0.015625, %v4149_v35  ;;  %v5102_v3 = vmul.f32 0.015625, %v18801_v1 }
 0x23a   : > { %v5103_v34 = vmul.f32 0.015625, %v4098_v39  ;;  %v4369_v35 = vsel %vm3336_vm0, %v15657_v42, 0.0  ;;  %v4375_v42 = vsel %vm3336_vm0, %v15661_v40, 0.0 }
 0x23b   : > { %4352 = vadd.xlane.f32.xlu1 %v4351_v36  ;;  %v16138_v36 = vld [vmem:[%s18038_s13 + $0x520] sm:$0xff]  }
 0x23c   : > { %4301 = vadd.xlane.f32.xlu0 %v4300_v41  ;;  %v4101_v8 = vpop.xlane.xlu1 %4100  ;;  %v15625_v2 = vunpack.c.l.bf16 %v16138_v36  ;;  %v15626_v1 = vunpack.c.h.bf16 %v16138_v36 }
 0x23d   : > { %v4152_v51 = vpop.xlane.xlu0 %4151 }
 0x23e   : > { %v5121_v37 = vmul.f32 0.015625, %v4152_v51  ;;  %v4315_v51 = vsel %vm3336_vm0, %v15621_v31, 0.0  ;;  %v4372_v31 = vsel %vm3336_vm0, %v15658_v55, 0.0 }
 0x23f   : > { %4304 = vadd.xlane.f32.xlu1 %v4303_v45  ;;  %v15622_v45 = vunpack.c.h.bf16 %v16137_v16  ;;  %v5104_v16 = vmul.f32 0.015625, %v4101_v8 }
 0x240   : > { %4355 = vadd.xlane.f32.xlu0 %v4354_v54  ;;  %v4155_v59 = vpop.xlane.xlu1 %4154  ;;  %v5489_v54 = vpack.c.bf16 %v5119_v18, %v5118_v9  ;;  %v5481_v9 = vpack.c.bf16 %v5103_v34, %v5102_v3  ;;  %v15697_v34 = vunpack.c.l.bf16 %v18840_v20 }
 0x241   : > { %v4104_v38 = vpop.xlane.xlu0 %4103  ;;  %v4318_v39 = vsel %vm3336_vm0, %v15622_v45, 0.0 }
 0x242   : > { %v6631_v15 = vunpack.c.l.b16 %v5489_v54 }
 0x243   : > { %4358 = vadd.xlane.f32.xlu1 %v4357_v26  ;;  %v5105_v26 = vmul.f32 0.015625, %v4104_v38  ;;  %v6632_v38 = vunpack.c.h.b16 %v5489_v54 }
 0x244   : > { %4307 = vadd.xlane.f32.xlu0 %v4306_v63  ;;  %v18819_v0 = vpop.xlane.xlu1 %4106  ;;  %v4366_v63 = vsel %vm3336_vm0, %v15654_v33, 0.0  ;;  %v5122_v33 = vmul.f32 0.015625, %v4155_v59  ;;  %v6615_v59 = vunpack.c.l.b16 %v5481_v9 }
 0x245   : > { %v4158_v4 = vpop.xlane.xlu0 %4157 }
 0x246   : > { %v5123_v18 = vmul.f32 0.015625, %v4158_v4 }
 0x247   : > { %4310 = vadd.xlane.f32.xlu1 %v4309_v56  ;;  %v5490_v56 = vpack.c.bf16 %v5121_v37, %v5120_v14  ;;  %v18844_v37 = vpack.c.bf16 %v5105_v26, %v5104_v16  ;;  %v15662_v14 = vunpack.c.h.bf16 %v16147_v46  ;;  %v6616_v26 = vunpack.c.h.b16 %v5481_v9 }
 0x248   : > { %4361 = vadd.xlane.f32.xlu0 %v4360_v10  ;;  %v18825_v24 = vpop.xlane.xlu1 %4160  ;;  %v16139_v10 = vld [vmem:[%s18038_s13 + $0x528] sm:$0xff]   ;;  %v5491_v55 = vpack.c.bf16 %v5123_v18, %v5122_v33  ;;  %v4324_v46 = vsel %vm3336_vm0, %v15626_v1, 0.0  ;;  %v8146_v1 = vrot.slane %v6615_v59, %v18169_v7 }
 0x249   : > { %v4110_v41 = vpop.xlane.xlu0 %4109  ;;  %v15629_v45 = vunpack.c.l.bf16 %v16139_v10  ;;  %v6633_v54 = vunpack.c.l.b16 %v5490_v56  ;;  %v15630_v36 = vunpack.c.h.bf16 %v16139_v10  ;;  %v6634_v40 = vunpack.c.h.b16 %v5490_v56 }
 0x24a   : > { %v5107_v8 = vmul.f32 0.015625, %v4110_v41  ;;  %v6617_v16 = vunpack.c.l.b16 %v18844_v37  ;;  %v5124_v10 = vmul.f32 0.015625, %v18825_v24  ;;  %v8150_v33 = vrot.slane %v6616_v26, %v18181_v19 }
 0x24b   : > { %4364 = vadd.xlane.f32.xlu1 %v4363_v25  ;;  %v4321_v25 = vsel %vm3336_vm0, %v15625_v2, 0.0  ;;  %v8229_v2 = vrot.slane %v6632_v38, %v18181_v19  ;;  %v8234_v38 = vrot.slane %v6633_v54, %v18174_v12  ;;  %v18869_v54 = vld [vmem:[%s18038_s13 + $0x570] sm:$0xff]  }
 0x24c   : > { %4313 = vadd.xlane.f32.xlu0 %v4312_v5  ;;  %v18831_v43 = vpop.xlane.xlu1 %4112 }
 0x24d   : > { %v4164_v61 = vpop.xlane.xlu0 %4163  ;;  %v5108_v26 = vmul.f32 0.015625, %v18831_v43 }
 0x24e   : > { %v5125_v3 = vmul.f32 0.015625, %v4164_v61  ;;  %v6635_v61 = vunpack.c.l.b16 %v5491_v55 }
 0x24f   : > { %4316 = vadd.xlane.f32.xlu1 %v4315_v51  ;;  %v8225_v51 = vrot.slane %v6631_v15, %v18169_v7  ;;  %v4327_v15 = vsel %vm3336_vm0, %v15629_v45, 0.0 }
 0x250   : > { %4367 = vadd.xlane.f32.xlu0 %v4366_v63  ;;  %v4167_v5 = vpop.xlane.xlu1 %4166  ;;  %v5106_v63 = vmul.f32 0.015625, %v18819_v0  ;;  %v4378_v0 = vsel %vm3336_vm0, %v15662_v14, 0.0  ;;  %v5492_v45 = vpack.c.bf16 %v5125_v3, %v5124_v10  ;;  %v6618_v14 = vunpack.c.h.b16 %v18844_v37 }
 0x251   : > { %v4116_v4 = vpop.xlane.xlu0 %4115  ;;  %v8230_v56 = vsel %vm6878_vm1, %v8229_v2, %v8225_v51  ;;  %v8155_v51 = vrot.slane %v6617_v16, %v18174_v12  ;;  %v5126_v3 = vmul.f32 0.015625, %v4167_v5  ;;  %v15698_v37 = vunpack.c.h.bf16 %v18840_v20 }
 0x252   : > { %v18856_v18 = vpack.c.bf16 %v5107_v8, %v5106_v63  ;;  %v5109_v24 = vmul.f32 0.015625, %v4116_v4  ;;  %v8239_v8 = vrot.slane %v6634_v40, %v18177_v13  ;;  %v6636_v63 = vunpack.c.h.b16 %v5491_v55 }
 0x253   : > { %4370 = vadd.xlane.f32.xlu1 %v4369_v35  ;;  %v18861_v35 = vsel %vm3336_vm0, %v15697_v34, 0.0  ;;  %v15665_v40 = vunpack.c.l.bf16 %v18869_v54  ;;  %v8151_v16 = vsel %vm6878_vm1, %v8150_v33, %v8146_v1  ;;  %v8160_v43 = vrot.slane %v6618_v14, %v18177_v13 }
 0x254   : > { %4319 = vadd.xlane.f32.xlu0 %v4318_v39  ;;  %v4119_v41 = vpop.xlane.xlu1 %4118  ;;  %v18864_v39 = vsel %vm3336_vm0, %v15630_v36, 0.0  ;;  %v8235_v36 = vsel %vm6885_vm2, %v8234_v38, %v8230_v56  ;;  %v6619_v59 = vunpack.c.l.b16 %v18856_v18  ;;  %v5484_v10 = vpack.c.bf16 %v5109_v24, %v5108_v26  ;;  %v18888_v24 = vld [vmem:[%s18038_s13 + $0x5b8] sm:$0xff]  }
 0x255   : > { %v4170_v9 = vpop.xlane.xlu0 %4169  ;;  %v8240_v55 = vsel %vm22199_vm3, %v8239_v8, %v8235_v36  ;;  %v8156_v38 = vsel %vm6885_vm2, %v8155_v51, %v8151_v16  ;;  %v6620_v20 = vunpack.c.h.b16 %v18856_v18  ;;  %v5110_v33 = vmul.f32 0.015625, %v4119_v41 }
 0x256   : > { %v5127_v34 = vmul.f32 0.015625, %v4170_v9  ;;  %v8165_v1 = vrot.slane %v6619_v59, %v18185_v22  ;;  %v6638_v8 = vunpack.c.h.b16 %v5492_v45  ;;  %v4381_v51 = vsel %vm3336_vm0, %v15665_v40, 0.0 }
 0x257   : > { %4322 = vadd.xlane.f32.xlu1 %v4321_v25  ;;  %v8244_v25 = vrot.slane %v6635_v61, %v18185_v22  ;;  %v8249_v61 = vrot.slane %v6636_v63, %v18188_v23  ;;  %v8161_v18 = vsel %vm22199_vm3, %v8160_v43, %v8156_v38  ;;  %v15701_v59 = vunpack.c.l.bf16 %v18888_v24 }
 0x258   : > { %4373 = vadd.xlane.f32.xlu0 %v4372_v31  ;;  %v4173_v2 = vpop.xlane.xlu1 %4172  ;;  %v6637_v31 = vunpack.c.l.b16 %v5492_v45  ;;  %v5493_v56 = vpack.c.bf16 %v5127_v34, %v5126_v3  ;;  %v8166_v45 = vsel %vm22185_vm4, %v8165_v1, %v8161_v18  ;;  %v6622_v40 = vunpack.c.h.b16 %v5484_v10 }
 0x259   : > { %v4122_v4 = vpop.xlane.xlu0 %4121  ;;  %v5128_v34 = vmul.f32 0.015625, %v4173_v2 }
 0x25a   : > { %v5111_v9 = vmul.f32 0.015625, %v4122_v4  ;;  %v8254_v14 = vrot.slane %v6637_v31, %v18194_v29  ;;  %v6639_v63 = vunpack.c.l.b16 %v5493_v56  ;;  %v15666_v4 = vunpack.c.h.bf16 %v18869_v54 }
 0x25b   : > { %4376 = vadd.xlane.f32.xlu1 %v4375_v42  ;;  %v8245_v42 = vsel %vm22185_vm4, %v8244_v25, %v8240_v55  ;;  %v8170_v25 = vrot.slane %v6620_v20, %v18188_v23  ;;  %v6640_v54 = vunpack.c.h.b16 %v5493_v56  ;;  %v4435_v20 = vsel %vm3336_vm0, %v15701_v59, 0.0 }
 0x25c   : > { %4325 = vadd.xlane.f32.xlu0 %v4324_v46  ;;  %v4125_v5 = vpop.xlane.xlu1 %4124  ;;  %v6621_v46 = vunpack.c.l.b16 %v5484_v10  ;;  %v5485_v26 = vpack.c.bf16 %v5111_v9, %v5110_v33  ;;  %v18901_v9 = vld [vmem:[%s18038_s13 + $0x578] sm:$0xff]   ;;  %v8264_v43 = vrot.slane %v6639_v63, %v18208_v52  ;;  %v4384_v56 = vsel %vm3336_vm0, %v15666_v4, 0.0 }
 0x25d   : > { %v4176_v57 = vpop.xlane.xlu0 %4175  ;;  %v5112_v16 = vmul.f32 0.015625, %v4125_v5  ;;  %v4432_v5 = vsel %vm3336_vm0, %v15698_v37, 0.0  ;;  %v8171_v1 = vsel %vm22184_vm5, %v8170_v25, %v8166_v45 }
 0x25e   : > { %v5129_v36 = vmul.f32 0.015625, %v4176_v57  ;;  %v8250_v57 = vsel %vm22184_vm5, %v8249_v61, %v8245_v42  ;;  %v8175_v55 = vrot.slane %v6621_v46, %v18194_v29  ;;  %v6623_v38 = vunpack.c.l.b16 %v5485_v26 }
 0x25f   : > { %4328 = vadd.xlane.f32.xlu1 %v4327_v15  ;;  %v8259_v15 = vrot.slane %v6638_v8, %v18197_v32  ;;  %v6624_v18 = vunpack.c.h.b16 %v5485_v26 }
 0x260   : > { %4379 = vadd.xlane.f32.xlu0 %v4378_v0  ;;  %v4179_v41 = vpop.xlane.xlu1 %4178  ;;  %v5494_v3 = vpack.c.bf16 %v5129_v36, %v5128_v34  ;;  %v8255_v0 = vsel %vm22183_vm6, %v8254_v14, %v8250_v57  ;;  %v8180_v36 = vrot.slane %v6622_v40, %v18197_v32  ;;  %v8176_v37 = vsel %vm22183_vm6, %v8175_v55, %v8171_v1 }
 0x261   : > { %v4128_v2 = vpop.xlane.xlu0 %4127  ;;  %v8260_v8 = vsel %vm22168_vm7, %v8259_v15, %v8255_v0  ;;  %v5130_v14 = vmul.f32 0.015625, %v4179_v41  ;;  %v8269_v34 = vrot.slane %v6640_v54, %v18211_v53  ;;  %v8185_v63 = vrot.slane %v6623_v38, %v18208_v52 }
 0x262   : > { %v5113_v31 = vmul.f32 0.015625, %v4128_v2  ;;  %v6641_v33 = vunpack.c.l.b16 %v5494_v3  ;;  %v8265_v59 = vsel %vm6927_vm8, %v8264_v43, %v8260_v8  ;;  %v6642_v4 = vunpack.c.h.b16 %v5494_v3 }
 0x263   : > { %4430 = vadd.xlane.f32.xlu1 %v18861_v35  ;;  %v15669_v35 = vunpack.c.l.bf16 %v18901_v9  ;;  %v15702_v40 = vunpack.c.h.bf16 %v18888_v24  ;;  %v8270_v0 = vsel %vm6934_vm9, %v8269_v34, %v8265_v59  ;;  %v8190_v54 = vrot.slane %v6624_v18, %v18211_v53 }
 0x264   : > { %v18907_v61 = vpack.c.bf16 %v5113_v31, %v5112_v16  ;;  %4331 = vadd.xlane.f32.xlu0 %v18864_v39  ;;  %v4131_v10 = vpop.xlane.xlu1 %4130  ;;  %v18918_v39 = vld [vmem:[%s18038_s13 + $0x5c0] sm:$0xff]   ;;  %v8274_v41 = vrot.slane %v6641_v33, %v18226_v21  ;;  %v15670_v38 = vunpack.c.h.bf16 %v18901_v9  ;;  %v8279_v43 = vrot.slane %v6642_v4, %v18239_v44 }
 0x265   : > { %v4182_v42 = vpop.xlane.xlu0 %4181  ;;  %v4387_v15 = vsel %vm3336_vm0, %v15669_v35, 0.0  ;;  %v15705_v26 = vunpack.c.l.bf16 %v18918_v39  ;;  %v5114_v16 = vmul.f32 0.015625, %v4131_v10  ;;  %v18938_v33 = vld [vmem:[%s18038_s13 + $0x580] sm:$0xff]   ;;  %v15706_v18 = vunpack.c.h.bf16 %v18918_v39 }
 0x266   : > { %v5131_v46 = vmul.f32 0.015625, %v4182_v42  ;;  %v6625_v57 = vunpack.c.l.b16 %v18907_v61  ;;  %v6626_v24 = vunpack.c.h.b16 %v18907_v61  ;;  %v8275_v42 = vsel %vm22167_vm10, %v8274_v41, %v8270_v0 }
 0x267   : > { %4382 = vadd.xlane.f32.xlu1 %v4381_v51  ;;  %v8181_v51 = vsel %vm22168_vm7, %v8180_v36, %v8176_v37  ;;  %v4441_v61 = vsel %vm3336_vm0, %v15705_v26, 0.0  ;;  %v15673_v34 = vunpack.c.l.bf16 %v18938_v33  ;;  %v4444_v0 = vsel %vm3336_vm0, %v15706_v18, 0.0 }
 0x268   : > { %v5495_v45 = vpack.c.bf16 %v5131_v46, %v5130_v14  ;;  %4433 = vadd.xlane.f32.xlu0 %v4432_v5  ;;  %v4185_v25 = vpop.xlane.xlu1 %4184  ;;  %v8186_v55 = vsel %vm6927_vm8, %v8185_v63, %v8181_v51  ;;  %v8195_v5 = vrot.slane %v6625_v57, %v18226_v21  ;;  %v8280_v63 = vsel %vm6948_vm11, %v8279_v43, %v8275_v42 }
 0x269   : > { %v4134_v2 = vpop.xlane.xlu0 %4133  ;;  %v5132_v9 = vmul.f32 0.015625, %v4185_v25  ;;  %v8191_v37 = vsel %vm6934_vm9, %v8190_v54, %v8186_v55  ;;  %v8200_v4 = vrot.slane %v6626_v24, %v18239_v44  ;;  %v16159_v25 = vld [vmem:[%s18038_s13 + $0x5c8] sm:$0xff]  }
 0x26a   : > { %v6643_v31 = vunpack.c.l.b16 %v5495_v45  ;;  %v5115_v3 = vmul.f32 0.015625, %v4134_v2  ;;  %v6644_v35 = vunpack.c.h.b16 %v5495_v45  ;;  %v8196_v59 = vsel %vm22167_vm10, %v8195_v5, %v8191_v37 }
 0x26b   : > { %4436 = vadd.xlane.f32.xlu1 %v4435_v20  ;;  %v4438_v20 = vsel %vm3336_vm0, %v15702_v40, 0.0  ;;  %v15709_v55 = vunpack.c.l.bf16 %v16159_v25  ;;  %vm9387_vm10 = vcmask 1041409   ;;  %v8201_v5 = vsel %vm6948_vm11, %v8200_v4, %v8196_v59 }
 0x26c   : > { %v5487_v1 = vpack.c.bf16 %v5115_v3, %v5114_v16  ;;  %4385 = vadd.xlane.f32.xlu0 %v4384_v56  ;;  %v4137_v10 = vpop.xlane.xlu1 %4136  ;;  %v8284_v8 = vrot.slane %v6643_v31, %v18245_v49  ;;  %v4390_v56 = vsel %vm3336_vm0, %v15670_v38, 0.0  ;;  %v8289_v41 = vrot.slane %v6644_v35, %v18255_v6 }
 0x26d   : > { %v4188_v36 = vpop.xlane.xlu0 %4187  ;;  %v4393_v3 = vsel %vm3336_vm0, %v15673_v34, 0.0  ;;  %v15674_v35 = vunpack.c.h.bf16 %v18938_v33 }
 0x26e   : > { %v6627_v14 = vunpack.c.l.b16 %v5487_v1  ;;  %v5133_v46 = vmul.f32 0.015625, %v4188_v36  ;;  %v6628_v2 = vunpack.c.h.b16 %v5487_v1  ;;  %v8285_v26 = vsel %vm6955_vm12, %v8284_v8, %v8280_v63  ;;  %v16151_v8 = vld [vmem:[%s18038_s13 + $0x588] sm:$0xff]  }
 0x26f   : > { %4388 = vadd.xlane.f32.xlu1 %v4387_v15  ;;  %v5116_v15 = vmul.f32 0.015625, %v4137_v10  ;;  %v8290_v42 = vsel %vm6962_vm13, %v8289_v41, %v8285_v26  ;;  %v15677_v18 = vunpack.c.l.bf16 %v16151_v8  ;;  %v4396_v4 = vsel %vm3336_vm0, %v15674_v35, 0.0 }
 0x270   : > { %v5496_v57 = vpack.c.bf16 %v5133_v46, %v5132_v9  ;;  %4439 = vadd.xlane.f32.xlu0 %v4438_v20  ;;  %v18951_v45 = vpop.xlane.xlu1 %4238  ;;  %v8205_v39 = vrot.slane %v6627_v14, %v18245_v49  ;;  %v8210_v1 = vrot.slane %v6628_v2, %v18255_v6  ;;  %v15710_v41 = vunpack.c.h.bf16 %v16159_v25 }
 0x271   : > { %v4140_v40 = vpop.xlane.xlu0 %4139  ;;  %v4399_v26 = vsel %vm3336_vm0, %v15677_v18, 0.0 }
 0x272   : > { %v6645_v51 = vunpack.c.l.b16 %v5496_v57  ;;  %v6646_v16 = vunpack.c.h.b16 %v5496_v57  ;;  %v5117_v31 = vmul.f32 0.015625, %v4140_v40  ;;  %v8206_v36 = vsel %vm6955_vm12, %v8205_v39, %v8201_v5 }
 0x273   : > { %4442 = vadd.xlane.f32.xlu1 %v4441_v61  ;;  %v4447_v61 = vsel %vm3336_vm0, %v15709_v55, 0.0  ;;  %v8211_v57 = vsel %vm6962_vm13, %v8210_v1, %v8206_v36  ;;  %v16152_v55 = vld [vmem:[%s18038_s13 + $0x590] sm:$0xff]   ;;  %v16435_v36 = vld [vmem:[%s18036_s12 + $0x220] ss:$16 sps:$4 sm:$0xff]  }
 0x274   : > { %v8294_v54 = vrot.slane %v6645_v51, %v18264_v28  ;;  %v8299_v38 = vrot.slane %v6646_v16, %v18267_v30  ;;  %v5488_v43 = vpack.c.bf16 %v5117_v31, %v5116_v15  ;;  %4391 = vadd.xlane.f32.xlu0 %v4390_v56  ;;  %v18961_v24 = vpop.xlane.xlu1 %4190  ;;  %v16160_v15 = vld [vmem:[%s18038_s13 + $0x5d0] sm:$0xff]   ;;  %v4450_v51 = vsel %vm3336_vm0, %v15710_v41, 0.0  ;;  %v16441_v41 = vld [vmem:[%s18036_s12 + $0x240] ss:$16 sps:$4 sm:$0xff]  }
 0x275   : > { %v18965_v10 = vpop.xlane.xlu0 %4241  ;;  %v15713_v16 = vunpack.c.l.bf16 %v16160_v15  ;;  %v15678_v31 = vunpack.c.h.bf16 %v16151_v8  ;;  %v15681_v35 = vunpack.c.l.bf16 %v16152_v55  ;;  %v15714_v8 = vunpack.c.h.bf16 %v16160_v15  ;;  %v16449_v15 = vld [vmem:[%s18036_s12 + $0x264] ss:$16 sps:$4 sm:$0xff]  }
 0x276   : > { %v6629_v20 = vunpack.c.l.b16 %v5488_v43  ;;  %v6630_v9 = vunpack.c.h.b16 %v5488_v43  ;;  %v8295_v14 = vsel %vm6969_vm14, %v8294_v54, %v8290_v42  ;;  %v16440_v43 = vld [vmem:[%s18036_s12 + $0x22c] ss:$16 sps:$4 sm:$0xff]  }
 0x277   : > { %4394 = vadd.xlane.f32.xlu1 %v4393_v3  ;;  %v8300_v46 = vsel %vm6976_vm15, %v8299_v38, %v8295_v14  ;;  %v16429_v3 = vld [vmem:[%s18036_s12 + $0x200] ss:$16 sps:$4 sm:$0xff]   ;;  %v16437_v38 = vld [vmem:[%s18036_s12 + $0x224] ss:$16 sps:$4 sm:$0xff]   ;;  %v4453_v1 = vsel %vm3336_vm0, %v15713_v16, 0.0  ;;  %v4402_v42 = vsel %vm3336_vm0, %v15678_v31, 0.0 }
 0x278   : > { %v8215_v37 = vrot.slane %v6629_v20, %v18264_v28  ;;  %v8220_v56 = vrot.slane %v6630_v9, %v18267_v30  ;;  %4445 = vadd.xlane.f32.xlu0 %v4444_v0  ;;  %v18976_v34 = vpop.xlane.xlu1 %4244  ;;  %v9389_v33 = vsel %vm9387_vm10, %v8300_v46, %v18342_v60  ;;  %v16432_v0 = vld [vmem:[%s18036_s12 + $0x208] ss:$16 sps:$4 sm:$0xff]   ;;  %v19005_v9 = vld [vmem:[%s18038_s13 + $0x5d8] sm:$0xff]   ;;  %v16446_v46 = vld [vmem:[%s18036_s12 + $0x24c] ss:$16 sps:$4 sm:$0xff]  }
 0x279   : > { %v18980_v63 = vpop.xlane.xlu0 %4193  ;;  %v9405_v59 = vpack.c.b16 %v9389_v33, %v9389_v33  ;;  %v16438_v20 = vld [vmem:[%s18036_s12 + $0x228] ss:$16 sps:$4 sm:$0xff]   ;;  %v16443_v14 = vld [vmem:[%s18036_s12 + $0x244] ss:$16 sps:$4 sm:$0xff]   ;;  %v4456_v33 = vsel %vm3336_vm0, %v15714_v8, 0.0  ;;  %v15717_v18 = vunpack.c.l.bf16 %v19005_v9 }
 0x27a   : > { %v8216_v2 = vsel %vm6969_vm14, %v8215_v37, %v8211_v57  ;;  %v5151_v57 = vmul.f32 0.015625, %v18965_v10  ;;  %v16162_v16 = vld [vmem:[%s18038_s13 + $0x5e0] sm:$0xff]   ;;  %v5135_v8 = vmul.f32 0.015625, %v18980_v63 }
 0x27b   : > { %11991 = vmatprep.mubr.bf16.mxu0 %v9405_v59  ;;  %12319 = vmatprep.mubr.bf16.mxu1 %v9405_v59  ;;  %v8221_v60 = vsel %vm6976_vm15, %v8220_v56, %v8216_v2  ;;  %v4405_v56 = vsel %vm3336_vm0, %v15681_v35, 0.0  ;;  %v15682_v59 = vunpack.c.h.bf16 %v16152_v55  ;;  %v16444_v2 = vld [vmem:[%s18036_s12 + $0x248] ss:$16 sps:$4 sm:$0xff]   ;;  %v15718_v55 = vunpack.c.h.bf16 %v19005_v9 }
 0x27c   : > { %4448 = vadd.xlane.f32.xlu1 %v4447_v61  ;;  %4397 = vadd.xlane.f32.xlu0 %v4396_v4  ;;  %v18987_v40 = vpop.xlane.xlu1 %4196  ;;  %v9388_v25 = vsel %vm9387_vm10, %v8221_v60, %v18285_v11  ;;  %v16153_v4 = vld [vmem:[%s18038_s13 + $0x598] sm:$0xff]   ;;  %v16452_v60 = vld [vmem:[%s18036_s12 + $0x26c] ss:$16 sps:$4 sm:$0xff]   ;;  %v15722_v9 = vunpack.c.h.bf16 %v16162_v16 }
 0x27d   : > { %v4248_v39 = vpop.xlane.xlu0 %4247  ;;  %v9404_v54 = vpack.c.b16 %v9388_v25, %v9388_v25  ;;  %v15685_v10 = vunpack.c.l.bf16 %v16153_v4  ;;  %v15686_v35 = vunpack.c.h.bf16 %v16153_v4 }
 0x27e   : > { %v5153_v25 = vmul.f32 0.015625, %v4248_v39  ;;  %v19029_v39 = vld [vmem:[%s18038_s13 + $0x5a0] sm:$0xff]  }
 0x27f   : > { %11992 = vmatmul.mubr.bf16.vlgmr.msra.gmra.mrb[0].mxu0 %v9404_v54  ;;  %12320 = vmatmul.mubr.bf16.vlgmr.msra.gmra.mrb[0].mxu1 %v9404_v54  ;;  %v17089_v54 = vld [vmem:[%s18038_s13 + $0x1f0] sm:$0xff]   ;;  %v15690_v63 = vunpack.c.h.bf16 %v19029_v39 }
 0x280   : > { %4400 = vadd.xlane.f32.xlu1 %v4399_v26  ;;  %4451 = vadd.xlane.f32.xlu0 %v4450_v51  ;;  %v18998_v5 = vpop.xlane.xlu1 %4250  ;;  %v5150_v26 = vmul.f32 0.015625, %v18951_v45  ;;  %v15218_v45 = vunpack.c.h.bf16 %v17089_v54  ;;  %v19061_v54 = vld [vmem:[%s18038_s13 + $0x5e8] sm:$0xff]  }
 0x281   : > { %v4200_v11 = vpop.xlane.xlu0 %4199  ;;  %12001 = vmatpush1.bf16.msra.mxu0 %v16429_v3  ;;  %12329 = vmatpush1.bf16.msra.mxu1 %v16432_v0  ;;  %v4459_v3 = vsel %vm3336_vm0, %v15717_v18, 0.0  ;;  %v4408_v0 = vsel %vm3336_vm0, %v15682_v59, 0.0  ;;  %v4411_v18 = vsel %vm3336_vm0, %v15685_v10, 0.0  ;;  %v5134_v59 = vmul.f32 0.015625, %v18961_v24 }
 0x282   : > { %12002 = vmatprep.subr.bf16.mxu0 %v16437_v38  ;;  %12330 = vmatprep.subr.bf16.mxu1 %v16440_v43  ;;  %v5505_v38 = vpack.c.bf16 %v5151_v57, %v5150_v26  ;;  %v5152_v43 = vmul.f32 0.015625, %v18976_v34  ;;  %v5136_v26 = vmul.f32 0.015625, %v18987_v40  ;;  %v4414_v10 = vsel %vm3336_vm0, %v15686_v35, 0.0 }
 0x283   : > { %v5497_v24 = vpack.c.bf16 %v5135_v8, %v5134_v59 }
 0x284   : > { %4454 = vadd.xlane.f32.xlu1 %v4453_v1  ;;  %4403 = vadd.xlane.f32.xlu0 %v4402_v42  ;;  %v19009_v61 = vpop.xlane.xlu1 %4202  ;;  %v16447_v1 = vld [vmem:[%s18036_s12 + $0x260] ss:$16 sps:$4 sm:$0xff]   ;;  %v16450_v42 = vld [vmem:[%s18036_s12 + $0x268] ss:$16 sps:$4 sm:$0xff]  }
 0x285   : > { %v4254_v37 = vpop.xlane.xlu0 %4253  ;;  %12003 = vmatpush1.bf16.msra.mxu0 %v16435_v36  ;;  %12331 = vmatpush1.bf16.msra.mxu1 %v16438_v20  ;;  %v16455_v36 = vld [vmem:[%s18036_s12 + $0x284] ss:$16 sps:$4 sm:$0xff]   ;;  %v16458_v20 = vld [vmem:[%s18036_s12 + $0x28c] ss:$16 sps:$4 sm:$0xff]   ;;  %v6648_v59 = vunpack.c.h.b16 %v5497_v24 }
 0x286   : > { %12004 = vmatprep.subr.bf16.mxu0 %v16443_v14  ;;  %12332 = vmatprep.subr.bf16.mxu1 %v16446_v46  ;;  %v15721_v14 = vunpack.c.l.bf16 %v16162_v16  ;;  %v19037_v46 = vpack.c.bf16 %v5153_v25, %v5152_v43  ;;  %v5155_v4 = vmul.f32 0.015625, %v4254_v37  ;;  %v16461_v25 = vld [vmem:[%s18036_s12 + $0x2a4] ss:$16 sps:$4 sm:$0xff]   ;;  %v5154_v37 = vmul.f32 0.015625, %v18998_v5 }
 0x287   : > { %v16037_v16 = vld [vmem:[%s18038_s13 + $0x1f8] sm:$0xff]   ;;  %v15689_v43 = vunpack.c.l.bf16 %v19029_v39  ;;  %v6647_v39 = vunpack.c.l.b16 %v5497_v24 }
 0x288   : > { %4406 = vadd.xlane.f32.xlu1 %v4405_v56  ;;  %4457 = vadd.xlane.f32.xlu0 %v4456_v33  ;;  %v19021_v51 = vpop.xlane.xlu1 %4256  ;;  %v5137_v56 = vmul.f32 0.015625, %v4200_v11  ;;  %v16453_v33 = vld [vmem:[%s18036_s12 + $0x280] ss:$16 sps:$4 sm:$0xff]   ;;  %v3712_v11 = vsel %vm3336_vm0, %v15218_v45, 0.0  ;;  %v6665_v40 = vunpack.c.l.b16 %v19037_v46  ;;  %v15222_v8 = vunpack.c.h.bf16 %v16037_v16 }
 0x289   : > { %v4206_v31 = vpop.xlane.xlu0 %4205  ;;  %12005 = vmatpush1.bf16.msra.mxu0 %v16441_v41  ;;  %12333 = vmatpush1.bf16.msra.mxu1 %v16444_v2  ;;  %v16456_v41 = vld [vmem:[%s18036_s12 + $0x288] ss:$16 sps:$4 sm:$0xff]   ;;  %v4462_v2 = vsel %vm3336_vm0, %v15718_v55, 0.0  ;;  %v19058_v55 = vsel %vm3336_vm0, %v15721_v14, 0.0 }
 0x28a   : > { %12006 = vmatprep.subr.bf16.mxu0 %v16449_v15  ;;  %12334 = vmatprep.subr.bf16.mxu1 %v16452_v60  ;;  %v6663_v15 = vunpack.c.l.b16 %v5505_v38  ;;  %v6664_v60 = vunpack.c.h.b16 %v5505_v38  ;;  %v19064_v45 = vpack.c.bf16 %v5137_v56, %v5136_v26  ;;  %v19069_v38 = vsel %vm3336_vm0, %v15690_v63, 0.0  ;;  %v16459_v56 = vld [vmem:[%s18036_s12 + $0x2a0] ss:$16 sps:$4 sm:$0xff]   ;;  %v16470_v26 = vld [vmem:[%s18036_s12 + $0x2cc] ss:$16 sps:$4 sm:$0xff]  }
 0x28b   : > { %v15726_v63 = vunpack.c.h.bf16 %v19061_v54 }
 0x28c   : > { %4460 = vadd.xlane.f32.xlu1 %v4459_v3  ;;  %4409 = vadd.xlane.f32.xlu0 %v4408_v0  ;;  %v19039_v34 = vpop.xlane.xlu1 %4208  ;;  %v16464_v3 = vld [vmem:[%s18036_s12 + $0x2ac] ss:$16 sps:$4 sm:$0xff]   ;;  %v19055_v0 = vsel %vm3336_vm0, %v15722_v9, 0.0  ;;  %v8387_v9 = vrot.slane %v6664_v60, %v18181_v19 }
 0x28d   : > { %v4260_v57 = vpop.xlane.xlu0 %4259  ;;  %12007 = vmatpush1.bf16.msra.mxu0 %v16447_v1  ;;  %12335 = vmatpush1.bf16.msra.mxu1 %v16450_v42  ;;  %v19072_v1 = vpack.c.bf16 %v5155_v4, %v5154_v37  ;;  %v5139_v42 = vmul.f32 0.015625, %v4206_v31  ;;  %v6666_v31 = vunpack.c.h.b16 %v19037_v46  ;;  %v5138_v4 = vmul.f32 0.015625, %v19009_v61  ;;  %v16468_v37 = vld [vmem:[%s18036_s12 + $0x2c8] ss:$16 sps:$4 sm:$0xff]  }
 0x28e   : > { %12008 = vmatprep.subr.bf16.mxu0 %v16455_v36  ;;  %12336 = vmatprep.subr.bf16.mxu1 %v16458_v20  ;;  %v15221_v36 = vunpack.c.l.bf16 %v16037_v16  ;;  %v8383_v20 = vrot.slane %v6663_v15, %v18169_v7  ;;  %v5157_v14 = vmul.f32 0.015625, %v4260_v57  ;;  %v8392_v15 = vrot.slane %v6665_v40, %v18174_v12 }
 0x28f   : > { %v5156_v57 = vmul.f32 0.015625, %v19021_v51  ;;  %v4417_v46 = vsel %vm3336_vm0, %v15689_v43, 0.0  ;;  %v6667_v61 = vunpack.c.l.b16 %v19072_v1  ;;  %v19090_v60 = vpack.c.bf16 %v5139_v42, %v5138_v4 }
 0x290   : > { %4412 = vadd.xlane.f32.xlu1 %v4411_v18  ;;  %4463 = vadd.xlane.f32.xlu0 %v4462_v2  ;;  %v19066_v5 = vpop.xlane.xlu1 %4262  ;;  %v16462_v18 = vld [vmem:[%s18036_s12 + $0x2a8] ss:$16 sps:$4 sm:$0xff]   ;;  %v16467_v2 = vld [vmem:[%s18036_s12 + $0x2c4] ss:$16 sps:$4 sm:$0xff]   ;;  %v19093_v16 = vsel %vm3336_vm0, %v15222_v8, 0.0  ;;  %v19096_v24 = vsel %vm3336_vm0, %v15221_v36, 0.0  ;;  %v8388_v51 = vsel %vm6878_vm1, %v8387_v9, %v8383_v20  ;;  %v15725_v40 = vunpack.c.l.bf16 %v19061_v54 }
 0x291   : > { %v4212_v35 = vpop.xlane.xlu0 %4211  ;;  %12009 = vmatpush1.bf16.msra.mxu0 %v16453_v33  ;;  %12337 = vmatpush1.bf16.msra.mxu1 %v16456_v41  ;;  %v6649_v33 = vunpack.c.l.b16 %v19064_v45  ;;  %v8304_v43 = vrot.slane %v6647_v39, %v18169_v7  ;;  %v8308_v42 = vrot.slane %v6648_v59, %v18181_v19  ;;  %v8397_v8 = vrot.slane %v6666_v31, %v18177_v13  ;;  %v16473_v20 = vld [vmem:[%s18036_s12 + $0x2e4] ss:$16 sps:$4 sm:$0xff]   ;;  %v16476_v9 = vld [vmem:[%s18036_s12 + $0x2ec] ss:$16 sps:$4 sm:$0xff]  }
 0x292   : > { %12010 = vmatprep.subr.bf16.mxu0 %v16461_v25  ;;  %12338 = vmatprep.subr.bf16.mxu1 %v16464_v3  ;;  %v19104_v3 = vsel %vm3336_vm0, %v15726_v63, 0.0  ;;  %v5141_v36 = vmul.f32 0.015625, %v4212_v35  ;;  %v6668_v35 = vunpack.c.h.b16 %v19072_v1  ;;  %v8402_v59 = vrot.slane %v6667_v61, %v18185_v22 }
 0x293   : > { %v8313_v54 = vrot.slane %v6649_v33, %v18174_v12  ;;  %v6651_v31 = vunpack.c.l.b16 %v19090_v60  ;;  %v5140_v4 = vmul.f32 0.015625, %v19039_v34  ;;  %v8309_v33 = vsel %vm6878_vm1, %v8308_v42, %v8304_v43  ;;  %v16479_v34 = vld [vmem:[%s18036_s12 + $0x304] ss:$16 sps:$4 sm:$0xff]  }
 0x294   : > { %3713 = vadd.xlane.f32.xlu1 %v3712_v11  ;;  %4415 = vadd.xlane.f32.xlu0 %v4414_v10  ;;  %v19086_v41 = vpop.xlane.xlu1 %4214  ;;  %v19099_v11 = vpack.c.bf16 %v5157_v14, %v5156_v57  ;;  %v16465_v10 = vld [vmem:[%s18036_s12 + $0x2c0] ss:$16 sps:$4 sm:$0xff]  }
 0x295   : > { %v4266_v25 = vpop.xlane.xlu0 %4265  ;;  %12011 = vmatpush1.bf16.msra.mxu0 %v16459_v56  ;;  %12339 = vmatpush1.bf16.msra.mxu1 %v16462_v18  ;;  %v16155_v14 = vld [vmem:[%s18038_s13 + $0x5a8] sm:$0xff]   ;;  %v8393_v56 = vsel %vm6885_vm2, %v8392_v15, %v8388_v51  ;;  %v6650_v18 = vunpack.c.h.b16 %v19064_v45  ;;  %v19127_v15 = vsel %vm3336_vm0, %v15725_v40, 0.0  ;;  %v19131_v61 = vpack.c.bf16 %v5141_v36, %v5140_v4 }
 0x296   : > { %12012 = vmatprep.subr.bf16.mxu0 %v16467_v2  ;;  %12340 = vmatprep.subr.bf16.mxu1 %v16470_v26  ;;  %v5159_v63 = vmul.f32 0.015625, %v4266_v25  ;;  %v6669_v2 = vunpack.c.l.b16 %v19099_v11  ;;  %v5158_v26 = vmul.f32 0.015625, %v19066_v5  ;;  %v15694_v1 = vunpack.c.h.bf16 %v16155_v14  ;;  %v16482_v5 = vld [vmem:[%s18036_s12 + $0x30c] ss:$16 sps:$4 sm:$0xff]  }
 0x297   : > { %v8398_v57 = vsel %vm22199_vm3, %v8397_v8, %v8393_v56  ;;  %v15693_v25 = vunpack.c.l.bf16 %v16155_v14  ;;  %v8314_v51 = vsel %vm6885_vm2, %v8313_v54, %v8309_v33  ;;  %v8407_v8 = vrot.slane %v6668_v35, %v18188_v23  ;;  %v16477_v14 = vld [vmem:[%s18036_s12 + $0x300] ss:$16 sps:$4 sm:$0xff]   ;;  %v16046_v56 = vld [vmem:[%s18038_s13 + $0x240] sm:$0xff]  }
 0x298   : > { %4469 = vadd.xlane.f32.xlu1 %v19055_v0  ;;  %4466 = vadd.xlane.f32.xlu0 %v19058_v55  ;;  %v4269_v39 = vpop.xlane.xlu1 %4268  ;;  %v16471_v0 = vld [vmem:[%s18036_s12 + $0x2e0] ss:$16 sps:$4 sm:$0xff]   ;;  %v16474_v55 = vld [vmem:[%s18036_s12 + $0x2e8] ss:$16 sps:$4 sm:$0xff]   ;;  %v8403_v42 = vsel %vm22185_vm4, %v8402_v59, %v8398_v57  ;;  %v6652_v36 = vunpack.c.h.b16 %v19090_v60  ;;  %v16485_v59 = vld [vmem:[%s18036_s12 + $0x324] ss:$16 sps:$4 sm:$0xff]   ;;  %v6653_v35 = vunpack.c.l.b16 %v19131_v61 }
 0x299   : > { %v4218_v45 = vpop.xlane.xlu0 %4217  ;;  %12013 = vmatpush1.bf16.msra.mxu0 %v16465_v10  ;;  %12341 = vmatpush1.bf16.msra.mxu1 %v16468_v37  ;;  %v8318_v10 = vrot.slane %v6650_v18, %v18177_v13  ;;  %v19137_v37 = vpack.c.bf16 %v5159_v63, %v5158_v26  ;;  %v6670_v18 = vunpack.c.h.b16 %v19099_v11  ;;  %v16480_v63 = vld [vmem:[%s18036_s12 + $0x308] ss:$16 sps:$4 sm:$0xff]   ;;  %v5160_v60 = vmul.f32 0.015625, %v4269_v39 }
 0x29a   : > { %12014 = vmatprep.subr.bf16.mxu0 %v16473_v20  ;;  %12342 = vmatprep.subr.bf16.mxu1 %v16476_v9  ;;  %v5143_v40 = vmul.f32 0.015625, %v4218_v45  ;;  %v8323_v20 = vrot.slane %v6651_v31, %v18185_v22  ;;  %v16488_v31 = vld [vmem:[%s18036_s12 + $0x32c] ss:$16 sps:$4 sm:$0xff]   ;;  %v19154_v4 = vsel %vm3336_vm0, %v15694_v1, 0.0  ;;  %v19157_v11 = vsel %vm3336_vm0, %v15693_v25, 0.0 }
 0x29b   : > { %v6671_v45 = vunpack.c.l.b16 %v19137_v37  ;;  %v15257_v26 = vunpack.c.l.bf16 %v16046_v56  ;;  %v8328_v1 = vrot.slane %v6652_v36, %v18188_v23  ;;  %v16483_v25 = vld [vmem:[%s18036_s12 + $0x320] ss:$16 sps:$4 sm:$0xff]  }
 0x29c   : > { %4421 = vadd.xlane.f32.xlu1 %v19069_v38  ;;  %4418 = vadd.xlane.f32.xlu0 %v4417_v46  ;;  %v4221_v43 = vpop.xlane.xlu1 %4220  ;;  %v8412_v38 = vrot.slane %v6669_v2, %v18194_v29  ;;  %v5142_v46 = vmul.f32 0.015625, %v19086_v41  ;;  %v15258_v2 = vunpack.c.h.bf16 %v16046_v56 }
 0x29d   : > { %v4272_v9 = vpop.xlane.xlu0 %4271  ;;  %12015 = vmatpush1.bf16.msra.mxu0 %v16471_v0  ;;  %12343 = vmatpush1.bf16.msra.mxu1 %v16474_v55  ;;  %v8319_v0 = vsel %vm22199_vm3, %v8318_v10, %v8314_v51  ;;  %v8408_v55 = vsel %vm22184_vm5, %v8407_v8, %v8403_v42  ;;  %v16486_v51 = vld [vmem:[%s18036_s12 + $0x328] ss:$16 sps:$4 sm:$0xff]   ;;  %v8333_v42 = vrot.slane %v6653_v35, %v18194_v29  ;;  %v6672_v8 = vunpack.c.h.b16 %v19137_v37 }
 0x29e   : > { %v5161_v54 = vmul.f32 0.015625, %v4272_v9  ;;  %12016 = vmatprep.subr.bf16.mxu0 %v16479_v34  ;;  %12344 = vmatprep.subr.bf16.mxu1 %v16482_v5  ;;  %v19160_v41 = vpack.c.bf16 %v5143_v40, %v5142_v46  ;;  %v8417_v34 = vrot.slane %v6670_v18, %v18197_v32  ;;  %v16172_v10 = vld [vmem:[%s18038_s13 + $0x630] sm:$0xff]   ;;  %v6654_v40 = vunpack.c.h.b16 %v19131_v61 }
 0x29f   : > { %v5144_v36 = vmul.f32 0.015625, %v4221_v43  ;;  %v16494_v9 = vld [vmem:[%s18036_s12 + $0x34c] ss:$16 sps:$4 sm:$0xff]   ;;  %v8422_v56 = vrot.slane %v6671_v45, %v18208_v52  ;;  %v3772_v18 = vsel %vm3336_vm0, %v15258_v2, 0.0  ;;  %v3769_v37 = vsel %vm3336_vm0, %v15257_v26, 0.0 }
 0x2a0   : > { %3719 = vadd.xlane.f32.xlu1 %v19093_v16  ;;  %3716 = vadd.xlane.f32.xlu0 %v19096_v24  ;;  %v4275_v39 = vpop.xlane.xlu1 %4274  ;;  %v19167_v33 = vpack.c.bf16 %v5161_v54, %v5160_v60  ;;  %v8324_v16 = vsel %vm22185_vm4, %v8323_v20, %v8319_v0  ;;  %v8413_v24 = vsel %vm22183_vm6, %v8412_v38, %v8408_v55  ;;  %v16491_v20 = vld [vmem:[%s18036_s12 + $0x344] ss:$16 sps:$4 sm:$0xff]   ;;  %v15762_v54 = vunpack.c.h.bf16 %v16172_v10  ;;  %v16489_v60 = vld [vmem:[%s18036_s12 + $0x340] ss:$16 sps:$4 sm:$0xff]  }
 0x2a1   : > { %v4224_v57 = vpop.xlane.xlu0 %4223  ;;  %12017 = vmatpush1.bf16.msra.mxu0 %v16477_v14  ;;  %12345 = vmatpush1.bf16.msra.mxu1 %v16480_v63  ;;  %v6655_v14 = vunpack.c.l.b16 %v19160_v41  ;;  %v15761_v63 = vunpack.c.l.bf16 %v16172_v10  ;;  %v8338_v2 = vrot.slane %v6654_v40, %v18197_v32  ;;  %v8427_v26 = vrot.slane %v6672_v8, %v18211_v53  ;;  %v16497_v55 = vld [vmem:[%s18036_s12 + $0x364] ss:$16 sps:$4 sm:$0xff]   ;;  %v16495_v8 = vld [vmem:[%s18036_s12 + $0x360] ss:$16 sps:$4 sm:$0xff]  }
 0x2a2   : > { %v5145_v5 = vmul.f32 0.015625, %v4224_v57  ;;  %12018 = vmatprep.subr.bf16.mxu0 %v16485_v59  ;;  %12346 = vmatprep.subr.bf16.mxu1 %v16488_v31  ;;  %v6673_v43 = vunpack.c.l.b16 %v19167_v33  ;;  %v5162_v59 = vmul.f32 0.015625, %v4275_v39  ;;  %v16492_v31 = vld [vmem:[%s18036_s12 + $0x348] ss:$16 sps:$4 sm:$0xff]   ;;  %v6656_v0 = vunpack.c.h.b16 %v19160_v41 }
 0x2a3   : > { %v16038_v57 = vld [vmem:[%s18038_s13 + $0x200] sm:$0xff]   ;;  %v4528_v10 = vsel %vm3336_vm0, %v15762_v54, 0.0  ;;  %v4525_v40 = vsel %vm3336_vm0, %v15761_v63, 0.0 }
 0x2a4   : > { %4475 = vadd.xlane.f32.xlu1 %v19104_v3  ;;  %4472 = vadd.xlane.f32.xlu0 %v19127_v15  ;;  %v4227_v61 = vpop.xlane.xlu1 %4226  ;;  %v19187_v38 = vpack.c.bf16 %v5145_v5, %v5144_v36  ;;  %v8329_v3 = vsel %vm22184_vm5, %v8328_v1, %v8324_v16  ;;  %v8418_v15 = vsel %vm22168_vm7, %v8417_v34, %v8413_v24  ;;  %v16500_v1 = vld [vmem:[%s18036_s12 + $0x36c] ss:$16 sps:$4 sm:$0xff]   ;;  %v6674_v24 = vunpack.c.h.b16 %v19167_v33 }
 0x2a5   : > { %v4278_v46 = vpop.xlane.xlu0 %4277  ;;  %12019 = vmatpush1.bf16.msra.mxu0 %v16483_v25  ;;  %12347 = vmatpush1.bf16.msra.mxu1 %v16486_v51  ;;  %v8334_v45 = vsel %vm22183_vm6, %v8333_v42, %v8329_v3  ;;  %v8423_v39 = vsel %vm6927_vm8, %v8422_v56, %v8418_v15  ;;  %v8343_v16 = vrot.slane %v6655_v14, %v18208_v52  ;;  %v5146_v33 = vmul.f32 0.015625, %v4227_v61  ;;  %v16503_v14 = vld [vmem:[%s18036_s12 + $0x384] ss:$16 sps:$4 sm:$0xff]   ;;  %v16506_v61 = vld [vmem:[%s18036_s12 + $0x38c] ss:$16 sps:$4 sm:$0xff]  }
 0x2a6   : > { %v5163_v35 = vmul.f32 0.015625, %v4278_v46  ;;  %12020 = vmatprep.subr.bf16.mxu0 %v16491_v20  ;;  %12348 = vmatprep.subr.bf16.mxu1 %v16494_v9  ;;  %v8432_v5 = vrot.slane %v6673_v43, %v18226_v21  ;;  %v6657_v25 = vunpack.c.l.b16 %v19187_v38  ;;  %v15226_v36 = vunpack.c.h.bf16 %v16038_v57 }
 0x2a7   : > { %v8339_v20 = vsel %vm22168_vm7, %v8338_v2, %v8334_v45  ;;  %v8428_v9 = vsel %vm6934_vm9, %v8427_v26, %v8423_v39  ;;  %v8348_v56 = vrot.slane %v6656_v0, %v18211_v53  ;;  %v15225_v43 = vunpack.c.l.bf16 %v16038_v57  ;;  %v16501_v26 = vld [vmem:[%s18036_s12 + $0x380] ss:$16 sps:$4 sm:$0xff]   ;;  %v16509_v57 = vld [vmem:[%s18036_s12 + $0x3a4] ss:$16 sps:$4 sm:$0xff]   ;;  %v16512_v39 = vld [vmem:[%s18036_s12 + $0x3ac] ss:$16 sps:$4 sm:$0xff]  }
 0x2a8   : > { %v19203_v34 = vpack.c.bf16 %v5163_v35, %v5162_v59  ;;  %4427 = vadd.xlane.f32.xlu1 %v19154_v4  ;;  %4424 = vadd.xlane.f32.xlu0 %v19157_v11  ;;  %v4281_v41 = vpop.xlane.xlu1 %4280  ;;  %v16498_v11 = vld [vmem:[%s18036_s12 + $0x368] ss:$16 sps:$4 sm:$0xff]   ;;  %v8344_v46 = vsel %vm6927_vm8, %v8343_v16, %v8339_v20  ;;  %v8437_v54 = vrot.slane %v6674_v24, %v18239_v44  ;;  %v6658_v63 = vunpack.c.h.b16 %v19187_v38  ;;  %v16047_v59 = vld [vmem:[%s18038_s13 + $0x248] sm:$0xff]  }
 0x2a9   : > { %v4230_v51 = vpop.xlane.xlu0 %4229  ;;  %12021 = vmatpush1.bf16.msra.mxu0 %v16489_v60  ;;  %12349 = vmatpush1.bf16.msra.mxu1 %v16492_v31  ;;  %vm22212_vm7 = vcmask 720512   ;;  %v8353_v60 = vrot.slane %v6657_v25, %v18226_v21  ;;  %v5164_v38 = vmul.f32 0.015625, %v4281_v41  ;;  %v3721_v16 = vsel %vm3336_vm0, %v15225_v43, 0.0  ;;  %v16515_v43 = vld [vmem:[%s18036_s12 + $0x3c4] ss:$16 sps:$4 sm:$0xff]  }
 0x2aa   : > { %v6675_v42 = vunpack.c.l.b16 %v19203_v34  ;;  %v5147_v4 = vmul.f32 0.015625, %v4230_v51  ;;  %12022 = vmatprep.subr.bf16.mxu0 %v16497_v55  ;;  %12350 = vmatprep.subr.bf16.mxu1 %v16500_v1  ;;  %v8433_v35 = vsel %vm22212_vm7, %v8432_v5, %v8428_v9  ;;  %v6676_v31 = vunpack.c.h.b16 %v19203_v34  ;;  %v16507_v9 = vld [vmem:[%s18036_s12 + $0x3a0] ss:$16 sps:$4 sm:$0xff]  }
 0x2ab   : > { %v8349_v55 = vsel %vm6934_vm9, %v8348_v56, %v8344_v46  ;;  %v15262_v24 = vunpack.c.h.bf16 %v16047_v59  ;;  %v8438_v34 = vsel %vm6948_vm11, %v8437_v54, %v8433_v35  ;;  %v8358_v41 = vrot.slane %v6658_v63, %v18239_v44  ;;  %v16510_v56 = vld [vmem:[%s18036_s12 + $0x3a8] ss:$16 sps:$4 sm:$0xff]   ;;  %v16518_v46 = vld [vmem:[%s18036_s12 + $0x3cc] ss:$16 sps:$4 sm:$0xff]  }
 0x2ac   : > { %v19222_v3 = vpack.c.bf16 %v5147_v4, %v5146_v33  ;;  %3773 = vadd.xlane.f32.xlu1 %v3772_v18  ;;  %3770 = vadd.xlane.f32.xlu0 %v3769_v37  ;;  %v4233_v15 = vpop.xlane.xlu1 %4232  ;;  %v8442_v45 = vrot.slane %v6675_v42, %v18245_v49  ;;  %v16504_v18 = vld [vmem:[%s18036_s12 + $0x388] ss:$16 sps:$4 sm:$0xff]   ;;  %v3724_v37 = vsel %vm3336_vm0, %v15226_v36, 0.0  ;;  %v15261_v51 = vunpack.c.l.bf16 %v16047_v59 }
 0x2ad   : > { %v4284_v2 = vpop.xlane.xlu0 %4283  ;;  %12023 = vmatpush1.bf16.msra.mxu0 %v16495_v8  ;;  %12351 = vmatpush1.bf16.msra.mxu1 %v16498_v11  ;;  %v8354_v33 = vsel %vm22212_vm7, %v8353_v60, %v8349_v55  ;;  %v8447_v4 = vrot.slane %v6676_v31, %v18255_v6  ;;  %v5148_v8 = vmul.f32 0.015625, %v4233_v15  ;;  %v3778_v54 = vsel %vm3336_vm0, %v15262_v24, 0.0  ;;  %v16516_v55 = vld [vmem:[%s18036_s12 + $0x3c8] ss:$16 sps:$4 sm:$0xff]   ;;  %v16524_v24 = vld [vmem:[%s18036_s12 + $0x3ec] ss:$16 sps:$4 sm:$0xff]  }
 0x2ae   : > { %v5165_v0 = vmul.f32 0.015625, %v4284_v2  ;;  %v6659_v1 = vunpack.c.l.b16 %v19222_v3  ;;  %12024 = vmatprep.subr.bf16.mxu0 %v16503_v14  ;;  %12352 = vmatprep.subr.bf16.mxu1 %v16506_v61  ;;  %v8443_v42 = vsel %vm6955_vm12, %v8442_v45, %v8438_v34  ;;  %v6660_v36 = vunpack.c.h.b16 %v19222_v3  ;;  %v16164_v14 = vld [vmem:[%s18038_s13 + $0x5f0] sm:$0xff]   ;;  %v16173_v34 = vld [vmem:[%s18038_s13 + $0x638] sm:$0xff]  }
 0x2af   : > { %v3775_v35 = vsel %vm3336_vm0, %v15261_v51, 0.0  ;;  %v8359_v60 = vsel %vm6948_vm11, %v8358_v41, %v8354_v33  ;;  %v8448_v45 = vsel %vm6962_vm13, %v8447_v4, %v8443_v42  ;;  %v15730_v2 = vunpack.c.h.bf16 %v16164_v14 }
 0x2b0   : > { %v5512_v5 = vpack.c.bf16 %v5165_v0, %v5164_v38  ;;  %4529 = vadd.xlane.f32.xlu1 %v4528_v10  ;;  %4526 = vadd.xlane.f32.xlu0 %v4525_v40  ;;  %v19239_v25 = vpop.xlane.xlu1 %4334  ;;  %v8363_v61 = vrot.slane %v6659_v1, %v18245_v49  ;;  %v8368_v38 = vrot.slane %v6660_v36, %v18255_v6  ;;  %v16519_v36 = vld [vmem:[%s18036_s12 + $0x3e0] ss:$16 sps:$4 sm:$0xff]   ;;  %vm22213_vm7 = vcmask 523712  }
 0x2b1   : > { %v4236_v11 = vpop.xlane.xlu0 %4235  ;;  %12025 = vmatpush1.bf16.msra.mxu0 %v16501_v26  ;;  %12353 = vmatpush1.bf16.msra.mxu1 %v16504_v18  ;;  %v15729_v26 = vunpack.c.l.bf16 %v16164_v14  ;;  %v4480_v4 = vsel %vm3336_vm0, %v15730_v2, 0.0  ;;  %v16527_v14 = vld [vmem:[%s18036_s12 + $0x404] ss:$16 sps:$4 sm:$0xff]   ;;  %v16525_v2 = vld [vmem:[%s18036_s12 + $0x400] ss:$16 sps:$4 sm:$0xff]  }
 0x2b2   : > { %v6677_v20 = vunpack.c.l.b16 %v5512_v5  ;;  %v6678_v10 = vunpack.c.h.b16 %v5512_v5  ;;  %v5149_v40 = vmul.f32 0.015625, %v4236_v11  ;;  %12026 = vmatprep.subr.bf16.mxu0 %v16509_v57  ;;  %12354 = vmatprep.subr.bf16.mxu1 %v16512_v39  ;;  %v8364_v57 = vsel %vm6955_vm12, %v8363_v61, %v8359_v60  ;;  %v16521_v39 = vld [vmem:[%s18036_s12 + $0x3e4] ss:$16 sps:$4 sm:$0xff]  }
 0x2b3   : > { %v8369_v11 = vsel %vm6962_vm13, %v8368_v38, %v8364_v57  ;;  %v16039_v61 = vld [vmem:[%s18038_s13 + $0x208] sm:$0xff]   ;;  %v16165_v60 = vld [vmem:[%s18038_s13 + $0x5f8] sm:$0xff]  }
 0x2b4   : > { %v8452_v63 = vrot.slane %v6677_v20, %v18264_v28  ;;  %v8457_v3 = vrot.slane %v6678_v10, %v18267_v30  ;;  %v5504_v15 = vpack.c.bf16 %v5149_v40, %v5148_v8  ;;  %3725 = vadd.xlane.f32.xlu1 %v3724_v37  ;;  %3722 = vadd.xlane.f32.xlu0 %v3721_v16  ;;  %v19254_v59 = vpop.xlane.xlu1 %4286  ;;  %v16513_v37 = vld [vmem:[%s18036_s12 + $0x3c0] ss:$16 sps:$4 sm:$0xff]   ;;  %v4477_v8 = vsel %vm3336_vm0, %v15729_v26, 0.0  ;;  %v16522_v10 = vld [vmem:[%s18036_s12 + $0x3e8] ss:$16 sps:$4 sm:$0xff]  }
 0x2b5   : > { %v19258_v31 = vpop.xlane.xlu0 %4337  ;;  %12027 = vmatpush1.bf16.msra.mxu0 %v16507_v9  ;;  %12355 = vmatpush1.bf16.msra.mxu1 %v16510_v56  ;;  %v15766_v40 = vunpack.c.h.bf16 %v16173_v34  ;;  %v15765_v9 = vunpack.c.l.bf16 %v16173_v34  ;;  %v16528_v26 = vld [vmem:[%s18036_s12 + $0x408] ss:$16 sps:$4 sm:$0xff]  }
 0x2b6   : > { %v6661_v0 = vunpack.c.l.b16 %v5504_v15  ;;  %v6662_v18 = vunpack.c.h.b16 %v5504_v15  ;;  %v8453_v1 = vsel %vm6969_vm14, %v8452_v63, %v8448_v45  ;;  %12028 = vmatprep.subr.bf16.mxu0 %v16515_v43  ;;  %12356 = vmatprep.subr.bf16.mxu1 %v16518_v46  ;;  %v15230_v15 = vunpack.c.h.bf16 %v16039_v61  ;;  %v16048_v34 = vld [vmem:[%s18038_s13 + $0x250] sm:$0xff]  }
 0x2b7   : > { %v8458_v16 = vsel %vm6976_vm15, %v8457_v3, %v8453_v1  ;;  %v4534_v63 = vsel %vm3336_vm0, %v15766_v40, 0.0  ;;  %v4531_v3 = vsel %vm3336_vm0, %v15765_v9, 0.0  ;;  %v15734_v1 = vunpack.c.h.bf16 %v16165_v60  ;;  %v16040_v9 = vld [vmem:[%s18038_s13 + $0x210] sm:$0xff]  }
 0x2b8   : > { %v8373_v41 = vrot.slane %v6661_v0, %v18264_v28  ;;  %3779 = vadd.xlane.f32.xlu1 %v3778_v54  ;;  %3776 = vadd.xlane.f32.xlu0 %v3775_v35  ;;  %v19271_v5 = vpop.xlane.xlu1 %4340  ;;  %v8378_v51 = vrot.slane %v6662_v18, %v18267_v30  ;;  %v9391_v42 = vsel %vm9387_vm10, %v8458_v16, %v18473_v58  ;;  %v16530_v58 = vld [vmem:[%s18036_s12 + $0x40c] ss:$16 sps:$4 sm:$0xff]   ;;  %v15229_v35 = vunpack.c.l.bf16 %v16039_v61  ;;  %v16533_v18 = vld [vmem:[%s18036_s12 + $0x424] ss:$16 sps:$4 sm:$0xff]   ;;  %v16531_v16 = vld [vmem:[%s18036_s12 + $0x420] ss:$16 sps:$4 sm:$0xff]  }
 0x2b9   : > { %v19274_v33 = vpop.xlane.xlu0 %4289  ;;  %12029 = vmatpush1.bf16.msra.mxu0 %v16513_v37  ;;  %12357 = vmatpush1.bf16.msra.mxu1 %v16516_v55  ;;  %v9407_v20 = vpack.c.b16 %v9391_v42, %v9391_v42  ;;  %v16536_v37 = vld [vmem:[%s18036_s12 + $0x42c] ss:$16 sps:$4 sm:$0xff]   ;;  %v15265_v40 = vunpack.c.l.bf16 %v16048_v34  ;;  %v5182_v61 = vmul.f32 0.015625, %v19239_v25 }
 0x2ba   : > { %12030 = vmatprep.subr.bf16.mxu0 %v16521_v39  ;;  %12358 = vmatprep.subr.bf16.mxu1 %v16524_v24  ;;  %v8374_v56 = vsel %vm6969_vm14, %v8373_v41, %v8369_v11  ;;  %v3727_v57 = vsel %vm3336_vm0, %v15229_v35, 0.0  ;;  %v15733_v39 = vunpack.c.l.bf16 %v16165_v60  ;;  %v16534_v24 = vld [vmem:[%s18036_s12 + $0x428] ss:$16 sps:$4 sm:$0xff]   ;;  %v16542_v42 = vld [vmem:[%s18036_s12 + $0x44c] ss:$16 sps:$4 sm:$0xff]  }
 0x2bb   : > { %12032 = vmatprep.mubr.bf16.mxu0 %v9407_v20  ;;  %12360 = vmatprep.mubr.bf16.mxu1 %v9407_v20  ;;  %v8379_v54 = vsel %vm6976_vm15, %v8378_v51, %v8374_v56  ;;  %v16539_v51 = vld [vmem:[%s18036_s12 + $0x444] ss:$16 sps:$4 sm:$0xff]   ;;  %v16174_v11 = vld [vmem:[%s18038_s13 + $0x640] sm:$0xff]   ;;  %v16537_v56 = vld [vmem:[%s18036_s12 + $0x440] ss:$16 sps:$4 sm:$0xff]  }
 0x2bc   : > { %v19287_v43 = vpop.xlane.xlu1 %4292  ;;  %4481 = vadd.xlane.f32.xlu1 %v4480_v4  ;;  %4478 = vadd.xlane.f32.xlu0 %v4477_v8  ;;  %v9390_v45 = vsel %vm9387_vm10, %v8379_v54, %v18400_v48  ;;  %v3730_v48 = vsel %vm3336_vm0, %v15230_v15, 0.0  ;;  %v4486_v8 = vsel %vm3336_vm0, %v15734_v1, 0.0  ;;  %v4483_v20 = vsel %vm3336_vm0, %v15733_v39, 0.0  ;;  %v16166_v15 = vld [vmem:[%s18038_s13 + $0x600] sm:$0xff]  }
 0x2bd   : > { %v4344_v46 = vpop.xlane.xlu0 %4343  ;;  %12031 = vmatpush1.bf16.msra.mxu0 %v16519_v36  ;;  %12359 = vmatpush1.bf16.msra.mxu1 %v16522_v10  ;;  %v9406_v38 = vpack.c.b16 %v9390_v45, %v9390_v45  ;;  %v5183_v36 = vmul.f32 0.015625, %v19258_v31  ;;  %v15266_v10 = vunpack.c.h.bf16 %v16048_v34  ;;  %v16548_v31 = vld [vmem:[%s18036_s12 + $0x46c] ss:$16 sps:$4 sm:$0xff]   ;;  %v15769_v60 = vunpack.c.l.bf16 %v16174_v11 }
 0x2be   : > { %12041 = vmatprep.subr.bf16.mxu0 %v16527_v14  ;;  %12369 = vmatprep.subr.bf16.mxu1 %v16530_v58  ;;  %v16540_v14 = vld [vmem:[%s18036_s12 + $0x448] ss:$16 sps:$4 sm:$0xff]   ;;  %v16545_v58 = vld [vmem:[%s18036_s12 + $0x464] ss:$16 sps:$4 sm:$0xff]   ;;  %v5185_v54 = vmul.f32 0.015625, %v4344_v46  ;;  %v15234_v45 = vunpack.c.h.bf16 %v16040_v9  ;;  %v3781_v46 = vsel %vm3336_vm0, %v15265_v40, 0.0  ;;  %v15233_v1 = vunpack.c.l.bf16 %v16040_v9 }
 0x2bf   : > { %v3784_v25 = vsel %vm3336_vm0, %v15266_v10, 0.0  ;;  %v16554_v34 = vld [vmem:[%s18036_s12 + $0x48c] ss:$16 sps:$4 sm:$0xff]   ;;  %v5168_v40 = vmul.f32 0.015625, %v19287_v43  ;;  %v16549_v9 = vld [vmem:[%s18036_s12 + $0x480] ss:$16 sps:$4 sm:$0xff]  }
 0x2c0   : > { %v19297_v0 = vpop.xlane.xlu1 %4346  ;;  %4535 = vadd.xlane.f32.xlu1 %v4534_v63  ;;  %4532 = vadd.xlane.f32.xlu0 %v4531_v3  ;;  %v15770_v3 = vunpack.c.h.bf16 %v16174_v11 }
 0x2c1   : > { %v4296_v55 = vpop.xlane.xlu0 %4295  ;;  %12033 = vmatmul.mubr.bf16.vlgmr.msra.gmra.mrb[0].mxu0 %v9406_v38  ;;  %12361 = vmatmul.mubr.bf16.vlgmr.msra.gmra.mrb[0].mxu1 %v9406_v38  ;;  %v5167_v38 = vmul.f32 0.015625, %v19274_v33 }
 0x2c2   : > { %12042 = vmatpush1.bf16.msra.mxu0 %v16525_v2  ;;  %12370 = vmatpush1.bf16.msra.mxu1 %v16528_v26  ;;  %v5521_v2 = vpack.c.bf16 %v5183_v36, %v5182_v61  ;;  %v5184_v26 = vmul.f32 0.015625, %v19271_v5  ;;  %v4540_v33 = vsel %vm3336_vm0, %v15770_v3, 0.0  ;;  %v3736_v36 = vsel %vm3336_vm0, %v15234_v45, 0.0 }
 0x2c3   : > { %12043 = vmatprep.subr.bf16.mxu0 %v16533_v18  ;;  %12371 = vmatprep.subr.bf16.mxu1 %v16536_v37  ;;  %v16543_v18 = vld [vmem:[%s18036_s12 + $0x460] ss:$16 sps:$4 sm:$0xff]   ;;  %v16546_v37 = vld [vmem:[%s18036_s12 + $0x468] ss:$16 sps:$4 sm:$0xff]   ;;  %v3733_v61 = vsel %vm3336_vm0, %v15233_v1, 0.0 }
 0x2c4   : > { %v19306_v41 = vpop.xlane.xlu1 %4298  ;;  %3731 = vadd.xlane.f32.xlu1 %v3730_v48  ;;  %3728 = vadd.xlane.f32.xlu0 %v3727_v57  ;;  %v15738_v48 = vunpack.c.h.bf16 %v16166_v15  ;;  %v19330_v57 = vld [vmem:[%s18038_s13 + $0x258] sm:$0xff]   ;;  %v19332_v39 = vpack.c.bf16 %v5185_v54, %v5184_v26  ;;  %v6696_v10 = vunpack.c.h.b16 %v5521_v2 }
 0x2c5   : > { %v4350_v4 = vpop.xlane.xlu0 %4349  ;;  %v15269_v45 = vunpack.c.l.bf16 %v19330_v57 }
 0x2c6   : > { %12044 = vmatpush1.bf16.msra.mxu0 %v16531_v16  ;;  %12372 = vmatpush1.bf16.msra.mxu1 %v16534_v24  ;;  %v5169_v16 = vmul.f32 0.015625, %v4296_v55  ;;  %v16551_v24 = vld [vmem:[%s18036_s12 + $0x484] ss:$16 sps:$4 sm:$0xff]   ;;  %v4537_v55 = vsel %vm3336_vm0, %v15769_v60, 0.0  ;;  %v19350_v54 = vsel %vm3336_vm0, %v15738_v48, 0.0 }
 0x2c7   : > { %12045 = vmatprep.subr.bf16.mxu0 %v16539_v51  ;;  %12373 = vmatprep.subr.bf16.mxu1 %v16542_v42  ;;  %v15737_v51 = vunpack.c.l.bf16 %v16166_v15  ;;  %v5166_v42 = vmul.f32 0.015625, %v19254_v59  ;;  %v16557_v15 = vld [vmem:[%s18036_s12 + $0x4a4] ss:$16 sps:$4 sm:$0xff]   ;;  %v16560_v60 = vld [vmem:[%s18036_s12 + $0x4ac] ss:$16 sps:$4 sm:$0xff]  }
 0x2c8   : > { %v19319_v63 = vpop.xlane.xlu1 %4352  ;;  %4487 = vadd.xlane.f32.xlu1 %v4486_v8  ;;  %4484 = vadd.xlane.f32.xlu0 %v4483_v20  ;;  %v5187_v8 = vmul.f32 0.015625, %v4350_v4  ;;  %v6695_v20 = vunpack.c.l.b16 %v5521_v2  ;;  %v5186_v4 = vmul.f32 0.015625, %v19297_v0  ;;  %v19353_v43 = vpack.c.bf16 %v5169_v16, %v5168_v40 }
 0x2c9   : > { %v4302_v35 = vpop.xlane.xlu0 %4301  ;;  %v5513_v59 = vpack.c.bf16 %v5167_v38, %v5166_v42  ;;  %v19360_v0 = vsel %vm3336_vm0, %v15737_v51, 0.0  ;;  %v6698_v16 = vunpack.c.h.b16 %v19332_v39  ;;  %v16041_v51 = vld [vmem:[%s18038_s13 + $0x218] sm:$0xff]  }
 0x2ca   : > { %12046 = vmatpush1.bf16.msra.mxu0 %v16537_v56  ;;  %12374 = vmatpush1.bf16.msra.mxu1 %v16540_v14  ;;  %v15270_v56 = vunpack.c.h.bf16 %v19330_v57  ;;  %v16175_v14 = vld [vmem:[%s18038_s13 + $0x648] sm:$0xff]   ;;  %v19363_v2 = vpack.c.bf16 %v5187_v8, %v5186_v4  ;;  %v5171_v26 = vmul.f32 0.015625, %v4302_v35  ;;  %v6681_v8 = vunpack.c.l.b16 %v19353_v43 }
 0x2cb   : > { %12047 = vmatprep.subr.bf16.mxu0 %v16545_v58  ;;  %12375 = vmatprep.subr.bf16.mxu1 %v16548_v31  ;;  %v16552_v58 = vld [vmem:[%s18036_s12 + $0x488] ss:$16 sps:$4 sm:$0xff]   ;;  %v6697_v31 = vunpack.c.l.b16 %v19332_v39  ;;  %v15773_v38 = vunpack.c.l.bf16 %v16175_v14  ;;  %v6679_v57 = vunpack.c.l.b16 %v5513_v59  ;;  %v6680_v35 = vunpack.c.h.b16 %v5513_v59 }
 0x2cc   : > { %v19334_v5 = vpop.xlane.xlu1 %4304  ;;  %3785 = vadd.xlane.f32.xlu1 %v3784_v25  ;;  %3782 = vadd.xlane.f32.xlu0 %v3781_v46  ;;  %v15774_v46 = vunpack.c.h.bf16 %v16175_v14  ;;  %v19368_v48 = vsel %vm3336_vm0, %v15270_v56, 0.0  ;;  %v3787_v39 = vsel %vm3336_vm0, %v15269_v45, 0.0  ;;  %v15238_v4 = vunpack.c.h.bf16 %v16041_v51  ;;  %v16564_v45 = vld [vmem:[%s18036_s12 + $0x4c8] ss:$16 sps:$4 sm:$0xff]  }
 0x2cd   : > { %v4356_v11 = vpop.xlane.xlu0 %4355  ;;  %v8550_v42 = vrot.slane %v6697_v31, %v18174_v12  ;;  %v8462_v31 = vrot.slane %v6679_v57, %v18169_v7  ;;  %v16572_v57 = vld [vmem:[%s18036_s12 + $0x4ec] ss:$16 sps:$4 sm:$0xff]  }
 0x2ce   : > { %12048 = vmatpush1.bf16.msra.mxu0 %v16543_v18  ;;  %12376 = vmatpush1.bf16.msra.mxu1 %v16546_v37  ;;  %v8541_v18 = vrot.slane %v6695_v20, %v18169_v7  ;;  %v8545_v37 = vrot.slane %v6696_v10, %v18181_v19  ;;  %v5189_v1 = vmul.f32 0.015625, %v4356_v11  ;;  %v5188_v11 = vmul.f32 0.015625, %v19319_v63  ;;  %v16563_v20 = vld [vmem:[%s18036_s12 + $0x4c4] ss:$16 sps:$4 sm:$0xff]   ;;  %v16566_v10 = vld [vmem:[%s18036_s12 + $0x4cc] ss:$16 sps:$4 sm:$0xff]  }
 0x2cf   : > { %12049 = vmatprep.subr.bf16.mxu0 %v16551_v24  ;;  %12377 = vmatprep.subr.bf16.mxu1 %v16554_v34  ;;  %v5170_v24 = vmul.f32 0.015625, %v19306_v41  ;;  %v16555_v34 = vld [vmem:[%s18036_s12 + $0x4a0] ss:$16 sps:$4 sm:$0xff]   ;;  %v6699_v41 = vunpack.c.l.b16 %v19363_v2  ;;  %v19387_v56 = vsel %vm3336_vm0, %v15774_v46, 0.0  ;;  %v19390_v63 = vsel %vm3336_vm0, %v15773_v38, 0.0 }
 0x2d0   : > { %v19355_v3 = vpop.xlane.xlu1 %4358  ;;  %4541 = vadd.xlane.f32.xlu1 %v4540_v33  ;;  %4538 = vadd.xlane.f32.xlu0 %v4537_v55  ;;  %v16558_v33 = vld [vmem:[%s18036_s12 + $0x4a8] ss:$16 sps:$4 sm:$0xff]   ;;  %v8546_v14 = vsel %vm6878_vm1, %v8545_v37, %v8541_v18  ;;  %v19393_v59 = vpack.c.bf16 %v5189_v1, %v5188_v11  ;;  %v6682_v46 = vunpack.c.h.b16 %v19353_v43  ;;  %v8471_v38 = vrot.slane %v6681_v8, %v18174_v12  ;;  %v16569_v1 = vld [vmem:[%s18036_s12 + $0x4e4] ss:$16 sps:$4 sm:$0xff]  }
 0x2d1   : > { %v4308_v25 = vpop.xlane.xlu0 %4307  ;;  %v19384_v40 = vpack.c.bf16 %v5171_v26, %v5170_v24  ;;  %v8551_v26 = vsel %vm6885_vm2, %v8550_v42, %v8546_v14  ;;  %v5172_v43 = vmul.f32 0.015625, %v19334_v5  ;;  %v19417_v42 = vsel %vm3336_vm0, %v15238_v4, 0.0  ;;  %v16570_v11 = vld [vmem:[%s18036_s12 + $0x4e8] ss:$16 sps:$4 sm:$0xff]   ;;  %v16575_v4 = vld [vmem:[%s18036_s12 + $0x504] ss:$16 sps:$4 sm:$0xff]  }
 0x2d2   : > { %12050 = vmatpush1.bf16.msra.mxu0 %v16549_v9  ;;  %12378 = vmatpush1.bf16.msra.mxu1 %v16552_v58  ;;  %v15237_v58 = vunpack.c.l.bf16 %v16041_v51  ;;  %v5190_v51 = vmul.f32 0.015625, %v19355_v3 }
 0x2d3   : > { %12051 = vmatprep.subr.bf16.mxu0 %v16557_v15  ;;  %12379 = vmatprep.subr.bf16.mxu1 %v16560_v60  ;;  %v5173_v15 = vmul.f32 0.015625, %v4308_v25  ;;  %v16561_v60 = vld [vmem:[%s18036_s12 + $0x4c0] ss:$16 sps:$4 sm:$0xff]   ;;  %v6700_v25 = vunpack.c.h.b16 %v19363_v2  ;;  %v6683_v24 = vunpack.c.l.b16 %v19384_v40 }
 0x2d4   : > { %v19378_v55 = vpop.xlane.xlu1 %4310  ;;  %3737 = vadd.xlane.f32.xlu1 %v3736_v36  ;;  %3734 = vadd.xlane.f32.xlu0 %v3733_v61  ;;  %v8466_v36 = vrot.slane %v6680_v35, %v18181_v19  ;;  %v8555_v61 = vrot.slane %v6698_v16, %v18177_v13  ;;  %v19406_v35 = vld [vmem:[%s18038_s13 + $0x608] sm:$0xff]   ;;  %v8560_v16 = vrot.slane %v6699_v41, %v18185_v22  ;;  %v19420_v2 = vsel %vm3336_vm0, %v15237_v58, 0.0  ;;  %v16578_v58 = vld [vmem:[%s18036_s12 + $0x50c] ss:$16 sps:$4 sm:$0xff]  }
 0x2d5   : > { %v4362_v9 = vpop.xlane.xlu0 %4361  ;;  %v15742_v3 = vunpack.c.h.bf16 %v19406_v35 }
 0x2d6   : > { %12052 = vmatpush1.bf16.msra.mxu0 %v16555_v34  ;;  %12380 = vmatpush1.bf16.msra.mxu1 %v16558_v33  ;;  %v5191_v18 = vmul.f32 0.015625, %v4362_v9  ;;  %v6701_v33 = vunpack.c.l.b16 %v19393_v59  ;;  %v8467_v8 = vsel %vm6878_vm1, %v8466_v36, %v8462_v31  ;;  %v8556_v5 = vsel %vm22199_vm3, %v8555_v61, %v8551_v26 }
 0x2d7   : > { %12053 = vmatprep.subr.bf16.mxu0 %v16563_v20  ;;  %12381 = vmatprep.subr.bf16.mxu1 %v16566_v10  ;;  %v8472_v20 = vsel %vm6885_vm2, %v8471_v38, %v8467_v8  ;;  %v8476_v10 = vrot.slane %v6682_v46, %v18177_v13  ;;  %v8561_v31 = vsel %vm22185_vm4, %v8560_v16, %v8556_v5  ;;  %v6684_v61 = vunpack.c.h.b16 %v19384_v40  ;;  %v16573_v40 = vld [vmem:[%s18036_s12 + $0x500] ss:$16 sps:$4 sm:$0xff]  }
 0x2d8   : > { %v4365_v37 = vpop.xlane.xlu1 %4364  ;;  %4493 = vadd.xlane.f32.xlu1 %v19350_v54  ;;  %4490 = vadd.xlane.f32.xlu0 %v19360_v0  ;;  %v19424_v54 = vpack.c.bf16 %v5173_v15, %v5172_v43  ;;  %v16567_v0 = vld [vmem:[%s18036_s12 + $0x4e0] ss:$16 sps:$4 sm:$0xff]   ;;  %v19431_v41 = vpack.c.bf16 %v5191_v18, %v5190_v51  ;;  %v8565_v36 = vrot.slane %v6700_v25, %v18188_v23  ;;  %v6702_v26 = vunpack.c.h.b16 %v19393_v59  ;;  %v16576_v25 = vld [vmem:[%s18036_s12 + $0x508] ss:$16 sps:$4 sm:$0xff]   ;;  %v16584_v43 = vld [vmem:[%s18036_s12 + $0x52c] ss:$16 sps:$4 sm:$0xff]  }
 0x2d9   : > { %v4314_v34 = vpop.xlane.xlu0 %4313  ;;  %v8481_v15 = vrot.slane %v6683_v24, %v18185_v22  ;;  %v8570_v46 = vrot.slane %v6701_v33, %v18194_v29  ;;  %v5174_v38 = vmul.f32 0.015625, %v19378_v55  ;;  %v8477_v59 = vsel %vm22199_vm3, %v8476_v10, %v8472_v20  ;;  %v19467_v10 = vld [vmem:[%s18038_s13 + $0x650] sm:$0xff]  }
 0x2da   : > { %12054 = vmatpush1.bf16.msra.mxu0 %v16561_v60  ;;  %12382 = vmatpush1.bf16.msra.mxu1 %v16564_v45  ;;  %v5175_v9 = vmul.f32 0.015625, %v4314_v34  ;;  %v16050_v45 = vld [vmem:[%s18038_s13 + $0x260] sm:$0xff]   ;;  %v6703_v16 = vunpack.c.l.b16 %v19431_v41  ;;  %v8566_v33 = vsel %vm22184_vm5, %v8565_v36, %v8561_v31  ;;  %v8486_v51 = vrot.slane %v6684_v61, %v18188_v23 }
 0x2db   : > { %12055 = vmatprep.subr.bf16.mxu0 %v16569_v1  ;;  %12383 = vmatprep.subr.bf16.mxu1 %v16572_v57  ;;  %v6685_v1 = vunpack.c.l.b16 %v19424_v54  ;;  %v5192_v57 = vmul.f32 0.015625, %v4365_v37  ;;  %v16581_v37 = vld [vmem:[%s18036_s12 + $0x524] ss:$16 sps:$4 sm:$0xff]   ;;  %v15274_v34 = vunpack.c.h.bf16 %v16050_v45  ;;  %v15273_v5 = vunpack.c.l.bf16 %v16050_v45  ;;  %v16582_v31 = vld [vmem:[%s18036_s12 + $0x528] ss:$16 sps:$4 sm:$0xff]  }
 0x2dc   : > { %v4317_v14 = vpop.xlane.xlu1 %4316  ;;  %3791 = vadd.xlane.f32.xlu1 %v19368_v48  ;;  %3788 = vadd.xlane.f32.xlu0 %v3787_v39  ;;  %v19448_v48 = vsel %vm3336_vm0, %v15742_v3, 0.0  ;;  %v15741_v39 = vunpack.c.l.bf16 %v19406_v35  ;;  %v19453_v55 = vpack.c.bf16 %v5175_v9, %v5174_v38  ;;  %v8575_v3 = vrot.slane %v6702_v26, %v18197_v32  ;;  %v16590_v45 = vld [vmem:[%s18036_s12 + $0x54c] ss:$16 sps:$4 sm:$0xff]  }
 0x2dd   : > { %v4368_v60 = vpop.xlane.xlu0 %4367  ;;  %v6686_v9 = vunpack.c.h.b16 %v19424_v54  ;;  %v8580_v36 = vrot.slane %v6703_v16, %v18208_v52  ;;  %v19480_v26 = vsel %vm3336_vm0, %v15274_v34, 0.0  ;;  %v3793_v38 = vsel %vm3336_vm0, %v15273_v5, 0.0  ;;  %v16585_v16 = vld [vmem:[%s18036_s12 + $0x540] ss:$16 sps:$4 sm:$0xff]   ;;  %v16593_v5 = vld [vmem:[%s18036_s12 + $0x564] ss:$16 sps:$4 sm:$0xff]  }
 0x2de   : > { %v5193_v18 = vmul.f32 0.015625, %v4368_v60  ;;  %12056 = vmatpush1.bf16.msra.mxu0 %v16567_v0  ;;  %12384 = vmatpush1.bf16.msra.mxu1 %v16570_v11  ;;  %v8482_v0 = vsel %vm22185_vm4, %v8481_v15, %v8477_v59  ;;  %v8571_v11 = vsel %vm22183_vm6, %v8570_v46, %v8566_v33  ;;  %v6687_v61 = vunpack.c.l.b16 %v19453_v55  ;;  %v16587_v60 = vld [vmem:[%s18036_s12 + $0x544] ss:$16 sps:$4 sm:$0xff]  }
 0x2df   : > { %12057 = vmatprep.subr.bf16.mxu0 %v16575_v4  ;;  %12385 = vmatprep.subr.bf16.mxu1 %v16578_v58  ;;  %v6704_v4 = vunpack.c.h.b16 %v19431_v41  ;;  %v16579_v58 = vld [vmem:[%s18036_s12 + $0x520] ss:$16 sps:$4 sm:$0xff]   ;;  %v4495_v54 = vsel %vm3336_vm0, %v15741_v39, 0.0  ;;  %v6688_v59 = vunpack.c.h.b16 %v19453_v55 }
 0x2e0   : > { %v4371_v24 = vpop.xlane.xlu1 %4370  ;;  %v19459_v8 = vpack.c.bf16 %v5193_v18, %v5192_v57  ;;  %4547 = vadd.xlane.f32.xlu1 %v19387_v56  ;;  %4544 = vadd.xlane.f32.xlu0 %v19390_v63  ;;  %v8491_v56 = vrot.slane %v6685_v1, %v18194_v29  ;;  %v5176_v63 = vmul.f32 0.015625, %v4317_v14  ;;  %v15778_v18 = vunpack.c.h.bf16 %v19467_v10 }
 0x2e1   : > { %v4320_v35 = vpop.xlane.xlu0 %4319  ;;  %v8487_v1 = vsel %vm22184_vm5, %v8486_v51, %v8482_v0  ;;  %v8576_v57 = vsel %vm22213_vm7, %v8575_v3, %v8571_v11  ;;  %v16596_v0 = vld [vmem:[%s18036_s12 + $0x56c] ss:$16 sps:$4 sm:$0xff]  }
 0x2e2   : > { %v5177_v20 = vmul.f32 0.015625, %v4320_v35  ;;  %12058 = vmatpush1.bf16.msra.mxu0 %v16573_v40  ;;  %12386 = vmatpush1.bf16.msra.mxu1 %v16576_v25  ;;  %v6705_v41 = vunpack.c.l.b16 %v19459_v8  ;;  %v5194_v40 = vmul.f32 0.015625, %v4371_v24  ;;  %v8492_v39 = vsel %vm22183_vm6, %v8491_v56, %v8487_v1  ;;  %v16168_v1 = vld [vmem:[%s18038_s13 + $0x610] sm:$0xff]  }
 0x2e3   : > { %12059 = vmatprep.subr.bf16.mxu0 %v16581_v37  ;;  %12387 = vmatprep.subr.bf16.mxu1 %v16584_v43  ;;  %v16588_v37 = vld [vmem:[%s18036_s12 + $0x548] ss:$16 sps:$4 sm:$0xff]   ;;  %v8581_v34 = vsel %vm6927_vm8, %v8580_v36, %v8576_v57  ;;  %v8501_v24 = vrot.slane %v6687_v61, %v18208_v52  ;;  %v6706_v33 = vunpack.c.h.b16 %v19459_v8  ;;  %v15777_v8 = vunpack.c.l.bf16 %v19467_v10  ;;  %v16591_v36 = vld [vmem:[%s18036_s12 + $0x560] ss:$16 sps:$4 sm:$0xff]  }
 0x2e4   : > { %v4323_v15 = vpop.xlane.xlu1 %4322  ;;  %v19483_v14 = vpack.c.bf16 %v5177_v20, %v5176_v63  ;;  %3743 = vadd.xlane.f32.xlu1 %v19417_v42  ;;  %3740 = vadd.xlane.f32.xlu0 %v19420_v2  ;;  %v8496_v42 = vrot.slane %v6686_v9, %v18197_v32  ;;  %v8585_v2 = vrot.slane %v6704_v4, %v18211_v53  ;;  %v16042_v43 = vld [vmem:[%s18038_s13 + $0x220] sm:$0xff]   ;;  %v4552_v20 = vsel %vm3336_vm0, %v15778_v18, 0.0 }
 0x2e5   : > { %v4374_v46 = vpop.xlane.xlu0 %4373  ;;  %v8590_v55 = vrot.slane %v6705_v41, %v18226_v21  ;;  %v5178_v9 = vmul.f32 0.015625, %v4323_v15  ;;  %v15242_v63 = vunpack.c.h.bf16 %v16042_v43  ;;  %v16594_v61 = vld [vmem:[%s18036_s12 + $0x568] ss:$16 sps:$4 sm:$0xff]   ;;  %v8595_v15 = vrot.slane %v6706_v33, %v18239_v44  ;;  %v16602_v18 = vld [vmem:[%s18036_s12 + $0x58c] ss:$16 sps:$4 sm:$0xff]  }
 0x2e6   : > { %v5195_v25 = vmul.f32 0.015625, %v4374_v46  ;;  %12060 = vmatpush1.bf16.msra.mxu0 %v16579_v58  ;;  %12388 = vmatpush1.bf16.msra.mxu1 %v16582_v31  ;;  %v6689_v11 = vunpack.c.l.b16 %v19483_v14  ;;  %v8497_v58 = vsel %vm22213_vm7, %v8496_v42, %v8492_v39  ;;  %v8586_v31 = vsel %vm6934_vm9, %v8585_v2, %v8581_v34  ;;  %v16599_v46 = vld [vmem:[%s18036_s12 + $0x584] ss:$16 sps:$4 sm:$0xff]   ;;  %v16597_v34 = vld [vmem:[%s18036_s12 + $0x580] ss:$16 sps:$4 sm:$0xff]  }
 0x2e7   : > { %12061 = vmatprep.subr.bf16.mxu0 %v16587_v60  ;;  %12389 = vmatprep.subr.bf16.mxu1 %v16590_v45  ;;  %v15241_v60 = vunpack.c.l.bf16 %v16042_v43  ;;  %v8502_v10 = vsel %vm6927_vm8, %v8501_v24, %v8497_v58  ;;  %v6690_v45 = vunpack.c.h.b16 %v19483_v14  ;;  %vm22214_vm7 = vcmask 720512   ;;  %v16600_v24 = vld [vmem:[%s18036_s12 + $0x588] ss:$16 sps:$4 sm:$0xff]  }
 0x2e8   : > { %v19501_v51 = vpack.c.bf16 %v5195_v25, %v5194_v40  ;;  %v4377_v35 = vpop.xlane.xlu1 %4376  ;;  %4499 = vadd.xlane.f32.xlu1 %v19448_v48  ;;  %4496 = vadd.xlane.f32.xlu0 %v4495_v54  ;;  %v8506_v48 = vrot.slane %v6688_v59, %v18211_v53  ;;  %v8591_v57 = vsel %vm22214_vm7, %v8590_v55, %v8586_v31  ;;  %v4549_v59 = vsel %vm3336_vm0, %v15777_v8, 0.0  ;;  %v16608_v55 = vld [vmem:[%s18036_s12 + $0x5ac] ss:$16 sps:$4 sm:$0xff]  }
 0x2e9   : > { %v4326_v3 = vpop.xlane.xlu0 %4325  ;;  %v8511_v40 = vrot.slane %v6689_v11, %v18226_v21  ;;  %v5196_v42 = vmul.f32 0.015625, %v4377_v35  ;;  %v8596_v33 = vsel %vm6948_vm11, %v8595_v15, %v8591_v57  ;;  %v15745_v11 = vunpack.c.l.bf16 %v16168_v1 }
 0x2ea   : > { %v6707_v56 = vunpack.c.l.b16 %v19501_v51  ;;  %v5179_v4 = vmul.f32 0.015625, %v4326_v3  ;;  %12062 = vmatpush1.bf16.msra.mxu0 %v16585_v16  ;;  %12390 = vmatpush1.bf16.msra.mxu1 %v16588_v37  ;;  %v6708_v25 = vunpack.c.h.b16 %v19501_v51  ;;  %v3748_v16 = vsel %vm3336_vm0, %v15242_v63, 0.0 }
 0x2eb   : > { %12063 = vmatprep.subr.bf16.mxu0 %v16593_v5  ;;  %12391 = vmatprep.subr.bf16.mxu1 %v16596_v0  ;;  %v8507_v37 = vsel %vm6934_vm9, %v8506_v48, %v8502_v10  ;;  %v8516_v51 = vrot.slane %v6690_v45, %v18239_v44  ;;  %v16605_v0 = vld [vmem:[%s18036_s12 + $0x5a4] ss:$16 sps:$4 sm:$0xff]  }
 0x2ec   : > { %v19519_v54 = vpack.c.bf16 %v5179_v4, %v5178_v9  ;;  %v4329_v41 = vpop.xlane.xlu1 %4328  ;;  %v8600_v39 = vrot.slane %v6707_v56, %v18245_v49  ;;  %3797 = vadd.xlane.f32.xlu1 %v19480_v26  ;;  %3794 = vadd.xlane.f32.xlu0 %v3793_v38  ;;  %v3745_v26 = vsel %vm3336_vm0, %v15241_v60, 0.0  ;;  %v15746_v38 = vunpack.c.h.bf16 %v16168_v1  ;;  %v16606_v60 = vld [vmem:[%s18036_s12 + $0x5a8] ss:$16 sps:$4 sm:$0xff]  }
 0x2ed   : > { %v4380_v14 = vpop.xlane.xlu0 %4379  ;;  %v8512_v3 = vsel %vm22214_vm7, %v8511_v40, %v8507_v37  ;;  %v8605_v9 = vrot.slane %v6708_v25, %v18255_v6  ;;  %v5180_v56 = vmul.f32 0.015625, %v4329_v41  ;;  %v16614_v41 = vld [vmem:[%s18036_s12 + $0x5cc] ss:$16 sps:$4 sm:$0xff]   ;;  %v4501_v40 = vsel %vm3336_vm0, %v15745_v11, 0.0  ;;  %v16612_v37 = vld [vmem:[%s18036_s12 + $0x5c8] ss:$16 sps:$4 sm:$0xff]  }
 0x2ee   : > { %v5197_v2 = vmul.f32 0.015625, %v4380_v14  ;;  %v6691_v43 = vunpack.c.l.b16 %v19519_v54  ;;  %12064 = vmatpush1.bf16.msra.mxu0 %v16591_v36  ;;  %12392 = vmatpush1.bf16.msra.mxu1 %v16594_v61  ;;  %v8601_v8 = vsel %vm6955_vm12, %v8600_v39, %v8596_v33  ;;  %v6692_v63 = vunpack.c.h.b16 %v19519_v54  ;;  %v16603_v61 = vld [vmem:[%s18036_s12 + $0x5a0] ss:$16 sps:$4 sm:$0xff]   ;;  %v16611_v54 = vld [vmem:[%s18036_s12 + $0x5c4] ss:$16 sps:$4 sm:$0xff]  }
 0x2ef   : > { %12065 = vmatprep.subr.bf16.mxu0 %v16599_v46  ;;  %12393 = vmatprep.subr.bf16.mxu1 %v16602_v18  ;;  %v16051_v46 = vld [vmem:[%s18038_s13 + $0x268] sm:$0xff]   ;;  %v8517_v18 = vsel %vm6948_vm11, %v8516_v51, %v8512_v3  ;;  %v4504_v57 = vsel %vm3336_vm0, %v15746_v38, 0.0  ;;  %v8606_v25 = vsel %vm6962_vm13, %v8605_v9, %v8601_v8  ;;  %v16177_v51 = vld [vmem:[%s18038_s13 + $0x658] sm:$0xff]   ;;  %v16620_v11 = vld [vmem:[%s18036_s12 + $0x5ec] ss:$16 sps:$4 sm:$0xff]   ;;  %vm22215_vm7 = vcmask 523712  }
 0x2f0   : > { %v5528_v35 = vpack.c.bf16 %v5197_v2, %v5196_v42  ;;  %v19538_v5 = vpop.xlane.xlu1 %4430  ;;  %4553 = vadd.xlane.f32.xlu1 %v4552_v20  ;;  %4550 = vadd.xlane.f32.xlu0 %v4549_v59  ;;  %v8521_v36 = vrot.slane %v6691_v43, %v18245_v49  ;;  %v8526_v39 = vrot.slane %v6692_v63, %v18255_v6  ;;  %v16617_v33 = vld [vmem:[%s18036_s12 + $0x5e4] ss:$16 sps:$4 sm:$0xff]   ;;  %v16615_v9 = vld [vmem:[%s18036_s12 + $0x5e0] ss:$16 sps:$4 sm:$0xff]  }
 0x2f1   : > { %v4332_v4 = vpop.xlane.xlu0 %4331 }
 0x2f2   : > { %v6709_v58 = vunpack.c.l.b16 %v5528_v35  ;;  %v6710_v31 = vunpack.c.h.b16 %v5528_v35  ;;  %v5181_v48 = vmul.f32 0.015625, %v4332_v4  ;;  %12066 = vmatpush1.bf16.msra.mxu0 %v16597_v34  ;;  %12394 = vmatpush1.bf16.msra.mxu1 %v16600_v24  ;;  %v8522_v59 = vsel %vm6955_vm12, %v8521_v36, %v8517_v18  ;;  %v16623_v36 = vld [vmem:[%s18036_s12 + $0x604] ss:$16 sps:$4 sm:$0xff]  }
 0x2f3   : > { %12067 = vmatprep.subr.bf16.mxu0 %v16605_v0  ;;  %12395 = vmatprep.subr.bf16.mxu1 %v16608_v55  ;;  %v15278_v34 = vunpack.c.h.bf16 %v16051_v46  ;;  %v15277_v24 = vunpack.c.l.bf16 %v16051_v46  ;;  %v8527_v3 = vsel %vm6962_vm13, %v8526_v39, %v8522_v59 }
 0x2f4   : > { %v8610_v10 = vrot.slane %v6709_v58, %v18264_v28  ;;  %v8615_v20 = vrot.slane %v6710_v31, %v18267_v30  ;;  %v5520_v15 = vpack.c.bf16 %v5181_v48, %v5180_v56  ;;  %v19551_v45 = vpop.xlane.xlu1 %4382  ;;  %3749 = vadd.xlane.f32.xlu1 %v3748_v16  ;;  %3746 = vadd.xlane.f32.xlu0 %v3745_v26  ;;  %v16609_v16 = vld [vmem:[%s18036_s12 + $0x5c0] ss:$16 sps:$4 sm:$0xff]   ;;  %v16618_v56 = vld [vmem:[%s18036_s12 + $0x5e8] ss:$16 sps:$4 sm:$0xff]   ;;  %v15782_v31 = vunpack.c.h.bf16 %v16177_v51 }
 0x2f5   : > { %v19557_v1 = vpop.xlane.xlu0 %4433  ;;  %v3802_v4 = vsel %vm3336_vm0, %v15278_v34, 0.0  ;;  %v3799_v63 = vsel %vm3336_vm0, %v15277_v24, 0.0  ;;  %v15781_v48 = vunpack.c.l.bf16 %v16177_v51  ;;  %v16178_v51 = vld [vmem:[%s18038_s13 + $0x660] sm:$0xff]  }
 0x2f6   : > { %v6693_v14 = vunpack.c.l.b16 %v5520_v15  ;;  %v6694_v42 = vunpack.c.h.b16 %v5520_v15  ;;  %v8611_v2 = vsel %vm6969_vm14, %v8610_v10, %v8606_v25  ;;  %12068 = vmatpush1.bf16.msra.mxu0 %v16603_v61  ;;  %12396 = vmatpush1.bf16.msra.mxu1 %v16606_v60  ;;  %v16626_v10 = vld [vmem:[%s18036_s12 + $0x60c] ss:$16 sps:$4 sm:$0xff]   ;;  %v16624_v25 = vld [vmem:[%s18036_s12 + $0x608] ss:$16 sps:$4 sm:$0xff]  }
 0x2f7   : > { %v8616_v43 = vsel %vm6976_vm15, %v8615_v20, %v8611_v2  ;;  %12069 = vmatprep.subr.bf16.mxu0 %v16611_v54  ;;  %12397 = vmatprep.subr.bf16.mxu1 %v16614_v41  ;;  %v16043_v20 = vld [vmem:[%s18038_s13 + $0x228] sm:$0xff]   ;;  %v4558_v54 = vsel %vm3336_vm0, %v15782_v31, 0.0  ;;  %v16169_v41 = vld [vmem:[%s18038_s13 + $0x618] sm:$0xff]   ;;  %v4555_v18 = vsel %vm3336_vm0, %v15781_v48, 0.0  ;;  %v16632_v2 = vld [vmem:[%s18036_s12 + $0x62c] ss:$16 sps:$4 sm:$0xff]  }
 0x2f8   : > { %v8531_v26 = vrot.slane %v6693_v14, %v18264_v28  ;;  %v19569_v38 = vpop.xlane.xlu1 %4436  ;;  %v8536_v35 = vrot.slane %v6694_v42, %v18267_v30  ;;  %4505 = vadd.xlane.f32.xlu1 %v4504_v57  ;;  %4502 = vadd.xlane.f32.xlu0 %v4501_v40  ;;  %v9393_v55 = vsel %vm9387_vm10, %v8616_v43, %v18703_v62  ;;  %v16621_v40 = vld [vmem:[%s18036_s12 + $0x600] ss:$16 sps:$4 sm:$0xff]   ;;  %v15246_v39 = vunpack.c.h.bf16 %v16043_v20 }
 0x2f9   : > { %v19574_v0 = vpop.xlane.xlu0 %4385  ;;  %v9409_v8 = vpack.c.b16 %v9393_v55, %v9393_v55  ;;  %v15245_v14 = vunpack.c.l.bf16 %v16043_v20  ;;  %v15750_v59 = vunpack.c.h.bf16 %v16169_v41  ;;  %v19622_v48 = vld [vmem:[%s18038_s13 + $0x278] sm:$0xff]   ;;  %v16636_v20 = vld [vmem:[%s18036_s12 + $0x648] ss:$16 sps:$4 sm:$0xff]  }
 0x2fa   : > { %12070 = vmatpush1.bf16.msra.mxu0 %v16609_v16  ;;  %12398 = vmatpush1.bf16.msra.mxu1 %v16612_v37  ;;  %v8532_v58 = vsel %vm6969_vm14, %v8531_v26, %v8527_v3  ;;  %v16627_v16 = vld [vmem:[%s18036_s12 + $0x620] ss:$16 sps:$4 sm:$0xff]   ;;  %v16052_v37 = vld [vmem:[%s18038_s13 + $0x270] sm:$0xff]   ;;  %v3754_v43 = vsel %vm3336_vm0, %v15246_v39, 0.0  ;;  %v5214_v39 = vmul.f32 0.015625, %v19538_v5 }
 0x2fb   : > { %12071 = vmatprep.subr.bf16.mxu0 %v16617_v33  ;;  %12073 = vmatprep.mubr.bf16.mxu0 %v9409_v8  ;;  %v8537_v60 = vsel %vm6976_vm15, %v8536_v35, %v8532_v58  ;;  %v3751_v34 = vsel %vm3336_vm0, %v15245_v14, 0.0  ;;  %v16630_v26 = vld [vmem:[%s18036_s12 + $0x628] ss:$16 sps:$4 sm:$0xff]   ;;  %v15749_v33 = vunpack.c.l.bf16 %v16169_v41  ;;  %v16638_v3 = vld [vmem:[%s18036_s12 + $0x64c] ss:$16 sps:$4 sm:$0xff]   ;;  %v15785_v58 = vunpack.c.l.bf16 %v16178_v51 }
 0x2fc   : > { %v19585_v62 = vpop.xlane.xlu1 %4388  ;;  %12399 = vmatprep.subr.bf16.mxu1 %v16620_v11  ;;  %12401 = vmatprep.mubr.bf16.mxu1 %v9409_v8  ;;  %v9392_v15 = vsel %vm9387_vm10, %v8537_v60, %v18587_v27  ;;  %v16629_v27 = vld [vmem:[%s18036_s12 + $0x624] ss:$16 sps:$4 sm:$0xff]   ;;  %v16044_v35 = vld [vmem:[%s18038_s13 + $0x230] sm:$0xff]   ;;  %v16170_v8 = vld [vmem:[%s18038_s13 + $0x620] sm:$0xff]   ;;  %v19629_v41 = vmul.f32 0.015625, %v18793_v50  ;;  %v15286_v50 = vunpack.c.h.bf16 %v19622_v48 }
 0x2fd   : > { %v19588_v61 = vpop.xlane.xlu0 %4439  ;;  %3803 = vadd.xlane.f32.xlu1 %v3802_v4  ;;  %3800 = vadd.xlane.f32.xlu0 %v3799_v63  ;;  %v9408_v46 = vpack.c.b16 %v9392_v15, %v9392_v15  ;;  %v16635_v11 = vld [vmem:[%s18036_s12 + $0x644] ss:$16 sps:$4 sm:$0xff]   ;;  %v15281_v4 = vunpack.c.l.bf16 %v16052_v37  ;;  %v15786_v63 = vunpack.c.h.bf16 %v16178_v51  ;;  %v15250_v31 = vunpack.c.h.bf16 %v16044_v35 }
 0x2fe   : > { %12072 = vmatpush1.bf16.msra.mxu0 %v16615_v9  ;;  %12400 = vmatpush1.bf16.msra.mxu1 %v16618_v56  ;;  %v4510_v9 = vsel %vm3336_vm0, %v15750_v59, 0.0  ;;  %v15282_v56 = vunpack.c.h.bf16 %v16052_v37  ;;  %v4507_v60 = vsel %vm3336_vm0, %v15749_v33, 0.0  ;;  %v15249_v15 = vunpack.c.l.bf16 %v16044_v35  ;;  %v16179_v59 = vld [vmem:[%s18038_s13 + $0x668] sm:$0xff]   ;;  %v16642_v37 = vld [vmem:[%s18036_s12 + $0x668] ss:$16 sps:$4 sm:$0xff]  }
 0x2ff   : > { %12082 = vmatprep.subr.bf16.mxu0 %v16623_v36  ;;  %12410 = vmatprep.subr.bf16.mxu1 %v16626_v10  ;;  %v5215_v36 = vmul.f32 0.015625, %v19557_v1  ;;  %v16633_v10 = vld [vmem:[%s18036_s12 + $0x640] ss:$16 sps:$4 sm:$0xff]   ;;  %v16641_v1 = vld [vmem:[%s18036_s12 + $0x664] ss:$16 sps:$4 sm:$0xff]   ;;  %v5217_v14 = vmul.f32 0.015625, %v19588_v61 }
 0x300   : > { %v19598_v57 = vpop.xlane.xlu1 %4442  ;;  %v4561_v5 = vsel %vm3336_vm0, %v15785_v58, 0.0  ;;  %v19648_v61 = vsel %vm3336_vm0, %v15250_v31, 0.0  ;;  %v16647_v33 = vld [vmem:[%s18036_s12 + $0x684] ss:$16 sps:$4 sm:$0xff]   ;;  %v19653_v51 = vsel %vm3336_vm0, %v15249_v15, 0.0 }
 0x301   : > { %v19602_v42 = vpop.xlane.xlu0 %4391  ;;  %12074 = vmatmul.mubr.bf16.vlgmr.msra.gmra.mrb[0].mxu0 %v9408_v46  ;;  %12402 = vmatmul.mubr.bf16.vlgmr.msra.gmra.mrb[0].mxu1 %v9408_v46  ;;  %v19668_v58 = vld [vmem:[%s18038_s13 + $0x628] sm:$0xff]  }
 0x302   : > { %4559 = vadd.xlane.f32.xlu1 %v4558_v54  ;;  %4556 = vadd.xlane.f32.xlu0 %v4555_v18  ;;  %v15754_v54 = vunpack.c.h.bf16 %v16170_v8 }
 0x303   : > { %12083 = vmatpush1.bf16.msra.mxu0 %v16621_v40  ;;  %12411 = vmatpush1.bf16.msra.mxu1 %v16624_v25  ;;  %v16644_v40 = vld [vmem:[%s18036_s12 + $0x66c] ss:$16 sps:$4 sm:$0xff]   ;;  %v15753_v25 = vunpack.c.l.bf16 %v16170_v8 }
 0x304   : > { %v19610_v24 = vpop.xlane.xlu1 %4394  ;;  %12084 = vmatprep.subr.bf16.mxu0 %v16629_v27  ;;  %12412 = vmatprep.subr.bf16.mxu1 %v16632_v2  ;;  %v3808_v27 = vsel %vm3336_vm0, %v15282_v56, 0.0  ;;  %v16639_v2 = vld [vmem:[%s18036_s12 + $0x660] ss:$16 sps:$4 sm:$0xff]   ;;  %v19656_v35 = vsel %vm3336_vm0, %v15754_v54, 0.0  ;;  %v16650_v56 = vld [vmem:[%s18036_s12 + $0x68c] ss:$16 sps:$4 sm:$0xff]  }
 0x305   : > { %v19615_v55 = vpop.xlane.xlu0 %4445 }
 0x306   : > { %3755 = vadd.xlane.f32.xlu1 %v3754_v43  ;;  %3752 = vadd.xlane.f32.xlu0 %v3751_v34  ;;  %v4564_v43 = vsel %vm3336_vm0, %v15786_v63, 0.0  ;;  %v5537_v34 = vpack.c.bf16 %v5215_v36, %v5214_v39  ;;  %v15790_v63 = vunpack.c.h.bf16 %v16179_v59  ;;  %v19674_v36 = vsel %vm3336_vm0, %v15286_v50, 0.0  ;;  %v16653_v50 = vld [vmem:[%s18036_s12 + $0x6a4] ss:$16 sps:$4 sm:$0xff]  }
 0x307   : > { %12085 = vmatpush1.bf16.msra.mxu0 %v16627_v16  ;;  %12413 = vmatpush1.bf16.msra.mxu1 %v16630_v26  ;;  %v3805_v16 = vsel %vm3336_vm0, %v15281_v4, 0.0  ;;  %v5216_v26 = vmul.f32 0.015625, %v19569_v38  ;;  %v19664_v38 = vsel %vm3336_vm0, %v15753_v25, 0.0  ;;  %v15285_v4 = vunpack.c.l.bf16 %v19622_v48  ;;  %v16648_v25 = vld [vmem:[%s18036_s12 + $0x688] ss:$16 sps:$4 sm:$0xff]  }
 0x308   : > { %12086 = vmatprep.subr.bf16.mxu0 %v16635_v11  ;;  %12414 = vmatprep.subr.bf16.mxu1 %v16638_v3  ;;  %v16045_v11 = vld [vmem:[%s18038_s13 + $0x238] sm:$0xff]   ;;  %v5199_v3 = vmul.f32 0.015625, %v19574_v0  ;;  %v5201_v0 = vmul.f32 0.015625, %v19602_v42  ;;  %v6727_v54 = vunpack.c.l.b16 %v5537_v34  ;;  %v15758_v39 = vunpack.c.h.bf16 %v19668_v58 }
 0x309   : > { %v19631_v46 = vpop.xlane.xlu1 %4448  ;;  %v19633_v18 = vpop.xlane.xlu0 %4397  ;;  %v19670_v31 = vpack.c.bf16 %v5217_v14, %v5216_v26  ;;  %v15254_v48 = vunpack.c.h.bf16 %v16045_v11  ;;  %v15253_v15 = vunpack.c.l.bf16 %v16045_v11  ;;  %v16645_v42 = vld [vmem:[%s18036_s12 + $0x680] ss:$16 sps:$4 sm:$0xff]  }
 0x30a   : > { %4511 = vadd.xlane.f32.xlu1 %v4510_v9  ;;  %4508 = vadd.xlane.f32.xlu0 %v4507_v60  ;;  %v15789_v60 = vunpack.c.l.bf16 %v16179_v59  ;;  %v19687_v59 = vsel %vm3336_vm0, %v15285_v4, 0.0 }
 0x30b   : > { %12087 = vmatpush1.bf16.msra.mxu0 %v16633_v10  ;;  %12415 = vmatpush1.bf16.msra.mxu1 %v16636_v20  ;;  %v5198_v10 = vmul.f32 0.015625, %v19551_v45  ;;  %v5219_v20 = vmul.f32 0.015625, %v19615_v55  ;;  %v5218_v45 = vmul.f32 0.015625, %v19598_v57  ;;  %v19704_v11 = vsel %vm3336_vm0, %v15254_v48, 0.0 }
 0x30c   : > { %12088 = vmatprep.subr.bf16.mxu0 %v16641_v1  ;;  %12416 = vmatprep.subr.bf16.mxu1 %v16644_v40  ;;  %v6728_v1 = vunpack.c.h.b16 %v5537_v34  ;;  %v5200_v40 = vmul.f32 0.015625, %v19585_v62  ;;  %v19690_v62 = vsel %vm3336_vm0, %v15790_v63, 0.0  ;;  %v19697_v57 = vsel %vm3336_vm0, %v15789_v60, 0.0 }
 0x30d   : > { %v19660_v8 = vpop.xlane.xlu1 %4400  ;;  %v4452_v9 = vpop.xlane.xlu0 %4451  ;;  %v5529_v14 = vpack.c.bf16 %v5199_v3, %v5198_v10  ;;  %v15757_v34 = vunpack.c.l.bf16 %v19668_v58  ;;  %v19700_v26 = vpack.c.bf16 %v5219_v20, %v5218_v45  ;;  %v19707_v3 = vsel %vm3336_vm0, %v15253_v15, 0.0  ;;  %v16651_v58 = vld [vmem:[%s18036_s12 + $0x6a0] ss:$16 sps:$4 sm:$0xff]   ;;  %v16654_v15 = vld [vmem:[%s18036_s12 + $0x6a8] ss:$16 sps:$4 sm:$0xff]  }
 0x30e   : > { %3809 = vadd.xlane.f32.xlu1 %v3808_v27  ;;  %3806 = vadd.xlane.f32.xlu0 %v3805_v16  ;;  %v19693_v16 = vpack.c.bf16 %v5201_v0, %v5200_v40  ;;  %v8703_v4 = vrot.slane %v6728_v1, %v18181_v19  ;;  %v5221_v63 = vmul.f32 0.015625, %v4452_v9  ;;  %v6730_v60 = vunpack.c.h.b16 %v19670_v31  ;;  %v16659_v9 = vld [vmem:[%s18036_s12 + $0x6c4] ss:$16 sps:$4 sm:$0xff]  }
 0x30f   : > { %12089 = vmatpush1.bf16.msra.mxu0 %v16639_v2  ;;  %12417 = vmatpush1.bf16.msra.mxu1 %v16642_v37  ;;  %v6729_v2 = vunpack.c.l.b16 %v19670_v31  ;;  %v16656_v37 = vld [vmem:[%s18036_s12 + $0x6ac] ss:$16 sps:$4 sm:$0xff]   ;;  %v6712_v0 = vunpack.c.h.b16 %v5529_v14  ;;  %v5202_v10 = vmul.f32 0.015625, %v19610_v24  ;;  %v19728_v31 = vsel %vm3336_vm0, %v15757_v34, 0.0 }
 0x310   : > { %12090 = vmatprep.subr.bf16.mxu0 %v16647_v33  ;;  %12418 = vmatprep.subr.bf16.mxu1 %v16650_v56  ;;  %v5203_v33 = vmul.f32 0.015625, %v19633_v18  ;;  %v8699_v56 = vrot.slane %v6727_v54, %v18169_v7  ;;  %v19713_v18 = vsel %vm3336_vm0, %v15758_v39, 0.0  ;;  %v16188_v54 = vld [vmem:[%s18038_s13 + $0x6b0] sm:$0xff]   ;;  %v6713_v40 = vunpack.c.l.b16 %v19693_v16 }
 0x311   : > { %v19683_v55 = vpop.xlane.xlu1 %4454  ;;  %v4404_v27 = vpop.xlane.xlu0 %4403  ;;  %v8708_v1 = vrot.slane %v6729_v2, %v18174_v12  ;;  %v16662_v39 = vld [vmem:[%s18036_s12 + $0x6cc] ss:$16 sps:$4 sm:$0xff]   ;;  %v6731_v24 = vunpack.c.l.b16 %v19700_v26  ;;  %v16657_v2 = vld [vmem:[%s18036_s12 + $0x6c0] ss:$16 sps:$4 sm:$0xff]   ;;  %v15825_v34 = vunpack.c.l.bf16 %v16188_v54 }
 0x312   : > { %4565 = vadd.xlane.f32.xlu1 %v4564_v43  ;;  %4562 = vadd.xlane.f32.xlu0 %v4561_v5  ;;  %v16062_v43 = vld [vmem:[%s18038_s13 + $0x2c0] sm:$0xff]   ;;  %v6711_v5 = vunpack.c.l.b16 %v5529_v14 }
 0x313   : > { %12091 = vmatpush1.bf16.msra.mxu0 %v16645_v42  ;;  %12419 = vmatpush1.bf16.msra.mxu1 %v16648_v25  ;;  %v5220_v42 = vmul.f32 0.015625, %v19631_v46  ;;  %v19731_v25 = vpack.c.bf16 %v5203_v33, %v5202_v10  ;;  %v15322_v14 = vunpack.c.h.bf16 %v16062_v43  ;;  %v15321_v45 = vunpack.c.l.bf16 %v16062_v43 }
 0x314   : > { %12092 = vmatprep.subr.bf16.mxu0 %v16653_v50  ;;  %12420 = vmatprep.subr.bf16.mxu1 %v16656_v37  ;;  %v8704_v50 = vsel %vm6878_vm1, %v8703_v4, %v8699_v56  ;;  %v15826_v37 = vunpack.c.h.bf16 %v16188_v54  ;;  %v8620_v33 = vrot.slane %v6711_v5, %v18169_v7  ;;  %v8624_v10 = vrot.slane %v6712_v0, %v18181_v19  ;;  %v16660_v56 = vld [vmem:[%s18036_s12 + $0x6c8] ss:$16 sps:$4 sm:$0xff]   ;;  %v16665_v4 = vld [vmem:[%s18036_s12 + $0x6e4] ss:$16 sps:$4 sm:$0xff]   ;;  %v16668_v0 = vld [vmem:[%s18036_s12 + $0x6ec] ss:$16 sps:$4 sm:$0xff]  }
 0x315   : > { %v19718_v20 = vpop.xlane.xlu1 %4406  ;;  %v4458_v48 = vpop.xlane.xlu0 %4457  ;;  %v19736_v46 = vpack.c.bf16 %v5221_v63, %v5220_v42  ;;  %v8709_v63 = vsel %vm6885_vm2, %v8708_v1, %v8704_v50  ;;  %v8629_v54 = vrot.slane %v6713_v40, %v18174_v12  ;;  %v6732_v5 = vunpack.c.h.b16 %v19700_v26  ;;  %v16663_v1 = vld [vmem:[%s18036_s12 + $0x6e0] ss:$16 sps:$4 sm:$0xff]   ;;  %v19779_v50 = vld [vmem:[%s18038_s13 + $0x280] sm:$0xff]  }
 0x316   : > { %3761 = vadd.xlane.f32.xlu1 %v19648_v61  ;;  %3758 = vadd.xlane.f32.xlu0 %v19653_v51  ;;  %v8713_v61 = vrot.slane %v6730_v60, %v18177_v13  ;;  %v5205_v51 = vmul.f32 0.015625, %v4404_v27  ;;  %v8718_v27 = vrot.slane %v6731_v24, %v18185_v22  ;;  %v6715_v60 = vunpack.c.l.b16 %v19731_v25  ;;  %v16666_v24 = vld [vmem:[%s18036_s12 + $0x6e8] ss:$16 sps:$4 sm:$0xff]  }
 0x317   : > { %12093 = vmatpush1.bf16.msra.mxu0 %v16651_v58  ;;  %12421 = vmatpush1.bf16.msra.mxu1 %v16654_v15  ;;  %v6714_v58 = vunpack.c.h.b16 %v19693_v16  ;;  %v5204_v15 = vmul.f32 0.015625, %v19660_v8  ;;  %v19757_v16 = vsel %vm3336_vm0, %v15322_v14, 0.0  ;;  %v5223_v26 = vmul.f32 0.015625, %v4458_v48  ;;  %v16671_v14 = vld [vmem:[%s18036_s12 + $0x704] ss:$16 sps:$4 sm:$0xff]  }
 0x318   : > { %12094 = vmatprep.subr.bf16.mxu0 %v16659_v9  ;;  %12422 = vmatprep.subr.bf16.mxu1 %v16662_v39  ;;  %v6733_v9 = vunpack.c.l.b16 %v19736_v46  ;;  %v19762_v40 = vsel %vm3336_vm0, %v15321_v45, 0.0  ;;  %v19765_v8 = vsel %vm3336_vm0, %v15826_v37, 0.0  ;;  %v19776_v45 = vsel %vm3336_vm0, %v15825_v34, 0.0 }
 0x319   : > { %v19742_v47 = vpop.xlane.xlu1 %4460  ;;  %v4410_v43 = vpop.xlane.xlu0 %4409  ;;  %v19769_v42 = vpack.c.bf16 %v5205_v51, %v5204_v15  ;;  %v8634_v37 = vrot.slane %v6714_v58, %v18177_v13  ;;  %v19787_v51 = vld [vmem:[%s18038_s13 + $0x2c8] sm:$0xff]   ;;  %v6716_v34 = vunpack.c.h.b16 %v19731_v25 }
 0x31a   : > { %4517 = vadd.xlane.f32.xlu1 %v19656_v35  ;;  %4514 = vadd.xlane.f32.xlu0 %v19664_v38  ;;  %v8625_v35 = vsel %vm6878_vm1, %v8624_v10, %v8620_v33  ;;  %v8714_v38 = vsel %vm22199_vm3, %v8713_v61, %v8709_v63  ;;  %v8723_v33 = vrot.slane %v6732_v5, %v18188_v23  ;;  %v5222_v10 = vmul.f32 0.015625, %v19683_v55  ;;  %v16674_v61 = vld [vmem:[%s18036_s12 + $0x70c] ss:$16 sps:$4 sm:$0xff]   ;;  %v16669_v5 = vld [vmem:[%s18036_s12 + $0x700] ss:$16 sps:$4 sm:$0xff]  }
 0x31b   : > { %12095 = vmatpush1.bf16.msra.mxu0 %v16657_v2  ;;  %12423 = vmatpush1.bf16.msra.mxu1 %v16660_v56  ;;  %v8630_v2 = vsel %vm6885_vm2, %v8629_v54, %v8625_v35  ;;  %v8719_v56 = vsel %vm22185_vm4, %v8718_v27, %v8714_v38  ;;  %v6734_v63 = vunpack.c.h.b16 %v19736_v46  ;;  %v8728_v55 = vrot.slane %v6733_v9, %v18194_v29  ;;  %v16677_v15 = vld [vmem:[%s18036_s12 + $0x724] ss:$16 sps:$4 sm:$0xff]   ;;  %v16680_v38 = vld [vmem:[%s18036_s12 + $0x72c] ss:$16 sps:$4 sm:$0xff]  }
 0x31c   : > { %12096 = vmatprep.subr.bf16.mxu0 %v16665_v4  ;;  %12424 = vmatprep.subr.bf16.mxu1 %v16668_v0  ;;  %v8639_v4 = vrot.slane %v6715_v60, %v18185_v22  ;;  %v19796_v58 = vpack.c.bf16 %v5223_v26, %v5222_v10  ;;  %v5207_v54 = vmul.f32 0.015625, %v4410_v43  ;;  %v15290_v0 = vunpack.c.h.bf16 %v19779_v50 }
 0x31d   : > { %v19771_v39 = vpop.xlane.xlu1 %4412  ;;  %v4464_v48 = vpop.xlane.xlu0 %4463  ;;  %v6717_v25 = vunpack.c.l.b16 %v19769_v42  ;;  %v15326_v9 = vunpack.c.h.bf16 %v19787_v51  ;;  %v8635_v43 = vsel %vm22199_vm3, %v8634_v37, %v8630_v2  ;;  %v8724_v26 = vsel %vm22184_vm5, %v8723_v33, %v8719_v56 }
 0x31e   : > { %3815 = vadd.xlane.f32.xlu1 %v19674_v36  ;;  %3812 = vadd.xlane.f32.xlu0 %v19687_v59  ;;  %v5225_v27 = vmul.f32 0.015625, %v4464_v48  ;;  %v16672_v36 = vld [vmem:[%s18036_s12 + $0x708] ss:$16 sps:$4 sm:$0xff]   ;;  %v15289_v59 = vunpack.c.l.bf16 %v19779_v50  ;;  %v8640_v48 = vsel %vm22185_vm4, %v8639_v4, %v8635_v43  ;;  %v5224_v10 = vmul.f32 0.015625, %v19742_v47  ;;  %v16686_v43 = vld [vmem:[%s18036_s12 + $0x74c] ss:$16 sps:$4 sm:$0xff]  }
 0x31f   : > { %12097 = vmatpush1.bf16.msra.mxu0 %v16663_v1  ;;  %12425 = vmatpush1.bf16.msra.mxu1 %v16666_v24  ;;  %v5206_v1 = vmul.f32 0.015625, %v19718_v20  ;;  %v8644_v24 = vrot.slane %v6716_v34, %v18188_v23  ;;  %v8729_v2 = vsel %vm22183_vm6, %v8728_v55, %v8724_v26  ;;  %v6735_v20 = vunpack.c.l.b16 %v19796_v58  ;;  %v16683_v55 = vld [vmem:[%s18036_s12 + $0x744] ss:$16 sps:$4 sm:$0xff]  }
 0x320   : > { %12098 = vmatprep.subr.bf16.mxu0 %v16671_v14  ;;  %12426 = vmatprep.subr.bf16.mxu1 %v16674_v61  ;;  %v8733_v14 = vrot.slane %v6734_v63, %v18197_v32  ;;  %v16675_v61 = vld [vmem:[%s18036_s12 + $0x720] ss:$16 sps:$4 sm:$0xff]   ;;  %v6718_v56 = vunpack.c.h.b16 %v19769_v42  ;;  %v8649_v47 = vrot.slane %v6717_v25, %v18194_v29  ;;  %v16678_v63 = vld [vmem:[%s18036_s12 + $0x728] ss:$16 sps:$4 sm:$0xff]   ;;  %v5208_v25 = vmul.f32 0.015625, %v19771_v39 }
 0x321   : > { %v3714_v46 = vpop.xlane.xlu1 %3713  ;;  %v4416_v60 = vpop.xlane.xlu0 %4415  ;;  %v19817_v37 = vpack.c.bf16 %v5207_v54, %v5206_v1  ;;  %v6736_v54 = vunpack.c.h.b16 %v19796_v58  ;;  %v8645_v42 = vsel %vm22184_vm5, %v8644_v24, %v8640_v48  ;;  %v8738_v58 = vrot.slane %v6735_v20, %v18208_v52  ;;  %v16681_v1 = vld [vmem:[%s18036_s12 + $0x740] ss:$16 sps:$4 sm:$0xff]   ;;  %v16684_v24 = vld [vmem:[%s18036_s12 + $0x748] ss:$16 sps:$4 sm:$0xff]  }
 0x322   : > { %v4975_v35 = vmul.f32 0.015625, %v3714_v46  ;;  %4571 = vadd.xlane.f32.xlu1 %v19690_v62  ;;  %4568 = vadd.xlane.f32.xlu0 %v19697_v57  ;;  %v19823_v62 = vpack.c.bf16 %v5225_v27, %v5224_v10  ;;  %v5209_v34 = vmul.f32 0.015625, %v4416_v60  ;;  %v15325_v60 = vunpack.c.l.bf16 %v19787_v51  ;;  %v16689_v10 = vld [vmem:[%s18036_s12 + $0x764] ss:$16 sps:$4 sm:$0xff]  }
 0x323   : > { %12099 = vmatpush1.bf16.msra.mxu0 %v16669_v5  ;;  %12427 = vmatpush1.bf16.msra.mxu1 %v16672_v36  ;;  %v6719_v36 = vunpack.c.l.b16 %v19817_v37  ;;  %v8650_v20 = vsel %vm22183_vm6, %v8649_v47, %v8645_v42 }
 0x324   : > { %v5417_v33 = vpack.c.bf16 %v4975_v35, %v19629_v41  ;;  %12100 = vmatprep.subr.bf16.mxu0 %v16677_v15  ;;  %12428 = vmatprep.subr.bf16.mxu1 %v16680_v38  ;;  %v6737_v39 = vunpack.c.l.b16 %v19823_v62  ;;  %v19842_v35 = vpack.c.bf16 %v5209_v34, %v5208_v25  ;;  %v19893_v51 = vsel %vm3336_vm0, %v15325_v60, 0.0 }
 0x325   : > { %v4470_v57 = vpop.xlane.xlu1 %4469  ;;  %v4467_v4 = vpop.xlane.xlu0 %4466 }
 0x326   : > { %v6487_v46 = vunpack.c.l.b16 %v5417_v33  ;;  %v6488_v41 = vunpack.c.h.b16 %v5417_v33  ;;  %v5227_v5 = vmul.f32 0.015625, %v4470_v57  ;;  %3767 = vadd.xlane.f32.xlu1 %v19704_v11  ;;  %3764 = vadd.xlane.f32.xlu0 %v19707_v3  ;;  %v5226_v27 = vmul.f32 0.015625, %v4467_v4 }
 0x327   : > { %12101 = vmatpush1.bf16.msra.mxu0 %v16675_v61  ;;  %v8734_v11 = vsel %vm22215_vm7, %v8733_v14, %v8729_v2  ;;  %v8654_v3 = vrot.slane %v6718_v56, %v18197_v32  ;;  %12429 = vmatpush1.bf16.msra.mxu1 %v16678_v63  ;;  %v8743_v33 = vrot.slane %v6736_v54, %v18211_v53  ;;  %v16692_v61 = vld [vmem:[%s18036_s12 + $0x76c] ss:$16 sps:$4 sm:$0xff]   ;;  %v6720_v56 = vunpack.c.h.b16 %v19817_v37 }
 0x328   : > { %v7514_v15 = vrot.slane %v6487_v46, %v18245_v49  ;;  %v7519_v26 = vrot.slane %v6488_v41, %v18255_v6  ;;  %12102 = vmatprep.subr.bf16.mxu0 %v16683_v55  ;;  %v19850_v2 = vpack.c.bf16 %v5227_v5, %v5226_v27  ;;  %12430 = vmatprep.subr.bf16.mxu1 %v16686_v43  ;;  %v6738_v63 = vunpack.c.h.b16 %v19823_v62  ;;  %v16687_v55 = vld [vmem:[%s18036_s12 + $0x760] ss:$16 sps:$4 sm:$0xff]   ;;  %v16690_v41 = vld [vmem:[%s18036_s12 + $0x768] ss:$16 sps:$4 sm:$0xff]   ;;  %v16695_v5 = vld [vmem:[%s18036_s12 + $0x784] ss:$16 sps:$4 sm:$0xff]  }
 0x329   : > { %v4422_v38 = vpop.xlane.xlu1 %4421  ;;  %v4419_v48 = vpop.xlane.xlu0 %4418  ;;  %v8739_v4 = vsel %vm6927_vm8, %v8738_v58, %v8734_v11  ;;  %v6721_v37 = vunpack.c.l.b16 %v19842_v35  ;;  %v19875_v62 = vsel %vm3336_vm0, %v15289_v59, 0.0  ;;  %v8655_v43 = vsel %vm22215_vm7, %v8654_v3, %v8650_v20  ;;  %v16698_v58 = vld [vmem:[%s18036_s12 + $0x78c] ss:$16 sps:$4 sm:$0xff]   ;;  %v16693_v3 = vld [vmem:[%s18036_s12 + $0x780] ss:$16 sps:$4 sm:$0xff]  }
 0x32a   : > { %v7515_v14 = vsel %vm6955_vm12, %v7514_v15, %v18808_v17  ;;  %4523 = vadd.xlane.f32.xlu1 %v19713_v18  ;;  %4520 = vadd.xlane.f32.xlu0 %v19728_v31  ;;  %v5211_v34 = vmul.f32 0.015625, %v4422_v38  ;;  %v5210_v47 = vmul.f32 0.015625, %v4419_v48  ;;  %v8659_v17 = vrot.slane %v6719_v36, %v18208_v52  ;;  %v16180_v36 = vld [vmem:[%s18038_s13 + $0x670] sm:$0xff]  }
 0x32b   : > { %v19857_v57 = vsel %vm6962_vm13, %v7519_v26, %v7515_v14  ;;  %12103 = vmatpush1.bf16.msra.mxu0 %v16681_v1  ;;  %v19866_v18 = vsel %vm3336_vm0, %v15290_v0, 0.0  ;;  %v8748_v31 = vrot.slane %v6737_v39, %v18226_v21  ;;  %12431 = vmatpush1.bf16.msra.mxu1 %v16684_v24  ;;  %v19880_v0 = vsel %vm3336_vm0, %v15326_v9, 0.0  ;;  %v16696_v48 = vld [vmem:[%s18036_s12 + $0x788] ss:$16 sps:$4 sm:$0xff]   ;;  %v16701_v24 = vld [vmem:[%s18036_s12 + $0x7a4] ss:$16 sps:$4 sm:$0xff]  }
 0x32c   : > { %12104 = vmatprep.subr.bf16.mxu0 %v16689_v10  ;;  %v6739_v42 = vunpack.c.l.b16 %v19850_v2  ;;  %12432 = vmatprep.subr.bf16.mxu1 %v16692_v61  ;;  %v8744_v50 = vsel %vm6934_vm9, %v8743_v33, %v8739_v4  ;;  %v8664_v59 = vrot.slane %v6720_v56, %v18211_v53  ;;  %v19888_v15 = vpack.c.bf16 %v5211_v34, %v5210_v47  ;;  %v16704_v14 = vld [vmem:[%s18036_s12 + $0x7ac] ss:$16 sps:$4 sm:$0xff]  }
 0x32d   : > { %v3720_v54 = vpop.xlane.xlu1 %3719  ;;  %v3717_v46 = vpop.xlane.xlu0 %3716  ;;  %v8660_v9 = vsel %vm6927_vm8, %v8659_v17, %v8655_v43  ;;  %v8753_v26 = vrot.slane %v6738_v63, %v18239_v44  ;;  %v6722_v1 = vunpack.c.h.b16 %v19842_v35  ;;  %vm22216_vm7 = vcmask 720512  }
 0x32e   : > { %v4977_v25 = vmul.f32 0.015625, %v3720_v54  ;;  %v4976_v27 = vmul.f32 0.015625, %v3717_v46  ;;  %3869 = vadd.xlane.f32.xlu1 %v19757_v16  ;;  %3866 = vadd.xlane.f32.xlu0 %v19762_v40  ;;  %v8749_v39 = vsel %vm22216_vm7, %v8748_v31, %v8744_v50  ;;  %v8669_v16 = vrot.slane %v6721_v37, %v18226_v21  ;;  %v16699_v31 = vld [vmem:[%s18036_s12 + $0x7a0] ss:$16 sps:$4 sm:$0xff]  }
 0x32f   : > { %12105 = vmatpush1.bf16.msra.mxu0 %v16687_v55  ;;  %v6740_v40 = vunpack.c.h.b16 %v19850_v2  ;;  %12433 = vmatpush1.bf16.msra.mxu1 %v16690_v41  ;;  %v15794_v10 = vunpack.c.h.bf16 %v16180_v36  ;;  %v8758_v20 = vrot.slane %v6739_v42, %v18245_v49  ;;  %v15793_v61 = vunpack.c.l.bf16 %v16180_v36  ;;  %v16702_v41 = vld [vmem:[%s18036_s12 + $0x7a8] ss:$16 sps:$4 sm:$0xff]   ;;  %v16189_v50 = vld [vmem:[%s18038_s13 + $0x6b8] sm:$0xff]  }
 0x330   : > { %v5418_v11 = vpack.c.bf16 %v4977_v25, %v4976_v27  ;;  %12106 = vmatprep.subr.bf16.mxu0 %v16695_v5  ;;  %12434 = vmatprep.subr.bf16.mxu1 %v16698_v58  ;;  %v8665_v56 = vsel %vm6934_vm9, %v8664_v59, %v8660_v9  ;;  %v6723_v34 = vunpack.c.l.b16 %v19888_v15  ;;  %v8754_v4 = vsel %vm6948_vm11, %v8753_v26, %v8749_v39  ;;  %v16707_v5 = vld [vmem:[%s18036_s12 + $0x7c4] ss:$16 sps:$4 sm:$0xff]   ;;  %v16710_v58 = vld [vmem:[%s18036_s12 + $0x7cc] ss:$16 sps:$4 sm:$0xff]   ;;  %v16705_v39 = vld [vmem:[%s18036_s12 + $0x7c0] ss:$16 sps:$4 sm:$0xff]  }
 0x331   : > { %v4476_v38 = vpop.xlane.xlu1 %4475  ;;  %v4473_v60 = vpop.xlane.xlu0 %4472  ;;  %v8674_v17 = vrot.slane %v6722_v1, %v18239_v44  ;;  %v6724_v63 = vunpack.c.h.b16 %v19888_v15  ;;  %v8670_v37 = vsel %vm22216_vm7, %v8669_v16, %v8665_v56  ;;  %v4576_v43 = vsel %vm3336_vm0, %v15794_v10, 0.0 }
 0x332   : > { %v6489_v35 = vunpack.c.l.b16 %v5418_v11  ;;  %v5229_v33 = vmul.f32 0.015625, %v4476_v38  ;;  %v6490_v2 = vunpack.c.h.b16 %v5418_v11  ;;  %4625 = vadd.xlane.f32.xlu1 %v19765_v8  ;;  %4622 = vadd.xlane.f32.xlu0 %v19776_v45  ;;  %v5228_v47 = vmul.f32 0.015625, %v4473_v60 }
 0x333   : > { %12107 = vmatpush1.bf16.msra.mxu0 %v16693_v3  ;;  %v8763_v8 = vrot.slane %v6740_v40, %v18255_v6  ;;  %12435 = vmatpush1.bf16.msra.mxu1 %v16696_v48  ;;  %v8759_v42 = vsel %vm6955_vm12, %v8758_v20, %v8754_v4  ;;  %v4573_v36 = vsel %vm3336_vm0, %v15793_v61, 0.0  ;;  %v8679_v59 = vrot.slane %v6723_v34, %v18245_v49  ;;  %v16713_v48 = vld [vmem:[%s18036_s12 + $0x7e4] ss:$16 sps:$4 sm:$0xff]  }
 0x334   : > { %v7524_v55 = vrot.slane %v6489_v35, %v18264_v28  ;;  %v5544_v54 = vpack.c.bf16 %v5229_v33, %v5228_v47  ;;  %12108 = vmatprep.subr.bf16.mxu0 %v16701_v24  ;;  %12436 = vmatprep.subr.bf16.mxu1 %v16704_v14  ;;  %v7529_v15 = vrot.slane %v6490_v2, %v18267_v30  ;;  %v15830_v10 = vunpack.c.h.bf16 %v16189_v50  ;;  %v16716_v14 = vld [vmem:[%s18036_s12 + $0x7ec] ss:$16 sps:$4 sm:$0xff]  }
 0x335   : > { %v4428_v45 = vpop.xlane.xlu1 %4427  ;;  %v4425_v46 = vpop.xlane.xlu0 %4424  ;;  %v8675_v1 = vsel %vm6948_vm11, %v8674_v17, %v8670_v37  ;;  %v8684_v11 = vrot.slane %v6724_v63, %v18255_v6  ;;  %v8764_v24 = vsel %vm6962_vm13, %v8763_v8, %v8759_v42  ;;  %v15829_v2 = vunpack.c.l.bf16 %v16189_v50  ;;  %v16711_v63 = vld [vmem:[%s18036_s12 + $0x7e0] ss:$16 sps:$4 sm:$0xff]  }
 0x336   : > { %v5213_v25 = vmul.f32 0.015625, %v4428_v45  ;;  %v5212_v27 = vmul.f32 0.015625, %v4425_v46  ;;  %v6741_v9 = vunpack.c.l.b16 %v5544_v54  ;;  %v6742_v26 = vunpack.c.h.b16 %v5544_v54  ;;  %3821 = vadd.xlane.f32.xlu1 %v19866_v18  ;;  %3818 = vadd.xlane.f32.xlu0 %v19875_v62  ;;  %v16708_v62 = vld [vmem:[%s18036_s12 + $0x7c8] ss:$16 sps:$4 sm:$0xff]  }
 0x337   : > { %12109 = vmatpush1.bf16.msra.mxu0 %v16699_v31  ;;  %v7525_v16 = vsel %vm6969_vm14, %v7524_v55, %v19857_v57  ;;  %12437 = vmatpush1.bf16.msra.mxu1 %v16702_v41  ;;  %v8680_v61 = vsel %vm6955_vm12, %v8679_v59, %v8675_v1  ;;  %v16714_v46 = vld [vmem:[%s18036_s12 + $0x7e8] ss:$16 sps:$4 sm:$0xff]   ;;  %v16719_v41 = vld [vmem:[%s18036_s12 + $0x804] ss:$16 sps:$4 sm:$0xff]   ;;  %v4630_v42 = vsel %vm3336_vm0, %v15830_v10, 0.0  ;;  %v4627_v50 = vsel %vm3336_vm0, %v15829_v2, 0.0 }
 0x338   : > { %v5536_v3 = vpack.c.bf16 %v5213_v25, %v5212_v27  ;;  %v8768_v40 = vrot.slane %v6741_v9, %v18264_v28  ;;  %v8773_v38 = vrot.slane %v6742_v26, %v18267_v30  ;;  %12110 = vmatprep.subr.bf16.mxu0 %v16707_v5  ;;  %12438 = vmatprep.subr.bf16.mxu1 %v16710_v58  ;;  %v16722_v9 = vld [vmem:[%s18036_s12 + $0x80c] ss:$16 sps:$4 sm:$0xff]   ;;  %v16725_v10 = vld [vmem:[%s18036_s12 + $0x824] ss:$16 sps:$4 sm:$0xff]   ;;  %v16723_v2 = vld [vmem:[%s18036_s12 + $0x820] ss:$16 sps:$4 sm:$0xff]  }
 0x339   : > { %v3774_v60 = vpop.xlane.xlu1 %3773  ;;  %v3771_v18 = vpop.xlane.xlu0 %3770  ;;  %v7530_v56 = vsel %vm6976_vm15, %v7529_v15, %v7525_v16  ;;  %v8685_v8 = vsel %vm6962_vm13, %v8684_v11, %v8680_v61  ;;  %v22217_v26 = vld [vmem:[#allocation18_spill] sm:$0xff]  ;;  %v16181_v11 = vld [vmem:[%s18038_s13 + $0x678] sm:$0xff]   ;;  %v16720_v16 = vld [vmem:[%s18036_s12 + $0x808] ss:$16 sps:$4 sm:$0xff]   ;;  %vm22223_vm7 = vcmask 523712  }
 0x33a   : > { %v6725_v20 = vunpack.c.l.b16 %v5536_v3  ;;  %v6726_v35 = vunpack.c.h.b16 %v5536_v3  ;;  %v4995_v33 = vmul.f32 0.015625, %v3774_v60  ;;  %v4994_v57 = vmul.f32 0.015625, %v3771_v18  ;;  %3875 = vadd.xlane.f32.xlu1 %v19880_v0  ;;  %3872 = vadd.xlane.f32.xlu0 %v19893_v51  ;;  %v16055_v0 = vld [vmem:[%s18038_s13 + $0x288] sm:$0xff]  }
 0x33b   : > { %v8769_v34 = vsel %vm6969_vm14, %v8768_v40, %v8764_v24  ;;  %12111 = vmatpush1.bf16.msra.mxu0 %v16705_v39  ;;  %12439 = vmatpush1.bf16.msra.mxu1 %v16708_v62  ;;  %v15294_v27 = vunpack.c.h.bf16 %v16055_v0  ;;  %v15293_v15 = vunpack.c.l.bf16 %v16055_v0  ;;  %v16717_v39 = vld [vmem:[%s18036_s12 + $0x800] ss:$16 sps:$4 sm:$0xff]   ;;  %v15798_v62 = vunpack.c.h.bf16 %v16181_v11  ;;  %v16064_v24 = vld [vmem:[%s18038_s13 + $0x2d0] sm:$0xff]  }
 0x33c   : > { %v8689_v47 = vrot.slane %v6725_v20, %v18264_v28  ;;  %v8694_v4 = vrot.slane %v6726_v35, %v18267_v30  ;;  %v19946_v17 = vpack.c.bf16 %v4995_v33, %v4994_v57  ;;  %v8774_v55 = vsel %vm6976_vm15, %v8773_v38, %v8769_v34  ;;  %12112 = vmatprep.subr.bf16.mxu0 %v16713_v48  ;;  %v16728_v20 = vld [vmem:[%s18036_s12 + $0x82c] ss:$16 sps:$4 sm:$0xff]  }
 0x33d   : > { %v4530_v51 = vpop.xlane.xlu1 %4529  ;;  %v4527_v31 = vpop.xlane.xlu0 %4526  ;;  %v9395_v37 = vsel %vm9387_vm10, %v8774_v55, %v7530_v56  ;;  %12440 = vmatprep.subr.bf16.mxu1 %v16716_v14  ;;  %v3826_v60 = vsel %vm3336_vm0, %v15294_v27, 0.0  ;;  %v3823_v18 = vsel %vm3336_vm0, %v15293_v15, 0.0  ;;  %v15797_v48 = vunpack.c.l.bf16 %v16181_v11  ;;  %v16732_v27 = vld [vmem:[%s18036_s12 + $0x848] ss:$16 sps:$4 sm:$0xff]  }
 0x33e   : > { %v5247_v54 = vmul.f32 0.015625, %v4530_v51  ;;  %v5246_v45 = vmul.f32 0.015625, %v4527_v31  ;;  %4577 = vadd.xlane.f32.xlu1 %v4576_v43  ;;  %4574 = vadd.xlane.f32.xlu0 %v4573_v36  ;;  %v9411_v5 = vpack.c.b16 %v9395_v37, %v9395_v37  ;;  %v8690_v25 = vsel %vm6969_vm14, %v8689_v47, %v8685_v8  ;;  %v16726_v47 = vld [vmem:[%s18036_s12 + $0x828] ss:$16 sps:$4 sm:$0xff]   ;;  %v16731_v31 = vld [vmem:[%s18036_s12 + $0x844] ss:$16 sps:$4 sm:$0xff]  }
 0x33f   : > { %12113 = vmatpush1.bf16.msra.mxu0 %v16711_v63  ;;  %v8695_v59 = vsel %vm6976_vm15, %v8694_v4, %v8690_v25  ;;  %12441 = vmatpush1.bf16.msra.mxu1 %v16714_v46  ;;  %v6507_v35 = vunpack.c.l.b16 %v19946_v17  ;;  %v6508_v33 = vunpack.c.h.b16 %v19946_v17  ;;  %v15330_v4 = vunpack.c.h.bf16 %v16064_v24  ;;  %v16190_v63 = vld [vmem:[%s18038_s13 + $0x6c0] sm:$0xff]   ;;  %v16729_v25 = vld [vmem:[%s18036_s12 + $0x840] ss:$16 sps:$4 sm:$0xff]  }
 0x340   : > { %v19957_v58 = vpack.c.bf16 %v5247_v54, %v5246_v45  ;;  %12114 = vmatprep.mubr.bf16.mxu0 %v9411_v5  ;;  %12442 = vmatprep.mubr.bf16.mxu1 %v9411_v5  ;;  %v9394_v1 = vsel %vm9387_vm10, %v8695_v59, %v22217_v26  ;;  %v4582_v17 = vsel %vm3336_vm0, %v15798_v62, 0.0  ;;  %v4579_v0 = vsel %vm3336_vm0, %v15797_v48, 0.0  ;;  %v16734_v37 = vld [vmem:[%s18036_s12 + $0x84c] ss:$16 sps:$4 sm:$0xff]  }
 0x341   : > { %v3726_v43 = vpop.xlane.xlu1 %3725  ;;  %v3723_v36 = vpop.xlane.xlu0 %3722  ;;  %12123 = vmatprep.subr.bf16.mxu0 %v16719_v41  ;;  %v9410_v38 = vpack.c.b16 %v9394_v1, %v9394_v1  ;;  %12451 = vmatprep.subr.bf16.mxu1 %v16722_v9  ;;  %v15329_v51 = vunpack.c.l.bf16 %v16064_v24  ;;  %v7613_v8 = vrot.slane %v6507_v35, %v18169_v7  ;;  %v7617_v54 = vrot.slane %v6508_v33, %v18181_v19  ;;  %v16056_v9 = vld [vmem:[%s18038_s13 + $0x290] sm:$0xff]   ;;  %v16182_v11 = vld [vmem:[%s18038_s13 + $0x680] sm:$0xff]   ;;  %v16735_v35 = vld [vmem:[%s18036_s12 + $0x860] ss:$16 sps:$4 sm:$0xff]  }
 0x342   : > { %v4979_v3 = vmul.f32 0.015625, %v3726_v43  ;;  %4631 = vadd.xlane.f32.xlu1 %v4630_v42  ;;  %4628 = vadd.xlane.f32.xlu0 %v4627_v50  ;;  %v4978_v40 = vmul.f32 0.015625, %v3723_v36  ;;  %v15834_v42 = vunpack.c.h.bf16 %v16190_v63  ;;  %v3880_v15 = vsel %vm3336_vm0, %v15330_v4, 0.0  ;;  %v16738_v33 = vld [vmem:[%s18036_s12 + $0x868] ss:$16 sps:$4 sm:$0xff]  }
 0x343   : > { %12115 = vmatmul.mubr.bf16.vlgmr.msra.gmra.mrb[0].mxu0 %v9410_v38  ;;  %12443 = vmatmul.mubr.bf16.vlgmr.msra.gmra.mrb[0].mxu1 %v9410_v38  ;;  %v3877_v26 = vsel %vm3336_vm0, %v15329_v51, 0.0  ;;  %v15833_v1 = vunpack.c.l.bf16 %v16190_v63  ;;  %v6760_v38 = vunpack.c.h.b16 %v19957_v58  ;;  %v16746_v4 = vld [vmem:[%s18036_s12 + $0x88c] ss:$16 sps:$4 sm:$0xff]   ;;  %v16065_v51 = vld [vmem:[%s18038_s13 + $0x2d8] sm:$0xff]  }
 0x344   : > { %v19974_v57 = vpack.c.bf16 %v4979_v3, %v4978_v40  ;;  %12124 = vmatpush1.bf16.msra.mxu0 %v16717_v39  ;;  %12452 = vmatpush1.bf16.msra.mxu1 %v16720_v16  ;;  %v16737_v3 = vld [vmem:[%s18036_s12 + $0x864] ss:$16 sps:$4 sm:$0xff]   ;;  %v16740_v39 = vld [vmem:[%s18036_s12 + $0x86c] ss:$16 sps:$4 sm:$0xff]   ;;  %v7618_v16 = vsel %vm6878_vm1, %v7617_v54, %v7613_v8  ;;  %v6759_v40 = vunpack.c.l.b16 %v19957_v58  ;;  %v4636_v24 = vsel %vm3336_vm0, %v15834_v42, 0.0 }
 0x345   : > { %v3780_v14 = vpop.xlane.xlu1 %3779  ;;  %v3777_v61 = vpop.xlane.xlu0 %3776  ;;  %12125 = vmatprep.subr.bf16.mxu0 %v16725_v10  ;;  %12453 = vmatprep.subr.bf16.mxu1 %v16728_v20  ;;  %v15298_v10 = vunpack.c.h.bf16 %v16056_v9  ;;  %v15297_v20 = vunpack.c.l.bf16 %v16056_v9  ;;  %v16749_v9 = vld [vmem:[%s18036_s12 + $0x8a4] ss:$16 sps:$4 sm:$0xff]  }
 0x346   : > { %v4997_v56 = vmul.f32 0.015625, %v3780_v14  ;;  %v4996_v34 = vmul.f32 0.015625, %v3777_v61  ;;  %3827 = vadd.xlane.f32.xlu1 %v3826_v60  ;;  %3824 = vadd.xlane.f32.xlu0 %v3823_v18  ;;  %v15802_v61 = vunpack.c.h.bf16 %v16182_v11  ;;  %v8857_v63 = vrot.slane %v6759_v40, %v18169_v7 }
 0x347   : > { %v3832_v54 = vsel %vm3336_vm0, %v15298_v10, 0.0 }
 0x348   : > { %v5428_v55 = vpack.c.bf16 %v4997_v56, %v4996_v34  ;;  %12126 = vmatpush1.bf16.msra.mxu0 %v16723_v2  ;;  %12454 = vmatpush1.bf16.msra.mxu1 %v16726_v47  ;;  %v15801_v56 = vunpack.c.l.bf16 %v16182_v11  ;;  %v4633_v2 = vsel %vm3336_vm0, %v15833_v1, 0.0  ;;  %v16743_v47 = vld [vmem:[%s18036_s12 + $0x884] ss:$16 sps:$4 sm:$0xff]  }
 0x349   : > { %v4482_v41 = vpop.xlane.xlu1 %4481  ;;  %v4479_v5 = vpop.xlane.xlu0 %4478  ;;  %12127 = vmatprep.subr.bf16.mxu0 %v16731_v31  ;;  %12455 = vmatprep.subr.bf16.mxu1 %v16734_v37 }
 0x34a   : > { %v6509_v45 = vunpack.c.l.b16 %v5428_v55  ;;  %v6510_v46 = vunpack.c.h.b16 %v5428_v55  ;;  %4583 = vadd.xlane.f32.xlu1 %v4582_v17  ;;  %4580 = vadd.xlane.f32.xlu0 %v4579_v0  ;;  %v5231_v50 = vmul.f32 0.015625, %v4482_v41  ;;  %v5230_v59 = vmul.f32 0.015625, %v4479_v5  ;;  %v16744_v41 = vld [vmem:[%s18036_s12 + $0x888] ss:$16 sps:$4 sm:$0xff]  }
 0x34b   : > { %v8861_v55 = vrot.slane %v6760_v38, %v18181_v19  ;;  %v6491_v17 = vunpack.c.l.b16 %v19974_v57  ;;  %v6492_v0 = vunpack.c.h.b16 %v19974_v57  ;;  %v4588_v57 = vsel %vm3336_vm0, %v15802_v61, 0.0 }
 0x34c   : > { %v7622_v43 = vrot.slane %v6509_v45, %v18174_v12  ;;  %v7627_v36 = vrot.slane %v6510_v46, %v18177_v13  ;;  %v19998_v60 = vpack.c.bf16 %v5231_v50, %v5230_v59  ;;  %12128 = vmatpush1.bf16.msra.mxu0 %v16729_v25  ;;  %12456 = vmatpush1.bf16.msra.mxu1 %v16732_v27  ;;  %v3829_v45 = vsel %vm3336_vm0, %v15297_v20, 0.0  ;;  %v16741_v46 = vld [vmem:[%s18036_s12 + $0x880] ss:$16 sps:$4 sm:$0xff]  }
 0x34d   : > { %v4536_v62 = vpop.xlane.xlu1 %4535  ;;  %v4533_v48 = vpop.xlane.xlu0 %4532  ;;  %12129 = vmatprep.subr.bf16.mxu0 %v16737_v3  ;;  %12457 = vmatprep.subr.bf16.mxu1 %v16740_v39  ;;  %v4585_v25 = vsel %vm3336_vm0, %v15801_v56, 0.0  ;;  %v15334_v59 = vunpack.c.h.bf16 %v16065_v51  ;;  %v7538_v1 = vrot.slane %v6492_v0, %v18181_v19  ;;  %v16191_v3 = vld [vmem:[%s18038_s13 + $0x6c8] sm:$0xff]  }
 0x34e   : > { %v7623_v18 = vsel %vm6885_vm2, %v7622_v43, %v7618_v16  ;;  %3881 = vadd.xlane.f32.xlu1 %v3880_v15  ;;  %3878 = vadd.xlane.f32.xlu0 %v3877_v26  ;;  %v5249_v58 = vmul.f32 0.015625, %v4536_v62  ;;  %v5248_v34 = vmul.f32 0.015625, %v4533_v48  ;;  %v15333_v15 = vunpack.c.l.bf16 %v16065_v51  ;;  %v16752_v43 = vld [vmem:[%s18036_s12 + $0x8ac] ss:$16 sps:$4 sm:$0xff]   ;;  %v16747_v48 = vld [vmem:[%s18036_s12 + $0x8a0] ss:$16 sps:$4 sm:$0xff]  }
 0x34f   : > { %v20005_v14 = vsel %vm22199_vm3, %v7627_v36, %v7623_v18  ;;  %v8862_v36 = vsel %vm6878_vm1, %v8861_v55, %v8857_v63  ;;  %v7534_v26 = vrot.slane %v6491_v17, %v18169_v7  ;;  %v6743_v39 = vunpack.c.l.b16 %v19998_v60 }
 0x350   : > { %v5554_v31 = vpack.c.bf16 %v5249_v58, %v5248_v34  ;;  %12130 = vmatpush1.bf16.msra.mxu0 %v16735_v35  ;;  %12458 = vmatpush1.bf16.msra.mxu1 %v16738_v33  ;;  %v6744_v16 = vunpack.c.h.b16 %v19998_v60  ;;  %v3886_v58 = vsel %vm3336_vm0, %v15334_v59, 0.0  ;;  %v3883_v61 = vsel %vm3336_vm0, %v15333_v15, 0.0  ;;  %v16755_v34 = vld [vmem:[%s18036_s12 + $0x8c4] ss:$16 sps:$4 sm:$0xff]  }
 0x351   : > { %v3732_v37 = vpop.xlane.xlu1 %3731  ;;  %v3729_v8 = vpop.xlane.xlu0 %3728  ;;  %12131 = vmatprep.subr.bf16.mxu0 %v16743_v47  ;;  %12459 = vmatprep.subr.bf16.mxu1 %v16746_v4  ;;  %v15838_v56 = vunpack.c.h.bf16 %v16191_v3  ;;  %v7539_v17 = vsel %vm6878_vm1, %v7538_v1, %v7534_v26  ;;  %v8778_v0 = vrot.slane %v6743_v39, %v18169_v7  ;;  %v16057_v59 = vld [vmem:[%s18038_s13 + $0x298] sm:$0xff]  }
 0x352   : > { %4637 = vadd.xlane.f32.xlu1 %v4636_v24  ;;  %4634 = vadd.xlane.f32.xlu0 %v4633_v2  ;;  %v4981_v5 = vmul.f32 0.015625, %v3732_v37  ;;  %v4980_v42 = vmul.f32 0.015625, %v3729_v8  ;;  %v6761_v27 = vunpack.c.l.b16 %v5554_v31  ;;  %v6762_v50 = vunpack.c.h.b16 %v5554_v31  ;;  %v16750_v24 = vld [vmem:[%s18036_s12 + $0x8a8] ss:$16 sps:$4 sm:$0xff]   ;;  %v16758_v2 = vld [vmem:[%s18036_s12 + $0x8cc] ss:$16 sps:$4 sm:$0xff]  }
 0x353   : > { %v8782_v51 = vrot.slane %v6744_v16, %v18181_v19  ;;  %v15837_v8 = vunpack.c.l.bf16 %v16191_v3  ;;  %v16761_v15 = vld [vmem:[%s18036_s12 + $0x8e4] ss:$16 sps:$4 sm:$0xff]   ;;  %v16759_v39 = vld [vmem:[%s18036_s12 + $0x8e0] ss:$16 sps:$4 sm:$0xff]   ;;  %v16762_v16 = vld [vmem:[%s18036_s12 + $0x8e8] ss:$16 sps:$4 sm:$0xff]  }
 0x354   : > { %v5420_v11 = vpack.c.bf16 %v4981_v5, %v4980_v42  ;;  %v8866_v40 = vrot.slane %v6761_v27, %v18174_v12  ;;  %v8871_v38 = vrot.slane %v6762_v50, %v18177_v13  ;;  %12132 = vmatpush1.bf16.msra.mxu0 %v16741_v46  ;;  %12460 = vmatpush1.bf16.msra.mxu1 %v16744_v41  ;;  %v16196_v19 = vld [vmem:[%s18038_s13 + $0x6f0] sm:$0xff]  }
 0x355   : > { %v4488_v18 = vpop.xlane.xlu1 %4487  ;;  %v4485_v62 = vpop.xlane.xlu0 %4484  ;;  %12133 = vmatprep.subr.bf16.mxu0 %v16749_v9  ;;  %12461 = vmatprep.subr.bf16.mxu1 %v16752_v43  ;;  %v16764_v9 = vld [vmem:[%s18036_s12 + $0x8ec] ss:$16 sps:$4 sm:$0xff]   ;;  %v8783_v26 = vsel %vm6878_vm1, %v8782_v51, %v8778_v0  ;;  %v4639_v3 = vsel %vm3336_vm0, %v15837_v8, 0.0  ;;  %v15857_v30 = vunpack.c.l.bf16 %v16196_v19 }
 0x356   : > { %v6493_v10 = vunpack.c.l.b16 %v5420_v11  ;;  %v6494_v20 = vunpack.c.h.b16 %v5420_v11  ;;  %3833 = vadd.xlane.f32.xlu1 %v3832_v54  ;;  %3830 = vadd.xlane.f32.xlu0 %v3829_v45  ;;  %v5233_v35 = vmul.f32 0.015625, %v4488_v18  ;;  %v5232_v33 = vmul.f32 0.015625, %v4485_v62  ;;  %v16753_v54 = vld [vmem:[%s18036_s12 + $0x8c0] ss:$16 sps:$4 sm:$0xff]   ;;  %v16756_v45 = vld [vmem:[%s18036_s12 + $0x8c8] ss:$16 sps:$4 sm:$0xff]  }
 0x357   : > { %v8867_v60 = vsel %vm6885_vm2, %v8866_v40, %v8862_v36  ;;  %v4642_v11 = vsel %vm3336_vm0, %v15838_v56, 0.0  ;;  %v15302_v62 = vunpack.c.h.bf16 %v16057_v59  ;;  %v16066_v8 = vld [vmem:[%s18038_s13 + $0x2e0] sm:$0xff]  }
 0x358   : > { %v20039_v47 = vsel %vm22199_vm3, %v8871_v38, %v8867_v60  ;;  %v7543_v4 = vrot.slane %v6493_v10, %v18174_v12  ;;  %v7548_v63 = vrot.slane %v6494_v20, %v18177_v13  ;;  %v5546_v55 = vpack.c.bf16 %v5233_v35, %v5232_v33  ;;  %12134 = vmatpush1.bf16.msra.mxu0 %v16747_v48  ;;  %v16183_v48 = vld [vmem:[%s18038_s13 + $0x688] sm:$0xff]   ;;  %v16770_v60 = vld [vmem:[%s18036_s12 + $0x90c] ss:$16 sps:$4 sm:$0xff]  }
 0x359   : > { %v3786_v31 = vpop.xlane.xlu1 %3785  ;;  %v3783_v37 = vpop.xlane.xlu0 %3782  ;;  %12462 = vmatpush1.bf16.msra.mxu1 %v16750_v24  ;;  %12135 = vmatprep.subr.bf16.mxu0 %v16755_v34  ;;  %v15301_v35 = vunpack.c.l.bf16 %v16057_v59  ;;  %v16767_v33 = vld [vmem:[%s18036_s12 + $0x904] ss:$16 sps:$4 sm:$0xff]  }
 0x35a   : > { %v7544_v46 = vsel %vm6885_vm2, %v7543_v4, %v7539_v17  ;;  %v6745_v41 = vunpack.c.l.b16 %v5546_v55  ;;  %v6746_v5 = vunpack.c.h.b16 %v5546_v55  ;;  %4589 = vadd.xlane.f32.xlu1 %v4588_v57  ;;  %4586 = vadd.xlane.f32.xlu0 %v4585_v25  ;;  %v4999_v42 = vmul.f32 0.015625, %v3786_v31  ;;  %v16765_v55 = vld [vmem:[%s18036_s12 + $0x900] ss:$16 sps:$4 sm:$0xff]   ;;  %v16768_v17 = vld [vmem:[%s18036_s12 + $0x908] ss:$16 sps:$4 sm:$0xff]  }
 0x35b   : > { %v20050_v27 = vsel %vm22199_vm3, %v7548_v63, %v7544_v46  ;;  %v4998_v50 = vmul.f32 0.015625, %v3783_v37  ;;  %12463 = vmatprep.subr.bf16.mxu1 %v16758_v2  ;;  %v15806_v4 = vunpack.c.h.bf16 %v16183_v48  ;;  %v15805_v63 = vunpack.c.l.bf16 %v16183_v48  ;;  %v16782_v48 = vld [vmem:[%s18036_s12 + $0x94c] ss:$16 sps:$4 sm:$0xff]  }
 0x35c   : > { %v8787_v43 = vrot.slane %v6745_v41, %v18174_v12  ;;  %v8792_v36 = vrot.slane %v6746_v5, %v18177_v13  ;;  %12136 = vmatpush1.bf16.msra.mxu0 %v16753_v54  ;;  %v3835_v46 = vsel %vm3336_vm0, %v15301_v35, 0.0  ;;  %v16773_v41 = vld [vmem:[%s18036_s12 + $0x924] ss:$16 sps:$4 sm:$0xff]   ;;  %v16776_v5 = vld [vmem:[%s18036_s12 + $0x92c] ss:$16 sps:$4 sm:$0xff]  }
 0x35d   : > { %v5429_v57 = vpack.c.bf16 %v4999_v42, %v4998_v50  ;;  %v4542_v25 = vpop.xlane.xlu1 %4541  ;;  %v4539_v1 = vpop.xlane.xlu0 %4538  ;;  %12464 = vmatpush1.bf16.msra.mxu1 %v16756_v45  ;;  %12137 = vmatprep.subr.bf16.mxu0 %v16761_v15  ;;  %v3838_v45 = vsel %vm3336_vm0, %v15302_v62, 0.0  ;;  %v16779_v62 = vld [vmem:[%s18036_s12 + $0x944] ss:$16 sps:$4 sm:$0xff]  }
 0x35e   : > { %v8788_v40 = vsel %vm6885_vm2, %v8787_v43, %v8783_v26  ;;  %3887 = vadd.xlane.f32.xlu1 %v3886_v58  ;;  %3884 = vadd.xlane.f32.xlu0 %v3883_v61  ;;  %v5251_v38 = vmul.f32 0.015625, %v4542_v25  ;;  %v5250_v18 = vmul.f32 0.015625, %v4539_v1  ;;  %v4594_v43 = vsel %vm3336_vm0, %v15806_v4, 0.0  ;;  %v16771_v25 = vld [vmem:[%s18036_s12 + $0x920] ss:$16 sps:$4 sm:$0xff]  }
 0x35f   : > { %v20065_v24 = vsel %vm22199_vm3, %v8792_v36, %v8788_v40  ;;  %v6511_v10 = vunpack.c.l.b16 %v5429_v57  ;;  %v6512_v20 = vunpack.c.h.b16 %v5429_v57  ;;  %12465 = vmatprep.subr.bf16.mxu1 %v16764_v9  ;;  %v4591_v36 = vsel %vm3336_vm0, %v15805_v63, 0.0  ;;  %v16774_v1 = vld [vmem:[%s18036_s12 + $0x928] ss:$16 sps:$4 sm:$0xff]  }
 0x360   : > { %v5555_v56 = vpack.c.bf16 %v5251_v38, %v5250_v18  ;;  %12138 = vmatpush1.bf16.msra.mxu0 %v16759_v39  ;;  %v15338_v26 = vunpack.c.h.bf16 %v16066_v8  ;;  %v15337_v57 = vunpack.c.l.bf16 %v16066_v8  ;;  %v16192_v18 = vld [vmem:[%s18038_s13 + $0x6d0] sm:$0xff]  }
 0x361   : > { %v7632_v58 = vrot.slane %v6511_v10, %v18185_v22  ;;  %v7637_v61 = vrot.slane %v6512_v20, %v18188_v23  ;;  %v3738_v34 = vpop.xlane.xlu1 %3737  ;;  %v3735_v2 = vpop.xlane.xlu0 %3734  ;;  %12466 = vmatpush1.bf16.msra.mxu1 %v16762_v16  ;;  %12139 = vmatprep.subr.bf16.mxu0 %v16767_v33 }
 0x362   : > { %v6763_v0 = vunpack.c.l.b16 %v5555_v56  ;;  %v6764_v51 = vunpack.c.h.b16 %v5555_v56  ;;  %4643 = vadd.xlane.f32.xlu1 %v4642_v11  ;;  %4640 = vadd.xlane.f32.xlu0 %v4639_v3  ;;  %v4983_v31 = vmul.f32 0.015625, %v3738_v34  ;;  %v4982_v37 = vmul.f32 0.015625, %v3735_v2  ;;  %v16780_v56 = vld [vmem:[%s18036_s12 + $0x948] ss:$16 sps:$4 sm:$0xff]  }
 0x363   : > { %v7633_v54 = vsel %vm22185_vm4, %v7632_v58, %v20005_v14  ;;  %12467 = vmatprep.subr.bf16.mxu1 %v16770_v60  ;;  %v16777_v60 = vld [vmem:[%s18036_s12 + $0x940] ss:$16 sps:$4 sm:$0xff]   ;;  %v3889_v34 = vsel %vm3336_vm0, %v15337_v57, 0.0  ;;  %v15842_v2 = vunpack.c.h.bf16 %v16192_v18 }
 0x364   : > { %v20081_v42 = vsel %vm22184_vm5, %v7637_v61, %v7633_v54  ;;  %v8876_v50 = vrot.slane %v6763_v0, %v18185_v22  ;;  %v8881_v59 = vrot.slane %v6764_v51, %v18188_v23  ;;  %v5421_v15 = vpack.c.bf16 %v4983_v31, %v4982_v37  ;;  %12140 = vmatpush1.bf16.msra.mxu0 %v16765_v55  ;;  %v16058_v0 = vld [vmem:[%s18038_s13 + $0x2a0] sm:$0xff]   ;;  %v16785_v51 = vld [vmem:[%s18036_s12 + $0x964] ss:$16 sps:$4 sm:$0xff]  }
 0x365   : > { %v4494_v9 = vpop.xlane.xlu1 %4493  ;;  %v4491_v14 = vpop.xlane.xlu0 %4490  ;;  %12468 = vmatpush1.bf16.msra.mxu1 %v16768_v17  ;;  %12141 = vmatprep.subr.bf16.mxu0 %v16773_v41  ;;  %v3892_v61 = vsel %vm3336_vm0, %v15338_v26, 0.0  ;;  %v15841_v17 = vunpack.c.l.bf16 %v16192_v18  ;;  %v15306_v41 = vunpack.c.h.bf16 %v16058_v0  ;;  %v16800_v18 = vld [vmem:[%s18036_s12 + $0x9ac] ss:$16 sps:$4 sm:$0xff]  }
 0x366   : > { %v8877_v11 = vsel %vm22185_vm4, %v8876_v50, %v20039_v47  ;;  %v6495_v3 = vunpack.c.l.b16 %v5421_v15  ;;  %v6496_v39 = vunpack.c.h.b16 %v5421_v15  ;;  %3839 = vadd.xlane.f32.xlu1 %v3838_v45  ;;  %3836 = vadd.xlane.f32.xlu0 %v3835_v46  ;;  %v5235_v16 = vmul.f32 0.015625, %v4494_v9  ;;  %v16783_v45 = vld [vmem:[%s18036_s12 + $0x960] ss:$16 sps:$4 sm:$0xff]   ;;  %v16786_v46 = vld [vmem:[%s18036_s12 + $0x968] ss:$16 sps:$4 sm:$0xff]  }
 0x367   : > { %v20092_v40 = vsel %vm22184_vm5, %v8881_v59, %v8877_v11  ;;  %v5234_v38 = vmul.f32 0.015625, %v4491_v14  ;;  %12469 = vmatprep.subr.bf16.mxu1 %v16776_v5  ;;  %v4648_v50 = vsel %vm3336_vm0, %v15842_v2, 0.0  ;;  %v4645_v59 = vsel %vm3336_vm0, %v15841_v17, 0.0  ;;  %v16791_v9 = vld [vmem:[%s18036_s12 + $0x984] ss:$16 sps:$4 sm:$0xff]  }
 0x368   : > { %v7553_v10 = vrot.slane %v6495_v3, %v18185_v22  ;;  %v7558_v47 = vrot.slane %v6496_v39, %v18188_v23  ;;  %12142 = vmatpush1.bf16.msra.mxu0 %v16771_v25  ;;  %v15305_v15 = vunpack.c.l.bf16 %v16058_v0  ;;  %v16794_v14 = vld [vmem:[%s18036_s12 + $0x98c] ss:$16 sps:$4 sm:$0xff]   ;;  %v16792_v25 = vld [vmem:[%s18036_s12 + $0x988] ss:$16 sps:$4 sm:$0xff]   ;;  %v16193_v2 = vld [vmem:[%s18038_s13 + $0x6d8] sm:$0xff]  }
 0x369   : > { %v5547_v20 = vpack.c.bf16 %v5235_v16, %v5234_v38  ;;  %v20099_v35 = vpop.xlane.xlu1 %3791  ;;  %v20101_v33 = vpop.xlane.xlu0 %3788  ;;  %12470 = vmatpush1.bf16.msra.mxu1 %v16774_v1  ;;  %12143 = vmatprep.subr.bf16.mxu0 %v16779_v62  ;;  %v3844_v1 = vsel %vm3336_vm0, %v15306_v41, 0.0  ;;  %v16067_v16 = vld [vmem:[%s18038_s13 + $0x2e8] sm:$0xff]   ;;  %v16804_v0 = vld [vmem:[%s18036_s12 + $0x9c8] ss:$16 sps:$4 sm:$0xff]   ;;  %v16812_v41 = vld [vmem:[%s18036_s12 + $0x9ec] ss:$16 sps:$4 sm:$0xff]  }
 0x36a   : > { %v7554_v58 = vsel %vm22185_vm4, %v7553_v10, %v20050_v27  ;;  %4595 = vadd.xlane.f32.xlu1 %v4594_v43  ;;  %4592 = vadd.xlane.f32.xlu0 %v4591_v36  ;;  %v16788_v27 = vld [vmem:[%s18036_s12 + $0x96c] ss:$16 sps:$4 sm:$0xff]   ;;  %v3841_v11 = vsel %vm3336_vm0, %v15305_v15, 0.0  ;;  %v16797_v38 = vld [vmem:[%s18036_s12 + $0x9a4] ss:$16 sps:$4 sm:$0xff]  }
 0x36b   : > { %v20110_v4 = vsel %vm22184_vm5, %v7558_v47, %v7554_v58  ;;  %v6747_v63 = vunpack.c.l.b16 %v5547_v20  ;;  %v6748_v55 = vunpack.c.h.b16 %v5547_v20  ;;  %12471 = vmatprep.subr.bf16.mxu1 %v16782_v48  ;;  %v16184_v36 = vld [vmem:[%s18038_s13 + $0x690] sm:$0xff]   ;;  %v16795_v10 = vld [vmem:[%s18036_s12 + $0x9a0] ss:$16 sps:$4 sm:$0xff]   ;;  %v15342_v20 = vunpack.c.h.bf16 %v16067_v16 }
 0x36c   : > { %12144 = vmatpush1.bf16.msra.mxu0 %v16777_v60  ;;  %v15810_v3 = vunpack.c.h.bf16 %v16184_v36  ;;  %v15809_v39 = vunpack.c.l.bf16 %v16184_v36  ;;  %v16798_v47 = vld [vmem:[%s18036_s12 + $0x9a8] ss:$16 sps:$4 sm:$0xff]   ;;  %v15341_v58 = vunpack.c.l.bf16 %v16067_v16  ;;  %v16801_v17 = vld [vmem:[%s18036_s12 + $0x9c0] ss:$16 sps:$4 sm:$0xff]  }
 0x36d   : > { %v8797_v31 = vrot.slane %v6747_v63, %v18185_v22  ;;  %v8802_v37 = vrot.slane %v6748_v55, %v18188_v23  ;;  %v20117_v8 = vpop.xlane.xlu1 %4547  ;;  %v20119_v54 = vpop.xlane.xlu0 %4544  ;;  %12472 = vmatpush1.bf16.msra.mxu1 %v16780_v56  ;;  %12145 = vmatprep.subr.bf16.mxu0 %v16785_v51  ;;  %v3898_v51 = vsel %vm3336_vm0, %v15342_v20, 0.0  ;;  %v16810_v15 = vld [vmem:[%s18036_s12 + $0x9e8] ss:$16 sps:$4 sm:$0xff]   ;;  %v16069_v20 = vld [vmem:[%s18038_s13 + $0x2f8] sm:$0xff]  }
 0x36e   : > { %3893 = vadd.xlane.f32.xlu1 %v3892_v61  ;;  %3890 = vadd.xlane.f32.xlu0 %v3889_v34  ;;  %v4600_v60 = vsel %vm3336_vm0, %v15810_v3, 0.0  ;;  %v4597_v56 = vsel %vm3336_vm0, %v15809_v39, 0.0  ;;  %v16803_v61 = vld [vmem:[%s18036_s12 + $0x9c4] ss:$16 sps:$4 sm:$0xff]   ;;  %v16806_v34 = vld [vmem:[%s18036_s12 + $0x9cc] ss:$16 sps:$4 sm:$0xff]  }
 0x36f   : > { %v8798_v5 = vsel %vm22185_vm4, %v8797_v31, %v20065_v24  ;;  %12473 = vmatprep.subr.bf16.mxu1 %v16788_v27  ;;  %v16789_v24 = vld [vmem:[%s18036_s12 + $0x980] ss:$16 sps:$4 sm:$0xff]   ;;  %v3895_v27 = vsel %vm3336_vm0, %v15341_v58, 0.0  ;;  %v15846_v31 = vunpack.c.h.bf16 %v16193_v2  ;;  %v16060_v16 = vld [vmem:[%s18038_s13 + $0x2b0] sm:$0xff]   ;;  %v16070_v22 = vld [vmem:[%s18038_s13 + $0x300] sm:$0xff]  }
 0x370   : > { %v20130_v43 = vsel %vm22184_vm5, %v8802_v37, %v8798_v5  ;;  %12146 = vmatpush1.bf16.msra.mxu0 %v16783_v45  ;;  %v15845_v37 = vunpack.c.l.bf16 %v16193_v2  ;;  %v16059_v45 = vld [vmem:[%s18038_s13 + $0x2a8] sm:$0xff]  }
 0x371   : > { %v20133_v26 = vpop.xlane.xlu1 %3743  ;;  %v20135_v57 = vpop.xlane.xlu0 %3740  ;;  %12474 = vmatpush1.bf16.msra.mxu1 %v16786_v46  ;;  %12147 = vmatprep.subr.bf16.mxu0 %v16791_v9  ;;  %v16809_v46 = vld [vmem:[%s18036_s12 + $0x9e4] ss:$16 sps:$4 sm:$0xff]   ;;  %v15310_v9 = vunpack.c.h.bf16 %v16059_v45  ;;  %v4654_v36 = vsel %vm3336_vm0, %v15846_v31, 0.0 }
 0x372   : > { %4649 = vadd.xlane.f32.xlu1 %v4648_v50  ;;  %4646 = vadd.xlane.f32.xlu0 %v4645_v59  ;;  %v16807_v59 = vld [vmem:[%s18036_s12 + $0x9e0] ss:$16 sps:$4 sm:$0xff]   ;;  %v4985_v23 = vmul.f32 0.015625, %v20133_v26 }
 0x373   : > { %12475 = vmatprep.subr.bf16.mxu1 %v16794_v14  ;;  %v15309_v14 = vunpack.c.l.bf16 %v16059_v45  ;;  %v15350_v45 = vunpack.c.h.bf16 %v16069_v20  ;;  %v16079_v26 = vld [vmem:[%s18038_s13 + $0x348] sm:$0xff]  }
 0x374   : > { %12148 = vmatpush1.bf16.msra.mxu0 %v16789_v24  ;;  %v4651_v24 = vsel %vm3336_vm0, %v15845_v37, 0.0 }
 0x375   : > { %v20144_v62 = vpop.xlane.xlu1 %4499  ;;  %v20146_v48 = vpop.xlane.xlu0 %4496  ;;  %12476 = vmatpush1.bf16.msra.mxu1 %v16792_v25  ;;  %12149 = vmatprep.subr.bf16.mxu0 %v16797_v38  ;;  %v16185_v25 = vld [vmem:[%s18038_s13 + $0x698] sm:$0xff]   ;;  %v16186_v38 = vld [vmem:[%s18038_s13 + $0x6a0] sm:$0xff]  }
 0x376   : > { %3845 = vadd.xlane.f32.xlu1 %v3844_v1  ;;  %3842 = vadd.xlane.f32.xlu0 %v3841_v11  ;;  %v16068_v1 = vld [vmem:[%s18038_s13 + $0x2f0] sm:$0xff]   ;;  %v16194_v11 = vld [vmem:[%s18038_s13 + $0x6e0] sm:$0xff]   ;;  %v15817_v37 = vunpack.c.l.bf16 %v16186_v38 }
 0x377   : > { %12477 = vmatprep.subr.bf16.mxu1 %v16800_v18  ;;  %v3850_v18 = vsel %vm3336_vm0, %v15310_v9, 0.0  ;;  %v15345_v58 = vunpack.c.l.bf16 %v16068_v1  ;;  %v15849_v2 = vunpack.c.l.bf16 %v16194_v11 }
 0x378   : > { %12150 = vmatpush1.bf16.msra.mxu0 %v16795_v10  ;;  %v3847_v10 = vsel %vm3336_vm0, %v15309_v14, 0.0 }
 0x379   : > { %v20155_v63 = vpop.xlane.xlu1 %3797  ;;  %v20157_v55 = vpop.xlane.xlu0 %3794  ;;  %12478 = vmatpush1.bf16.msra.mxu1 %v16798_v47  ;;  %12151 = vmatprep.subr.bf16.mxu0 %v16803_v61  ;;  %v15814_v47 = vunpack.c.h.bf16 %v16185_v25  ;;  %v15850_v61 = vunpack.c.h.bf16 %v16194_v11  ;;  %v16187_v11 = vld [vmem:[%s18038_s13 + $0x6a8] sm:$0xff]  }
 0x37a   : > { %4601 = vadd.xlane.f32.xlu1 %v4600_v60  ;;  %4598 = vadd.xlane.f32.xlu0 %v4597_v56  ;;  %v15813_v60 = vunpack.c.l.bf16 %v16185_v25  ;;  %v15346_v56 = vunpack.c.h.bf16 %v16068_v1  ;;  %v16061_v1 = vld [vmem:[%s18038_s13 + $0x2b8] sm:$0xff]  }
 0x37b   : > { %12479 = vmatprep.subr.bf16.mxu1 %v16806_v34  ;;  %v16195_v34 = vld [vmem:[%s18038_s13 + $0x6e8] sm:$0xff]   ;;  %v4660_v25 = vsel %vm3336_vm0, %v15850_v61, 0.0 }
 0x37c   : > { %12152 = vmatpush1.bf16.msra.mxu0 %v16801_v17  ;;  %v15314_v17 = vunpack.c.h.bf16 %v16060_v16  ;;  %v15854_v9 = vunpack.c.h.bf16 %v16195_v34  ;;  %v4603_v14 = vsel %vm3336_vm0, %v15813_v60, 0.0  ;;  %v20215_v60 = vsel %vm3336_vm0, %v15350_v45, 0.0 }
 0x37d   : > { %v20166_v5 = vpop.xlane.xlu1 %4553  ;;  %v20168_v50 = vpop.xlane.xlu0 %4550  ;;  %12480 = vmatpush1.bf16.msra.mxu1 %v16804_v0  ;;  %12153 = vmatprep.subr.bf16.mxu0 %v16809_v46  ;;  %v15313_v0 = vunpack.c.l.bf16 %v16060_v16  ;;  %v15349_v46 = vunpack.c.l.bf16 %v16069_v20  ;;  %v4657_v16 = vsel %vm3336_vm0, %v15849_v2, 0.0  ;;  %v20212_v20 = vsel %vm3336_vm0, %v15817_v37, 0.0 }
 0x37e   : > { %3899 = vadd.xlane.f32.xlu1 %v3898_v51  ;;  %3896 = vadd.xlane.f32.xlu0 %v3895_v27  ;;  %v15818_v51 = vunpack.c.h.bf16 %v16186_v38  ;;  %v20202_v38 = vsel %vm3336_vm0, %v15314_v17, 0.0  ;;  %v20225_v17 = vsel %vm3336_vm0, %v15854_v9, 0.0  ;;  %v15822_v37 = vunpack.c.h.bf16 %v16187_v11 }
 0x37f   : > { %12481 = vmatprep.subr.bf16.mxu1 %v16812_v41  ;;  %v16815_v41 = vld [vmem:[%s18036_s12 + $0xa04] ss:$16 sps:$4 sm:$0xff]   ;;  %v5001_v45 = vmul.f32 0.015625, %v20099_v35  ;;  %v4984_v9 = vmul.f32 0.015625, %v20135_v57 }
 0x380   : > { %12154 = vmatpush1.bf16.msra.mxu0 %v16807_v59  ;;  %v16818_v59 = vld [vmem:[%s18036_s12 + $0xa0c] ss:$16 sps:$4 sm:$0xff]  }
 0x381   : > { %v20177_v3 = vpop.xlane.xlu1 %3749  ;;  %v20179_v39 = vpop.xlane.xlu0 %3746  ;;  %12482 = vmatpush1.bf16.msra.mxu1 %v16810_v15  ;;  %v4606_v15 = vsel %vm3336_vm0, %v15814_v47, 0.0  ;;  %12164 = vmatprep.subr.bf16.mxu0 %v16815_v41  ;;  %v16078_v47 = vld [vmem:[%s18038_s13 + $0x340] sm:$0xff]   ;;  %v16204_v41 = vld [vmem:[%s18038_s13 + $0x730] sm:$0xff]  }
 0x382   : > { %4655 = vadd.xlane.f32.xlu1 %v4654_v36  ;;  %4652 = vadd.xlane.f32.xlu0 %v4651_v24  ;;  %v3904_v36 = vsel %vm3336_vm0, %v15346_v56, 0.0  ;;  %v3901_v24 = vsel %vm3336_vm0, %v15345_v58, 0.0  ;;  %v20218_v56 = vsel %vm3336_vm0, %v15349_v46, 0.0  ;;  %v15853_v58 = vunpack.c.l.bf16 %v16195_v34 }
 0x383   : > { %12492 = vmatprep.subr.bf16.mxu1 %v16818_v59  ;;  %v5000_v46 = vmul.f32 0.015625, %v20101_v33  ;;  %v15821_v59 = vunpack.c.l.bf16 %v16187_v11  ;;  %v15386_v34 = vunpack.c.h.bf16 %v16078_v47  ;;  %v15385_v13 = vunpack.c.l.bf16 %v16078_v47 }
 0x384   : > { %v15890_v12 = vunpack.c.h.bf16 %v16204_v41  ;;  %v15889_v35 = vunpack.c.l.bf16 %v16204_v41  ;;  %v5237_v33 = vmul.f32 0.015625, %v20144_v62  ;;  %v5236_v11 = vmul.f32 0.015625, %v20146_v48 }
 0x385   : > { %v20187_v27 = vpop.xlane.xlu1 %4505  ;;  %v20189_v31 = vpop.xlane.xlu0 %4502  ;;  %v5430_v57 = vpack.c.bf16 %v5001_v45, %v5000_v46  ;;  %v20252_v41 = vsel %vm3336_vm0, %v15822_v37, 0.0  ;;  %v20255_v62 = vsel %vm3336_vm0, %v15821_v59, 0.0  ;;  %v15354_v48 = vunpack.c.h.bf16 %v16070_v22 }
 0x386   : > { %3851 = vadd.xlane.f32.xlu1 %v3850_v18  ;;  %3848 = vadd.xlane.f32.xlu0 %v3847_v10  ;;  %v20205_v18 = vsel %vm3336_vm0, %v15313_v0, 0.0  ;;  %v20208_v10 = vsel %vm3336_vm0, %v15818_v51, 0.0  ;;  %v15318_v0 = vunpack.c.h.bf16 %v16061_v1  ;;  %v15317_v51 = vunpack.c.l.bf16 %v16061_v1 }
 0x387   : > { %v20236_v1 = vsel %vm3336_vm0, %v15853_v58, 0.0  ;;  %v20264_v45 = vsel %vm3336_vm0, %v15385_v13, 0.0  ;;  %v20267_v46 = vsel %vm3336_vm0, %v15890_v12, 0.0  ;;  %v20270_v37 = vsel %vm3336_vm0, %v15889_v35, 0.0 }
 0x388   : > { %22218 = vst [vmem:[#allocation18_spill] sm:$0xff] %v20270_v37  ;;  %v15390_v59 = vunpack.c.h.bf16 %v16079_v26  ;;  %v5548_v7 = vpack.c.bf16 %v5237_v33, %v5236_v11  ;;  %v15858_v12 = vunpack.c.h.bf16 %v16196_v19  ;;  %v6514_v35 = vunpack.c.h.b16 %v5430_v57 }
 0x389   : > { %v4986_v11 = vmul.f32 0.015625, %v20179_v39 }
 0x38a   : > { %4607 = vadd.xlane.f32.xlu1 %v4606_v15  ;;  %4604 = vadd.xlane.f32.xlu0 %v4603_v14  ;;  %v20220_v61 = vpop.xlane.xlu1 %3803  ;;  %v20222_v2 = vpop.xlane.xlu0 %3800  ;;  %v5253_v15 = vmul.f32 0.015625, %v20117_v8  ;;  %v5252_v14 = vmul.f32 0.015625, %v20119_v54  ;;  %v20241_v8 = vsel %vm3336_vm0, %v15318_v0, 0.0  ;;  %v20244_v54 = vsel %vm3336_vm0, %v15317_v51, 0.0 }
 0x38b   : > { %v20260_v0 = vsel %vm3336_vm0, %v15386_v34, 0.0  ;;  %v15353_v51 = vunpack.c.l.bf16 %v16070_v22  ;;  %v15389_v22 = vunpack.c.l.bf16 %v16079_v26  ;;  %v6513_v34 = vunpack.c.l.b16 %v5430_v57  ;;  %v20286_v26 = vld [vmem:[%s18038_s13 + $0x738] sm:$0xff]  }
 0x38c   : > { %v20291_v19 = vsel %vm3336_vm0, %v15390_v59, 0.0 }
 0x38d   : > { %22220 = vst [vmem:[#allocation20_spill] sm:$0xff] %v20291_v19  ;;  %v20294_v57 = vsel %vm3336_vm0, %v15389_v22, 0.0  ;;  %v6750_v22 = vunpack.c.h.b16 %v5548_v7 }
 0x38e   : > { %3905 = vadd.xlane.f32.xlu1 %v3904_v36  ;;  %3902 = vadd.xlane.f32.xlu0 %v3901_v24  ;;  %v5556_v36 = vpack.c.bf16 %v5253_v15, %v5252_v14  ;;  %v20257_v24 = vpack.c.bf16 %v4985_v23, %v4984_v9  ;;  %v5003_v15 = vmul.f32 0.015625, %v20155_v63  ;;  %v5002_v23 = vmul.f32 0.015625, %v20157_v55  ;;  %22221 = vst [vmem:[#allocation21_spill] sm:$0xff] %v20294_v57 }
 0x38f   : > { %v20247_v58 = vpop.xlane.xlu1 %4559  ;;  %v20249_v47 = vpop.xlane.xlu0 %4556  ;;  %v20275_v9 = vsel %vm3336_vm0, %v15354_v48, 0.0  ;;  %v20279_v63 = vsel %vm3336_vm0, %v15353_v51, 0.0  ;;  %v5255_v55 = vmul.f32 0.015625, %v20166_v5  ;;  %v6749_v48 = vunpack.c.l.b16 %v5548_v7 }
 0x390   : > { %22219 = vst [vmem:[#allocation19_spill] sm:$0xff] %v20275_v9  ;;  %v6765_v37 = vunpack.c.l.b16 %v5556_v36  ;;  %v6497_v33 = vunpack.c.l.b16 %v20257_v24  ;;  %v5431_v9 = vpack.c.bf16 %v5003_v15, %v5002_v23  ;;  %v7642_v5 = vrot.slane %v6513_v34, %v18194_v29 }
 0x391   : > { %v20302_v51 = vsel %vm3336_vm0, %v15858_v12, 0.0  ;;  %v6498_v15 = vunpack.c.h.b16 %v20257_v24  ;;  %v8807_v19 = vrot.slane %v6749_v48, %v18194_v29  ;;  %v5005_v7 = vmul.f32 0.015625, %v20220_v61 }
 0x392   : > { %4661 = vadd.xlane.f32.xlu1 %v4660_v25  ;;  %4658 = vadd.xlane.f32.xlu0 %v4657_v16  ;;  %v5254_v25 = vmul.f32 0.015625, %v20168_v50  ;;  %v4987_v16 = vmul.f32 0.015625, %v20177_v3  ;;  %v6766_v50 = vunpack.c.h.b16 %v5556_v36  ;;  %22222 = vst [vmem:[#allocation22_spill] sm:$0xff] %v20302_v51  ;;  %v8886_v59 = vrot.slane %v6765_v37, %v18194_v29 }
 0x393   : > { %v3756_v14 = vpop.xlane.xlu1 %3755  ;;  %v3753_v13 = vpop.xlane.xlu0 %3752  ;;  %v7563_v36 = vrot.slane %v6497_v33, %v18194_v29  ;;  %v6515_v12 = vunpack.c.l.b16 %v5431_v9  ;;  %v5239_v51 = vmul.f32 0.015625, %v20187_v27  ;;  %v7643_v24 = vsel %vm22183_vm6, %v7642_v5, %v20081_v42 }
 0x394   : > { %v5557_v34 = vpack.c.bf16 %v5255_v55, %v5254_v25  ;;  %v5423_v57 = vpack.c.bf16 %v4987_v16, %v4986_v11  ;;  %v8891_v37 = vrot.slane %v6766_v50, %v18197_v32  ;;  %v8887_v27 = vsel %vm22183_vm6, %v8886_v59, %v20092_v40 }
 0x395   : > { %v7564_v42 = vsel %vm22183_vm6, %v7563_v36, %v20110_v4  ;;  %v8812_v25 = vrot.slane %v6750_v22, %v18197_v32  ;;  %v6516_v11 = vunpack.c.h.b16 %v5431_v9  ;;  %v7652_v48 = vrot.slane %v6515_v12, %v18208_v52 }
 0x396   : > { %3857 = vadd.xlane.f32.xlu1 %v20202_v38  ;;  %3854 = vadd.xlane.f32.xlu0 %v20205_v18  ;;  %v20305_v38 = vsel %vm3336_vm0, %v15857_v30, 0.0  ;;  %v7647_v18 = vrot.slane %v6514_v35, %v18197_v32  ;;  %v5238_v30 = vmul.f32 0.015625, %v20189_v31  ;;  %v5004_v35 = vmul.f32 0.015625, %v20222_v2 }
 0x397   : > { %v20297_v3 = vpop.xlane.xlu1 %4511  ;;  %v20299_v39 = vpop.xlane.xlu0 %4508  ;;  %v7568_v31 = vrot.slane %v6498_v15, %v18197_v32  ;;  %v6767_v16 = vunpack.c.l.b16 %v5557_v34  ;;  %v6499_v61 = vunpack.c.l.b16 %v5423_v57  ;;  %v8808_v2 = vsel %vm22183_vm6, %v8807_v19, %v20130_v43  ;;  %vm22224_vm6 = vmmov %vm22223_vm7 }
 0x398   : > { %v5549_v40 = vpack.c.bf16 %v5239_v51, %v5238_v30  ;;  %v6768_v5 = vunpack.c.h.b16 %v5557_v34  ;;  %v4989_v50 = vmul.f32 0.015625, %v3756_v14  ;;  %v7648_v15 = vsel %vm22223_vm7, %v7647_v18, %v7643_v24  ;;  %vm22225_vm5 = vmmov %vm22224_vm6 }
 0x399   : > { %v8892_v43 = vsel %vm22224_vm6, %v8891_v37, %v8887_v27  ;;  %v8896_v9 = vrot.slane %v6767_v16, %v18208_v52  ;;  %v6500_v19 = vunpack.c.h.b16 %v5423_v57  ;;  %v7569_v51 = vsel %vm22225_vm5, %v7568_v31, %v7564_v42  ;;  %vm22226_vm4 = vmmov %vm22225_vm5 }
 0x39a   : > { %4613 = vadd.xlane.f32.xlu1 %v20208_v10  ;;  %4610 = vadd.xlane.f32.xlu0 %v20212_v20  ;;  %v5257_v10 = vmul.f32 0.015625, %v20247_v58  ;;  %v5256_v20 = vmul.f32 0.015625, %v20249_v47  ;;  %v5432_v58 = vpack.c.bf16 %v5005_v7, %v5004_v35  ;;  %v4988_v47 = vmul.f32 0.015625, %v3753_v13 }
 0x39b   : > { %v3810_v33 = vpop.xlane.xlu1 %3809  ;;  %v3807_v55 = vpop.xlane.xlu0 %3806  ;;  %v8813_v14 = vsel %vm22226_vm4, %v8812_v25, %v8808_v2  ;;  %v6751_v13 = vunpack.c.l.b16 %v5549_v40  ;;  %v7653_v18 = vsel %vm6927_vm8, %v7652_v48, %v7648_v15  ;;  %v8901_v34 = vrot.slane %v6768_v5, %v18211_v53 }
 0x39c   : > { %v5558_v36 = vpack.c.bf16 %v5257_v10, %v5256_v20  ;;  %v5007_v22 = vmul.f32 0.015625, %v3810_v33  ;;  %v5006_v23 = vmul.f32 0.015625, %v3807_v55  ;;  %v6517_v12 = vunpack.c.l.b16 %v5432_v58 }
 0x39d   : > { %v5424_v30 = vpack.c.bf16 %v4989_v50, %v4988_v47  ;;  %v8897_v55 = vsel %vm6927_vm8, %v8896_v9, %v8892_v43  ;;  %v6752_v31 = vunpack.c.h.b16 %v5549_v40  ;;  %v8817_v10 = vrot.slane %v6751_v13, %v18208_v52 }
 0x39e   : > { %3911 = vadd.xlane.f32.xlu1 %v20215_v60  ;;  %3908 = vadd.xlane.f32.xlu0 %v20218_v56  ;;  %v7573_v60 = vrot.slane %v6499_v61, %v18208_v52  ;;  %v7657_v56 = vrot.slane %v6516_v11, %v18211_v53  ;;  %v6769_v37 = vunpack.c.l.b16 %v5558_v36  ;;  %v5433_v7 = vpack.c.bf16 %v5007_v22, %v5006_v23 }
 0x39f   : > { %v4566_v4 = vpop.xlane.xlu1 %4565  ;;  %v4563_v59 = vpop.xlane.xlu0 %4562  ;;  %v6518_v20 = vunpack.c.h.b16 %v5432_v58  ;;  %v5241_v42 = vmul.f32 0.015625, %v20297_v3  ;;  %v7662_v25 = vrot.slane %v6517_v12, %v18226_v21  ;;  %v6770_v16 = vunpack.c.h.b16 %v5558_v36 }
 0x3a0   : > { %v5259_v35 = vmul.f32 0.015625, %v4566_v4  ;;  %v5258_v33 = vmul.f32 0.015625, %v4563_v59  ;;  %v7574_v27 = vsel %vm6927_vm8, %v7573_v60, %v7569_v51  ;;  %v7658_v23 = vsel %vm6934_vm9, %v7657_v56, %v7653_v18 }
 0x3a1   : > { %v6501_v61 = vunpack.c.l.b16 %v5424_v30  ;;  %v8902_v48 = vsel %vm6934_vm9, %v8901_v34, %v8897_v55  ;;  %v8906_v40 = vrot.slane %v6769_v37, %v18226_v21  ;;  %v6519_v5 = vunpack.c.l.b16 %v5433_v7 }
 0x3a2   : > { %4667 = vadd.xlane.f32.xlu1 %v20225_v17  ;;  %4664 = vadd.xlane.f32.xlu0 %v20236_v1  ;;  %v7578_v17 = vrot.slane %v6500_v19, %v18211_v53  ;;  %v5240_v1 = vmul.f32 0.015625, %v20299_v39  ;;  %v5559_v3 = vpack.c.bf16 %v5259_v35, %v5258_v33  ;;  %v8818_v47 = vsel %vm6927_vm8, %v8817_v10, %v8813_v14 }
 0x3a3   : > { %v3762_v57 = vpop.xlane.xlu1 %3761  ;;  %v3759_v24 = vpop.xlane.xlu0 %3758  ;;  %v7667_v4 = vrot.slane %v6518_v20, %v18239_v44  ;;  %v6502_v59 = vunpack.c.h.b16 %v5424_v30  ;;  %vm22227_vm4 = vcmask 720512   ;;  %v8911_v36 = vrot.slane %v6770_v16, %v18239_v44 }
 0x3a4   : > { %v7579_v39 = vsel %vm6934_vm9, %v7578_v17, %v7574_v27  ;;  %v4991_v58 = vmul.f32 0.015625, %v3762_v57  ;;  %v4990_v50 = vmul.f32 0.015625, %v3759_v24  ;;  %v7663_v15 = vsel %vm22227_vm4, %v7662_v25, %v7658_v23  ;;  %vm22228_vm5 = vmmov %vm22227_vm4 }
 0x3a5   : > { %v7583_v22 = vrot.slane %v6501_v61, %v18226_v21  ;;  %v6520_v43 = vunpack.c.h.b16 %v5433_v7  ;;  %v8907_v60 = vsel %vm22228_vm5, %v8906_v40, %v8902_v48  ;;  %v7672_v51 = vrot.slane %v6519_v5, %v18245_v49  ;;  %vm22229_vm6 = vmmov %vm22227_vm4  ;;  %v22230_v48 = vld [vmem:[#allocation18_spill] sm:$0xff] }
 0x3a6   : > { %3863 = vadd.xlane.f32.xlu1 %v20241_v8  ;;  %3860 = vadd.xlane.f32.xlu0 %v20244_v54  ;;  %v8822_v8 = vrot.slane %v6752_v31, %v18211_v53  ;;  %v20362_v54 = vpack.c.bf16 %v5241_v42, %v5240_v1  ;;  %v6771_v14 = vunpack.c.l.b16 %v5559_v3  ;;  %v5425_v13 = vpack.c.bf16 %v4991_v58, %v4990_v50  ;;  %vm22233_vm7 = vmmov %vm22227_vm4 }
 0x3a7   : > { %v4518_v2 = vpop.xlane.xlu1 %4517  ;;  %v4515_v11 = vpop.xlane.xlu0 %4514  ;;  %v7668_v30 = vsel %vm6948_vm11, %v7667_v4, %v7663_v15  ;;  %v7588_v57 = vrot.slane %v6502_v59, %v18239_v44  ;;  %v7584_v24 = vsel %vm22229_vm6, %v7583_v22, %v7579_v39  ;;  %v7677_v37 = vrot.slane %v6520_v43, %v18255_v6 }
 0x3a8   : > { %v5243_v18 = vmul.f32 0.015625, %v4518_v2  ;;  %v8823_v12 = vsel %vm6934_vm9, %v8822_v8, %v8818_v47  ;;  %v6772_v7 = vunpack.c.h.b16 %v5559_v3  ;;  %v8912_v27 = vsel %vm6948_vm11, %v8911_v36, %v8907_v60 }
 0x3a9   : > { %v7673_v17 = vsel %vm6955_vm12, %v7672_v51, %v7668_v30  ;;  %v8916_v20 = vrot.slane %v6771_v14, %v18245_v49  ;;  %v6503_v42 = vunpack.c.l.b16 %v5425_v13  ;;  %v7589_v23 = vsel %vm6948_vm11, %v7588_v57, %v7584_v24 }
 0x3aa   : > { %4619 = vadd.xlane.f32.xlu1 %v20252_v41  ;;  %4616 = vadd.xlane.f32.xlu0 %v20255_v62  ;;  %v5242_v41 = vmul.f32 0.015625, %v4515_v11  ;;  %v6753_v62 = vunpack.c.l.b16 %v20362_v54  ;;  %v6754_v25 = vunpack.c.h.b16 %v20362_v54  ;;  %v8921_v2 = vrot.slane %v6772_v7, %v18255_v6  ;;  %v22231_v54 = vld [vmem:[#allocation17_spill] sm:$0xff]  ;;  %v22234_v7 = vld [vmem:[#allocation20_spill] sm:$0xff] }
 0x3ab   : > { %v3816_v9 = vpop.xlane.xlu1 %3815  ;;  %v3813_v19 = vpop.xlane.xlu0 %3812  ;;  %v7678_v3 = vsel %vm6962_vm13, %v7677_v37, %v7673_v17  ;;  %v8917_v47 = vsel %vm6955_vm12, %v8916_v20, %v8912_v27  ;;  %v6504_v4 = vunpack.c.h.b16 %v5425_v13  ;;  %vm22244_vm4 = vcmask 326912  }
 0x3ac   : > { %v5009_v56 = vmul.f32 0.015625, %v3816_v9  ;;  %v5008_v34 = vmul.f32 0.015625, %v3813_v19  ;;  %v22232_v9 = vld [vmem:[#allocation19_spill] sm:$0xff]  ;;  %v8832_v60 = vrot.slane %v6754_v25, %v18239_v44  ;;  %v8922_v30 = vsel %vm6962_vm13, %v8921_v2, %v8917_v47  ;;  %vm22246_vm6 = vmmov %vm22244_vm4 }
 0x3ad   : > { %vm22245_vm5 = vcmask 392512  }
 0x3ae   : > { %3965 = vadd.xlane.f32.xlu1 %v20260_v0  ;;  %v5434_v35 = vpack.c.bf16 %v5009_v56, %v5008_v34  ;;  %3962 = vadd.xlane.f32.xlu0 %v20264_v45  ;;  %v5551_v0 = vpack.c.bf16 %v5243_v18, %v5242_v41  ;;  %v8827_v45 = vrot.slane %v6753_v62, %v18226_v21 }
 0x3af   : > { %v4572_v33 = vpop.xlane.xlu1 %4571  ;;  %v4569_v55 = vpop.xlane.xlu0 %4568  ;;  %v7598_v62 = vrot.slane %v6504_v4, %v18255_v6 }
 0x3b0   : > { %v5261_v31 = vmul.f32 0.015625, %v4572_v33  ;;  %v5260_v10 = vmul.f32 0.015625, %v4569_v55  ;;  %v6521_v1 = vunpack.c.l.b16 %v5434_v35  ;;  %v6522_v16 = vunpack.c.h.b16 %v5434_v35 }
 0x3b1   : > { %v6755_v59 = vunpack.c.l.b16 %v5551_v0  ;;  %v8828_v19 = vsel %vm22233_vm7, %v8827_v45, %v8823_v12  ;;  %v6756_v51 = vunpack.c.h.b16 %v5551_v0  ;;  %vm22247_vm7 = vmmov %vm22245_vm5 }
 0x3b2   : > { %v5560_v61 = vpack.c.bf16 %v5261_v31, %v5260_v10  ;;  %4721 = vadd.xlane.f32.xlu1 %v20267_v46  ;;  %v7682_v11 = vrot.slane %v6521_v1, %v18264_v28  ;;  %4718 = vadd.xlane.f32.xlu0 %v22230_v48  ;;  %v7593_v46 = vrot.slane %v6503_v42, %v18245_v49  ;;  %v22235_v31 = vld [vmem:[#allocation21_spill] sm:$0xff] }
 0x3b3   : > { %v3768_v40 = vpop.xlane.xlu1 %3767  ;;  %v3765_v5 = vpop.xlane.xlu0 %3764  ;;  %v7687_v15 = vrot.slane %v6522_v16, %v22231_v54  ;;  %v8837_v12 = vrot.slane %v6755_v59, %v18245_v49  ;;  %v8833_v55 = vsel %vm6948_vm11, %v8832_v60, %v8828_v19  ;;  %v8842_v27 = vrot.slane %v6756_v51, %v18255_v6  ;;  %v16071_v16 = vld [vmem:[%s18038_s13 + $0x308] sm:$0xff]  }
 0x3b4   : > { %v6773_v39 = vunpack.c.l.b16 %v5560_v61  ;;  %v6774_v8 = vunpack.c.h.b16 %v5560_v61  ;;  %v4993_v58 = vmul.f32 0.015625, %v3768_v40  ;;  %v4992_v50 = vmul.f32 0.015625, %v3765_v5 }
 0x3b5   : > { %v7683_v13 = vsel %vm6969_vm14, %v7682_v11, %v7678_v3  ;;  %v7594_v57 = vsel %vm6955_vm12, %v7593_v46, %v7589_v23  ;;  %v8838_v45 = vsel %vm6955_vm12, %v8837_v12, %v8833_v55  ;;  %v15893_v11 = vunpack.c.l.bf16 %v20286_v26 }
 0x3b6   : > { %v8926_v36 = vrot.slane %v6773_v39, %v18264_v28  ;;  %v8931_v22 = vrot.slane %v6774_v8, %v22231_v54  ;;  %v5426_v43 = vpack.c.bf16 %v4993_v58, %v4992_v50  ;;  %3917 = vadd.xlane.f32.xlu1 %v22232_v9  ;;  %3914 = vadd.xlane.f32.xlu0 %v20279_v63  ;;  %v22236_v39 = vld [vmem:[#allocation22_spill] sm:$0xff]  ;;  %v22237_v50 = vunpack.c.h.bf16 %v20286_v26 }
 0x3b7   : > { %v4524_v14 = vpop.xlane.xlu1 %4523  ;;  %v4521_v56 = vpop.xlane.xlu0 %4520  ;;  %v7688_v35 = vsel %vm6976_vm15, %v7687_v15, %v7683_v13  ;;  %v7599_v61 = vsel %vm6962_vm13, %v7598_v62, %v7594_v57  ;;  %v15358_v46 = vunpack.c.h.bf16 %v16071_v16  ;;  %v8843_v59 = vsel %vm6962_vm13, %v8842_v27, %v8838_v45 }
 0x3b8   : > { %v6505_v18 = vunpack.c.l.b16 %v5426_v43  ;;  %v5245_v41 = vmul.f32 0.015625, %v4524_v14  ;;  %v5244_v34 = vmul.f32 0.015625, %v4521_v56  ;;  %v8927_v24 = vsel %vm6969_vm14, %v8926_v36, %v8922_v30  ;;  %v16813_v30 = vld [vmem:[%s18036_s12 + $0xa00] ss:$16 sps:$4 sm:$0xff]  }
 0x3b9   : > { %v6506_v37 = vunpack.c.h.b16 %v5426_v43  ;;  %v8932_v33 = vsel %vm6976_vm15, %v8931_v22, %v8927_v24  ;;  %v4726_v47 = vsel %vm3336_vm0, %v22237_v50, 0.0  ;;  %v16197_v22 = vld [vmem:[%s18038_s13 + $0x6f8] sm:$0xff]   ;;  %v4723_v43 = vsel %vm3336_vm0, %v15893_v11, 0.0  ;;  %v16830_v11 = vld [vmem:[%s18036_s12 + $0xa4c] ss:$16 sps:$4 sm:$0xff]  }
 0x3ba   : > { %v5552_v63 = vpack.c.bf16 %v5245_v41, %v5244_v34  ;;  %3971 = vadd.xlane.f32.xlu1 %v22234_v7  ;;  %v7603_v17 = vrot.slane %v6505_v18, %v18264_v28  ;;  %3968 = vadd.xlane.f32.xlu0 %v22235_v31  ;;  %v9397_v42 = vsel %vm9387_vm10, %v8932_v33, %v7688_v35  ;;  %v15357_v19 = vunpack.c.l.bf16 %v16071_v16  ;;  %v16080_v41 = vld [vmem:[%s18038_s13 + $0x350] sm:$0xff]  }
 0x3bb   : > { %v3870_v10 = vpop.xlane.xlu1 %3869  ;;  %v3867_v20 = vpop.xlane.xlu0 %3866  ;;  %v9413_v2 = vpack.c.b16 %v9397_v42, %v9397_v42  ;;  %v7608_v48 = vrot.slane %v6506_v37, %v22231_v54  ;;  %v3922_v13 = vsel %vm3336_vm0, %v15358_v46, 0.0  ;;  %v15862_v18 = vunpack.c.h.bf16 %v16197_v22  ;;  %v16816_v37 = vld [vmem:[%s18036_s12 + $0xa08] ss:$16 sps:$4 sm:$0xff]   ;;  %v16824_v35 = vld [vmem:[%s18036_s12 + $0xa2c] ss:$16 sps:$4 sm:$0xff]  }
 0x3bc   : > { %v6757_v0 = vunpack.c.l.b16 %v5552_v63  ;;  %v6758_v1 = vunpack.c.h.b16 %v5552_v63  ;;  %v5027_v23 = vmul.f32 0.015625, %v3870_v10  ;;  %v5026_v25 = vmul.f32 0.015625, %v3867_v20  ;;  %v16821_v63 = vld [vmem:[%s18036_s12 + $0xa24] ss:$16 sps:$4 sm:$0xff]   ;;  %v16822_v16 = vld [vmem:[%s18036_s12 + $0xa28] ss:$16 sps:$4 sm:$0xff]  }
 0x3bd   : > { %12155 = vmatprep.mubr.bf16.mxu0 %v9413_v2  ;;  %12483 = vmatprep.mubr.bf16.mxu1 %v9413_v2  ;;  %v7604_v4 = vsel %vm6969_vm14, %v7603_v17, %v7599_v61  ;;  %v3919_v12 = vsel %vm3336_vm0, %v15357_v19, 0.0  ;;  %v15861_v24 = vunpack.c.l.bf16 %v16197_v22  ;;  %v15394_v7 = vunpack.c.h.bf16 %v16080_v41  ;;  %v16827_v61 = vld [vmem:[%s18036_s12 + $0xa44] ss:$16 sps:$4 sm:$0xff]   ;;  %v20464_v19 = vld [vmem:[%s18038_s13 + $0x700] sm:$0xff]  }
 0x3be   : > { %v8847_v40 = vrot.slane %v6757_v0, %v18264_v28  ;;  %v8852_v5 = vrot.slane %v6758_v1, %v22231_v54  ;;  %v20420_v3 = vpack.c.bf16 %v5027_v23, %v5026_v25  ;;  %4673 = vadd.xlane.f32.xlu1 %v22236_v39  ;;  %4670 = vadd.xlane.f32.xlu0 %v20305_v38  ;;  %v4678_v10 = vsel %vm3336_vm0, %v15862_v18, 0.0  ;;  %v16206_v0 = vld [vmem:[%s18038_s13 + $0x740] sm:$0xff]   ;;  %v16819_v1 = vld [vmem:[%s18036_s12 + $0xa20] ss:$16 sps:$4 sm:$0xff]  }
 0x3bf   : > { %v4626_v8 = vpop.xlane.xlu1 %4625  ;;  %v4623_v58 = vpop.xlane.xlu0 %4622  ;;  %v7609_v60 = vsel %vm6976_vm15, %v7608_v48, %v7604_v4  ;;  %v4675_v23 = vsel %vm3336_vm0, %v15861_v24, 0.0  ;;  %v15393_v25 = vunpack.c.l.bf16 %v16080_v41  ;;  %v3976_v2 = vsel %vm3336_vm0, %v15394_v7, 0.0  ;;  %v22238_v48 = vld [vmem:[#allocation8_spill] sm:$0xff] }
 0x3c0   : > { %v5279_v15 = vmul.f32 0.015625, %v4626_v8  ;;  %v5278_v36 = vmul.f32 0.015625, %v4623_v58  ;;  %v8848_v9 = vsel %vm6969_vm14, %v8847_v40, %v8843_v59  ;;  %v6539_v33 = vunpack.c.l.b16 %v20420_v3  ;;  %v16836_v41 = vld [vmem:[%s18036_s12 + $0xa6c] ss:$16 sps:$4 sm:$0xff]  }
 0x3c1   : > { %v8853_v51 = vsel %vm6976_vm15, %v8852_v5, %v8848_v9  ;;  %v6540_v55 = vunpack.c.h.b16 %v20420_v3  ;;  %v22239_v5 = vld [vmem:[#allocation11_spill] sm:$0xff]  ;;  %v15898_v58 = vunpack.c.h.bf16 %v16206_v0  ;;  %v15897_v50 = vunpack.c.l.bf16 %v16206_v0 }
 0x3c2   : > { %v20432_v26 = vpack.c.bf16 %v5279_v15, %v5278_v36  ;;  %4727 = vadd.xlane.f32.xlu1 %v4726_v47  ;;  %v9396_v56 = vsel %vm9387_vm10, %v8853_v51, %v7609_v60  ;;  %4724 = vadd.xlane.f32.xlu0 %v4723_v43  ;;  %v7771_v40 = vrot.slane %v6539_v33, %v22238_v48  ;;  %v16072_v15 = vld [vmem:[%s18038_s13 + $0x310] sm:$0xff]   ;;  %v16825_v36 = vld [vmem:[%s18036_s12 + $0xa40] ss:$16 sps:$4 sm:$0xff]   ;;  %v3973_v9 = vsel %vm3336_vm0, %v15393_v25, 0.0  ;;  %v16833_v51 = vld [vmem:[%s18036_s12 + $0xa64] ss:$16 sps:$4 sm:$0xff]  }
 0x3c3   : > { %v3822_v38 = vpop.xlane.xlu1 %3821  ;;  %v3819_v14 = vpop.xlane.xlu0 %3818  ;;  %v9412_v62 = vpack.c.b16 %v9396_v56, %v9396_v56  ;;  %v7775_v3 = vrot.slane %v6540_v55, %v22239_v5  ;;  %v16828_v60 = vld [vmem:[%s18036_s12 + $0xa48] ss:$16 sps:$4 sm:$0xff]   ;;  %v22241_v56 = vld [vmem:[#allocation10_spill] sm:$0xff]  ;;  %v15866_v7 = vunpack.c.h.bf16 %v20464_v19 }
 0x3c4   : > { %v5011_v34 = vmul.f32 0.015625, %v3822_v38  ;;  %v5010_v57 = vmul.f32 0.015625, %v3819_v14  ;;  %v6791_v22 = vunpack.c.l.b16 %v20432_v26  ;;  %v6792_v43 = vunpack.c.h.b16 %v20432_v26  ;;  %v22240_v38 = vld [vmem:[#allocation9_spill] sm:$0xff]  ;;  %v16842_v25 = vld [vmem:[%s18036_s12 + $0xa8c] ss:$16 sps:$4 sm:$0xff]  }
 0x3c5   : > { %12156 = vmatmul.mubr.bf16.vlgmr.msra.gmra.mrb[0].mxu0 %v9412_v62  ;;  %12484 = vmatmul.mubr.bf16.vlgmr.msra.gmra.mrb[0].mxu1 %v9412_v62  ;;  %v7776_v26 = vsel %vm6878_vm1, %v7775_v3, %v7771_v40  ;;  %v4729_v62 = vsel %vm3336_vm0, %v15897_v50, 0.0  ;;  %v4684_v3 = vsel %vm3336_vm0, %v15866_v7, 0.0  ;;  %v16851_v7 = vld [vmem:[%s18036_s12 + $0xac4] ss:$16 sps:$4 sm:$0xff]  }
 0x3c6   : > { %3923 = vadd.xlane.f32.xlu1 %v3922_v13  ;;  %v20446_v27 = vpack.c.bf16 %v5011_v34, %v5010_v57  ;;  %3920 = vadd.xlane.f32.xlu0 %v3919_v12  ;;  %v4732_v57 = vsel %vm3336_vm0, %v15898_v58, 0.0  ;;  %v15362_v12 = vunpack.c.h.bf16 %v16072_v15  ;;  %v9015_v33 = vrot.slane %v6791_v22, %v22238_v48 }
 0x3c7   : > { %v3876_v17 = vpop.xlane.xlu1 %3875  ;;  %v3873_v31 = vpop.xlane.xlu0 %3872  ;;  %12165 = vmatpush1.bf16.msra.mxu0 %v16813_v30  ;;  %12493 = vmatpush1.bf16.msra.mxu1 %v16816_v37  ;;  %v9019_v55 = vrot.slane %v6792_v43, %v22239_v5  ;;  %v20505_v43 = vld [vmem:[%s18038_s13 + $0x748] sm:$0xff]  }
 0x3c8   : > { %v5029_v20 = vmul.f32 0.015625, %v3876_v17  ;;  %v5028_v42 = vmul.f32 0.015625, %v3873_v31  ;;  %12166 = vmatprep.subr.bf16.mxu0 %v16821_v63  ;;  %12494 = vmatprep.subr.bf16.mxu1 %v16824_v35  ;;  %v15361_v63 = vunpack.c.l.bf16 %v16072_v15  ;;  %v16831_v35 = vld [vmem:[%s18036_s12 + $0xa60] ss:$16 sps:$4 sm:$0xff]   ;;  %v6524_v0 = vunpack.c.h.b16 %v20446_v27 }
 0x3ca   : > { %v5444_v45 = vpack.c.bf16 %v5029_v20, %v5028_v42  ;;  %4679 = vadd.xlane.f32.xlu1 %v4678_v10  ;;  %4676 = vadd.xlane.f32.xlu0 %v4675_v23  ;;  %v16834_v10 = vld [vmem:[%s18036_s12 + $0xa68] ss:$16 sps:$4 sm:$0xff]   ;;  %v16839_v20 = vld [vmem:[%s18036_s12 + $0xa84] ss:$16 sps:$4 sm:$0xff]   ;;  %v6523_v42 = vunpack.c.l.b16 %v20446_v27  ;;  %v3925_v27 = vsel %vm3336_vm0, %v15361_v63, 0.0  ;;  %v7696_v15 = vrot.slane %v6524_v0, %v22239_v5 }
 0x3cb   : > { %v4578_v39 = vpop.xlane.xlu1 %4577  ;;  %v4575_v8 = vpop.xlane.xlu0 %4574  ;;  %12167 = vmatpush1.bf16.msra.mxu0 %v16819_v1  ;;  %12495 = vmatpush1.bf16.msra.mxu1 %v16822_v16  ;;  %v15865_v1 = vunpack.c.l.bf16 %v20464_v19  ;;  %v20490_v23 = vld [vmem:[%s18038_s13 + $0x358] sm:$0xff]   ;;  %v16846_v63 = vld [vmem:[%s18036_s12 + $0xaa8] ss:$16 sps:$4 sm:$0xff]  }
 0x3cc   : > { %v6541_v47 = vunpack.c.l.b16 %v5444_v45  ;;  %v6542_v4 = vunpack.c.h.b16 %v5444_v45  ;;  %v5263_v46 = vmul.f32 0.015625, %v4578_v39  ;;  %v5262_v59 = vmul.f32 0.015625, %v4575_v8  ;;  %12168 = vmatprep.subr.bf16.mxu0 %v16827_v61  ;;  %12496 = vmatprep.subr.bf16.mxu1 %v16830_v11  ;;  %v16837_v39 = vld [vmem:[%s18036_s12 + $0xa80] ss:$16 sps:$4 sm:$0xff]  }
 0x3cd   : > { %v9020_v8 = vsel %vm6878_vm1, %v9019_v55, %v9015_v33  ;;  %v4681_v22 = vsel %vm3336_vm0, %v15865_v1, 0.0 }
 0x3ce   : > { %v7780_v14 = vrot.slane %v6541_v47, %v22240_v38  ;;  %v7785_v13 = vrot.slane %v6542_v4, %v22241_v56  ;;  %v20470_v18 = vpack.c.bf16 %v5263_v46, %v5262_v59  ;;  %3977 = vadd.xlane.f32.xlu1 %v3976_v2  ;;  %3974 = vadd.xlane.f32.xlu0 %v3973_v9  ;;  %v3928_v2 = vsel %vm3336_vm0, %v15362_v12, 0.0  ;;  %v16840_v4 = vld [vmem:[%s18036_s12 + $0xa88] ss:$16 sps:$4 sm:$0xff]   ;;  %v16845_v46 = vld [vmem:[%s18036_s12 + $0xaa4] ss:$16 sps:$4 sm:$0xff]  }
 0x3cf   : > { %v4632_v34 = vpop.xlane.xlu1 %4631  ;;  %v4629_v30 = vpop.xlane.xlu0 %4628  ;;  %12169 = vmatpush1.bf16.msra.mxu0 %v16825_v36  ;;  %12497 = vmatpush1.bf16.msra.mxu1 %v16828_v60  ;;  %v15398_v47 = vunpack.c.h.bf16 %v20490_v23  ;;  %v7692_v59 = vrot.slane %v6523_v42, %v22238_v48 }
 0x3d0   : > { %v7781_v24 = vsel %vm6885_vm2, %v7780_v14, %v7776_v26  ;;  %v5281_v37 = vmul.f32 0.015625, %v4632_v34  ;;  %v5280_v31 = vmul.f32 0.015625, %v4629_v30  ;;  %12170 = vmatprep.subr.bf16.mxu0 %v16833_v51  ;;  %12498 = vmatprep.subr.bf16.mxu1 %v16836_v41  ;;  %v6775_v9 = vunpack.c.l.b16 %v20470_v18  ;;  %v16848_v41 = vld [vmem:[%s18036_s12 + $0xaac] ss:$16 sps:$4 sm:$0xff]  }
 0x3d1   : > { %v20482_v17 = vsel %vm22199_vm3, %v7785_v13, %v7781_v24  ;;  %v6776_v19 = vunpack.c.h.b16 %v20470_v18  ;;  %v3982_v18 = vsel %vm3336_vm0, %v15398_v47, 0.0  ;;  %v15397_v24 = vunpack.c.l.bf16 %v20490_v23 }
 0x3d2   : > { %4733 = vadd.xlane.f32.xlu1 %v4732_v57  ;;  %v5570_v16 = vpack.c.bf16 %v5281_v37, %v5280_v31  ;;  %4730 = vadd.xlane.f32.xlu0 %v4729_v62  ;;  %v16843_v62 = vld [vmem:[%s18036_s12 + $0xaa0] ss:$16 sps:$4 sm:$0xff]   ;;  %v15902_v37 = vunpack.c.h.bf16 %v20505_v43  ;;  %v8936_v42 = vrot.slane %v6775_v9, %v22238_v48 }
 0x3d3   : > { %v3828_v61 = vpop.xlane.xlu1 %3827  ;;  %v3825_v45 = vpop.xlane.xlu0 %3824  ;;  %12171 = vmatpush1.bf16.msra.mxu0 %v16831_v35  ;;  %12499 = vmatpush1.bf16.msra.mxu1 %v16834_v10  ;;  %v16854_v10 = vld [vmem:[%s18036_s12 + $0xacc] ss:$16 sps:$4 sm:$0xff]   ;;  %v8940_v0 = vrot.slane %v6776_v19, %v22239_v5 }
 0x3d4   : > { %v5013_v11 = vmul.f32 0.015625, %v3828_v61  ;;  %v5012_v40 = vmul.f32 0.015625, %v3825_v45  ;;  %v6793_v58 = vunpack.c.l.b16 %v5570_v16  ;;  %v6794_v50 = vunpack.c.h.b16 %v5570_v16  ;;  %12172 = vmatprep.subr.bf16.mxu0 %v16839_v20  ;;  %12500 = vmatprep.subr.bf16.mxu1 %v16842_v25 }
 0x3d5   : > { %v7697_v20 = vsel %vm6878_vm1, %v7696_v15, %v7692_v59  ;;  %v15901_v25 = vunpack.c.l.bf16 %v20505_v43 }
 0x3d6   : > { %v5436_v36 = vpack.c.bf16 %v5013_v11, %v5012_v40  ;;  %3929 = vadd.xlane.f32.xlu1 %v3928_v2  ;;  %v9024_v60 = vrot.slane %v6793_v58, %v22240_v38  ;;  %v9029_v51 = vrot.slane %v6794_v50, %v22241_v56  ;;  %3926 = vadd.xlane.f32.xlu0 %v3925_v27  ;;  %v16073_v11 = vld [vmem:[%s18038_s13 + $0x318] sm:$0xff]  }
 0x3d7   : > { %v4584_v14 = vpop.xlane.xlu1 %4583  ;;  %v4581_v13 = vpop.xlane.xlu0 %4580  ;;  %12173 = vmatpush1.bf16.msra.mxu0 %v16837_v39  ;;  %12501 = vmatpush1.bf16.msra.mxu1 %v16840_v4  ;;  %v16849_v40 = vld [vmem:[%s18036_s12 + $0xac0] ss:$16 sps:$4 sm:$0xff]   ;;  %v3979_v39 = vsel %vm3336_vm0, %v15397_v24, 0.0  ;;  %v16857_v58 = vld [vmem:[%s18036_s12 + $0xae4] ss:$16 sps:$4 sm:$0xff]   ;;  %v15366_v43 = vunpack.c.h.bf16 %v16073_v11 }
 0x3d8   : > { %v6525_v26 = vunpack.c.l.b16 %v5436_v36  ;;  %v6526_v34 = vunpack.c.h.b16 %v5436_v36  ;;  %v5265_v30 = vmul.f32 0.015625, %v4584_v14  ;;  %v5264_v57 = vmul.f32 0.015625, %v4581_v13  ;;  %12174 = vmatprep.subr.bf16.mxu0 %v16845_v46  ;;  %12502 = vmatprep.subr.bf16.mxu1 %v16848_v41  ;;  %v16860_v4 = vld [vmem:[%s18036_s12 + $0xaec] ss:$16 sps:$4 sm:$0xff]   ;;  %v16199_v14 = vld [vmem:[%s18038_s13 + $0x708] sm:$0xff]  }
 0x3d9   : > { %v9025_v12 = vsel %vm6885_vm2, %v9024_v60, %v9020_v8  ;;  %v16852_v8 = vld [vmem:[%s18036_s12 + $0xac8] ss:$16 sps:$4 sm:$0xff]   ;;  %v8941_v46 = vsel %vm6878_vm1, %v8940_v0, %v8936_v42  ;;  %v16855_v13 = vld [vmem:[%s18036_s12 + $0xae0] ss:$16 sps:$4 sm:$0xff]  }
 0x3da   : > { %v20520_v35 = vsel %vm22199_vm3, %v9029_v51, %v9025_v12  ;;  %v7701_v33 = vrot.slane %v6525_v26, %v22240_v38  ;;  %v7706_v55 = vrot.slane %v6526_v34, %v22241_v56  ;;  %v5562_v31 = vpack.c.bf16 %v5265_v30, %v5264_v57  ;;  %4685 = vadd.xlane.f32.xlu1 %v4684_v3  ;;  %v16858_v57 = vld [vmem:[%s18036_s12 + $0xae8] ss:$16 sps:$4 sm:$0xff]  }
 0x3db   : > { %v3882_v1 = vpop.xlane.xlu1 %3881  ;;  %v3879_v23 = vpop.xlane.xlu0 %3878  ;;  %4682 = vadd.xlane.f32.xlu0 %v4681_v22  ;;  %12175 = vmatpush1.bf16.msra.mxu0 %v16843_v62  ;;  %v4738_v22 = vsel %vm3336_vm0, %v15902_v37, 0.0  ;;  %v4735_v51 = vsel %vm3336_vm0, %v15901_v25, 0.0  ;;  %v15365_v30 = vunpack.c.l.bf16 %v16073_v11  ;;  %v16863_v62 = vld [vmem:[%s18036_s12 + $0xb04] ss:$16 sps:$4 sm:$0xff]   ;;  %v16861_v25 = vld [vmem:[%s18036_s12 + $0xb00] ss:$16 sps:$4 sm:$0xff]  }
 0x3dc   : > { %v7702_v16 = vsel %vm6885_vm2, %v7701_v33, %v7697_v20  ;;  %v6777_v61 = vunpack.c.l.b16 %v5562_v31  ;;  %v6778_v45 = vunpack.c.h.b16 %v5562_v31  ;;  %v5031_v2 = vmul.f32 0.015625, %v3882_v1  ;;  %12503 = vmatpush1.bf16.msra.mxu1 %v16846_v63  ;;  %12176 = vmatprep.subr.bf16.mxu0 %v16851_v7  ;;  %v22243_v37 = vld [vmem:[#allocation13_spill] sm:$0xff] }
 0x3dd   : > { %v20533_v27 = vsel %vm22199_vm3, %v7706_v55, %v7702_v16  ;;  %v5030_v3 = vmul.f32 0.015625, %v3879_v23  ;;  %12504 = vmatprep.subr.bf16.mxu1 %v16854_v10  ;;  %v3934_v55 = vsel %vm3336_vm0, %v15366_v43, 0.0  ;;  %v15870_v31 = vunpack.c.h.bf16 %v16199_v14  ;;  %v16866_v10 = vld [vmem:[%s18036_s12 + $0xb0c] ss:$16 sps:$4 sm:$0xff]   ;;  %v16869_v11 = vld [vmem:[%s18036_s12 + $0xb24] ss:$16 sps:$4 sm:$0xff]  }
 0x3de   : > { %v8945_v50 = vrot.slane %v6777_v61, %v22240_v38  ;;  %v8950_v47 = vrot.slane %v6778_v45, %v22241_v56  ;;  %3983 = vadd.xlane.f32.xlu1 %v3982_v18  ;;  %v22242_v18 = vld [vmem:[#allocation12_spill] sm:$0xff]  ;;  %v16082_v23 = vld [vmem:[%s18038_s13 + $0x360] sm:$0xff]   ;;  %v3931_v61 = vsel %vm3336_vm0, %v15365_v30, 0.0  ;;  %v15869_v45 = vunpack.c.l.bf16 %v16199_v14 }
 0x3df   : > { %v5445_v59 = vpack.c.bf16 %v5031_v2, %v5030_v3  ;;  %v4638_v15 = vpop.xlane.xlu1 %4637  ;;  %v4635_v36 = vpop.xlane.xlu0 %4634  ;;  %3980 = vadd.xlane.f32.xlu0 %v3979_v39  ;;  %12177 = vmatpush1.bf16.msra.mxu0 %v16849_v40  ;;  %v16864_v2 = vld [vmem:[%s18036_s12 + $0xb08] ss:$16 sps:$4 sm:$0xff]  }
 0x3e0   : > { %v8946_v9 = vsel %vm6885_vm2, %v8945_v50, %v8941_v46  ;;  %v5283_v19 = vmul.f32 0.015625, %v4638_v15  ;;  %v5282_v60 = vmul.f32 0.015625, %v4635_v36  ;;  %12505 = vmatpush1.bf16.msra.mxu1 %v16852_v8  ;;  %12178 = vmatprep.subr.bf16.mxu0 %v16857_v58  ;;  %v16872_v58 = vld [vmem:[%s18036_s12 + $0xb2c] ss:$16 sps:$4 sm:$0xff]   ;;  %v15401_v46 = vunpack.c.l.bf16 %v16082_v23  ;;  %v16870_v14 = vld [vmem:[%s18036_s12 + $0xb28] ss:$16 sps:$4 sm:$0xff]  }
 0x3e1   : > { %v20548_v41 = vsel %vm22199_vm3, %v8950_v47, %v8946_v9  ;;  %v6543_v26 = vunpack.c.l.b16 %v5445_v59  ;;  %v6544_v34 = vunpack.c.h.b16 %v5445_v59  ;;  %12506 = vmatprep.subr.bf16.mxu1 %v16860_v4  ;;  %v4690_v47 = vsel %vm3336_vm0, %v15870_v31, 0.0  ;;  %v16208_v43 = vld [vmem:[%s18038_s13 + $0x750] sm:$0xff]   ;;  %v16867_v9 = vld [vmem:[%s18036_s12 + $0xb20] ss:$16 sps:$4 sm:$0xff]  }
 0x3e2   : > { %v5571_v12 = vpack.c.bf16 %v5283_v19, %v5282_v60  ;;  %4739 = vadd.xlane.f32.xlu1 %v4738_v22  ;;  %v15402_v4 = vunpack.c.h.bf16 %v16082_v23  ;;  %v16088_v56 = vld [vmem:[%s18038_s13 + $0x390] sm:$0xff]  }
 0x3e3   : > { %v7790_v24 = vrot.slane %v6543_v26, %v22242_v18  ;;  %v7795_v63 = vrot.slane %v6544_v34, %v22243_v37  ;;  %v3834_v7 = vpop.xlane.xlu1 %3833  ;;  %v3831_v33 = vpop.xlane.xlu0 %3830  ;;  %4736 = vadd.xlane.f32.xlu0 %v4735_v51  ;;  %12179 = vmatpush1.bf16.msra.mxu0 %v16855_v13  ;;  %v4687_v51 = vsel %vm3336_vm0, %v15869_v45, 0.0  ;;  %v16875_v13 = vld [vmem:[%s18036_s12 + $0xb44] ss:$16 sps:$4 sm:$0xff]   ;;  %v16878_v34 = vld [vmem:[%s18036_s12 + $0xb4c] ss:$16 sps:$4 sm:$0xff]   ;;  %v15426_v6 = vunpack.c.h.bf16 %v16088_v56 }
 0x3e4   : > { %v6795_v20 = vunpack.c.l.b16 %v5571_v12  ;;  %v6796_v42 = vunpack.c.h.b16 %v5571_v12  ;;  %v5015_v0 = vmul.f32 0.015625, %v3834_v7  ;;  %v5014_v1 = vmul.f32 0.015625, %v3831_v33  ;;  %12507 = vmatpush1.bf16.msra.mxu1 %v16858_v57  ;;  %12180 = vmatprep.subr.bf16.mxu0 %v16863_v62  ;;  %v16074_v33 = vld [vmem:[%s18038_s13 + $0x320] sm:$0xff]  }
 0x3e5   : > { %v7791_v16 = vsel %vm22244_vm4, %v7790_v24, %v20482_v17  ;;  %12508 = vmatprep.subr.bf16.mxu1 %v16866_v10  ;;  %v3988_v12 = vsel %vm3336_vm0, %v15402_v4, 0.0  ;;  %v15906_v24 = vunpack.c.h.bf16 %v16208_v43  ;;  %v3985_v7 = vsel %vm3336_vm0, %v15401_v46, 0.0  ;;  %v16890_v4 = vld [vmem:[%s18036_s12 + $0xb8c] ss:$16 sps:$4 sm:$0xff]  }
 0x3e6   : > { %v20564_v40 = vsel %vm22245_vm5, %v7795_v63, %v7791_v16  ;;  %v9034_v3 = vrot.slane %v6795_v20, %v22242_v18  ;;  %v9039_v39 = vrot.slane %v6796_v42, %v22243_v37  ;;  %v5437_v8 = vpack.c.bf16 %v5015_v0, %v5014_v1  ;;  %3935 = vadd.xlane.f32.xlu1 %v3934_v55  ;;  %v16873_v55 = vld [vmem:[%s18036_s12 + $0xb40] ss:$16 sps:$4 sm:$0xff]   ;;  %v16876_v0 = vld [vmem:[%s18036_s12 + $0xb48] ss:$16 sps:$4 sm:$0xff]   ;;  %v16881_v1 = vld [vmem:[%s18036_s12 + $0xb64] ss:$16 sps:$4 sm:$0xff]  }
 0x3e7   : > { %v4590_v17 = vpop.xlane.xlu1 %4589  ;;  %v4587_v50 = vpop.xlane.xlu0 %4586  ;;  %3932 = vadd.xlane.f32.xlu0 %v3931_v61  ;;  %12181 = vmatpush1.bf16.msra.mxu0 %v16861_v25  ;;  %v15905_v42 = vunpack.c.l.bf16 %v16208_v43  ;;  %v4744_v61 = vsel %vm3336_vm0, %v15906_v24, 0.0  ;;  %v15370_v45 = vunpack.c.h.bf16 %v16074_v33  ;;  %v15425_v49 = vunpack.c.l.bf16 %v16088_v56 }
 0x3e8   : > { %v9035_v59 = vsel %vm22246_vm6, %v9034_v3, %v20520_v35  ;;  %v6527_v15 = vunpack.c.l.b16 %v5437_v8  ;;  %v6528_v36 = vunpack.c.h.b16 %v5437_v8  ;;  %v5267_v22 = vmul.f32 0.015625, %v4590_v17  ;;  %12509 = vmatpush1.bf16.msra.mxu1 %v16864_v2  ;;  %12182 = vmatprep.subr.bf16.mxu0 %v16869_v11  ;;  %v16884_v2 = vld [vmem:[%s18036_s12 + $0xb6c] ss:$16 sps:$4 sm:$0xff]   ;;  %v16879_v3 = vld [vmem:[%s18036_s12 + $0xb60] ss:$16 sps:$4 sm:$0xff]   ;;  %vm22248_vm6 = vmmov %vm22244_vm4 }
 0x3e9   : > { %v20575_v19 = vsel %vm22247_vm7, %v9039_v39, %v9035_v59  ;;  %v5266_v60 = vmul.f32 0.015625, %v4587_v50  ;;  %12510 = vmatprep.subr.bf16.mxu1 %v16872_v58  ;;  %v16200_v11 = vld [vmem:[%s18038_s13 + $0x710] sm:$0xff]   ;;  %v4741_v8 = vsel %vm3336_vm0, %v15905_v42, 0.0  ;;  %v15369_v58 = vunpack.c.l.bf16 %v16074_v33  ;;  %v16887_v50 = vld [vmem:[%s18036_s12 + $0xb84] ss:$16 sps:$4 sm:$0xff]   ;;  %vm22249_vm7 = vmmov %vm22245_vm5 }
 0x3ea   : > { %v7711_v35 = vrot.slane %v6527_v15, %v22242_v18  ;;  %v7716_v26 = vrot.slane %v6528_v36, %v22243_v37  ;;  %4691 = vadd.xlane.f32.xlu1 %v4690_v47  ;;  %v16882_v17 = vld [vmem:[%s18036_s12 + $0xb68] ss:$16 sps:$4 sm:$0xff]   ;;  %v15874_v15 = vunpack.c.h.bf16 %v16200_v11  ;;  %v16083_v36 = vld [vmem:[%s18038_s13 + $0x368] sm:$0xff]  }
 0x3eb   : > { %v5563_v30 = vpack.c.bf16 %v5267_v22, %v5266_v60  ;;  %v20583_v57 = vpop.xlane.xlu1 %3887  ;;  %v20585_v62 = vpop.xlane.xlu0 %3884  ;;  %4688 = vadd.xlane.f32.xlu0 %v4687_v51  ;;  %12183 = vmatpush1.bf16.msra.mxu0 %v16867_v9  ;;  %v16885_v22 = vld [vmem:[%s18036_s12 + $0xb80] ss:$16 sps:$4 sm:$0xff]   ;;  %v3937_v43 = vsel %vm3336_vm0, %v15369_v58, 0.0  ;;  %v15873_v9 = vunpack.c.l.bf16 %v16200_v11  ;;  %v16888_v60 = vld [vmem:[%s18036_s12 + $0xb88] ss:$16 sps:$4 sm:$0xff]  }
 0x3ec   : > { %v7712_v63 = vsel %vm22244_vm4, %v7711_v35, %v20533_v27  ;;  %12511 = vmatpush1.bf16.msra.mxu1 %v16870_v14  ;;  %12184 = vmatprep.subr.bf16.mxu0 %v16875_v13  ;;  %v16893_v51 = vld [vmem:[%s18036_s12 + $0xba4] ss:$16 sps:$4 sm:$0xff]   ;;  %v16896_v14 = vld [vmem:[%s18036_s12 + $0xbac] ss:$16 sps:$4 sm:$0xff]   ;;  %vm22251_vm4 = vcmask 458112  }
 0x3ed   : > { %v20594_v31 = vsel %vm22245_vm5, %v7716_v26, %v7712_v63  ;;  %v6779_v10 = vunpack.c.l.b16 %v5563_v30  ;;  %v6780_v20 = vunpack.c.h.b16 %v5563_v30  ;;  %12512 = vmatprep.subr.bf16.mxu1 %v16878_v34  ;;  %v4696_v26 = vsel %vm3336_vm0, %v15874_v15, 0.0  ;;  %v16209_v30 = vld [vmem:[%s18038_s13 + $0x758] sm:$0xff]   ;;  %vm22252_vm5 = vmmov %vm22251_vm4 }
 0x3ee   : > { %3989 = vadd.xlane.f32.xlu1 %v3988_v12  ;;  %v15406_v34 = vunpack.c.h.bf16 %v16083_v36  ;;  %v16891_v12 = vld [vmem:[%s18036_s12 + $0xba0] ss:$16 sps:$4 sm:$0xff]   ;;  %v4693_v24 = vsel %vm3336_vm0, %v15873_v9, 0.0  ;;  %v15405_v63 = vunpack.c.l.bf16 %v16083_v36  ;;  %v16899_v33 = vld [vmem:[%s18036_s12 + $0xbc4] ss:$16 sps:$4 sm:$0xff]   ;;  %v15910_v42 = vunpack.c.h.bf16 %v16209_v30 }
 0x3ef   : > { %v8955_v27 = vrot.slane %v6779_v10, %v22242_v18  ;;  %v8960_v23 = vrot.slane %v6780_v20, %v22243_v37  ;;  %v20600_v25 = vpop.xlane.xlu1 %4643  ;;  %v20602_v16 = vpop.xlane.xlu0 %4640  ;;  %3986 = vadd.xlane.f32.xlu0 %v3985_v7  ;;  %12185 = vmatpush1.bf16.msra.mxu0 %v16873_v55  ;;  %v16894_v7 = vld [vmem:[%s18036_s12 + $0xba8] ss:$16 sps:$4 sm:$0xff]   ;;  %v16201_v11 = vld [vmem:[%s18038_s13 + $0x718] sm:$0xff]  }
 0x3f0   : > { %12513 = vmatpush1.bf16.msra.mxu1 %v16876_v0  ;;  %12186 = vmatprep.subr.bf16.mxu0 %v16881_v1  ;;  %v3994_v20 = vsel %vm3336_vm0, %v15406_v34, 0.0  ;;  %v16902_v0 = vld [vmem:[%s18036_s12 + $0xbcc] ss:$16 sps:$4 sm:$0xff]   ;;  %v16075_v1 = vld [vmem:[%s18038_s13 + $0x328] sm:$0xff]   ;;  %v4750_v58 = vsel %vm3336_vm0, %v15910_v42, 0.0  ;;  %v15878_v36 = vunpack.c.h.bf16 %v16201_v11  ;;  %v16213_v18 = vld [vmem:[%s18038_s13 + $0x778] sm:$0xff]  }
 0x3f1   : > { %v8956_v39 = vsel %vm22248_vm6, %v8955_v27, %v20548_v41  ;;  %v3940_v41 = vsel %vm3336_vm0, %v15370_v45, 0.0  ;;  %12514 = vmatprep.subr.bf16.mxu1 %v16884_v2  ;;  %v16897_v27 = vld [vmem:[%s18036_s12 + $0xbc0] ss:$16 sps:$4 sm:$0xff]   ;;  %v16900_v45 = vld [vmem:[%s18036_s12 + $0xbc8] ss:$16 sps:$4 sm:$0xff]   ;;  %v15373_v15 = vunpack.c.l.bf16 %v16075_v1  ;;  %v15925_v28 = vunpack.c.l.bf16 %v16213_v18  ;;  %vm22253_vm6 = vmmov %vm22251_vm4 }
 0x3f2   : > { %v20614_v47 = vsel %vm22249_vm7, %v8960_v23, %v8956_v39  ;;  %4745 = vadd.xlane.f32.xlu1 %v4744_v61  ;;  %v3991_v23 = vsel %vm3336_vm0, %v15405_v63, 0.0  ;;  %v15909_v61 = vunpack.c.l.bf16 %v16209_v30  ;;  %v16905_v2 = vld [vmem:[%s18036_s12 + $0xbe4] ss:$16 sps:$4 sm:$0xff]   ;;  %v16906_v9 = vld [vmem:[%s18036_s12 + $0xbe8] ss:$16 sps:$4 sm:$0xff]   ;;  %vm22254_vm7 = vcmask 523712  }
 0x3f3   : > { %v20617_v46 = vpop.xlane.xlu1 %3839  ;;  %v20619_v59 = vpop.xlane.xlu0 %3836  ;;  %4742 = vadd.xlane.f32.xlu0 %v4741_v8  ;;  %12187 = vmatpush1.bf16.msra.mxu0 %v16879_v3  ;;  %v16908_v3 = vld [vmem:[%s18036_s12 + $0xbec] ss:$16 sps:$4 sm:$0xff]   ;;  %v16211_v42 = vld [vmem:[%s18038_s13 + $0x768] sm:$0xff]  }
 0x3f4   : > { %12515 = vmatpush1.bf16.msra.mxu1 %v16882_v17  ;;  %12188 = vmatprep.subr.bf16.mxu0 %v16887_v50  ;;  %v15374_v17 = vunpack.c.h.bf16 %v16075_v1  ;;  %v16084_v50 = vld [vmem:[%s18038_s13 + $0x370] sm:$0xff]   ;;  %v4702_v1 = vsel %vm3336_vm0, %v15878_v36, 0.0  ;;  %v15918_v36 = vunpack.c.h.bf16 %v16211_v42 }
 0x3f5   : > { %12516 = vmatprep.subr.bf16.mxu1 %v16890_v4  ;;  %v16903_v4 = vld [vmem:[%s18036_s12 + $0xbe0] ss:$16 sps:$4 sm:$0xff]   ;;  %v15410_v34 = vunpack.c.h.bf16 %v16084_v50  ;;  %v15409_v30 = vunpack.c.l.bf16 %v16084_v50 }
 0x3f6   : > { %3941 = vadd.xlane.f32.xlu1 %v3940_v41  ;;  %v4747_v41 = vsel %vm3336_vm0, %v15909_v61, 0.0 }
 0x3f7   : > { %v20628_v13 = vpop.xlane.xlu1 %4595  ;;  %v20630_v35 = vpop.xlane.xlu0 %4592  ;;  %3938 = vadd.xlane.f32.xlu0 %v3937_v43  ;;  %12189 = vmatpush1.bf16.msra.mxu0 %v16885_v22  ;;  %v16210_v22 = vld [vmem:[%s18038_s13 + $0x760] sm:$0xff]   ;;  %v16076_v43 = vld [vmem:[%s18038_s13 + $0x330] sm:$0xff]  }
 0x3f8   : > { %12517 = vmatpush1.bf16.msra.mxu1 %v16888_v60  ;;  %12190 = vmatprep.subr.bf16.mxu0 %v16893_v51  ;;  %v15877_v60 = vunpack.c.l.bf16 %v16201_v11  ;;  %v15914_v63 = vunpack.c.h.bf16 %v16210_v22 }
 0x3f9   : > { %12518 = vmatprep.subr.bf16.mxu1 %v16896_v14 }
 0x3fa   : > { %4697 = vadd.xlane.f32.xlu1 %v4696_v26  ;;  %v3946_v26 = vsel %vm3336_vm0, %v15374_v17, 0.0  ;;  %v4699_v61 = vsel %vm3336_vm0, %v15877_v60, 0.0 }
 0x3fb   : > { %v20638_v55 = vpop.xlane.xlu1 %3893  ;;  %v20640_v10 = vpop.xlane.xlu0 %3890  ;;  %4694 = vadd.xlane.f32.xlu0 %v4693_v24  ;;  %12191 = vmatpush1.bf16.msra.mxu0 %v16891_v12  ;;  %v16202_v12 = vld [vmem:[%s18038_s13 + $0x720] sm:$0xff]   ;;  %v16085_v24 = vld [vmem:[%s18038_s13 + $0x378] sm:$0xff]  }
 0x3fc   : > { %12519 = vmatpush1.bf16.msra.mxu1 %v16894_v7  ;;  %12192 = vmatprep.subr.bf16.mxu0 %v16899_v33  ;;  %v15913_v7 = vunpack.c.l.bf16 %v16210_v22  ;;  %v15378_v33 = vunpack.c.h.bf16 %v16076_v43  ;;  %v15414_v11 = vunpack.c.h.bf16 %v16085_v24  ;;  %v4756_v22 = vsel %vm3336_vm0, %v15914_v63, 0.0 }
 0x3fd   : > { %12520 = vmatprep.subr.bf16.mxu1 %v16902_v0  ;;  %v3943_v0 = vsel %vm3336_vm0, %v15373_v15, 0.0  ;;  %v15413_v15 = vunpack.c.l.bf16 %v16085_v24 }
 0x3fe   : > { %3995 = vadd.xlane.f32.xlu1 %v3994_v20  ;;  %v15377_v20 = vunpack.c.l.bf16 %v16076_v43  ;;  %v20685_v43 = vsel %vm3336_vm0, %v15913_v7, 0.0  ;;  %v20700_v7 = vsel %vm3336_vm0, %v15414_v11, 0.0  ;;  %v5285_v11 = vmul.f32 0.015625, %v20600_v25 }
 0x3ff   : > { %v20651_v39 = vpop.xlane.xlu1 %4649  ;;  %v20653_v8 = vpop.xlane.xlu0 %4646  ;;  %3992 = vadd.xlane.f32.xlu0 %v3991_v23  ;;  %12193 = vmatpush1.bf16.msra.mxu0 %v16897_v27  ;;  %v16911_v27 = vld [vmem:[%s18036_s12 + $0xc04] ss:$16 sps:$4 sm:$0xff]   ;;  %v16914_v23 = vld [vmem:[%s18036_s12 + $0xc0c] ss:$16 sps:$4 sm:$0xff]  }
 0x400   : > { %12521 = vmatpush1.bf16.msra.mxu1 %v16900_v45  ;;  %12194 = vmatprep.subr.bf16.mxu0 %v16905_v2  ;;  %v15882_v45 = vunpack.c.h.bf16 %v16202_v12  ;;  %v15881_v2 = vunpack.c.l.bf16 %v16202_v12  ;;  %v20691_v60 = vsel %vm3336_vm0, %v15377_v20, 0.0  ;;  %v5033_v20 = vmul.f32 0.015625, %v20583_v57 }
 0x401   : > { %12522 = vmatprep.subr.bf16.mxu1 %v16908_v3  ;;  %v16077_v3 = vld [vmem:[%s18038_s13 + $0x338] sm:$0xff]   ;;  %v5284_v57 = vmul.f32 0.015625, %v20602_v16 }
 0x402   : > { %4751 = vadd.xlane.f32.xlu1 %v4750_v58  ;;  %v16203_v58 = vld [vmem:[%s18038_s13 + $0x728] sm:$0xff]   ;;  %v20694_v24 = vsel %vm3336_vm0, %v15882_v45, 0.0  ;;  %v20697_v63 = vsel %vm3336_vm0, %v15881_v2, 0.0  ;;  %v16086_v45 = vld [vmem:[%s18038_s13 + $0x380] sm:$0xff]   ;;  %v16212_v2 = vld [vmem:[%s18038_s13 + $0x770] sm:$0xff]  }
 0x403   : > { %v20662_v51 = vpop.xlane.xlu1 %3845  ;;  %v20664_v14 = vpop.xlane.xlu0 %3842  ;;  %4748 = vadd.xlane.f32.xlu0 %v4747_v41  ;;  %12195 = vmatpush1.bf16.msra.mxu0 %v16903_v4  ;;  %v4000_v4 = vsel %vm3336_vm0, %v15410_v34, 0.0  ;;  %v3997_v41 = vsel %vm3336_vm0, %v15409_v30, 0.0  ;;  %v15382_v34 = vunpack.c.h.bf16 %v16077_v3  ;;  %v15381_v30 = vunpack.c.l.bf16 %v16077_v3 }
 0x404   : > { %12523 = vmatpush1.bf16.msra.mxu1 %v16906_v9  ;;  %12205 = vmatprep.subr.bf16.mxu0 %v16911_v27  ;;  %v20688_v9 = vsel %vm3336_vm0, %v15378_v33, 0.0  ;;  %v15886_v12 = vunpack.c.h.bf16 %v16203_v58  ;;  %v15885_v33 = vunpack.c.l.bf16 %v16203_v58  ;;  %v5016_v3 = vmul.f32 0.015625, %v20619_v59  ;;  %v16087_v58 = vld [vmem:[%s18038_s13 + $0x388] sm:$0xff]  }
 0x405   : > { %12533 = vmatprep.subr.bf16.mxu1 %v16914_v23  ;;  %v20712_v23 = vsel %vm3336_vm0, %v15918_v36, 0.0  ;;  %v20725_v36 = vsel %vm3336_vm0, %v15382_v34, 0.0  ;;  %v20728_v37 = vsel %vm3336_vm0, %v15381_v30, 0.0  ;;  %v15417_v59 = vunpack.c.l.bf16 %v16086_v45 }
 0x406   : > { %3947 = vadd.xlane.f32.xlu1 %v3946_v26  ;;  %v15917_v26 = vunpack.c.l.bf16 %v16211_v42  ;;  %v5032_v42 = vmul.f32 0.015625, %v20585_v62  ;;  %v5017_v62 = vmul.f32 0.015625, %v20617_v46  ;;  %v20731_v25 = vsel %vm3336_vm0, %v15886_v12, 0.0 }
 0x407   : > { %v20677_v17 = vpop.xlane.xlu1 %4601  ;;  %v20679_v50 = vpop.xlane.xlu0 %4598  ;;  %3944 = vadd.xlane.f32.xlu0 %v3943_v0  ;;  %v20734_v16 = vsel %vm3336_vm0, %v15885_v33, 0.0  ;;  %v15418_v46 = vunpack.c.h.bf16 %v16086_v45  ;;  %v15921_v30 = vunpack.c.l.bf16 %v16212_v2  ;;  %v15422_v5 = vunpack.c.h.bf16 %v16087_v58 }
 0x408   : > { %v15421_v48 = vunpack.c.l.bf16 %v16087_v58  ;;  %v5572_v12 = vpack.c.bf16 %v5285_v11, %v5284_v57  ;;  %v5438_v54 = vpack.c.bf16 %v5017_v62, %v5016_v3  ;;  %v5268_v33 = vmul.f32 0.015625, %v20630_v35 }
 0x409   : > { %v15926_v45 = vunpack.c.h.bf16 %v16213_v18  ;;  %v20752_v11 = vsel %vm3336_vm0, %v15417_v59, 0.0  ;;  %v20759_v56 = vsel %vm3336_vm0, %v15921_v30, 0.0  ;;  %v20762_v18 = vsel %vm3336_vm0, %v15422_v5, 0.0 }
 0x40a   : > { %4703 = vadd.xlane.f32.xlu1 %v4702_v1  ;;  %v20709_v1 = vsel %vm3336_vm0, %v15413_v15, 0.0  ;;  %v20722_v15 = vsel %vm3336_vm0, %v15917_v26, 0.0  ;;  %v20738_v26 = vpack.c.bf16 %v5033_v20, %v5032_v42  ;;  %v5035_v20 = vmul.f32 0.015625, %v20638_v55 }
 0x40b   : > { %v20704_v0 = vpop.xlane.xlu1 %3899  ;;  %v20706_v27 = vpop.xlane.xlu0 %3896  ;;  %4700 = vadd.xlane.f32.xlu0 %v4699_v61  ;;  %v15922_v61 = vunpack.c.h.bf16 %v16212_v2  ;;  %v5034_v42 = vmul.f32 0.015625, %v20640_v10  ;;  %v20749_v2 = vsel %vm3336_vm0, %v15418_v46, 0.0  ;;  %v6797_v55 = vunpack.c.l.b16 %v5572_v12 }
 0x40c   : > { %v6529_v10 = vunpack.c.l.b16 %v5438_v54  ;;  %v20768_v62 = vsel %vm3336_vm0, %v15421_v48, 0.0  ;;  %v20771_v3 = vsel %vm3336_vm0, %v15926_v45, 0.0  ;;  %v20774_v58 = vsel %vm3336_vm0, %v15925_v28, 0.0  ;;  %v20794_v45 = vld [vmem:[%s18038_s13 + $0x3c0] sm:$0xff]  }
 0x40d   : > { %v20777_v46 = vsel %vm3336_vm0, %v15426_v6, 0.0  ;;  %v20780_v5 = vsel %vm3336_vm0, %v15425_v49, 0.0  ;;  %v6546_v59 = vunpack.c.h.b16 %v20738_v26  ;;  %v5286_v48 = vmul.f32 0.015625, %v20653_v8 }
 0x40e   : > { %4001 = vadd.xlane.f32.xlu1 %v4000_v4  ;;  %v5269_v4 = vmul.f32 0.015625, %v20628_v13  ;;  %v6545_v13 = vunpack.c.l.b16 %v20738_v26  ;;  %22250 = vst [vmem:[#allocation18_spill] sm:$0xff] %v20780_v5  ;;  %v5019_v28 = vmul.f32 0.015625, %v20662_v51  ;;  %v5018_v6 = vmul.f32 0.015625, %v20664_v14 }
 0x40f   : > { %v20740_v38 = vpop.xlane.xlu1 %4655  ;;  %v20742_v34 = vpop.xlane.xlu0 %4652  ;;  %3998 = vadd.xlane.f32.xlu0 %v3997_v41  ;;  %v20756_v41 = vsel %vm3336_vm0, %v15922_v61, 0.0  ;;  %v5447_v61 = vpack.c.bf16 %v5035_v20, %v5034_v42  ;;  %v9044_v26 = vrot.slane %v6797_v55, %v18194_v29  ;;  %v7721_v8 = vrot.slane %v6529_v10, %v18194_v29 }
 0x410   : > { %v7800_v30 = vrot.slane %v6545_v13, %v18194_v29  ;;  %v5270_v51 = vmul.f32 0.015625, %v20679_v50  ;;  %v5037_v14 = vmul.f32 0.015625, %v20704_v0  ;;  %v5036_v20 = vmul.f32 0.015625, %v20706_v27 }
 0x411   : > { %v6547_v42 = vunpack.c.l.b16 %v5447_v61  ;;  %v5439_v50 = vpack.c.bf16 %v5019_v28, %v5018_v6  ;;  %v9045_v27 = vsel %vm22252_vm5, %v9044_v26, %v20575_v19  ;;  %v5289_v55 = vmul.f32 0.015625, %v20740_v38 }
 0x412   : > { %4757 = vadd.xlane.f32.xlu1 %v4756_v22  ;;  %v20764_v22 = vpack.c.bf16 %v5269_v4, %v5268_v33  ;;  %v6798_v4 = vunpack.c.h.b16 %v5572_v12  ;;  %v5271_v12 = vmul.f32 0.015625, %v20677_v17  ;;  %v7801_v10 = vsel %vm22251_vm4, %v7800_v30, %v20564_v40  ;;  %vm22255_vm4 = vmmov %vm22254_vm7 }
 0x413   : > { %v3852_v57 = vpop.xlane.xlu1 %3851  ;;  %v3849_v35 = vpop.xlane.xlu0 %3848  ;;  %4754 = vadd.xlane.f32.xlu0 %v20685_v43  ;;  %v5287_v43 = vmul.f32 0.015625, %v20651_v39  ;;  %v6530_v39 = vunpack.c.h.b16 %v5438_v54  ;;  %v7722_v40 = vsel %vm22253_vm6, %v7721_v8, %v20594_v31  ;;  %v7810_v28 = vrot.slane %v6547_v42, %v18208_v52  ;;  %vm22256_vm5 = vmmov %vm22255_vm4 }
 0x414   : > { %v9049_v17 = vrot.slane %v6798_v4, %v18197_v32  ;;  %v5565_v30 = vpack.c.bf16 %v5271_v12, %v5270_v51  ;;  %v5448_v4 = vpack.c.bf16 %v5037_v14, %v5036_v20  ;;  %v5288_v19 = vmul.f32 0.015625, %v20742_v34 }
 0x415   : > { %v5573_v13 = vpack.c.bf16 %v5287_v43, %v5286_v48  ;;  %v7726_v43 = vrot.slane %v6530_v39, %v18197_v32  ;;  %v6531_v26 = vunpack.c.l.b16 %v5439_v50  ;;  %v5021_v39 = vmul.f32 0.015625, %v3852_v57 }
 0x416   : > { %3953 = vadd.xlane.f32.xlu1 %v20688_v9  ;;  %v6781_v9 = vunpack.c.l.b16 %v20764_v22  ;;  %v9050_v31 = vsel %vm22255_vm4, %v9049_v17, %v9045_v27  ;;  %v6783_v12 = vunpack.c.l.b16 %v5565_v30  ;;  %v6549_v51 = vunpack.c.l.b16 %v5448_v4 }
 0x417   : > { %v20789_v33 = vpop.xlane.xlu1 %4607  ;;  %v20791_v49 = vpop.xlane.xlu0 %4604  ;;  %3950 = vadd.xlane.f32.xlu0 %v20691_v60  ;;  %v7805_v60 = vrot.slane %v6546_v59, %v18197_v32  ;;  %v6548_v59 = vunpack.c.h.b16 %v5447_v61  ;;  %v6799_v6 = vunpack.c.l.b16 %v5573_v13  ;;  %v7727_v61 = vsel %vm22256_vm5, %v7726_v43, %v7722_v40 }
 0x418   : > { %v8965_v48 = vrot.slane %v6781_v9, %v18194_v29  ;;  %v6800_v34 = vunpack.c.h.b16 %v5573_v13  ;;  %v6532_v14 = vunpack.c.h.b16 %v5439_v50  ;;  %v5574_v20 = vpack.c.bf16 %v5289_v55, %v5288_v19 }
 0x419   : > { %v7731_v42 = vrot.slane %v6531_v26, %v18208_v52  ;;  %v6784_v27 = vunpack.c.h.b16 %v5565_v30  ;;  %v6550_v43 = vunpack.c.h.b16 %v5448_v4  ;;  %v8975_v55 = vrot.slane %v6783_v12, %v18208_v52 }
 0x41a   : > { %4709 = vadd.xlane.f32.xlu1 %v20694_v24  ;;  %v6782_v24 = vunpack.c.h.b16 %v20764_v22  ;;  %v7806_v22 = vsel %vm22254_vm7, %v7805_v60, %v7801_v10  ;;  %v8966_v8 = vsel %vm22253_vm6, %v8965_v48, %v20614_v47  ;;  %vm22257_vm7 = vmmov %vm22255_vm4  ;;  %v9059_v50 = vrot.slane %v6800_v34, %v18211_v53 }
 0x41b   : > { %v3906_v5 = vpop.xlane.xlu1 %3905  ;;  %v3903_v0 = vpop.xlane.xlu0 %3902  ;;  %4706 = vadd.xlane.f32.xlu0 %v20697_v63  ;;  %v5020_v63 = vmul.f32 0.015625, %v3849_v35  ;;  %v7811_v57 = vsel %vm6927_vm8, %v7810_v28, %v7806_v22  ;;  %v9054_v35 = vrot.slane %v6799_v6, %v18208_v52  ;;  %v5272_v30 = vmul.f32 0.015625, %v20791_v49 }
 0x41c   : > { %v8970_v38 = vrot.slane %v6782_v24, %v18197_v32  ;;  %v5039_v10 = vmul.f32 0.015625, %v3906_v5  ;;  %v5038_v60 = vmul.f32 0.015625, %v3903_v0  ;;  %v7736_v0 = vrot.slane %v6532_v14, %v18211_v53 }
 0x41d   : > { %v5440_v47 = vpack.c.bf16 %v5021_v39, %v5020_v63  ;;  %v9055_v5 = vsel %vm6927_vm8, %v9054_v35, %v9050_v31  ;;  %v7732_v19 = vsel %vm6927_vm8, %v7731_v42, %v7727_v61  ;;  %v8980_v22 = vrot.slane %v6784_v27, %v18211_v53 }
 0x41e   : > { %4007 = vadd.xlane.f32.xlu1 %v20700_v7  ;;  %v7815_v7 = vrot.slane %v6548_v59, %v18211_v53  ;;  %v8971_v48 = vsel %vm22257_vm7, %v8970_v38, %v8966_v8  ;;  %v6801_v59 = vunpack.c.l.b16 %v5574_v20  ;;  %v5449_v4 = vpack.c.bf16 %v5039_v10, %v5038_v60 }
 0x41f   : > { %v4662_v9 = vpop.xlane.xlu1 %4661  ;;  %v4659_v54 = vpop.xlane.xlu0 %4658  ;;  %4004 = vadd.xlane.f32.xlu0 %v20709_v1  ;;  %v7825_v26 = vrot.slane %v6550_v43, %v18239_v44  ;;  %v9060_v63 = vsel %vm6934_vm9, %v9059_v50, %v9055_v5  ;;  %vm22258_vm4 = vcmask 720512   ;;  %v6534_v31 = vunpack.c.h.b16 %v5440_v47 }
 0x420   : > { %v5291_v13 = vmul.f32 0.015625, %v4662_v9  ;;  %v5290_v24 = vmul.f32 0.015625, %v4659_v54  ;;  %v7816_v40 = vsel %vm6934_vm9, %v7815_v7, %v7811_v57  ;;  %v6533_v54 = vunpack.c.l.b16 %v5440_v47  ;;  %vm22259_vm5 = vmmov %vm22258_vm4 }
 0x421   : > { %v6802_v9 = vunpack.c.h.b16 %v5574_v20  ;;  %v9064_v49 = vrot.slane %v6801_v59, %v18226_v21  ;;  %v7737_v61 = vsel %vm6934_vm9, %v7736_v0, %v7732_v19  ;;  %vm22260_vm6 = vmmov %vm22258_vm4 }
 0x422   : > { %4763 = vadd.xlane.f32.xlu1 %v20712_v23  ;;  %v7820_v23 = vrot.slane %v6549_v51, %v18226_v21  ;;  %v5575_v39 = vpack.c.bf16 %v5291_v13, %v5290_v24  ;;  %v7741_v7 = vrot.slane %v6533_v54, %v18226_v21  ;;  %v22261_v24 = vld [vmem:[#allocation14_spill] sm:$0xff]  ;;  %vm22265_vm7 = vmmov %vm22258_vm4 }
 0x423   : > { %v3858_v17 = vpop.xlane.xlu1 %3857  ;;  %v3855_v1 = vpop.xlane.xlu0 %3854  ;;  %4760 = vadd.xlane.f32.xlu0 %v20722_v15  ;;  %v5273_v15 = vmul.f32 0.015625, %v20789_v33  ;;  %v9069_v42 = vrot.slane %v6802_v9, %v18239_v44  ;;  %v9065_v60 = vsel %vm22259_vm5, %v9064_v49, %v9060_v63  ;;  %vm22276_vm5 = vcmask 392512  }
 0x424   : > { %v7821_v33 = vsel %vm22258_vm4, %v7820_v23, %v7816_v40  ;;  %v5023_v8 = vmul.f32 0.015625, %v3858_v17  ;;  %v5022_v38 = vmul.f32 0.015625, %v3855_v1  ;;  %v6803_v35 = vunpack.c.l.b16 %v5575_v39 }
 0x425   : > { %v5566_v34 = vpack.c.bf16 %v5273_v15, %v5272_v30  ;;  %v7826_v57 = vsel %vm6948_vm11, %v7825_v26, %v7821_v33  ;;  %v7746_v17 = vrot.slane %v6534_v31, %v18239_v44  ;;  %v6552_v1 = vunpack.c.h.b16 %v5449_v4 }
 0x426   : > { %3959 = vadd.xlane.f32.xlu1 %v20725_v36  ;;  %v8976_v36 = vsel %vm6927_vm8, %v8975_v55, %v8971_v48  ;;  %v5441_v27 = vpack.c.bf16 %v5023_v8, %v5022_v38  ;;  %v7742_v43 = vsel %vm22260_vm6, %v7741_v7, %v7737_v61  ;;  %v6804_v23 = vunpack.c.h.b16 %v5575_v39 }
 0x427   : > { %v4614_v28 = vpop.xlane.xlu1 %4613  ;;  %v4611_v6 = vpop.xlane.xlu0 %4610  ;;  %3956 = vadd.xlane.f32.xlu0 %v20728_v37  ;;  %v6551_v37 = vunpack.c.l.b16 %v5449_v4  ;;  %v8981_v51 = vsel %vm6934_vm9, %v8980_v22, %v8976_v36  ;;  %v6785_v13 = vunpack.c.l.b16 %v5566_v34  ;;  %v6786_v55 = vunpack.c.h.b16 %v5566_v34  ;;  %v22262_v4 = vld [vmem:[#allocation15_spill] sm:$0xff] }
 0x428   : > { %v5275_v47 = vmul.f32 0.015625, %v4614_v28  ;;  %v9074_v40 = vrot.slane %v6803_v35, %v22261_v24  ;;  %v9070_v59 = vsel %vm6948_vm11, %v9069_v42, %v9065_v60  ;;  %v7747_v30 = vsel %vm6948_vm11, %v7746_v17, %v7742_v43 }
 0x429   : > { %v7835_v28 = vrot.slane %v6552_v1, %v22262_v4  ;;  %v8985_v22 = vrot.slane %v6785_v13, %v18226_v21  ;;  %v8990_v33 = vrot.slane %v6786_v55, %v18239_v44  ;;  %v9079_v49 = vrot.slane %v6804_v23, %v22262_v4 }
 0x42a   : > { %4715 = vadd.xlane.f32.xlu1 %v20731_v25  ;;  %v5274_v25 = vmul.f32 0.015625, %v4611_v6  ;;  %v6535_v6 = vunpack.c.l.b16 %v5441_v27  ;;  %v9075_v9 = vsel %vm6955_vm12, %v9074_v40, %v9070_v59  ;;  %v6536_v34 = vunpack.c.h.b16 %v5441_v27 }
 0x42b   : > { %v3912_v12 = vpop.xlane.xlu1 %3911  ;;  %4712 = vadd.xlane.f32.xlu0 %v20734_v16  ;;  %v3909_v20 = vpop.xlane.xlu0 %3908  ;;  %v7830_v16 = vrot.slane %v6551_v37, %v22261_v24  ;;  %v9080_v1 = vsel %vm6962_vm13, %v9079_v49, %v9075_v9  ;;  %vm22275_vm4 = vcmask 326912  }
 0x42c   : > { %v5041_v14 = vmul.f32 0.015625, %v3912_v12  ;;  %v5040_v10 = vmul.f32 0.015625, %v3909_v20  ;;  %v5567_v54 = vpack.c.bf16 %v5275_v47, %v5274_v25  ;;  %v7751_v37 = vrot.slane %v6535_v6, %v22261_v24  ;;  %v22264_v12 = vld [vmem:[#allocation17_spill] sm:$0xff]  ;;  %vm22277_vm6 = vmmov %vm22275_vm4 }
 0x42d   : > { %v7831_v26 = vsel %vm6955_vm12, %v7830_v16, %v7826_v57  ;;  %v8986_v25 = vsel %vm22265_vm7, %v8985_v22, %v8981_v51  ;;  %v7756_v16 = vrot.slane %v6536_v34, %v22262_v4  ;;  %v16220_v34 = vld [vmem:[%s18038_s13 + $0x7b0] sm:$0xff]   ;;  %vm22278_vm7 = vmmov %vm22276_vm5 }
 0x42e   : > { %4013 = vadd.xlane.f32.xlu1 %v20749_v2  ;;  %v5450_v48 = vpack.c.bf16 %v5041_v14, %v5040_v10  ;;  %v6787_v38 = vunpack.c.l.b16 %v5567_v54  ;;  %v7836_v35 = vsel %vm6962_vm13, %v7835_v28, %v7831_v26  ;;  %v6788_v10 = vunpack.c.h.b16 %v5567_v54 }
 0x42f   : > { %v4668_v50 = vpop.xlane.xlu1 %4667  ;;  %4010 = vadd.xlane.f32.xlu0 %v20752_v11  ;;  %v4665_v0 = vpop.xlane.xlu0 %4664  ;;  %v22263_v11 = vld [vmem:[#allocation16_spill] sm:$0xff] }
 0x430   : > { %v5293_v5 = vmul.f32 0.015625, %v4668_v50  ;;  %v6553_v15 = vunpack.c.l.b16 %v5450_v48  ;;  %v5292_v2 = vmul.f32 0.015625, %v4665_v0  ;;  %v6554_v19 = vunpack.c.h.b16 %v5450_v48 }
 0x431   : > { %v8991_v0 = vsel %vm6948_vm11, %v8990_v33, %v8986_v25  ;;  %v9000_v59 = vrot.slane %v6788_v10, %v22262_v4  ;;  %v15954_v25 = vunpack.c.h.bf16 %v16220_v34 }
 0x432   : > { %4769 = vadd.xlane.f32.xlu1 %v20756_v41  ;;  %v7840_v39 = vrot.slane %v6553_v15, %v22263_v11  ;;  %v5576_v63 = vpack.c.bf16 %v5293_v5, %v5292_v2  ;;  %v7845_v57 = vrot.slane %v6554_v19, %v22264_v12  ;;  %v16214_v19 = vld [vmem:[%s18038_s13 + $0x780] sm:$0xff]  }
 0x433   : > { %v3864_v36 = vpop.xlane.xlu1 %3863  ;;  %4766 = vadd.xlane.f32.xlu0 %v20759_v56  ;;  %v3861_v8 = vpop.xlane.xlu0 %3860 }
 0x434   : > { %v5025_v31 = vmul.f32 0.015625, %v3864_v36  ;;  %v6805_v41 = vunpack.c.l.b16 %v5576_v63  ;;  %v6806_v61 = vunpack.c.h.b16 %v5576_v63  ;;  %v5024_v7 = vmul.f32 0.015625, %v3861_v8  ;;  %v22267_v8 = vld [vmem:[#allocation18_spill] sm:$0xff] }
 0x435   : > { %v7841_v47 = vsel %vm6969_vm14, %v7840_v39, %v7836_v35  ;;  %v22266_v39 = vunpack.c.h.bf16 %v20794_v45 }
 0x436   : > { %4019 = vadd.xlane.f32.xlu1 %v20762_v18  ;;  %v9084_v14 = vrot.slane %v6805_v41, %v22263_v11  ;;  %v9089_v20 = vrot.slane %v6806_v61, %v22264_v12  ;;  %v5442_v56 = vpack.c.bf16 %v5025_v31, %v5024_v7  ;;  %v8995_v18 = vrot.slane %v6787_v38, %v22261_v24 }
 0x437   : > { %v4620_v42 = vpop.xlane.xlu1 %4619  ;;  %4016 = vadd.xlane.f32.xlu0 %v20768_v62  ;;  %v4617_v17 = vpop.xlane.xlu0 %4616  ;;  %v7846_v51 = vsel %vm6976_vm15, %v7845_v57, %v7841_v47  ;;  %v7752_v62 = vsel %vm6955_vm12, %v7751_v37, %v7747_v30  ;;  %v15930_v61 = vunpack.c.h.bf16 %v16214_v19  ;;  %v15929_v7 = vunpack.c.l.bf16 %v16214_v19  ;;  %v16926_v19 = vld [vmem:[%s18036_s12 + $0xc4c] ss:$16 sps:$4 sm:$0xff]  }
 0x438   : > { %v5277_v60 = vmul.f32 0.015625, %v4620_v42  ;;  %v6537_v27 = vunpack.c.l.b16 %v5442_v56  ;;  %v5276_v43 = vmul.f32 0.015625, %v4617_v17  ;;  %v9085_v13 = vsel %vm6969_vm14, %v9084_v14, %v9080_v1 }
 0x439   : > { %v6538_v48 = vunpack.c.h.b16 %v5442_v56  ;;  %v9090_v50 = vsel %vm6976_vm15, %v9089_v20, %v9085_v13  ;;  %v8996_v2 = vsel %vm6955_vm12, %v8995_v18, %v8991_v0  ;;  %v7757_v22 = vsel %vm6962_vm13, %v7756_v16, %v7752_v62  ;;  %v16095_v16 = vld [vmem:[%s18038_s13 + $0x3c8] sm:$0xff]  }
 0x43a   : > { %4775 = vadd.xlane.f32.xlu1 %v20771_v3  ;;  %v7761_v55 = vrot.slane %v6537_v27, %v22263_v11  ;;  %v5568_v23 = vpack.c.bf16 %v5277_v60, %v5276_v43  ;;  %v9399_v5 = vsel %vm9387_vm10, %v9090_v50, %v7846_v51  ;;  %v9001_v31 = vsel %vm6962_vm13, %v9000_v59, %v8996_v2  ;;  %v16912_v27 = vld [vmem:[%s18036_s12 + $0xc08] ss:$16 sps:$4 sm:$0xff]   ;;  %v16920_v51 = vld [vmem:[%s18036_s12 + $0xc2c] ss:$16 sps:$4 sm:$0xff]  }
 0x43b   : > { %v3966_v40 = vpop.xlane.xlu1 %3965  ;;  %4772 = vadd.xlane.f32.xlu0 %v20774_v58  ;;  %v3963_v54 = vpop.xlane.xlu0 %3962  ;;  %v9415_v15 = vpack.c.b16 %v9399_v5, %v9399_v5  ;;  %v7766_v26 = vrot.slane %v6538_v48, %v22264_v12  ;;  %v4060_v58 = vsel %vm3336_vm0, %v22266_v39, 0.0  ;;  %v22268_v57 = vunpack.c.l.bf16 %v20794_v45  ;;  %v16909_v45 = vld [vmem:[%s18036_s12 + $0xc00] ss:$16 sps:$4 sm:$0xff]   ;;  %v16917_v48 = vld [vmem:[%s18036_s12 + $0xc24] ss:$16 sps:$4 sm:$0xff]  }
 0x43c   : > { %v5059_v3 = vmul.f32 0.015625, %v3966_v40  ;;  %v6789_v28 = vunpack.c.l.b16 %v5568_v23  ;;  %v6790_v6 = vunpack.c.h.b16 %v5568_v23  ;;  %v5058_v30 = vmul.f32 0.015625, %v3963_v54  ;;  %v16221_v23 = vld [vmem:[%s18038_s13 + $0x7b8] sm:$0xff]  }
 0x43d   : > { %12196 = vmatprep.mubr.bf16.mxu0 %v9415_v15  ;;  %12524 = vmatprep.mubr.bf16.mxu1 %v9415_v15  ;;  %v7762_v49 = vsel %vm6969_vm14, %v7761_v55, %v7757_v22  ;;  %v4057_v35 = vsel %vm3336_vm0, %v22268_v57, 0.0  ;;  %v4780_v1 = vsel %vm3336_vm0, %v15930_v61, 0.0  ;;  %v4777_v18 = vsel %vm3336_vm0, %v15929_v7, 0.0  ;;  %v16915_v40 = vld [vmem:[%s18036_s12 + $0xc20] ss:$16 sps:$4 sm:$0xff]  }
 0x43e   : > { %v9005_v63 = vrot.slane %v6789_v28, %v22263_v11  ;;  %v9010_v36 = vrot.slane %v6790_v6, %v22264_v12  ;;  %v20910_v33 = vpack.c.bf16 %v5059_v3, %v5058_v30  ;;  %4025 = vadd.xlane.f32.xlu1 %v20777_v46  ;;  %v7767_v14 = vsel %vm6976_vm15, %v7766_v26, %v7762_v49  ;;  %v16918_v15 = vld [vmem:[%s18036_s12 + $0xc28] ss:$16 sps:$4 sm:$0xff]   ;;  %v16923_v30 = vld [vmem:[%s18036_s12 + $0xc44] ss:$16 sps:$4 sm:$0xff]  }
 0x43f   : > { %v4722_v9 = vpop.xlane.xlu1 %4721  ;;  %4022 = vadd.xlane.f32.xlu0 %v22267_v8  ;;  %v4719_v41 = vpop.xlane.xlu0 %4718  ;;  %v15953_v13 = vunpack.c.l.bf16 %v16220_v34  ;;  %v4816_v55 = vsel %vm3336_vm0, %v15954_v25, 0.0  ;;  %v15454_v54 = vunpack.c.h.bf16 %v16095_v16  ;;  %v15453_v6 = vunpack.c.l.bf16 %v16095_v16  ;;  %v16924_v8 = vld [vmem:[%s18036_s12 + $0xc48] ss:$16 sps:$4 sm:$0xff]   ;;  %v16929_v57 = vld [vmem:[%s18036_s12 + $0xc64] ss:$16 sps:$4 sm:$0xff]  }
 0x440   : > { %v5311_v38 = vmul.f32 0.015625, %v4722_v9  ;;  %v5310_v37 = vmul.f32 0.015625, %v4719_v41  ;;  %v9006_v46 = vsel %vm6969_vm14, %v9005_v63, %v9001_v31  ;;  %v6571_v5 = vunpack.c.l.b16 %v20910_v33  ;;  %v22269_v63 = vld [vmem:[#allocation8_spill] sm:$0xff] }
 0x441   : > { %v9011_v20 = vsel %vm6976_vm15, %v9010_v36, %v9006_v46  ;;  %v6572_v0 = vunpack.c.h.b16 %v20910_v33  ;;  %v4813_v28 = vsel %vm3336_vm0, %v15953_v13, 0.0  ;;  %v15958_v22 = vunpack.c.h.bf16 %v16221_v23  ;;  %v22270_v33 = vld [vmem:[#allocation11_spill] sm:$0xff] }
 0x442   : > { %v20923_v56 = vpack.c.bf16 %v5311_v38, %v5310_v37  ;;  %4061 = vadd.xlane.f32.xlu1 %v4060_v58  ;;  %v9398_v47 = vsel %vm9387_vm10, %v9011_v20, %v7767_v14  ;;  %v16921_v58 = vld [vmem:[%s18036_s12 + $0xc40] ss:$16 sps:$4 sm:$0xff]   ;;  %v7929_v36 = vrot.slane %v6571_v5, %v22269_v63  ;;  %v4066_v31 = vsel %vm3336_vm0, %v15454_v54, 0.0 }
 0x443   : > { %v3918_v42 = vpop.xlane.xlu1 %3917  ;;  %4058 = vadd.xlane.f32.xlu0 %v4057_v35  ;;  %v3915_v60 = vpop.xlane.xlu0 %3914  ;;  %v9414_v17 = vpack.c.b16 %v9398_v47, %v9398_v47  ;;  %v7933_v9 = vrot.slane %v6572_v0, %v22270_v33  ;;  %v4063_v7 = vsel %vm3336_vm0, %v15453_v6, 0.0  ;;  %v15957_v34 = vunpack.c.l.bf16 %v16221_v23  ;;  %v16089_v37 = vld [vmem:[%s18038_s13 + $0x398] sm:$0xff]   ;;  %v16932_v35 = vld [vmem:[%s18036_s12 + $0xc6c] ss:$16 sps:$4 sm:$0xff]  }
 0x444   : > { %v5043_v10 = vmul.f32 0.015625, %v3918_v42  ;;  %v5042_v43 = vmul.f32 0.015625, %v3915_v60  ;;  %v4822_v14 = vsel %vm3336_vm0, %v15958_v22, 0.0  ;;  %v6823_v20 = vunpack.c.l.b16 %v20923_v56  ;;  %v22271_v47 = vld [vmem:[#allocation9_spill] sm:$0xff]  ;;  %v16938_v23 = vld [vmem:[%s18036_s12 + $0xc8c] ss:$16 sps:$4 sm:$0xff]  }
 0x445   : > { %12197 = vmatmul.mubr.bf16.vlgmr.msra.gmra.mrb[0].mxu0 %v9414_v17  ;;  %12525 = vmatmul.mubr.bf16.vlgmr.msra.gmra.mrb[0].mxu1 %v9414_v17  ;;  %v6824_v42 = vunpack.c.h.b16 %v20923_v56  ;;  %v16215_v17 = vld [vmem:[%s18038_s13 + $0x788] sm:$0xff]   ;;  %v15430_v13 = vunpack.c.h.bf16 %v16089_v37  ;;  %v16930_v56 = vld [vmem:[%s18036_s12 + $0xc68] ss:$16 sps:$4 sm:$0xff]  }
 0x446   : > { %v20933_v50 = vpack.c.bf16 %v5043_v10, %v5042_v43  ;;  %4781 = vadd.xlane.f32.xlu1 %v4780_v1  ;;  %12206 = vmatpush1.bf16.msra.mxu0 %v16909_v45  ;;  %v22272_v45 = vld [vmem:[#allocation10_spill] sm:$0xff]  ;;  %v15934_v0 = vunpack.c.h.bf16 %v16215_v17  ;;  %v16936_v22 = vld [vmem:[%s18036_s12 + $0xc88] ss:$16 sps:$4 sm:$0xff]  }
 0x447   : > { %v3972_v62 = vpop.xlane.xlu1 %3971  ;;  %4778 = vadd.xlane.f32.xlu0 %v4777_v18  ;;  %v3969_v3 = vpop.xlane.xlu0 %3968  ;;  %12534 = vmatpush1.bf16.msra.mxu1 %v16912_v27  ;;  %v16927_v1 = vld [vmem:[%s18036_s12 + $0xc60] ss:$16 sps:$4 sm:$0xff]   ;;  %v7934_v18 = vsel %vm6878_vm1, %v7933_v9, %v7929_v36  ;;  %v16941_v9 = vld [vmem:[%s18036_s12 + $0xca4] ss:$16 sps:$4 sm:$0xff]  }
 0x448   : > { %v5061_v59 = vmul.f32 0.015625, %v3972_v62  ;;  %v5060_v2 = vmul.f32 0.015625, %v3969_v3  ;;  %12207 = vmatprep.subr.bf16.mxu0 %v16917_v48  ;;  %12535 = vmatprep.subr.bf16.mxu1 %v16920_v51  ;;  %v4819_v51 = vsel %vm3336_vm0, %v15957_v34, 0.0  ;;  %v15429_v62 = vunpack.c.l.bf16 %v16089_v37 }
 0x449   : > { %v9177_v3 = vrot.slane %v6824_v42, %v22270_v33  ;;  %v20989_v42 = vld [vmem:[%s18038_s13 + $0x7c0] sm:$0xff]  }
 0x44a   : > { %v5460_v26 = vpack.c.bf16 %v5061_v59, %v5060_v2  ;;  %4817 = vadd.xlane.f32.xlu1 %v4816_v55  ;;  %12208 = vmatpush1.bf16.msra.mxu0 %v16915_v40  ;;  %v16935_v55 = vld [vmem:[%s18036_s12 + $0xc84] ss:$16 sps:$4 sm:$0xff]   ;;  %v9173_v59 = vrot.slane %v6823_v20, %v22269_v63  ;;  %v16933_v2 = vld [vmem:[%s18036_s12 + $0xc80] ss:$16 sps:$4 sm:$0xff]   ;;  %v4027_v36 = vsel %vm3336_vm0, %v15429_v62, 0.0 }
 0x44b   : > { %v4674_v39 = vpop.xlane.xlu1 %4673  ;;  %4814 = vadd.xlane.f32.xlu0 %v4813_v28  ;;  %12536 = vmatpush1.bf16.msra.mxu1 %v16918_v15  ;;  %v4671_v61 = vpop.xlane.xlu0 %4670  ;;  %v15933_v15 = vunpack.c.l.bf16 %v16215_v17 }
 0x44c   : > { %v5295_v49 = vmul.f32 0.015625, %v4674_v39  ;;  %v6573_v38 = vunpack.c.l.b16 %v5460_v26  ;;  %v6574_v41 = vunpack.c.h.b16 %v5460_v26  ;;  %12209 = vmatprep.subr.bf16.mxu0 %v16923_v30  ;;  %12537 = vmatprep.subr.bf16.mxu1 %v16926_v19  ;;  %v5294_v46 = vmul.f32 0.015625, %v4671_v61  ;;  %v16096_v19 = vld [vmem:[%s18038_s13 + $0x3d0] sm:$0xff]  }
 0x44d   : > { %v4030_v30 = vsel %vm3336_vm0, %v15430_v13, 0.0  ;;  %v6555_v26 = vunpack.c.l.b16 %v20933_v50  ;;  %v6556_v39 = vunpack.c.h.b16 %v20933_v50  ;;  %v9178_v61 = vsel %vm6878_vm1, %v9177_v3, %v9173_v59  ;;  %v16950_v13 = vld [vmem:[%s18036_s12 + $0xccc] ss:$16 sps:$4 sm:$0xff]  }
 0x44e   : > { %v7938_v25 = vrot.slane %v6573_v38, %v22271_v47  ;;  %v7943_v10 = vrot.slane %v6574_v41, %v22272_v45  ;;  %4067 = vadd.xlane.f32.xlu1 %v4066_v31  ;;  %12210 = vmatpush1.bf16.msra.mxu0 %v16921_v58  ;;  %v20961_v27 = vpack.c.bf16 %v5295_v49, %v5294_v46  ;;  %v16944_v49 = vld [vmem:[%s18036_s12 + $0xcac] ss:$16 sps:$4 sm:$0xff]   ;;  %v4786_v41 = vsel %vm3336_vm0, %v15934_v0, 0.0  ;;  %v16945_v0 = vld [vmem:[%s18036_s12 + $0xcc0] ss:$16 sps:$4 sm:$0xff]  }
 0x44f   : > { %v4728_v60 = vpop.xlane.xlu1 %4727  ;;  %4064 = vadd.xlane.f32.xlu0 %v4063_v7  ;;  %12538 = vmatpush1.bf16.msra.mxu1 %v16924_v8  ;;  %v4725_v48 = vpop.xlane.xlu0 %4724  ;;  %v4783_v50 = vsel %vm3336_vm0, %v15933_v15, 0.0  ;;  %v15458_v34 = vunpack.c.h.bf16 %v16096_v19  ;;  %v15457_v37 = vunpack.c.l.bf16 %v16096_v19 }
 0x450   : > { %v5313_v43 = vmul.f32 0.015625, %v4728_v60  ;;  %v7939_v16 = vsel %vm6885_vm2, %v7938_v25, %v7934_v18  ;;  %12211 = vmatprep.subr.bf16.mxu0 %v16929_v57  ;;  %12539 = vmatprep.subr.bf16.mxu1 %v16932_v35  ;;  %v5312_v5 = vmul.f32 0.015625, %v4725_v48  ;;  %v16939_v57 = vld [vmem:[%s18036_s12 + $0xca0] ss:$16 sps:$4 sm:$0xff]   ;;  %v16942_v25 = vld [vmem:[%s18036_s12 + $0xca8] ss:$16 sps:$4 sm:$0xff]   ;;  %v7854_v60 = vrot.slane %v6556_v39, %v22270_v33 }
 0x451   : > { %v20969_v40 = vsel %vm22199_vm3, %v7943_v10, %v7939_v16  ;;  %v7850_v10 = vrot.slane %v6555_v26, %v22269_v63  ;;  %v6807_v17 = vunpack.c.l.b16 %v20961_v27  ;;  %v15961_v26 = vunpack.c.l.bf16 %v20989_v42  ;;  %v16953_v39 = vld [vmem:[%s18036_s12 + $0xce4] ss:$16 sps:$4 sm:$0xff]  }
 0x452   : > { %4823 = vadd.xlane.f32.xlu1 %v4822_v14  ;;  %12212 = vmatpush1.bf16.msra.mxu0 %v16927_v1  ;;  %v5586_v28 = vpack.c.bf16 %v5313_v43, %v5312_v5  ;;  %v6808_v1 = vunpack.c.h.b16 %v20961_v27  ;;  %v16947_v43 = vld [vmem:[%s18036_s12 + $0xcc4] ss:$16 sps:$4 sm:$0xff]   ;;  %v4072_v27 = vsel %vm3336_vm0, %v15458_v34, 0.0  ;;  %v15962_v5 = vunpack.c.h.bf16 %v20989_v42 }
 0x453   : > { %v3924_v54 = vpop.xlane.xlu1 %3923  ;;  %4820 = vadd.xlane.f32.xlu0 %v4819_v51  ;;  %12540 = vmatpush1.bf16.msra.mxu1 %v16930_v56  ;;  %v3921_v58 = vpop.xlane.xlu0 %3920  ;;  %v4825_v42 = vsel %vm3336_vm0, %v15961_v26, 0.0 }
 0x454   : > { %v5045_v6 = vmul.f32 0.015625, %v3924_v54  ;;  %12213 = vmatprep.subr.bf16.mxu0 %v16935_v55  ;;  %12541 = vmatprep.subr.bf16.mxu1 %v16938_v23  ;;  %v6825_v31 = vunpack.c.l.b16 %v5586_v28  ;;  %v6826_v8 = vunpack.c.h.b16 %v5586_v28  ;;  %v5044_v38 = vmul.f32 0.015625, %v3921_v58  ;;  %v16948_v28 = vld [vmem:[%s18036_s12 + $0xcc8] ss:$16 sps:$4 sm:$0xff]   ;;  %v16956_v58 = vld [vmem:[%s18036_s12 + $0xcec] ss:$16 sps:$4 sm:$0xff]  }
 0x455   : > { %v4069_v23 = vsel %vm3336_vm0, %v15457_v37, 0.0  ;;  %v9098_v19 = vrot.slane %v6808_v1, %v22270_v33 }
 0x456   : > { %4031 = vadd.xlane.f32.xlu1 %v4030_v30  ;;  %12214 = vmatpush1.bf16.msra.mxu0 %v16933_v2  ;;  %v9182_v35 = vrot.slane %v6825_v31, %v22271_v47  ;;  %v9187_v46 = vrot.slane %v6826_v8, %v22272_v45  ;;  %v5452_v14 = vpack.c.bf16 %v5045_v6, %v5044_v38  ;;  %v16090_v2 = vld [vmem:[%s18038_s13 + $0x3a0] sm:$0xff]  }
 0x457   : > { %v4680_v7 = vpop.xlane.xlu1 %4679  ;;  %4028 = vadd.xlane.f32.xlu0 %v4027_v36  ;;  %12542 = vmatpush1.bf16.msra.mxu1 %v16936_v22  ;;  %v4677_v18 = vpop.xlane.xlu0 %4676  ;;  %v7855_v6 = vsel %vm6878_vm1, %v7854_v60, %v7850_v10  ;;  %v9094_v30 = vrot.slane %v6807_v17, %v22269_v63  ;;  %v16959_v10 = vld [vmem:[%s18036_s12 + $0xd04] ss:$16 sps:$4 sm:$0xff]   ;;  %v16962_v60 = vld [vmem:[%s18036_s12 + $0xd0c] ss:$16 sps:$4 sm:$0xff]  }
 0x458   : > { %v5297_v20 = vmul.f32 0.015625, %v4680_v7  ;;  %12215 = vmatprep.subr.bf16.mxu0 %v16941_v9  ;;  %12543 = vmatprep.subr.bf16.mxu1 %v16944_v49  ;;  %v9183_v56 = vsel %vm6885_vm2, %v9182_v35, %v9178_v61  ;;  %v6557_v16 = vunpack.c.l.b16 %v5452_v14  ;;  %v6558_v48 = vunpack.c.h.b16 %v5452_v14  ;;  %v16951_v7 = vld [vmem:[%s18036_s12 + $0xce0] ss:$16 sps:$4 sm:$0xff]   ;;  %v16216_v35 = vld [vmem:[%s18038_s13 + $0x790] sm:$0xff]  }
 0x459   : > { %v5296_v51 = vmul.f32 0.015625, %v4677_v18  ;;  %v21000_v62 = vsel %vm22199_vm3, %v9187_v46, %v9183_v56  ;;  %v15434_v61 = vunpack.c.h.bf16 %v16090_v2  ;;  %v16954_v46 = vld [vmem:[%s18036_s12 + $0xce8] ss:$16 sps:$4 sm:$0xff]   ;;  %v9099_v14 = vsel %vm6878_vm1, %v9098_v19, %v9094_v30  ;;  %v16968_v30 = vld [vmem:[%s18036_s12 + $0xd2c] ss:$16 sps:$4 sm:$0xff]  }
 0x45a   : > { %4787 = vadd.xlane.f32.xlu1 %v4786_v41  ;;  %12216 = vmatpush1.bf16.msra.mxu0 %v16939_v57  ;;  %v7859_v59 = vrot.slane %v6557_v16, %v22271_v47  ;;  %v7864_v3 = vrot.slane %v6558_v48, %v22272_v45  ;;  %v4828_v41 = vsel %vm3336_vm0, %v15962_v5, 0.0  ;;  %v15938_v48 = vunpack.c.h.bf16 %v16216_v35 }
 0x45b   : > { %v3978_v55 = vpop.xlane.xlu1 %3977  ;;  %v5578_v54 = vpack.c.bf16 %v5297_v20, %v5296_v51  ;;  %4784 = vadd.xlane.f32.xlu0 %v4783_v50  ;;  %12544 = vmatpush1.bf16.msra.mxu1 %v16942_v25  ;;  %v3975_v22 = vpop.xlane.xlu0 %3974  ;;  %v15433_v25 = vunpack.c.l.bf16 %v16090_v2  ;;  %v4036_v16 = vsel %vm3336_vm0, %v15434_v61, 0.0  ;;  %v16957_v51 = vld [vmem:[%s18036_s12 + $0xd00] ss:$16 sps:$4 sm:$0xff]  }
 0x45c   : > { %v5063_v15 = vmul.f32 0.015625, %v3978_v55  ;;  %12217 = vmatprep.subr.bf16.mxu0 %v16947_v43  ;;  %12545 = vmatprep.subr.bf16.mxu1 %v16950_v13  ;;  %v7860_v36 = vsel %vm6885_vm2, %v7859_v59, %v7855_v6  ;;  %v5062_v31 = vmul.f32 0.015625, %v3975_v22  ;;  %v22273_v55 = vld [vmem:[#allocation12_spill] sm:$0xff]  ;;  %v16965_v6 = vld [vmem:[%s18036_s12 + $0xd24] ss:$16 sps:$4 sm:$0xff]  }
 0x45d   : > { %v6809_v9 = vunpack.c.l.b16 %v5578_v54  ;;  %v6810_v49 = vunpack.c.h.b16 %v5578_v54  ;;  %v21018_v8 = vsel %vm22199_vm3, %v7864_v3, %v7860_v36  ;;  %v16097_v3 = vld [vmem:[%s18038_s13 + $0x3d8] sm:$0xff]   ;;  %v16960_v54 = vld [vmem:[%s18036_s12 + $0xd08] ss:$16 sps:$4 sm:$0xff]   ;;  %v4033_v2 = vsel %vm3336_vm0, %v15433_v25, 0.0 }
 0x45e   : > { %4073 = vadd.xlane.f32.xlu1 %v4072_v27  ;;  %12218 = vmatpush1.bf16.msra.mxu0 %v16945_v0  ;;  %v5461_v37 = vpack.c.bf16 %v5063_v15, %v5062_v31  ;;  %v16963_v31 = vld [vmem:[%s18036_s12 + $0xd20] ss:$16 sps:$4 sm:$0xff]  }
 0x45f   : > { %v4734_v38 = vpop.xlane.xlu1 %4733  ;;  %v9103_v50 = vrot.slane %v6809_v9, %v22271_v47  ;;  %v9108_v34 = vrot.slane %v6810_v49, %v22272_v45  ;;  %4070 = vadd.xlane.f32.xlu0 %v4069_v23  ;;  %12546 = vmatpush1.bf16.msra.mxu1 %v16948_v28  ;;  %v4731_v20 = vpop.xlane.xlu0 %4730  ;;  %v22274_v23 = vld [vmem:[#allocation13_spill] sm:$0xff]  ;;  %v15937_v28 = vunpack.c.l.bf16 %v16216_v35  ;;  %v4792_v9 = vsel %vm3336_vm0, %v15938_v48, 0.0 }
 0x460   : > { %v5315_v57 = vmul.f32 0.015625, %v4734_v38  ;;  %12219 = vmatprep.subr.bf16.mxu0 %v16953_v39  ;;  %12547 = vmatprep.subr.bf16.mxu1 %v16956_v58  ;;  %v6575_v1 = vunpack.c.l.b16 %v5461_v37  ;;  %v6576_v18 = vunpack.c.h.b16 %v5461_v37  ;;  %v5314_v43 = vmul.f32 0.015625, %v4731_v20  ;;  %v16971_v35 = vld [vmem:[%s18036_s12 + $0xd44] ss:$16 sps:$4 sm:$0xff]  }
 0x461   : > { %v9104_v17 = vsel %vm6885_vm2, %v9103_v50, %v9099_v14  ;;  %v15462_v49 = vunpack.c.h.bf16 %v16097_v3  ;;  %v15461_v37 = vunpack.c.l.bf16 %v16097_v3 }
 0x462   : > { %v21032_v13 = vsel %vm22199_vm3, %v9108_v34, %v9104_v17  ;;  %4829 = vadd.xlane.f32.xlu1 %v4828_v41  ;;  %12220 = vmatpush1.bf16.msra.mxu0 %v16951_v7  ;;  %v7948_v27 = vrot.slane %v6575_v1, %v22273_v55  ;;  %v7953_v5 = vrot.slane %v6576_v18, %v22274_v23  ;;  %v16966_v7 = vld [vmem:[%s18036_s12 + $0xd28] ss:$16 sps:$4 sm:$0xff]   ;;  %v4789_v34 = vsel %vm3336_vm0, %v15937_v28, 0.0  ;;  %v16969_v1 = vld [vmem:[%s18036_s12 + $0xd40] ss:$16 sps:$4 sm:$0xff]  }
 0x463   : > { %v3930_v56 = vpop.xlane.xlu1 %3929  ;;  %v5587_v0 = vpack.c.bf16 %v5315_v57, %v5314_v43  ;;  %4826 = vadd.xlane.f32.xlu0 %v4825_v42  ;;  %12548 = vmatpush1.bf16.msra.mxu1 %v16954_v46  ;;  %v3927_v15 = vpop.xlane.xlu0 %3926  ;;  %v16223_v57 = vld [vmem:[%s18038_s13 + $0x7c8] sm:$0xff]   ;;  %v16974_v46 = vld [vmem:[%s18036_s12 + $0xd4c] ss:$16 sps:$4 sm:$0xff]   ;;  %v4078_v17 = vsel %vm3336_vm0, %v15462_v49, 0.0  ;;  %v16217_v49 = vld [vmem:[%s18038_s13 + $0x798] sm:$0xff]  }
 0x464   : > { %v5047_v59 = vmul.f32 0.015625, %v3930_v56  ;;  %12221 = vmatprep.subr.bf16.mxu0 %v16959_v10  ;;  %12549 = vmatprep.subr.bf16.mxu1 %v16962_v60  ;;  %v7949_v19 = vsel %vm22275_vm4, %v7948_v27, %v20969_v40  ;;  %v5046_v39 = vmul.f32 0.015625, %v3927_v15  ;;  %v15966_v56 = vunpack.c.h.bf16 %v16223_v57 }
 0x465   : > { %v6827_v22 = vunpack.c.l.b16 %v5587_v0  ;;  %v6828_v26 = vunpack.c.h.b16 %v5587_v0  ;;  %v21046_v58 = vsel %vm22276_vm5, %v7953_v5, %v7949_v19  ;;  %v15965_v27 = vunpack.c.l.bf16 %v16223_v57  ;;  %v16091_v5 = vld [vmem:[%s18038_s13 + $0x3a8] sm:$0xff]  }
 0x466   : > { %4037 = vadd.xlane.f32.xlu1 %v4036_v16  ;;  %12222 = vmatpush1.bf16.msra.mxu0 %v16957_v51  ;;  %v5453_v41 = vpack.c.bf16 %v5047_v59, %v5046_v39  ;;  %v16972_v16 = vld [vmem:[%s18036_s12 + $0xd48] ss:$16 sps:$4 sm:$0xff]   ;;  %v4075_v51 = vsel %vm3336_vm0, %v15461_v37, 0.0  ;;  %v16977_v0 = vld [vmem:[%s18036_s12 + $0xd64] ss:$16 sps:$4 sm:$0xff]  }
 0x467   : > { %v4686_v36 = vpop.xlane.xlu1 %4685  ;;  %v9192_v38 = vrot.slane %v6827_v22, %v22273_v55  ;;  %v9197_v40 = vrot.slane %v6828_v26, %v22274_v23  ;;  %4034 = vadd.xlane.f32.xlu0 %v4033_v2  ;;  %12550 = vmatpush1.bf16.msra.mxu1 %v16960_v54  ;;  %v16980_v59 = vld [vmem:[%s18036_s12 + $0xd6c] ss:$16 sps:$4 sm:$0xff]   ;;  %v15438_v22 = vunpack.c.h.bf16 %v16091_v5  ;;  %v16978_v26 = vld [vmem:[%s18036_s12 + $0xd68] ss:$16 sps:$4 sm:$0xff]  }
 0x468   : > { %v5299_v61 = vmul.f32 0.015625, %v4686_v36  ;;  %v4683_v50 = vpop.xlane.xlu0 %4682  ;;  %12223 = vmatprep.subr.bf16.mxu0 %v16965_v6  ;;  %12551 = vmatprep.subr.bf16.mxu1 %v16968_v30  ;;  %v6559_v20 = vunpack.c.l.b16 %v5453_v41  ;;  %v6560_v42 = vunpack.c.h.b16 %v5453_v41  ;;  %v16975_v6 = vld [vmem:[%s18036_s12 + $0xd60] ss:$16 sps:$4 sm:$0xff]   ;;  %v4831_v36 = vsel %vm3336_vm0, %v15965_v27, 0.0  ;;  %v16984_v37 = vld [vmem:[%s18036_s12 + $0xd88] ss:$16 sps:$4 sm:$0xff]  }
 0x469   : > { %v9193_v14 = vsel %vm22277_vm6, %v9192_v38, %v21000_v62  ;;  %v5298_v25 = vmul.f32 0.015625, %v4683_v50  ;;  %v16986_v38 = vld [vmem:[%s18036_s12 + $0xd8c] ss:$16 sps:$4 sm:$0xff]   ;;  %vm22279_vm6 = vmmov %vm22275_vm4  ;;  %v4042_v50 = vsel %vm3336_vm0, %v15438_v22, 0.0 }
 0x46a   : > { %v21060_v10 = vsel %vm22278_vm7, %v9197_v40, %v9193_v14  ;;  %4793 = vadd.xlane.f32.xlu1 %v4792_v9  ;;  %12224 = vmatpush1.bf16.msra.mxu0 %v16963_v31  ;;  %v7869_v18 = vrot.slane %v6559_v20, %v22273_v55  ;;  %v7874_v62 = vrot.slane %v6560_v42, %v22274_v23  ;;  %v15437_v9 = vunpack.c.l.bf16 %v16091_v5  ;;  %v16983_v31 = vld [vmem:[%s18036_s12 + $0xd84] ss:$16 sps:$4 sm:$0xff]   ;;  %vm22280_vm7 = vmmov %vm22276_vm5  ;;  %v16992_v20 = vld [vmem:[%s18036_s12 + $0xdac] ss:$16 sps:$4 sm:$0xff]  }
 0x46b   : > { %v21062_v60 = vpop.xlane.xlu1 %3983  ;;  %v5579_v43 = vpack.c.bf16 %v5299_v61, %v5298_v25  ;;  %4790 = vadd.xlane.f32.xlu0 %v4789_v34  ;;  %12552 = vmatpush1.bf16.msra.mxu1 %v16966_v7  ;;  %v16981_v7 = vld [vmem:[%s18036_s12 + $0xd80] ss:$16 sps:$4 sm:$0xff]   ;;  %v15942_v34 = vunpack.c.h.bf16 %v16217_v49  ;;  %v16989_v14 = vld [vmem:[%s18036_s12 + $0xda4] ss:$16 sps:$4 sm:$0xff]   ;;  %v16998_v27 = vld [vmem:[%s18036_s12 + $0xdcc] ss:$16 sps:$4 sm:$0xff]  }
 0x46c   : > { %v21069_v48 = vpop.xlane.xlu0 %3980  ;;  %12225 = vmatprep.subr.bf16.mxu0 %v16971_v35  ;;  %12553 = vmatprep.subr.bf16.mxu1 %v16974_v46  ;;  %v7870_v3 = vsel %vm22275_vm4, %v7869_v18, %v21018_v8  ;;  %v4834_v8 = vsel %vm3336_vm0, %v15966_v56, 0.0  ;;  %v15941_v35 = vunpack.c.l.bf16 %v16217_v49  ;;  %v16098_v46 = vld [vmem:[%s18038_s13 + $0x3e0] sm:$0xff]   ;;  %v16987_v25 = vld [vmem:[%s18036_s12 + $0xda0] ss:$16 sps:$4 sm:$0xff]   ;;  %vm22281_vm4 = vcmask 458112  }
 0x46d   : > { %v6811_v54 = vunpack.c.l.b16 %v5579_v43  ;;  %v6812_v15 = vunpack.c.h.b16 %v5579_v43  ;;  %v21078_v2 = vsel %vm22276_vm5, %v7874_v62, %v7870_v3  ;;  %v16990_v18 = vld [vmem:[%s18036_s12 + $0xda8] ss:$16 sps:$4 sm:$0xff]   ;;  %v15465_v56 = vunpack.c.l.bf16 %v16098_v46  ;;  %v17004_v22 = vld [vmem:[%s18036_s12 + $0xdec] ss:$16 sps:$4 sm:$0xff]   ;;  %vm22282_vm5 = vmmov %vm22281_vm4 }
 0x46e   : > { %4079 = vadd.xlane.f32.xlu1 %v4078_v17  ;;  %12226 = vmatpush1.bf16.msra.mxu0 %v16969_v1  ;;  %v4798_v17 = vsel %vm3336_vm0, %v15942_v34, 0.0  ;;  %v15466_v1 = vunpack.c.h.bf16 %v16098_v46  ;;  %v4795_v43 = vsel %vm3336_vm0, %v15941_v35, 0.0  ;;  %v17007_v34 = vld [vmem:[%s18036_s12 + $0xe04] ss:$16 sps:$4 sm:$0xff]  }
 0x46f   : > { %v21080_v28 = vpop.xlane.xlu1 %4739  ;;  %v9113_v30 = vrot.slane %v6811_v54, %v22273_v55  ;;  %v9118_v19 = vrot.slane %v6812_v15, %v22274_v23  ;;  %4076 = vadd.xlane.f32.xlu0 %v4075_v51  ;;  %12554 = vmatpush1.bf16.msra.mxu1 %v16972_v16  ;;  %v16224_v16 = vld [vmem:[%s18038_s13 + $0x7d0] sm:$0xff]   ;;  %v16995_v51 = vld [vmem:[%s18036_s12 + $0xdc4] ss:$16 sps:$4 sm:$0xff]  }
 0x470   : > { %v21087_v39 = vpop.xlane.xlu0 %4736  ;;  %12227 = vmatprep.subr.bf16.mxu0 %v16977_v0  ;;  %12555 = vmatprep.subr.bf16.mxu1 %v16980_v59  ;;  %v16993_v0 = vld [vmem:[%s18036_s12 + $0xdc0] ss:$16 sps:$4 sm:$0xff]   ;;  %v4084_v59 = vsel %vm3336_vm0, %v15466_v1, 0.0  ;;  %v15970_v3 = vunpack.c.h.bf16 %v16224_v16  ;;  %v16996_v54 = vld [vmem:[%s18036_s12 + $0xdc8] ss:$16 sps:$4 sm:$0xff]  }
 0x471   : > { %v9114_v40 = vsel %vm22279_vm6, %v9113_v30, %v21032_v13  ;;  %v4039_v13 = vsel %vm3336_vm0, %v15437_v9, 0.0  ;;  %v15969_v30 = vunpack.c.l.bf16 %v16224_v16 }
 0x472   : > { %v21096_v41 = vsel %vm22280_vm7, %v9118_v19, %v9114_v40  ;;  %4835 = vadd.xlane.f32.xlu1 %v4834_v8  ;;  %12228 = vmatpush1.bf16.msra.mxu0 %v16975_v6  ;;  %v4081_v6 = vsel %vm3336_vm0, %v15465_v56, 0.0  ;;  %v16092_v19 = vld [vmem:[%s18038_s13 + $0x3b0] sm:$0xff]   ;;  %v17001_v8 = vld [vmem:[%s18036_s12 + $0xde4] ss:$16 sps:$4 sm:$0xff]   ;;  %v4840_v9 = vsel %vm3336_vm0, %v15970_v3, 0.0  ;;  %vm22285_vm7 = vcmask 523712  }
 0x473   : > { %v21098_v61 = vpop.xlane.xlu1 %3935  ;;  %4832 = vadd.xlane.f32.xlu0 %v4831_v36  ;;  %12556 = vmatpush1.bf16.msra.mxu1 %v16978_v26  ;;  %v16999_v36 = vld [vmem:[%s18036_s12 + $0xde0] ss:$16 sps:$4 sm:$0xff]   ;;  %v15442_v49 = vunpack.c.h.bf16 %v16092_v19  ;;  %v4837_v40 = vsel %vm3336_vm0, %v15969_v30, 0.0 }
 0x474   : > { %v21103_v57 = vpop.xlane.xlu0 %3932  ;;  %12229 = vmatprep.subr.bf16.mxu0 %v16983_v31  ;;  %12557 = vmatprep.subr.bf16.mxu1 %v16986_v38  ;;  %v17002_v31 = vld [vmem:[%s18036_s12 + $0xde8] ss:$16 sps:$4 sm:$0xff]  }
 0x475   : > { %v4048_v35 = vsel %vm3336_vm0, %v15442_v49, 0.0 }
 0x476   : > { %4043 = vadd.xlane.f32.xlu1 %v4042_v50  ;;  %12230 = vmatpush1.bf16.msra.mxu0 %v16981_v7  ;;  %v15441_v7 = vunpack.c.l.bf16 %v16092_v19  ;;  %v16218_v50 = vld [vmem:[%s18038_s13 + $0x7a0] sm:$0xff]  }
 0x477   : > { %v21109_v42 = vpop.xlane.xlu1 %4691  ;;  %4040 = vadd.xlane.f32.xlu0 %v4039_v13  ;;  %12558 = vmatpush1.bf16.msra.mxu1 %v16984_v37  ;;  %v17010_v37 = vld [vmem:[%s18036_s12 + $0xe0c] ss:$16 sps:$4 sm:$0xff]   ;;  %v15946_v46 = vunpack.c.h.bf16 %v16218_v50 }
 0x478   : > { %v21114_v62 = vpop.xlane.xlu0 %4688  ;;  %12231 = vmatprep.subr.bf16.mxu0 %v16989_v14  ;;  %12559 = vmatprep.subr.bf16.mxu1 %v16992_v20  ;;  %v4045_v20 = vsel %vm3336_vm0, %v15441_v7, 0.0 }
 0x47a   : > { %4799 = vadd.xlane.f32.xlu1 %v4798_v17  ;;  %12232 = vmatpush1.bf16.msra.mxu0 %v16987_v25  ;;  %v15945_v25 = vunpack.c.l.bf16 %v16218_v50  ;;  %v16099_v17 = vld [vmem:[%s18038_s13 + $0x3e8] sm:$0xff]  }
 0x47b   : > { %v21120_v5 = vpop.xlane.xlu1 %3989  ;;  %4796 = vadd.xlane.f32.xlu0 %v4795_v43  ;;  %12560 = vmatpush1.bf16.msra.mxu1 %v16990_v18  ;;  %v4804_v18 = vsel %vm3336_vm0, %v15946_v46, 0.0  ;;  %v15470_v43 = vunpack.c.h.bf16 %v16099_v17 }
 0x47c   : > { %v21125_v15 = vpop.xlane.xlu0 %3986  ;;  %12233 = vmatprep.subr.bf16.mxu0 %v16995_v51  ;;  %12561 = vmatprep.subr.bf16.mxu1 %v16998_v27  ;;  %v4801_v16 = vsel %vm3336_vm0, %v15945_v25, 0.0  ;;  %v15469_v51 = vunpack.c.l.bf16 %v16099_v17  ;;  %v16225_v27 = vld [vmem:[%s18038_s13 + $0x7d8] sm:$0xff]  }
 0x47d   : > { %v4090_v30 = vsel %vm3336_vm0, %v15470_v43, 0.0  ;;  %v15974_v19 = vunpack.c.h.bf16 %v16225_v27 }
 0x47e   : > { %4085 = vadd.xlane.f32.xlu1 %v4084_v59  ;;  %12234 = vmatpush1.bf16.msra.mxu0 %v16993_v0  ;;  %v5065_v0 = vmul.f32 0.015625, %v21062_v60  ;;  %v5064_v59 = vmul.f32 0.015625, %v21069_v48  ;;  %v4087_v60 = vsel %vm3336_vm0, %v15469_v51, 0.0  ;;  %v15973_v48 = vunpack.c.l.bf16 %v16225_v27 }
 0x47f   : > { %v21131_v26 = vpop.xlane.xlu1 %4745  ;;  %4082 = vadd.xlane.f32.xlu0 %v4081_v6  ;;  %12562 = vmatpush1.bf16.msra.mxu1 %v16996_v54  ;;  %v5317_v54 = vmul.f32 0.015625, %v21080_v28  ;;  %v5316_v6 = vmul.f32 0.015625, %v21087_v39  ;;  %v5300_v28 = vmul.f32 0.015625, %v21114_v62  ;;  %v4846_v7 = vsel %vm3336_vm0, %v15974_v19, 0.0 }
 0x480   : > { %v21136_v38 = vpop.xlane.xlu0 %4742  ;;  %12235 = vmatprep.subr.bf16.mxu0 %v17001_v8  ;;  %12563 = vmatprep.subr.bf16.mxu1 %v17004_v22  ;;  %v5049_v8 = vmul.f32 0.015625, %v21098_v61  ;;  %v5048_v22 = vmul.f32 0.015625, %v21103_v57  ;;  %v5462_v49 = vpack.c.bf16 %v5065_v0, %v5064_v59 }
 0x481   : > { %v5318_v19 = vmul.f32 0.015625, %v21136_v38 }
 0x482   : > { %4841 = vadd.xlane.f32.xlu1 %v4840_v9  ;;  %12236 = vmatpush1.bf16.msra.mxu0 %v16999_v36  ;;  %v16093_v9 = vld [vmem:[%s18038_s13 + $0x3b8] sm:$0xff]   ;;  %v5454_v50 = vpack.c.bf16 %v5049_v8, %v5048_v22  ;;  %v6577_v46 = vunpack.c.l.b16 %v5462_v49 }
 0x483   : > { %v21142_v13 = vpop.xlane.xlu1 %3941  ;;  %4838 = vadd.xlane.f32.xlu0 %v4837_v40  ;;  %12564 = vmatpush1.bf16.msra.mxu1 %v17002_v31  ;;  %v5301_v31 = vmul.f32 0.015625, %v21109_v42  ;;  %v5588_v40 = vpack.c.bf16 %v5317_v54, %v5316_v6  ;;  %v15446_v61 = vunpack.c.h.bf16 %v16093_v9  ;;  %v5067_v54 = vmul.f32 0.015625, %v21120_v5 }
 0x484   : > { %v21145_v14 = vpop.xlane.xlu0 %3938  ;;  %12246 = vmatprep.subr.bf16.mxu0 %v17007_v34  ;;  %12574 = vmatprep.subr.bf16.mxu1 %v17010_v37  ;;  %v4843_v34 = vsel %vm3336_vm0, %v15973_v48, 0.0  ;;  %v15445_v37 = vunpack.c.l.bf16 %v16093_v9  ;;  %v6561_v43 = vunpack.c.l.b16 %v5454_v50  ;;  %v7958_v0 = vrot.slane %v6577_v46, %v18194_v29 }
 0x485   : > { %v6829_v42 = vunpack.c.l.b16 %v5588_v40  ;;  %v4054_v62 = vsel %vm3336_vm0, %v15446_v61, 0.0  ;;  %v5066_v6 = vmul.f32 0.015625, %v21125_v15  ;;  %v5051_v8 = vmul.f32 0.015625, %v21142_v13 }
 0x486   : > { %4049 = vadd.xlane.f32.xlu1 %v4048_v35  ;;  %v16219_v35 = vld [vmem:[%s18038_s13 + $0x7a8] sm:$0xff]   ;;  %v4051_v51 = vsel %vm3336_vm0, %v15445_v37, 0.0  ;;  %v5050_v22 = vmul.f32 0.015625, %v21145_v14  ;;  %v6830_v48 = vunpack.c.h.b16 %v5588_v40  ;;  %v6562_v5 = vunpack.c.h.b16 %v5454_v50 }
 0x487   : > { %v21149_v1 = vpop.xlane.xlu1 %4697  ;;  %4046 = vadd.xlane.f32.xlu0 %v4045_v20  ;;  %v5580_v20 = vpack.c.bf16 %v5301_v31, %v5300_v28  ;;  %v15950_v17 = vunpack.c.h.bf16 %v16219_v35  ;;  %v15949_v27 = vunpack.c.l.bf16 %v16219_v35  ;;  %v9202_v9 = vrot.slane %v6829_v42, %v18194_v29 }
 0x488   : > { %v21152_v56 = vpop.xlane.xlu0 %4694  ;;  %v7879_v15 = vrot.slane %v6561_v43, %v18194_v29  ;;  %v5463_v14 = vpack.c.bf16 %v5067_v54, %v5066_v6  ;;  %v5303_v28 = vmul.f32 0.015625, %v21149_v1  ;;  %v9207_v46 = vrot.slane %v6830_v48, %v18197_v32 }
 0x489   : > { %v6813_v59 = vunpack.c.l.b16 %v5580_v20  ;;  %v6814_v31 = vunpack.c.h.b16 %v5580_v20  ;;  %v4807_v38 = vsel %vm3336_vm0, %v15949_v27, 0.0  ;;  %v5302_v40 = vmul.f32 0.015625, %v21152_v56 }
 0x48a   : > { %4805 = vadd.xlane.f32.xlu1 %v4804_v18  ;;  %v6578_v18 = vunpack.c.h.b16 %v5462_v49  ;;  %v4810_v49 = vsel %vm3336_vm0, %v15950_v17, 0.0  ;;  %v9203_v35 = vsel %vm22282_vm5, %v9202_v9, %v21060_v10  ;;  %v7884_v1 = vrot.slane %v6562_v5, %v18197_v32  ;;  %vm22283_vm0 = vmmov %vm22281_vm4 }
 0x48b   : > { %v21158_v3 = vpop.xlane.xlu1 %3995  ;;  %4802 = vadd.xlane.f32.xlu0 %v4801_v16  ;;  %v9123_v13 = vrot.slane %v6813_v59, %v18194_v29  ;;  %v9128_v56 = vrot.slane %v6814_v31, %v18197_v32  ;;  %vm22284_vm6 = vmmov %vm22283_vm0  ;;  %v6579_v10 = vunpack.c.l.b16 %v5463_v14  ;;  %v6580_v59 = vunpack.c.h.b16 %v5463_v14 }
 0x48c   : > { %v3993_v36 = vpop.xlane.xlu0 %3992  ;;  %v7963_v61 = vrot.slane %v6578_v18, %v18197_v32  ;;  %v5069_v20 = vmul.f32 0.015625, %v21158_v3  ;;  %v7880_v18 = vsel %vm22283_vm0, %v7879_v15, %v21078_v2 }
 0x48d   : > { %v5068_v42 = vmul.f32 0.015625, %v3993_v36  ;;  %v9124_v43 = vsel %vm22284_vm6, %v9123_v13, %v21096_v41  ;;  %v7973_v31 = vrot.slane %v6580_v59, %v18211_v53 }
 0x48e   : > { %4091 = vadd.xlane.f32.xlu1 %v4090_v30  ;;  %v5319_v30 = vmul.f32 0.015625, %v21131_v26 }
 0x48f   : > { %v4752_v39 = vpop.xlane.xlu1 %4751  ;;  %4088 = vadd.xlane.f32.xlu0 %v4087_v60  ;;  %v5464_v54 = vpack.c.bf16 %v5069_v20, %v5068_v42 }
 0x490   : > { %v4749_v57 = vpop.xlane.xlu0 %4748  ;;  %v5589_v50 = vpack.c.bf16 %v5319_v30, %v5318_v19  ;;  %v7968_v19 = vrot.slane %v6579_v10, %v18208_v52 }
 0x491   : > { %v6582_v42 = vunpack.c.h.b16 %v5464_v54 }
 0x492   : > { %4847 = vadd.xlane.f32.xlu1 %v4846_v7  ;;  %v7959_v7 = vsel %vm22281_vm4, %v7958_v0, %v21046_v58  ;;  %v5321_v58 = vmul.f32 0.015625, %v4752_v39  ;;  %v6831_v27 = vunpack.c.l.b16 %v5589_v50  ;;  %vm22286_vm4 = vmmov %vm22285_vm7  ;;  %v6832_v41 = vunpack.c.h.b16 %v5589_v50 }
 0x493   : > { %v21172_v25 = vpop.xlane.xlu1 %3947  ;;  %4844 = vadd.xlane.f32.xlu0 %v4843_v34  ;;  %v5455_v34 = vpack.c.bf16 %v5051_v8, %v5050_v22  ;;  %v7964_v36 = vsel %vm22285_vm7, %v7963_v61, %v7959_v7  ;;  %v9208_v6 = vsel %vm22286_vm4, %v9207_v46, %v9203_v35  ;;  %vm22287_vm5 = vmmov %vm22286_vm4 }
 0x494   : > { %v21175_v16 = vpop.xlane.xlu0 %3944  ;;  %v7885_v39 = vsel %vm22287_vm5, %v7884_v1, %v7880_v18  ;;  %vm22288_vm3 = vmmov %vm22286_vm4  ;;  %v9212_v48 = vrot.slane %v6831_v27, %v18208_v52  ;;  %v9217_v35 = vrot.slane %v6832_v41, %v18211_v53  ;;  %vm22293_vm4 = vcmask 261312  }
 0x495   : > { %v6563_v0 = vunpack.c.l.b16 %v5455_v34  ;;  %v6564_v8 = vunpack.c.h.b16 %v5455_v34  ;;  %v5052_v5 = vmul.f32 0.015625, %v21175_v16  ;;  %v7969_v34 = vsel %vm6927_vm8, %v7968_v19, %v7964_v36  ;;  %vm22294_vm5 = vmmov %vm22293_vm4 }
 0x496   : > { %4055 = vadd.xlane.f32.xlu1 %v4054_v62  ;;  %v5320_v62 = vmul.f32 0.015625, %v4749_v57  ;;  %v9129_v57 = vsel %vm22288_vm3, %v9128_v56, %v9124_v43  ;;  %v9213_v16 = vsel %vm6927_vm8, %v9212_v48, %v9208_v6  ;;  %vm22289_vm3 = vcmask 720512  }
 0x497   : > { %v21185_v60 = vpop.xlane.xlu1 %4703  ;;  %4052 = vadd.xlane.f32.xlu0 %v4051_v51  ;;  %v5581_v51 = vpack.c.bf16 %v5303_v28, %v5302_v40  ;;  %v7889_v9 = vrot.slane %v6563_v0, %v18208_v52  ;;  %v7894_v46 = vrot.slane %v6564_v8, %v18211_v53  ;;  %v7974_v0 = vsel %vm6934_vm9, %v7973_v31, %v7969_v34  ;;  %vm22290_vm0 = vmmov %vm22289_vm3 }
 0x498   : > { %v21190_v26 = vpop.xlane.xlu0 %4700  ;;  %v5590_v30 = vpack.c.bf16 %v5321_v58, %v5320_v62  ;;  %v5305_v58 = vmul.f32 0.015625, %v21185_v60  ;;  %v7983_v60 = vrot.slane %v6582_v42, %v18239_v44  ;;  %vm22291_vm6 = vmmov %vm22290_vm0 }
 0x499   : > { %v6815_v22 = vunpack.c.l.b16 %v5581_v51  ;;  %v6816_v28 = vunpack.c.h.b16 %v5581_v51  ;;  %v7890_v20 = vsel %vm6927_vm8, %v7889_v9, %v7885_v39  ;;  %v5304_v62 = vmul.f32 0.015625, %v21190_v26  ;;  %vm22292_vm7 = vmmov %vm22290_vm0 }
 0x49a   : > { %4811 = vadd.xlane.f32.xlu1 %v4810_v49  ;;  %v5053_v49 = vmul.f32 0.015625, %v21172_v25  ;;  %v6833_v40 = vunpack.c.l.b16 %v5590_v30  ;;  %v6834_v43 = vunpack.c.h.b16 %v5590_v30  ;;  %v7895_v36 = vsel %vm6934_vm9, %v7894_v46, %v7890_v20 }
 0x49b   : > { %v4002_v37 = vpop.xlane.xlu1 %4001  ;;  %4808 = vadd.xlane.f32.xlu0 %v4807_v38  ;;  %v6581_v38 = vunpack.c.l.b16 %v5464_v54  ;;  %v9133_v25 = vrot.slane %v6815_v22, %v18208_v52  ;;  %v9138_v18 = vrot.slane %v6816_v28, %v18211_v53 }
 0x49c   : > { %v3999_v17 = vpop.xlane.xlu0 %3998  ;;  %v5071_v13 = vmul.f32 0.015625, %v4002_v37  ;;  %v5456_v37 = vpack.c.bf16 %v5053_v49, %v5052_v5  ;;  %v9222_v10 = vrot.slane %v6833_v40, %v18226_v21  ;;  %v9227_v48 = vrot.slane %v6834_v43, %v18239_v44 }
 0x49d   : > { %v5070_v14 = vmul.f32 0.015625, %v3999_v17  ;;  %v7978_v56 = vrot.slane %v6581_v38, %v18226_v21  ;;  %v9134_v59 = vsel %vm6927_vm8, %v9133_v25, %v9129_v57 }
 0x49e   : > { %v6565_v54 = vunpack.c.l.b16 %v5456_v37  ;;  %v9139_v8 = vsel %vm6934_vm9, %v9138_v18, %v9134_v59  ;;  %v6566_v57 = vunpack.c.h.b16 %v5456_v37 }
 0x49f   : > { %v4758_v3 = vpop.xlane.xlu1 %4757  ;;  %v5465_v17 = vpack.c.bf16 %v5071_v13, %v5070_v14  ;;  %v7979_v30 = vsel %vm22289_vm3, %v7978_v56, %v7974_v0  ;;  %vm22295_vm3 = vcmask 326912  }
 0x4a0   : > { %v4755_v2 = vpop.xlane.xlu0 %4754  ;;  %v5323_v7 = vmul.f32 0.015625, %v4758_v3  ;;  %v9218_v3 = vsel %vm6934_vm9, %v9217_v35, %v9213_v16  ;;  %v7899_v13 = vrot.slane %v6565_v54, %v18226_v21  ;;  %v7904_v42 = vrot.slane %v6566_v57, %v18239_v44 }
 0x4a1   : > { %v5322_v61 = vmul.f32 0.015625, %v4755_v2  ;;  %v5582_v2 = vpack.c.bf16 %v5305_v58, %v5304_v62  ;;  %v6583_v19 = vunpack.c.l.b16 %v5465_v17  ;;  %v9223_v22 = vsel %vm22290_vm0, %v9222_v10, %v9218_v3 }
 0x4a2   : > { %v6584_v14 = vunpack.c.h.b16 %v5465_v17  ;;  %v9228_v35 = vsel %vm6948_vm11, %v9227_v48, %v9223_v22  ;;  %v7900_v58 = vsel %vm22291_vm6, %v7899_v13, %v7895_v36  ;;  %vm22296_vm0 = vcmask 392512   ;;  %vm22297_vm6 = vmmov %vm22295_vm3 }
 0x4a3   : > { %v3954_v15 = vpop.xlane.xlu1 %3953  ;;  %v5591_v51 = vpack.c.bf16 %v5323_v7, %v5322_v61  ;;  %v6817_v7 = vunpack.c.l.b16 %v5582_v2  ;;  %v7988_v61 = vrot.slane %v6583_v19, %v22261_v24  ;;  %v6818_v46 = vunpack.c.h.b16 %v5582_v2 }
 0x4a4   : > { %v3951_v50 = vpop.xlane.xlu0 %3950  ;;  %v5055_v26 = vmul.f32 0.015625, %v3954_v15  ;;  %v7984_v15 = vsel %vm6948_vm11, %v7983_v60, %v7979_v30  ;;  %v7993_v62 = vrot.slane %v6584_v14, %v22262_v4 }
 0x4a5   : > { %v5054_v6 = vmul.f32 0.015625, %v3951_v50  ;;  %v6835_v9 = vunpack.c.l.b16 %v5591_v51  ;;  %v6836_v25 = vunpack.c.h.b16 %v5591_v51  ;;  %v9143_v10 = vrot.slane %v6817_v7, %v18226_v21 }
 0x4a6   : > { %v9148_v3 = vrot.slane %v6818_v46, %v18239_v44 }
 0x4a7   : > { %v4710_v1 = vpop.xlane.xlu1 %4709  ;;  %v5457_v28 = vpack.c.bf16 %v5055_v26, %v5054_v6  ;;  %v9232_v16 = vrot.slane %v6835_v9, %v22261_v24  ;;  %v9237_v60 = vrot.slane %v6836_v25, %v22262_v4 }
 0x4a8   : > { %v4707_v27 = vpop.xlane.xlu0 %4706  ;;  %v5307_v5 = vmul.f32 0.015625, %v4710_v1 }
 0x4a9   : > { %v5306_v31 = vmul.f32 0.015625, %v4707_v27  ;;  %v6567_v17 = vunpack.c.l.b16 %v5457_v28  ;;  %v7989_v27 = vsel %vm6955_vm12, %v7988_v61, %v7984_v15  ;;  %v9233_v59 = vsel %vm6955_vm12, %v9232_v16, %v9228_v35 }
 0x4aa   : > { %v6568_v2 = vunpack.c.h.b16 %v5457_v28  ;;  %v7994_v48 = vsel %vm6962_vm13, %v7993_v62, %v7989_v27  ;;  %v9238_v14 = vsel %vm6962_vm13, %v9237_v60, %v9233_v59 }
 0x4ab   : > { %v4008_v39 = vpop.xlane.xlu1 %4007  ;;  %v5583_v37 = vpack.c.bf16 %v5307_v5, %v5306_v31  ;;  %v7909_v19 = vrot.slane %v6567_v17, %v22261_v24  ;;  %v9144_v31 = vsel %vm22292_vm7, %v9143_v10, %v9139_v8  ;;  %vm22298_vm7 = vmmov %vm22296_vm0 }
 0x4ac   : > { %v5073_v41 = vmul.f32 0.015625, %v4008_v39  ;;  %v4005_v49 = vpop.xlane.xlu0 %4004 }
 0x4ad   : > { %v5072_v38 = vmul.f32 0.015625, %v4005_v49  ;;  %v6819_v26 = vunpack.c.l.b16 %v5583_v37 }
 0x4af   : > { %v4764_v40 = vpop.xlane.xlu1 %4763  ;;  %v5466_v50 = vpack.c.bf16 %v5073_v41, %v5072_v38  ;;  %v6820_v38 = vunpack.c.h.b16 %v5583_v37  ;;  %v9153_v28 = vrot.slane %v6819_v26, %v22261_v24 }
 0x4b0   : > { %v5325_v34 = vmul.f32 0.015625, %v4764_v40  ;;  %v4761_v20 = vpop.xlane.xlu0 %4760 }
 0x4b1   : > { %v6585_v1 = vunpack.c.l.b16 %v5466_v50  ;;  %v5324_v56 = vmul.f32 0.015625, %v4761_v20  ;;  %v6586_v18 = vunpack.c.h.b16 %v5466_v50  ;;  %v7905_v50 = vsel %vm6948_vm11, %v7904_v42, %v7900_v58 }
 0x4b2   : > { %v7910_v25 = vsel %vm6955_vm12, %v7909_v19, %v7905_v50 }
 0x4b3   : > { %v3960_v43 = vpop.xlane.xlu1 %3959  ;;  %v5592_v51 = vpack.c.bf16 %v5325_v34, %v5324_v56  ;;  %v7998_v54 = vrot.slane %v6585_v1, %v22263_v11  ;;  %v8003_v41 = vrot.slane %v6586_v18, %v22264_v12  ;;  %v7914_v34 = vrot.slane %v6568_v2, %v22262_v4 }
 0x4b4   : > { %v5057_v0 = vmul.f32 0.015625, %v3960_v43  ;;  %v3957_v36 = vpop.xlane.xlu0 %3956  ;;  %v9149_v1 = vsel %vm6948_vm11, %v9148_v3, %v9144_v31  ;;  %v9158_v56 = vrot.slane %v6820_v38, %v22262_v4 }
 0x4b5   : > { %v6837_v6 = vunpack.c.l.b16 %v5592_v51  ;;  %v6838_v39 = vunpack.c.h.b16 %v5592_v51  ;;  %v5056_v30 = vmul.f32 0.015625, %v3957_v36  ;;  %v7999_v13 = vsel %vm6969_vm14, %v7998_v54, %v7994_v48 }
 0x4b6   : > { %v8004_v37 = vsel %vm6976_vm15, %v8003_v41, %v7999_v13  ;;  %v9154_v58 = vsel %vm6955_vm12, %v9153_v28, %v9149_v1  ;;  %v7915_v27 = vsel %vm6962_vm13, %v7914_v34, %v7910_v25  ;;  %v17008_v13 = vld [vmem:[%s18036_s12 + $0xe08] ss:$16 sps:$4 sm:$0xff]   ;;  %v17011_v1 = vld [vmem:[%s18036_s12 + $0xe20] ss:$16 sps:$4 sm:$0xff]  }
 0x4b7   : > { %v4716_v22 = vpop.xlane.xlu1 %4715  ;;  %v9242_v9 = vrot.slane %v6837_v6, %v22263_v11  ;;  %v9247_v49 = vrot.slane %v6838_v39, %v22264_v12  ;;  %v5458_v57 = vpack.c.bf16 %v5057_v0, %v5056_v30  ;;  %v9159_v26 = vsel %vm6962_vm13, %v9158_v56, %v9154_v58  ;;  %v17014_v56 = vld [vmem:[%s18036_s12 + $0xe28] ss:$16 sps:$4 sm:$0xff]  }
 0x4b8   : > { %v5309_v5 = vmul.f32 0.015625, %v4716_v22  ;;  %v4713_v15 = vpop.xlane.xlu0 %4712 }
 0x4b9   : > { %v6569_v40 = vunpack.c.l.b16 %v5458_v57  ;;  %v5308_v7 = vmul.f32 0.015625, %v4713_v15  ;;  %v9243_v61 = vsel %vm6969_vm14, %v9242_v9, %v9238_v14  ;;  %v6570_v35 = vunpack.c.h.b16 %v5458_v57  ;;  %v17005_v15 = vld [vmem:[%s18036_s12 + $0xe00] ss:$16 sps:$4 sm:$0xff]  }
 0x4ba   : > { %v9248_v8 = vsel %vm6976_vm15, %v9247_v49, %v9243_v61 }
 0x4bb   : > { %v4014_v46 = vpop.xlane.xlu1 %4013  ;;  %v5584_v16 = vpack.c.bf16 %v5309_v5, %v5308_v7  ;;  %v7919_v62 = vrot.slane %v6569_v40, %v22263_v11  ;;  %v9401_v42 = vsel %vm9387_vm10, %v9248_v8, %v8004_v37  ;;  %v7924_v51 = vrot.slane %v6570_v35, %v22264_v12  ;;  %v17013_v40 = vld [vmem:[%s18036_s12 + $0xe24] ss:$16 sps:$4 sm:$0xff]   ;;  %v17016_v7 = vld [vmem:[%s18036_s12 + $0xe2c] ss:$16 sps:$4 sm:$0xff]  }
 0x4bc   : > { %v5075_v20 = vmul.f32 0.015625, %v4014_v46  ;;  %v4011_v17 = vpop.xlane.xlu0 %4010  ;;  %v9417_v0 = vpack.c.b16 %v9401_v42, %v9401_v42 }
 0x4bd   : > { %v6821_v18 = vunpack.c.l.b16 %v5584_v16  ;;  %v6822_v43 = vunpack.c.h.b16 %v5584_v16  ;;  %v5074_v10 = vmul.f32 0.015625, %v4011_v17  ;;  %v7920_v6 = vsel %vm6969_vm14, %v7919_v62, %v7915_v27  ;;  %v17019_v62 = vld [vmem:[%s18036_s12 + $0xe44] ss:$16 sps:$4 sm:$0xff]   ;;  %v17022_v17 = vld [vmem:[%s18036_s12 + $0xe4c] ss:$16 sps:$4 sm:$0xff]  }
 0x4be   : > { %12237 = vmatprep.mubr.bf16.mxu0 %v9417_v0  ;;  %12565 = vmatprep.mubr.bf16.mxu1 %v9417_v0  ;;  %v7925_v9 = vsel %vm6976_vm15, %v7924_v51, %v7920_v6  ;;  %v17020_v6 = vld [vmem:[%s18036_s12 + $0xe48] ss:$16 sps:$4 sm:$0xff]  }
 0x4bf   : > { %v4770_v59 = vpop.xlane.xlu1 %4769  ;;  %v9163_v3 = vrot.slane %v6821_v18, %v22263_v11  ;;  %v9168_v60 = vrot.slane %v6822_v43, %v22264_v12  ;;  %v5467_v54 = vpack.c.bf16 %v5075_v20, %v5074_v10 }
 0x4c0   : > { %v5327_v36 = vmul.f32 0.015625, %v4770_v59  ;;  %v4767_v39 = vpop.xlane.xlu0 %4766 }
 0x4c1   : > { %v9164_v30 = vsel %vm6969_vm14, %v9163_v3, %v9159_v26  ;;  %v5326_v2 = vmul.f32 0.015625, %v4767_v39  ;;  %v6587_v49 = vunpack.c.l.b16 %v5467_v54  ;;  %v6588_v57 = vunpack.c.h.b16 %v5467_v54  ;;  %v17017_v26 = vld [vmem:[%s18036_s12 + $0xe40] ss:$16 sps:$4 sm:$0xff]  }
 0x4c2   : > { %v9169_v41 = vsel %vm6976_vm15, %v9168_v60, %v9164_v30  ;;  %v17025_v30 = vld [vmem:[%s18036_s12 + $0xe64] ss:$16 sps:$4 sm:$0xff]  }
 0x4c3   : > { %v4020_v19 = vpop.xlane.xlu1 %4019  ;;  %v5593_v22 = vpack.c.bf16 %v5327_v36, %v5326_v2  ;;  %v9400_v31 = vsel %vm9387_vm10, %v9169_v41, %v7925_v9  ;;  %v8008_v34 = vrot.slane %v6587_v49, %v22269_v63  ;;  %v8012_v35 = vrot.slane %v6588_v57, %v22270_v33  ;;  %v17028_v2 = vld [vmem:[%s18036_s12 + $0xe6c] ss:$16 sps:$4 sm:$0xff]  }
 0x4c4   : > { %v5077_v48 = vmul.f32 0.015625, %v4020_v19  ;;  %v4017_v5 = vpop.xlane.xlu0 %4016  ;;  %v9416_v14 = vpack.c.b16 %v9400_v31, %v9400_v31 }
 0x4c5   : > { %v5076_v38 = vmul.f32 0.015625, %v4017_v5  ;;  %v6839_v46 = vunpack.c.l.b16 %v5593_v22  ;;  %v6840_v8 = vunpack.c.h.b16 %v5593_v22  ;;  %v8013_v10 = vsel %vm6878_vm1, %v8012_v35, %v8008_v34 }
 0x4c6   : > { %12238 = vmatmul.mubr.bf16.vlgmr.msra.gmra.mrb[0].mxu0 %v9416_v14  ;;  %12566 = vmatmul.mubr.bf16.vlgmr.msra.gmra.mrb[0].mxu1 %v9416_v14  ;;  %v17026_v14 = vld [vmem:[%s18036_s12 + $0xe68] ss:$16 sps:$4 sm:$0xff]  }
 0x4c7   : > { %v4776_v28 = vpop.xlane.xlu1 %4775  ;;  %v5468_v61 = vpack.c.bf16 %v5077_v48, %v5076_v38  ;;  %12247 = vmatpush1.bf16.msra.mxu0 %v17005_v15  ;;  %12575 = vmatpush1.bf16.msra.mxu1 %v17008_v13  ;;  %v9252_v27 = vrot.slane %v6839_v46, %v22269_v63  ;;  %v9256_v51 = vrot.slane %v6840_v8, %v22270_v33  ;;  %v17023_v13 = vld [vmem:[%s18036_s12 + $0xe60] ss:$16 sps:$4 sm:$0xff]  }
 0x4c8   : > { %v5329_v50 = vmul.f32 0.015625, %v4776_v28  ;;  %v4773_v25 = vpop.xlane.xlu0 %4772  ;;  %12248 = vmatprep.subr.bf16.mxu0 %v17013_v40  ;;  %12576 = vmatprep.subr.bf16.mxu1 %v17016_v7  ;;  %v17031_v40 = vld [vmem:[%s18036_s12 + $0xe84] ss:$16 sps:$4 sm:$0xff]   ;;  %v17034_v7 = vld [vmem:[%s18036_s12 + $0xe8c] ss:$16 sps:$4 sm:$0xff]  }
 0x4c9   : > { %v6589_v16 = vunpack.c.l.b16 %v5468_v61  ;;  %v6590_v20 = vunpack.c.h.b16 %v5468_v61  ;;  %v5328_v37 = vmul.f32 0.015625, %v4773_v25  ;;  %v9257_v9 = vsel %vm6878_vm1, %v9256_v51, %v9252_v27  ;;  %v17038_v27 = vld [vmem:[%s18036_s12 + $0xea8] ss:$16 sps:$4 sm:$0xff]   ;;  %v17043_v51 = vld [vmem:[%s18036_s12 + $0xec4] ss:$16 sps:$4 sm:$0xff]  }
 0x4cb   : > { %v8017_v42 = vrot.slane %v6589_v16, %v22271_v47  ;;  %v8022_v58 = vrot.slane %v6590_v20, %v22272_v45  ;;  %v5594_v18 = vpack.c.bf16 %v5329_v50, %v5328_v37  ;;  %v4026_v43 = vpop.xlane.xlu1 %4025  ;;  %12249 = vmatpush1.bf16.msra.mxu0 %v17011_v1  ;;  %12577 = vmatpush1.bf16.msra.mxu1 %v17014_v56  ;;  %v17029_v20 = vld [vmem:[%s18036_s12 + $0xe80] ss:$16 sps:$4 sm:$0xff]   ;;  %v17032_v37 = vld [vmem:[%s18036_s12 + $0xe88] ss:$16 sps:$4 sm:$0xff]   ;;  %v17037_v56 = vld [vmem:[%s18036_s12 + $0xea4] ss:$16 sps:$4 sm:$0xff]  }
 0x4cc   : > { %v5079_v0 = vmul.f32 0.015625, %v4026_v43  ;;  %v4023_v59 = vpop.xlane.xlu0 %4022  ;;  %12250 = vmatprep.subr.bf16.mxu0 %v17019_v62  ;;  %12578 = vmatprep.subr.bf16.mxu1 %v17022_v17  ;;  %v17040_v62 = vld [vmem:[%s18036_s12 + $0xeac] ss:$16 sps:$4 sm:$0xff]  }
 0x4cd   : > { %v8018_v3 = vsel %vm6885_vm2, %v8017_v42, %v8013_v10  ;;  %v6841_v60 = vunpack.c.l.b16 %v5594_v18  ;;  %v6842_v54 = vunpack.c.h.b16 %v5594_v18  ;;  %v5078_v36 = vmul.f32 0.015625, %v4023_v59  ;;  %v17035_v10 = vld [vmem:[%s18036_s12 + $0xea0] ss:$16 sps:$4 sm:$0xff]  }
 0x4ce   : > { %v8023_v39 = vsel %vm22293_vm4, %v8022_v58, %v8018_v3 }
 0x4cf   : > { %v9261_v19 = vrot.slane %v6841_v60, %v22271_v47  ;;  %v9266_v41 = vrot.slane %v6842_v54, %v22272_v45  ;;  %v5469_v22 = vpack.c.bf16 %v5079_v0, %v5078_v36  ;;  %v4062_v48 = vpop.xlane.xlu1 %4061  ;;  %12251 = vmatpush1.bf16.msra.mxu0 %v17017_v26  ;;  %12579 = vmatpush1.bf16.msra.mxu1 %v17020_v6  ;;  %v17046_v0 = vld [vmem:[%s18036_s12 + $0xecc] ss:$16 sps:$4 sm:$0xff]   ;;  %v17041_v26 = vld [vmem:[%s18036_s12 + $0xec0] ss:$16 sps:$4 sm:$0xff]   ;;  %v17044_v6 = vld [vmem:[%s18036_s12 + $0xec8] ss:$16 sps:$4 sm:$0xff]  }
 0x4d0   : > { %v5091_v49 = vmul.f32 0.015625, %v4062_v48  ;;  %v4059_v57 = vpop.xlane.xlu0 %4058  ;;  %12252 = vmatprep.subr.bf16.mxu0 %v17025_v30  ;;  %12580 = vmatprep.subr.bf16.mxu1 %v17028_v2  ;;  %v17049_v30 = vld [vmem:[%s18036_s12 + $0xee4] ss:$16 sps:$4 sm:$0xff]   ;;  %v17052_v2 = vld [vmem:[%s18036_s12 + $0xeec] ss:$16 sps:$4 sm:$0xff]  }
 0x4d1   : > { %v9262_v5 = vsel %vm6885_vm2, %v9261_v19, %v9257_v9  ;;  %v6591_v31 = vunpack.c.l.b16 %v5469_v22  ;;  %v6592_v38 = vunpack.c.h.b16 %v5469_v22  ;;  %v5090_v15 = vmul.f32 0.015625, %v4059_v57  ;;  %v17047_v22 = vld [vmem:[%s18036_s12 + $0xee0] ss:$16 sps:$4 sm:$0xff]   ;;  %v17050_v48 = vld [vmem:[%s18036_s12 + $0xee8] ss:$16 sps:$4 sm:$0xff]  }
 0x4d2   : > { %v9267_v28 = vsel %vm22294_vm5, %v9266_v41, %v9262_v5  ;;  %v17055_v9 = vld [vmem:[%s18036_s12 + $0xf04] ss:$16 sps:$4 sm:$0xff]   ;;  %vm22301_vm5 = vcmask 523712  }
 0x4d3   : > { %v8027_v61 = vrot.slane %v6591_v31, %v22273_v55  ;;  %v8032_v50 = vrot.slane %v6592_v38, %v22274_v23  ;;  %v21315_v34 = vpack.c.bf16 %v5091_v49, %v5090_v15  ;;  %v4782_v35 = vpop.xlane.xlu1 %4781  ;;  %12253 = vmatpush1.bf16.msra.mxu0 %v17023_v13  ;;  %12581 = vmatpush1.bf16.msra.mxu1 %v17026_v14  ;;  %v17058_v49 = vld [vmem:[%s18036_s12 + $0xf0c] ss:$16 sps:$4 sm:$0xff]   ;;  %v17053_v31 = vld [vmem:[%s18036_s12 + $0xf00] ss:$16 sps:$4 sm:$0xff]   ;;  %v17056_v38 = vld [vmem:[%s18036_s12 + $0xf08] ss:$16 sps:$4 sm:$0xff]  }
 0x4d4   : > { %v5331_v46 = vmul.f32 0.015625, %v4782_v35  ;;  %v4779_v8 = vpop.xlane.xlu0 %4778  ;;  %12254 = vmatprep.subr.bf16.mxu0 %v17031_v40  ;;  %12582 = vmatprep.subr.bf16.mxu1 %v17034_v7  ;;  %v17061_v15 = vld [vmem:[%s18036_s12 + $0xf24] ss:$16 sps:$4 sm:$0xff]   ;;  %v17064_v13 = vld [vmem:[%s18036_s12 + $0xf2c] ss:$16 sps:$4 sm:$0xff]  }
 0x4d5   : > { %v8028_v25 = vsel %vm22295_vm3, %v8027_v61, %v8023_v39  ;;  %v5330_v16 = vmul.f32 0.015625, %v4779_v8  ;;  %v17059_v40 = vld [vmem:[%s18036_s12 + $0xf20] ss:$16 sps:$4 sm:$0xff]   ;;  %v17062_v7 = vld [vmem:[%s18036_s12 + $0xf28] ss:$16 sps:$4 sm:$0xff]  }
 0x4d6   : > { %v21321_v1 = vsel %vm22296_vm0, %v8032_v50, %v8028_v25  ;;  %v17067_v61 = vld [vmem:[%s18036_s12 + $0xf44] ss:$16 sps:$4 sm:$0xff]   ;;  %v17070_v50 = vld [vmem:[%s18036_s12 + $0xf4c] ss:$16 sps:$4 sm:$0xff]   ;;  %v17065_v8 = vld [vmem:[%s18036_s12 + $0xf40] ss:$16 sps:$4 sm:$0xff]  }
 0x4d7   : > { %v5595_v17 = vpack.c.bf16 %v5331_v46, %v5330_v16  ;;  %v21325_v42 = vpop.xlane.xlu1 %4817  ;;  %12255 = vmatpush1.bf16.msra.mxu0 %v17029_v20  ;;  %12583 = vmatpush1.bf16.msra.mxu1 %v17032_v37  ;;  %v17068_v25 = vld [vmem:[%s18036_s12 + $0xf48] ss:$16 sps:$4 sm:$0xff]   ;;  %v17073_v16 = vld [vmem:[%s18036_s12 + $0xf64] ss:$16 sps:$4 sm:$0xff]   ;;  %v17076_v20 = vld [vmem:[%s18036_s12 + $0xf6c] ss:$16 sps:$4 sm:$0xff]  }
 0x4d8   : > { %v21327_v58 = vpop.xlane.xlu0 %4814  ;;  %12256 = vmatprep.subr.bf16.mxu0 %v17037_v56  ;;  %12584 = vmatprep.subr.bf16.mxu1 %v17040_v62  ;;  %v17071_v62 = vld [vmem:[%s18036_s12 + $0xf60] ss:$16 sps:$4 sm:$0xff]   ;;  %vm22303_vm0 = vmmov %vm22297_vm6 }
 0x4d9   : > { %v6843_v18 = vunpack.c.l.b16 %v5595_v17  ;;  %v6844_v43 = vunpack.c.h.b16 %v5595_v17  ;;  %v17074_v17 = vld [vmem:[%s18036_s12 + $0xf68] ss:$16 sps:$4 sm:$0xff]  }
 0x4db   : > { %v9271_v59 = vrot.slane %v6843_v18, %v22273_v55  ;;  %v9276_v3 = vrot.slane %v6844_v43, %v22274_v23  ;;  %v21335_v60 = vpop.xlane.xlu1 %4067  ;;  %12257 = vmatpush1.bf16.msra.mxu0 %v17035_v10  ;;  %12585 = vmatpush1.bf16.msra.mxu1 %v17038_v27  ;;  %v17079_v18 = vld [vmem:[%s18036_s12 + $0xf84] ss:$16 sps:$4 sm:$0xff]   ;;  %v17082_v43 = vld [vmem:[%s18036_s12 + $0xf8c] ss:$16 sps:$4 sm:$0xff]  }
 0x4dc   : > { %v21337_v54 = vpop.xlane.xlu0 %4064  ;;  %12258 = vmatprep.subr.bf16.mxu0 %v17043_v51  ;;  %12586 = vmatprep.subr.bf16.mxu1 %v17046_v0  ;;  %v17077_v51 = vld [vmem:[%s18036_s12 + $0xf80] ss:$16 sps:$4 sm:$0xff]   ;;  %v17080_v0 = vld [vmem:[%s18036_s12 + $0xf88] ss:$16 sps:$4 sm:$0xff]  }
 0x4dd   : > { %v9272_v36 = vsel %vm22297_vm6, %v9271_v59, %v9267_v28  ;;  %v17085_v59 = vld [vmem:[%s18036_s12 + $0xfa4] ss:$16 sps:$4 sm:$0xff]   ;;  %vm22304_vm6 = vmmov %vm22301_vm5 }
 0x4de   : > { %v21343_v39 = vsel %vm22298_vm7, %v9276_v3, %v9272_v36  ;;  %v17088_v3 = vld [vmem:[%s18036_s12 + $0xfac] ss:$16 sps:$4 sm:$0xff]  }
 0x4df   : > { %v21347_v19 = vpop.xlane.xlu1 %4823  ;;  %12259 = vmatpush1.bf16.msra.mxu0 %v17041_v26  ;;  %12587 = vmatpush1.bf16.msra.mxu1 %v17044_v6  ;;  %v5343_v6 = vmul.f32 0.015625, %v21325_v42 }
 0x4e0   : > { %v21349_v41 = vpop.xlane.xlu0 %4820  ;;  %12260 = vmatprep.subr.bf16.mxu0 %v17049_v30  ;;  %12588 = vmatprep.subr.bf16.mxu1 %v17052_v2  ;;  %v5342_v30 = vmul.f32 0.015625, %v21327_v58  ;;  %v17083_v2 = vld [vmem:[%s18036_s12 + $0xfa0] ss:$16 sps:$4 sm:$0xff]  }
 0x4e3   : > { %v21355_v57 = vpop.xlane.xlu1 %4031  ;;  %12261 = vmatpush1.bf16.msra.mxu0 %v17047_v22  ;;  %12589 = vmatpush1.bf16.msra.mxu1 %v17050_v48  ;;  %v17086_v22 = vld [vmem:[%s18036_s12 + $0xfa8] ss:$16 sps:$4 sm:$0xff]   ;;  %v5093_v48 = vmul.f32 0.015625, %v21335_v60 }
 0x4e4   : > { %v21357_v5 = vpop.xlane.xlu0 %4028  ;;  %12262 = vmatprep.subr.bf16.mxu0 %v17055_v9  ;;  %12590 = vmatprep.subr.bf16.mxu1 %v17058_v49  ;;  %v5092_v9 = vmul.f32 0.015625, %v21337_v54 }
 0x4e5   : > { %v5080_v42 = vmul.f32 0.015625, %v21357_v5 }
 0x4e7   : > { %v21363_v14 = vpop.xlane.xlu1 %4787  ;;  %12263 = vmatpush1.bf16.msra.mxu0 %v17053_v31  ;;  %12591 = vmatpush1.bf16.msra.mxu1 %v17056_v38  ;;  %v5345_v31 = vmul.f32 0.015625, %v21347_v19  ;;  %v5344_v38 = vmul.f32 0.015625, %v21349_v41  ;;  %v6603_v19 = vunpack.c.l.b16 %v21315_v34  ;;  %v6604_v41 = vunpack.c.h.b16 %v21315_v34 }
 0x4e8   : > { %v21365_v28 = vpop.xlane.xlu0 %4784  ;;  %12264 = vmatprep.subr.bf16.mxu0 %v17061_v15  ;;  %12592 = vmatprep.subr.bf16.mxu1 %v17064_v13  ;;  %v5081_v15 = vmul.f32 0.015625, %v21355_v57  ;;  %v5601_v13 = vpack.c.bf16 %v5343_v6, %v5342_v30  ;;  %v5333_v60 = vmul.f32 0.015625, %v21363_v14 }
 0x4e9   : > { %v5332_v54 = vmul.f32 0.015625, %v21365_v28  ;;  %v8091_v14 = vrot.slane %v6604_v41, %v22270_v33 }
 0x4ea   : > { %v6855_v57 = vunpack.c.l.b16 %v5601_v13 }
 0x4eb   : > { %v4074_v35 = vpop.xlane.xlu1 %4073  ;;  %12265 = vmatpush1.bf16.msra.mxu0 %v17059_v40  ;;  %12593 = vmatpush1.bf16.msra.mxu1 %v17062_v7  ;;  %v5476_v40 = vpack.c.bf16 %v5093_v48, %v5092_v9 }
 0x4ec   : > { %v4071_v46 = vpop.xlane.xlu0 %4070  ;;  %12266 = vmatprep.subr.bf16.mxu0 %v17067_v61  ;;  %12594 = vmatprep.subr.bf16.mxu1 %v17070_v50  ;;  %v5602_v61 = vpack.c.bf16 %v5345_v31, %v5344_v38  ;;  %v5470_v50 = vpack.c.bf16 %v5081_v15, %v5080_v42  ;;  %v5095_v5 = vmul.f32 0.015625, %v4074_v35  ;;  %v9331_v28 = vrot.slane %v6855_v57, %v22269_v63 }
 0x4ee   : > { %v6858_v30 = vunpack.c.h.b16 %v5602_v61  ;;  %v6594_v31 = vunpack.c.h.b16 %v5470_v50 }
 0x4ef   : > { %v21375_v37 = vpop.xlane.xlu1 %4829  ;;  %12267 = vmatpush1.bf16.msra.mxu0 %v17065_v8  ;;  %12595 = vmatpush1.bf16.msra.mxu1 %v17068_v25  ;;  %v6856_v25 = vunpack.c.h.b16 %v5601_v13 }
 0x4f0   : > { %v21377_v56 = vpop.xlane.xlu0 %4826  ;;  %12268 = vmatprep.subr.bf16.mxu0 %v17073_v16  ;;  %12596 = vmatprep.subr.bf16.mxu1 %v17076_v20  ;;  %v5094_v16 = vmul.f32 0.015625, %v4071_v46  ;;  %v6605_v20 = vunpack.c.l.b16 %v5476_v40  ;;  %v5347_v6 = vmul.f32 0.015625, %v21375_v37 }
 0x4f1   : > { %v5346_v35 = vmul.f32 0.015625, %v21377_v56 }
 0x4f2   : > { %v5477_v34 = vpack.c.bf16 %v5095_v5, %v5094_v16  ;;  %v8096_v46 = vrot.slane %v6605_v20, %v22271_v47 }
 0x4f3   : > { %v4038_v10 = vpop.xlane.xlu1 %4037  ;;  %12269 = vmatpush1.bf16.msra.mxu0 %v17071_v62  ;;  %12597 = vmatpush1.bf16.msra.mxu1 %v17074_v17  ;;  %v6857_v17 = vunpack.c.l.b16 %v5602_v61 }
 0x4f4   : > { %v4035_v27 = vpop.xlane.xlu0 %4034  ;;  %12270 = vmatprep.subr.bf16.mxu0 %v17079_v18  ;;  %12598 = vmatprep.subr.bf16.mxu1 %v17082_v43  ;;  %v6593_v18 = vunpack.c.l.b16 %v5470_v50  ;;  %v5596_v43 = vpack.c.bf16 %v5333_v60, %v5332_v54  ;;  %v9345_v50 = vrot.slane %v6858_v30, %v22272_v45  ;;  %v6608_v57 = vunpack.c.h.b16 %v5477_v34 }
 0x4f5   : > { %v9340_v9 = vrot.slane %v6857_v17, %v22271_v47 }
 0x4f6   : > { %v6845_v38 = vunpack.c.l.b16 %v5596_v43 }
 0x4f7   : > { %v4794_v36 = vpop.xlane.xlu1 %4793  ;;  %12271 = vmatpush1.bf16.msra.mxu0 %v17077_v51  ;;  %12599 = vmatpush1.bf16.msra.mxu1 %v17080_v0  ;;  %v8087_v0 = vrot.slane %v6603_v19, %v22269_v63  ;;  %v8037_v63 = vrot.slane %v6593_v18, %v18194_v29 }
 0x4f8   : > { %v4791_v26 = vpop.xlane.xlu0 %4790  ;;  %12272 = vmatprep.subr.bf16.mxu0 %v17085_v59  ;;  %12600 = vmatprep.subr.bf16.mxu1 %v17088_v3  ;;  %v9335_v59 = vrot.slane %v6856_v25, %v22270_v33  ;;  %v6606_v3 = vunpack.c.h.b16 %v5476_v40  ;;  %v5335_v15 = vmul.f32 0.015625, %v4794_v36  ;;  %v8042_v36 = vrot.slane %v6594_v31, %v18197_v32 }
 0x4f9   : > { %v5334_v42 = vmul.f32 0.015625, %v4791_v26  ;;  %v8092_v56 = vsel %vm6878_vm1, %v8091_v14, %v8087_v0  ;;  %v6846_v26 = vunpack.c.h.b16 %v5596_v43 }
 0x4fa   : > { %v9336_v40 = vsel %vm6878_vm1, %v9335_v59, %v9331_v28  ;;  %v8097_v61 = vsel %vm6885_vm2, %v8096_v46, %v8092_v56  ;;  %v8101_v47 = vrot.slane %v6606_v3, %v22272_v45  ;;  %vm22299_vm1 = vcmask 458112  }
 0x4fb   : > { %v4080_v49 = vpop.xlane.xlu1 %4079  ;;  %12273 = vmatpush1.bf16.msra.mxu0 %v17083_v2  ;;  %12601 = vmatpush1.bf16.msra.mxu1 %v17086_v22  ;;  %v5083_v2 = vmul.f32 0.015625, %v4038_v10  ;;  %v5082_v22 = vmul.f32 0.015625, %v4035_v27  ;;  %v6607_v10 = vunpack.c.l.b16 %v5477_v34  ;;  %v5603_v27 = vpack.c.bf16 %v5347_v6, %v5346_v35  ;;  %vm22302_vm3 = vmmov %vm22299_vm1 }
 0x4fc   : > { %v4077_v58 = vpop.xlane.xlu0 %4076  ;;  %v5097_v37 = vmul.f32 0.015625, %v4080_v49  ;;  %v9341_v19 = vsel %vm6885_vm2, %v9340_v9, %v9336_v40  ;;  %v9281_v49 = vrot.slane %v6845_v38, %v18194_v29  ;;  %v8038_v41 = vsel %vm22299_vm1, %v8037_v63, %v21321_v1  ;;  %vm22300_vm2 = vmmov %vm22293_vm4 }
 0x4fd   : > { %v5096_v13 = vmul.f32 0.015625, %v4077_v58  ;;  %v5471_v60 = vpack.c.bf16 %v5083_v2, %v5082_v22  ;;  %v5597_v25 = vpack.c.bf16 %v5335_v15, %v5334_v42  ;;  %v8106_v16 = vrot.slane %v6607_v10, %v22273_v55  ;;  %vm22305_vm1 = vmmov %vm22303_vm0 }
 0x4fe   : > { %v6859_v20 = vunpack.c.l.b16 %v5603_v27  ;;  %v8102_v18 = vsel %vm22293_vm4, %v8101_v47, %v8097_v61  ;;  %v9346_v59 = vsel %vm22300_vm2, %v9345_v50, %v9341_v19  ;;  %v8043_v3 = vsel %vm22301_vm5, %v8042_v36, %v8038_v41  ;;  %vm22306_vm4 = vmmov %vm22298_vm7 }
 0x4ff   : > { %v4836_v7 = vpop.xlane.xlu1 %4835  ;;  %v5478_v5 = vpack.c.bf16 %v5097_v37, %v5096_v13  ;;  %v6595_v0 = vunpack.c.l.b16 %v5471_v60  ;;  %v9282_v1 = vsel %vm22302_vm3, %v9281_v49, %v21343_v39  ;;  %v9286_v34 = vrot.slane %v6846_v26, %v18197_v32  ;;  %vm22307_vm2 = vmmov %vm22302_vm3 }
 0x500   : > { %v4833_v8 = vpop.xlane.xlu0 %4832  ;;  %v5349_v45 = vmul.f32 0.015625, %v4836_v7  ;;  %v8111_v35 = vrot.slane %v6608_v57, %v22274_v23  ;;  %v6860_v7 = vunpack.c.h.b16 %v5603_v27  ;;  %v8107_v30 = vsel %vm22303_vm0, %v8106_v16, %v8102_v18  ;;  %vm22308_vm3 = vmmov %vm22307_vm2 }
 0x501   : > { %v5348_v17 = vmul.f32 0.015625, %v4833_v8  ;;  %v6847_v8 = vunpack.c.l.b16 %v5597_v25  ;;  %v6609_v46 = vunpack.c.l.b16 %v5478_v5  ;;  %v8047_v22 = vrot.slane %v6595_v0, %v18208_v52 }
 0x502   : > { %v6848_v38 = vunpack.c.h.b16 %v5597_v25  ;;  %v6610_v15 = vunpack.c.h.b16 %v5478_v5  ;;  %v9287_v56 = vsel %vm22304_vm6, %v9286_v34, %v9282_v1  ;;  %v9355_v40 = vrot.slane %v6860_v7, %v22274_v23  ;;  %vm22310_vm6 = vmmov %vm22301_vm5 }
 0x503   : > { %v4044_v62 = vpop.xlane.xlu1 %4043  ;;  %v5604_v2 = vpack.c.bf16 %v5349_v45, %v5348_v17  ;;  %v9291_v10 = vrot.slane %v6847_v8, %v18208_v52  ;;  %v8112_v27 = vsel %vm22298_vm7, %v8111_v35, %v8107_v30  ;;  %v8048_v23 = vsel %vm6927_vm8, %v8047_v22, %v8043_v3 }
 0x504   : > { %v4041_v51 = vpop.xlane.xlu0 %4040  ;;  %v5085_v14 = vmul.f32 0.015625, %v4044_v62  ;;  %v9350_v62 = vrot.slane %v6859_v20, %v22273_v55  ;;  %v8116_v55 = vrot.slane %v6609_v46, %v18194_v29  ;;  %v9296_v49 = vrot.slane %v6848_v38, %v18211_v53 }
 0x505   : > { %v5084_v28 = vmul.f32 0.015625, %v4041_v51  ;;  %v6596_v51 = vunpack.c.h.b16 %v5471_v60  ;;  %v6861_v50 = vunpack.c.l.b16 %v5604_v2  ;;  %v9292_v5 = vsel %vm6927_vm8, %v9291_v10, %v9287_v56 }
 0x506   : > { %v9351_v61 = vsel %vm22305_vm1, %v9350_v62, %v9346_v59  ;;  %v8117_v16 = vsel %vm22307_vm2, %v8116_v55, %v8112_v27  ;;  %v6862_v20 = vunpack.c.h.b16 %v5604_v2  ;;  %v9297_v59 = vsel %vm6934_vm9, %v9296_v49, %v9292_v5 }
 0x507   : > { %v21408_v48 = vpop.xlane.xlu1 %4799  ;;  %v5472_v9 = vpack.c.bf16 %v5085_v14, %v5084_v28  ;;  %v8052_v47 = vrot.slane %v6596_v51, %v18211_v53  ;;  %v9356_v25 = vsel %vm22306_vm4, %v9355_v40, %v9351_v61  ;;  %vm22309_vm0 = vcmask 720512  }
 0x508   : > { %v21412_v33 = vpop.xlane.xlu0 %4796  ;;  %v9365_v35 = vrot.slane %v6862_v20, %v18197_v32  ;;  %vm11955_vm7 = vcmask 785408   ;;  %vm22311_vm1 = vmmov %vm22309_vm0 }
 0x509   : > { %v6597_v60 = vunpack.c.l.b16 %v5472_v9  ;;  %v5336_v19 = vmul.f32 0.015625, %v21412_v33  ;;  %v6598_v33 = vunpack.c.h.b16 %v5472_v9  ;;  %v8053_v18 = vsel %vm6934_vm9, %v8052_v47, %v8048_v23  ;;  %vm22313_vm4 = vmmov %vm22309_vm0 }
 0x50b   : > { %v4086_v54 = vpop.xlane.xlu1 %4085  ;;  %v8057_v0 = vrot.slane %v6597_v60, %v18226_v21  ;;  %v8062_v30 = vrot.slane %v6598_v33, %v18239_v44 }
 0x50c   : > { %v4083_v58 = vpop.xlane.xlu0 %4082  ;;  %v5099_v31 = vmul.f32 0.015625, %v4086_v54  ;;  %v5337_v54 = vmul.f32 0.015625, %v21408_v48  ;;  %v9360_v48 = vrot.slane %v6861_v50, %v18194_v29 }
 0x50d   : > { %v5098_v63 = vmul.f32 0.015625, %v4083_v58  ;;  %v8121_v58 = vrot.slane %v6610_v15, %v18197_v32  ;;  %v8058_v2 = vsel %vm22309_vm0, %v8057_v0, %v8053_v18 }
 0x50e   : > { %v5598_v14 = vpack.c.bf16 %v5337_v54, %v5336_v19  ;;  %v9361_v46 = vsel %vm22308_vm3, %v9360_v48, %v9356_v25  ;;  %v8063_v10 = vsel %vm6948_vm11, %v8062_v30, %v8058_v2 }
 0x50f   : > { %v4842_v43 = vpop.xlane.xlu1 %4841  ;;  %v5479_v36 = vpack.c.bf16 %v5099_v31, %v5098_v63  ;;  %v8122_v3 = vsel %vm22301_vm5, %v8121_v58, %v8117_v16 }
 0x510   : > { %v4839_v6 = vpop.xlane.xlu0 %4838  ;;  %v5351_v42 = vmul.f32 0.015625, %v4842_v43  ;;  %v6849_v22 = vunpack.c.l.b16 %v5598_v14 }
 0x511   : > { %v5350_v37 = vmul.f32 0.015625, %v4839_v6  ;;  %v6611_v28 = vunpack.c.l.b16 %v5479_v36  ;;  %v6612_v62 = vunpack.c.h.b16 %v5479_v36 }
 0x512   : > { %v9301_v47 = vrot.slane %v6849_v22, %v18226_v21 }
 0x513   : > { %v4050_v39 = vpop.xlane.xlu1 %4049  ;;  %v5605_v41 = vpack.c.bf16 %v5351_v42, %v5350_v37  ;;  %v8126_v9 = vrot.slane %v6611_v28, %v18208_v52  ;;  %v9366_v37 = vsel %vm22310_vm6, %v9365_v35, %v9361_v46  ;;  %v8131_v55 = vrot.slane %v6612_v62, %v18211_v53 }
 0x514   : > { %v4047_v13 = vpop.xlane.xlu0 %4046  ;;  %v5087_v45 = vmul.f32 0.015625, %v4050_v39  ;;  %v6850_v39 = vunpack.c.h.b16 %v5598_v14 }
 0x515   : > { %v5086_v17 = vmul.f32 0.015625, %v4047_v13  ;;  %v6863_v1 = vunpack.c.l.b16 %v5605_v41  ;;  %v6864_v38 = vunpack.c.h.b16 %v5605_v41  ;;  %v8127_v50 = vsel %vm6927_vm8, %v8126_v9, %v8122_v3 }
 0x516   : > { %v9306_v19 = vrot.slane %v6850_v39, %v18239_v44  ;;  %v8132_v5 = vsel %vm6934_vm9, %v8131_v55, %v8127_v50 }
 0x517   : > { %v4806_v26 = vpop.xlane.xlu1 %4805  ;;  %v5473_v51 = vpack.c.bf16 %v5087_v45, %v5086_v17  ;;  %v9370_v32 = vrot.slane %v6863_v1, %v18208_v52 }
 0x518   : > { %v4803_v57 = vpop.xlane.xlu0 %4802  ;;  %v5339_v29 = vmul.f32 0.015625, %v4806_v26  ;;  %v9375_v26 = vrot.slane %v6864_v38, %v18211_v53 }
 0x519   : > { %v5338_v7 = vmul.f32 0.015625, %v4803_v57  ;;  %v6599_v27 = vunpack.c.l.b16 %v5473_v51  ;;  %v9371_v36 = vsel %vm6927_vm8, %v9370_v32, %v9366_v37  ;;  %v6600_v16 = vunpack.c.h.b16 %v5473_v51  ;;  %vm22312_vm8 = vmmov %vm22309_vm0 }
 0x51a   : > { %v9302_v0 = vsel %vm22312_vm8, %v9301_v47, %v9297_v59  ;;  %v9376_v14 = vsel %vm6934_vm9, %v9375_v26, %v9371_v36  ;;  %vm14150_vm9 = vcmask (!%p14768_p11), 1041408  }
 0x51b   : > { %v4092_v43 = vpop.xlane.xlu1 %4091  ;;  %v5599_v13 = vpack.c.bf16 %v5339_v29, %v5338_v7  ;;  %v8067_v20 = vrot.slane %v6599_v27, %v22261_v24  ;;  %v8072_v29 = vrot.slane %v6600_v16, %v22262_v4  ;;  %v17094_v16 = vld [vmem:[%s22162_s2] ss:$24 sps:$4 sm:$0xff] (!%p14768_p11)  }
 0x51c   : > { %v5101_v34 = vmul.f32 0.015625, %v4092_v43  ;;  %v4089_v6 = vpop.xlane.xlu0 %4088 }
 0x51d   : > { %v5100_v8 = vmul.f32 0.015625, %v4089_v6  ;;  %v6851_v58 = vunpack.c.l.b16 %v5599_v13  ;;  %v6852_v28 = vunpack.c.h.b16 %v5599_v13  ;;  %v8068_v59 = vsel %vm6955_vm12, %v8067_v20, %v8063_v10  ;;  %v17095_v20 = vld [vmem:[%s22162_s2 + $0x300] ss:$24 sps:$4 sm:$0xff] (!%p14768_p11)  }
 0x51f   : > { %v5480_v31 = vpack.c.bf16 %v5101_v34, %v5100_v8  ;;  %v4848_v63 = vpop.xlane.xlu1 %4847  ;;  %v9311_v1 = vrot.slane %v6851_v58, %v22261_v24  ;;  %v9307_v24 = vsel %vm6948_vm11, %v9306_v19, %v9302_v0  ;;  %v9316_v62 = vrot.slane %v6852_v28, %v22262_v4  ;;  %v5354_v58 = vld [vmem:[#allocation2] sm:$0xff]  ;;  %v17108_v28 = vld [vmem:[%s22162_s2 + $0x94] ss:$24 sps:$4 sm:$0xff] (!%p14768_p11)  }
 0x520   : > { %v5353_v15 = vmul.f32 0.015625, %v4848_v63  ;;  %v4845_v42 = vpop.xlane.xlu0 %4844  ;;  %v17106_v0 = vld [vmem:[%s22162_s2 + $0x60] ss:$24 sps:$4 sm:$0xff] (!%p14768_p11)  }
 0x521   : > { %v6613_v56 = vunpack.c.l.b16 %v5480_v31  ;;  %v5352_v40 = vmul.f32 0.015625, %v4845_v42  ;;  %v6614_v61 = vunpack.c.h.b16 %v5480_v31  ;;  %v9312_v2 = vsel %vm6955_vm12, %v9311_v1, %v9307_v24  ;;  %v17113_v1 = vld [vmem:[%s22162_s2 + $0x390] ss:$24 sps:$4 sm:$0xff] (!%p14768_p11)   ;;  %v17131_v24 = vld [vmem:[%s22162_s2 + $0x420] ss:$24 sps:$4 sm:$0xff] (!%p14768_p11)  }
 0x522   : > { %v8073_v31 = vsel %vm6962_vm13, %v8072_v29, %v8068_v59  ;;  %v9317_v4 = vsel %vm6962_vm13, %v9316_v62, %v9312_v2  ;;  %v17119_v29 = vld [vmem:[%s22162_s2 + $0x3c0] ss:$24 sps:$4 sm:$0xff] (!%p14768_p11)   ;;  %v17125_v59 = vld [vmem:[%s22162_s2 + $0x3f0] ss:$24 sps:$4 sm:$0xff] (!%p14768_p11)   ;;  %v17132_v62 = vld [vmem:[%s22162_s2 + $0x154] ss:$24 sps:$4 sm:$0xff] (!%p14768_p11)  }
 0x523   : > { %v8136_v60 = vrot.slane %v6613_v56, %v18226_v21  ;;  %v5606_v52 = vpack.c.bf16 %v5353_v15, %v5352_v40  ;;  %v4056_v54 = vpop.xlane.xlu1 %4055  ;;  %v8141_v48 = vrot.slane %v6614_v61, %v18239_v44  ;;  %v17450_v40 = vmov 1983009808   ;;  %v22314_v61 = vld [vmem:[#allocation7_spill] sm:$0xff]  ;;  %v17136_v2 = vld [vmem:[%s22162_s2 + $0x150] ss:$24 sps:$4 sm:$0xff] (!%p14768_p11)  }
 0x524   : > { %v5089_v23 = vmul.f32 0.015625, %v4056_v54  ;;  %v4053_v49 = vpop.xlane.xlu0 %4052  ;;  %v12622_v10 = vunpack.c.l.s4 %v17450_v40  ;;  %v17156_v40 = vld [vmem:[%s22162_s2 + $0x214] ss:$24 sps:$4 sm:$0xff] (!%p14768_p11)  }
 0x525   : > { %v6865_v41 = vunpack.c.l.b16 %v5606_v52  ;;  %v6866_v57 = vunpack.c.h.b16 %v5606_v52  ;;  %v5088_v25 = vmul.f32 0.015625, %v4053_v49  ;;  %v8137_v33 = vsel %vm22311_vm1, %v8136_v60, %v8132_v5  ;;  %v17092_v5 = vld [vmem:[%s22162_s2 + $0x304] ss:$24 sps:$4 sm:$0xff] (!%p14768_p11)  }
 0x526   : > { %v12623_v55 = vunpack.c.0.s8 %v12622_v10  ;;  %13863 = vmatprep.subr.bf16.mxu1 (!%p14768_p11), %v17092_v5  ;;  %v17158_v10 = vld [vmem:[%s22162_s2 + $0x514] ss:$24 sps:$4 sm:$0xff] (!%p14768_p11)   ;;  %v17174_v5 = vld [vmem:[%s22162_s2 + $0x2a4] ss:$24 sps:$4 sm:$0xff] (!%p14768_p11)  }
 0x527   : > { %v9380_v45 = vrot.slane %v6865_v41, %v18226_v21  ;;  %v9385_v17 = vrot.slane %v6866_v57, %v18239_v44  ;;  %v5474_v53 = vpack.c.bf16 %v5089_v23, %v5088_v25  ;;  %v4812_v18 = vpop.xlane.xlu1 %4811  ;;  %v8142_v44 = vsel %vm6948_vm11, %v8141_v48, %v8137_v33  ;;  %v17090_v25 = vld [vmem:[%s22162_s2 + $0x4] ss:$24 sps:$4 sm:$0xff] (!%p14768_p11)   ;;  %v17096_v48 = vld [vmem:[%s22162_s2 + $0x34] ss:$24 sps:$4 sm:$0xff] (!%p14768_p11)  }
 0x528   : > { %v5341_v43 = vmul.f32 0.015625, %v4812_v18  ;;  %v4809_v3 = vpop.xlane.xlu0 %4808  ;;  %13822 = vmatprep.subr.bf16.mxu0 (!%p14768_p11), %v17090_v25  ;;  %v17098_v33 = vld [vmem:[%s22162_s2 + $0x334] ss:$24 sps:$4 sm:$0xff] (!%p14768_p11)   ;;  %v17104_v18 = vld [vmem:[%s22162_s2 + $0x364] ss:$24 sps:$4 sm:$0xff] (!%p14768_p11)  }
 0x529   : > { %v9381_v34 = vsel %vm22313_vm4, %v9380_v45, %v9376_v14  ;;  %v6601_v6 = vunpack.c.l.b16 %v5474_v53  ;;  %v5340_v35 = vmul.f32 0.015625, %v4809_v3  ;;  %v6602_v21 = vunpack.c.h.b16 %v5474_v53  ;;  %v17100_v45 = vld [vmem:[%s22162_s2 + $0x30] ss:$24 sps:$4 sm:$0xff] (!%p14768_p11)   ;;  %v17102_v53 = vld [vmem:[%s22162_s2 + $0x64] ss:$24 sps:$4 sm:$0xff] (!%p14768_p11)  }
 0x52a   : > { %v9386_v7 = vsel %vm6948_vm11, %v9385_v17, %v9381_v34  ;;  %v17101_v17 = vld [vmem:[%s22162_s2 + $0x330] ss:$24 sps:$4 sm:$0xff] (!%p14768_p11)   ;;  %v17107_v14 = vld [vmem:[%s22162_s2 + $0x360] ss:$24 sps:$4 sm:$0xff] (!%p14768_p11)   ;;  %v17114_v34 = vld [vmem:[%s22162_s2 + $0xc4] ss:$24 sps:$4 sm:$0xff] (!%p14768_p11)  }
 0x52b   : > { %v8077_v8 = vrot.slane %v6601_v6, %v22263_v11  ;;  %v5600_v46 = vpack.c.bf16 %v5341_v43, %v5340_v35  ;;  %v9403_v30 = vsel %vm9387_vm10, %v9386_v7, %v8142_v44  ;;  %v8082_v63 = vrot.slane %v6602_v21, %v22264_v12  ;;  %v17110_v43 = vld [vmem:[%s22162_s2 + $0x394] ss:$24 sps:$4 sm:$0xff] (!%p14768_p11)   ;;  %v17112_v3 = vld [vmem:[%s22162_s2 + $0x90] ss:$24 sps:$4 sm:$0xff] (!%p14768_p11)   ;;  %v17116_v6 = vld [vmem:[%s22162_s2 + $0x3c4] ss:$24 sps:$4 sm:$0xff] (!%p14768_p11)  }
 0x52c   : > { %v9419_v51 = vpack.c.b16 %v9403_v30, %v9403_v30  ;;  %v17118_v35 = vld [vmem:[%s22162_s2 + $0xc0] ss:$24 sps:$4 sm:$0xff] (!%p14768_p11)   ;;  %v17120_v21 = vld [vmem:[%s22162_s2 + $0xf4] ss:$24 sps:$4 sm:$0xff] (!%p14768_p11)   ;;  %v17124_v7 = vld [vmem:[%s22162_s2 + $0xf0] ss:$24 sps:$4 sm:$0xff] (!%p14768_p11)  }
 0x52d   : > { %v6853_v22 = vunpack.c.l.b16 %v5600_v46  ;;  %v6854_v9 = vunpack.c.h.b16 %v5600_v46  ;;  %v8078_v39 = vsel %vm6969_vm14, %v8077_v8, %v8073_v31  ;;  %v17122_v44 = vld [vmem:[%s22162_s2 + $0x3f4] ss:$24 sps:$4 sm:$0xff] (!%p14768_p11)   ;;  %v17126_v8 = vld [vmem:[%s22162_s2 + $0x124] ss:$24 sps:$4 sm:$0xff] (!%p14768_p11)   ;;  %v17130_v30 = vld [vmem:[%s22162_s2 + $0x120] ss:$24 sps:$4 sm:$0xff] (!%p14768_p11)  }
 0x52e   : > { %14766 = vmatprep.mubr.msk.bf16.mxu0 %vm11955_vm7, %v9419_v51  ;;  %14767 = vmatprep.mubr.msk.bf16.mxu1 %vm11955_vm7, %v9419_v51  ;;  %v8083_v42 = vsel %vm6976_vm15, %v8082_v63, %v8078_v39  ;;  %v17128_v46 = vld [vmem:[%s22162_s2 + $0x424] ss:$24 sps:$4 sm:$0xff] (!%p14768_p11)   ;;  %v17134_v51 = vld [vmem:[%s22162_s2 + $0x454] ss:$24 sps:$4 sm:$0xff] (!%p14768_p11)   ;;  %v17142_v63 = vld [vmem:[%s22162_s2 + $0x180] ss:$24 sps:$4 sm:$0xff] (!%p14768_p11)  }
 0x52f   : > { %v9321_v38 = vrot.slane %v6853_v22, %v22263_v11  ;;  %v9326_v32 = vrot.slane %v6854_v9, %v22264_v12  ;;  %v21502_v12 = vsub.s32 %v12623_v55, %v22314_v61  ;;  %v17137_v22 = vld [vmem:[%s22162_s2 + $0x450] ss:$24 sps:$4 sm:$0xff] (!%p14768_p11)   ;;  %v17138_v9 = vld [vmem:[%s22162_s2 + $0x184] ss:$24 sps:$4 sm:$0xff] (!%p14768_p11)   ;;  %v17143_v39 = vld [vmem:[%s22162_s2 + $0x480] ss:$24 sps:$4 sm:$0xff] (!%p14768_p11)  }
 0x530   : > { %v17140_v31 = vld [vmem:[%s22162_s2 + $0x484] ss:$24 sps:$4 sm:$0xff] (!%p14768_p11)   ;;  %v17173_v25 = vld [vmem:[%s22162_s2 + $0x570] ss:$24 sps:$4 sm:$0xff] (!%p14768_p11)  }
 0x531   : > { %v9322_v15 = vsel %vm6969_vm14, %v9321_v38, %v9317_v4  ;;  %v17144_v38 = vld [vmem:[%s22162_s2 + $0x1b4] ss:$24 sps:$4 sm:$0xff] (!%p14768_p11)   ;;  %v17148_v4 = vld [vmem:[%s22162_s2 + $0x1b0] ss:$24 sps:$4 sm:$0xff] (!%p14768_p11)  }
 0x532   : > { %v9327_v37 = vsel %vm6976_vm15, %v9326_v32, %v9322_v15  ;;  %v17146_v32 = vld [vmem:[%s22162_s2 + $0x4b4] ss:$24 sps:$4 sm:$0xff] (!%p14768_p11)   ;;  %v17149_v15 = vld [vmem:[%s22162_s2 + $0x4b0] ss:$24 sps:$4 sm:$0xff] (!%p14768_p11)  }
 0x533   : > { %v9402_v13 = vsel %vm9387_vm10, %v9327_v37, %v8083_v42  ;;  %v17150_v42 = vld [vmem:[%s22162_s2 + $0x1e4] ss:$24 sps:$4 sm:$0xff] (!%p14768_p11)   ;;  %vm14151_vm10 = vcmask (!%p14768_p11), 904194  }
 0x534   : > { %v9418_v56 = vpack.c.b16 %v9402_v13, %v9402_v13  ;;  %v17152_v37 = vld [vmem:[%s22162_s2 + $0x4e4] ss:$24 sps:$4 sm:$0xff] (!%p14768_p11)   ;;  %v17154_v13 = vld [vmem:[%s22162_s2 + $0x1e0] ss:$24 sps:$4 sm:$0xff] (!%p14768_p11)   ;;  %vm14152_vm11 = vmor (!%p14768_p11), %vm14151_vm10, %vm14150_vm9 }
 0x536   : > { %12279 = vmatmul.mubr.bf16.vlgmr.msra.gmra.mrb[0].mxu0 %v9418_v56  ;;  %12607 = vmatmul.mubr.bf16.vlgmr.msra.gmra.mrb[0].mxu1 %v9418_v56  ;;  %v17155_v56 = vld [vmem:[%s22162_s2 + $0x4e0] ss:$24 sps:$4 sm:$0xff] (!%p14768_p11)  }
 0x537   : > { %13823 = vmatpush1.bf16.msra.mxu0 (!%p14768_p11), %v17094_v16  ;;  %13864 = vmatpush1.bf16.msra.mxu1 (!%p14768_p11), %v17095_v20  ;;  %v17176_v16 = vld [vmem:[%s22162_s2 + $0x5a4] ss:$24 sps:$4 sm:$0xff] (!%p14768_p11)   ;;  %v17178_v20 = vld [vmem:[%s22162_s2 + $0x2a0] ss:$24 sps:$4 sm:$0xff] (!%p14768_p11)  }
 0x538   : > { %13824 = vmatprep.subr.bf16.mxu0 (!%p14768_p11), %v17096_v48  ;;  %13865 = vmatprep.subr.bf16.mxu1 (!%p14768_p11), %v17098_v33  ;;  %v17179_v48 = vld [vmem:[%s22162_s2 + $0x5a0] ss:$24 sps:$4 sm:$0xff] (!%p14768_p11)   ;;  %v17180_v33 = vld [vmem:[%s22162_s2 + $0x2d4] ss:$24 sps:$4 sm:$0xff] (!%p14768_p11)  }
 0x53b   : > { %13825 = vmatpush1.bf16.msra.mxu0 (!%p14768_p11), %v17100_v45  ;;  %13866 = vmatpush1.bf16.msra.mxu1 (!%p14768_p11), %v17101_v17  ;;  %v17182_v45 = vld [vmem:[%s22162_s2 + $0x5d4] ss:$24 sps:$4 sm:$0xff] (!%p14768_p11)   ;;  %v17184_v17 = vld [vmem:[%s22162_s2 + $0x2d0] ss:$24 sps:$4 sm:$0xff] (!%p14768_p11)  }
 0x53c   : > { %13826 = vmatprep.subr.bf16.mxu0 (!%p14768_p11), %v17102_v53  ;;  %13867 = vmatprep.subr.bf16.mxu1 (!%p14768_p11), %v17104_v18  ;;  %v17185_v53 = vld [vmem:[%s22162_s2 + $0x5d0] ss:$24 sps:$4 sm:$0xff] (!%p14768_p11)   ;;  %v17189_v18 = vld [vmem:[%s22162_s2 + $0xc] ss:$24 sps:$4 sm:$0xff] (!%p14768_p11)  }
 0x53f   : > { %13827 = vmatpush1.bf16.msra.mxu0 (!%p14768_p11), %v17106_v0  ;;  %13868 = vmatpush1.bf16.msra.mxu1 (!%p14768_p11), %v17107_v14  ;;  %v17192_v0 = vld [vmem:[%s22162_s2 + $0x30c] ss:$24 sps:$4 sm:$0xff] (!%p14768_p11)  }
 0x540   : > { %13828 = vmatprep.subr.bf16.mxu0 (!%p14768_p11), %v17108_v28  ;;  %13869 = vmatprep.subr.bf16.mxu1 (!%p14768_p11), %v17110_v43  ;;  %v17187_v43 = vld [vmem:[%s22162_s2 + $0x8] ss:$24 sps:$4 sm:$0xff] (!%p14768_p11)  }
 0x543   : > { %13829 = vmatpush1.bf16.msra.mxu0 (!%p14768_p11), %v17112_v3  ;;  %13870 = vmatpush1.bf16.msra.mxu1 (!%p14768_p11), %v17113_v1  ;;  %v17190_v3 = vld [vmem:[%s22162_s2 + $0x308] ss:$24 sps:$4 sm:$0xff] (!%p14768_p11)   ;;  %v17195_v1 = vld [vmem:[%s22162_s2 + $0x3c] ss:$24 sps:$4 sm:$0xff] (!%p14768_p11)  }
 0x544   : > { %13830 = vmatprep.subr.bf16.mxu0 (!%p14768_p11), %v17114_v34  ;;  %13871 = vmatprep.subr.bf16.mxu1 (!%p14768_p11), %v17116_v6  ;;  %v17198_v34 = vld [vmem:[%s22162_s2 + $0x33c] ss:$24 sps:$4 sm:$0xff] (!%p14768_p11)   ;;  %v17193_v6 = vld [vmem:[%s22162_s2 + $0x38] ss:$24 sps:$4 sm:$0xff] (!%p14768_p11)  }
 0x547   : > { %13831 = vmatpush1.bf16.msra.mxu0 (!%p14768_p11), %v17118_v35  ;;  %13872 = vmatpush1.bf16.msra.mxu1 (!%p14768_p11), %v17119_v29  ;;  %v17196_v35 = vld [vmem:[%s22162_s2 + $0x338] ss:$24 sps:$4 sm:$0xff] (!%p14768_p11)   ;;  %v17201_v29 = vld [vmem:[%s22162_s2 + $0x6c] ss:$24 sps:$4 sm:$0xff] (!%p14768_p11)  }
 0x548   : > { %13832 = vmatprep.subr.bf16.mxu0 (!%p14768_p11), %v17120_v21  ;;  %13873 = vmatprep.subr.bf16.mxu1 (!%p14768_p11), %v17122_v44  ;;  %v17204_v21 = vld [vmem:[%s22162_s2 + $0x36c] ss:$24 sps:$4 sm:$0xff] (!%p14768_p11)   ;;  %v17199_v44 = vld [vmem:[%s22162_s2 + $0x68] ss:$24 sps:$4 sm:$0xff] (!%p14768_p11)  }
 0x54b   : > { %13833 = vmatpush1.bf16.msra.mxu0 (!%p14768_p11), %v17124_v7  ;;  %13874 = vmatpush1.bf16.msra.mxu1 (!%p14768_p11), %v17125_v59  ;;  %v17202_v7 = vld [vmem:[%s22162_s2 + $0x368] ss:$24 sps:$4 sm:$0xff] (!%p14768_p11)   ;;  %v17207_v59 = vld [vmem:[%s22162_s2 + $0x9c] ss:$24 sps:$4 sm:$0xff] (!%p14768_p11)  }
 0x54c   : > { %13834 = vmatprep.subr.bf16.mxu0 (!%p14768_p11), %v17126_v8  ;;  %13875 = vmatprep.subr.bf16.mxu1 (!%p14768_p11), %v17128_v46  ;;  %v17210_v8 = vld [vmem:[%s22162_s2 + $0x39c] ss:$24 sps:$4 sm:$0xff] (!%p14768_p11)   ;;  %v17205_v46 = vld [vmem:[%s22162_s2 + $0x98] ss:$24 sps:$4 sm:$0xff] (!%p14768_p11)  }
 0x54f   : > { %13835 = vmatpush1.bf16.msra.mxu0 (!%p14768_p11), %v17130_v30  ;;  %13876 = vmatpush1.bf16.msra.mxu1 (!%p14768_p11), %v17131_v24  ;;  %v17208_v30 = vld [vmem:[%s22162_s2 + $0x398] ss:$24 sps:$4 sm:$0xff] (!%p14768_p11)   ;;  %v17213_v24 = vld [vmem:[%s22162_s2 + $0xcc] ss:$24 sps:$4 sm:$0xff] (!%p14768_p11)  }
 0x550   : > { %13836 = vmatprep.subr.bf16.mxu0 (!%p14768_p11), %v17132_v62  ;;  %13877 = vmatprep.subr.bf16.mxu1 (!%p14768_p11), %v17134_v51  ;;  %v17216_v62 = vld [vmem:[%s22162_s2 + $0x3cc] ss:$24 sps:$4 sm:$0xff] (!%p14768_p11)   ;;  %v17211_v51 = vld [vmem:[%s22162_s2 + $0xc8] ss:$24 sps:$4 sm:$0xff] (!%p14768_p11)  }
 0x553   : > { %13837 = vmatpush1.bf16.msra.mxu0 (!%p14768_p11), %v17136_v2  ;;  %13878 = vmatpush1.bf16.msra.mxu1 (!%p14768_p11), %v17137_v22  ;;  %v17214_v2 = vld [vmem:[%s22162_s2 + $0x3c8] ss:$24 sps:$4 sm:$0xff] (!%p14768_p11)   ;;  %v17219_v22 = vld [vmem:[%s22162_s2 + $0xfc] ss:$24 sps:$4 sm:$0xff] (!%p14768_p11)  }
 0x554   : > { %13838 = vmatprep.subr.bf16.mxu0 (!%p14768_p11), %v17138_v9  ;;  %13879 = vmatprep.subr.bf16.mxu1 (!%p14768_p11), %v17140_v31  ;;  %v17222_v9 = vld [vmem:[%s22162_s2 + $0x3fc] ss:$24 sps:$4 sm:$0xff] (!%p14768_p11)   ;;  %v17217_v31 = vld [vmem:[%s22162_s2 + $0xf8] ss:$24 sps:$4 sm:$0xff] (!%p14768_p11)  }
 0x557   : > { %13839 = vmatpush1.bf16.msra.mxu0 (!%p14768_p11), %v17142_v63  ;;  %13880 = vmatpush1.bf16.msra.mxu1 (!%p14768_p11), %v17143_v39  ;;  %v17220_v63 = vld [vmem:[%s22162_s2 + $0x3f8] ss:$24 sps:$4 sm:$0xff] (!%p14768_p11)   ;;  %v17225_v39 = vld [vmem:[%s22162_s2 + $0x12c] ss:$24 sps:$4 sm:$0xff] (!%p14768_p11)  }
 0x558   : > { %13840 = vmatprep.subr.bf16.mxu0 (!%p14768_p11), %v17144_v38  ;;  %13881 = vmatprep.subr.bf16.mxu1 (!%p14768_p11), %v17146_v32  ;;  %v17228_v38 = vld [vmem:[%s22162_s2 + $0x42c] ss:$24 sps:$4 sm:$0xff] (!%p14768_p11)   ;;  %v17223_v32 = vld [vmem:[%s22162_s2 + $0x128] ss:$24 sps:$4 sm:$0xff] (!%p14768_p11)  }
 0x55b   : > { %13841 = vmatpush1.bf16.msra.mxu0 (!%p14768_p11), %v17148_v4  ;;  %13882 = vmatpush1.bf16.msra.mxu1 (!%p14768_p11), %v17149_v15  ;;  %v17226_v4 = vld [vmem:[%s22162_s2 + $0x428] ss:$24 sps:$4 sm:$0xff] (!%p14768_p11)   ;;  %v17231_v15 = vld [vmem:[%s22162_s2 + $0x15c] ss:$24 sps:$4 sm:$0xff] (!%p14768_p11)  }
 0x55c   : > { %13842 = vmatprep.subr.bf16.mxu0 (!%p14768_p11), %v17150_v42  ;;  %13883 = vmatprep.subr.bf16.mxu1 (!%p14768_p11), %v17152_v37  ;;  %v17234_v42 = vld [vmem:[%s22162_s2 + $0x45c] ss:$24 sps:$4 sm:$0xff] (!%p14768_p11)   ;;  %v17229_v37 = vld [vmem:[%s22162_s2 + $0x158] ss:$24 sps:$4 sm:$0xff] (!%p14768_p11)  }
 0x55f   : > { %13843 = vmatpush1.bf16.msra.mxu0 (!%p14768_p11), %v17154_v13  ;;  %13884 = vmatpush1.bf16.msra.mxu1 (!%p14768_p11), %v17155_v56  ;;  %v17232_v13 = vld [vmem:[%s22162_s2 + $0x458] ss:$24 sps:$4 sm:$0xff] (!%p14768_p11)   ;;  %v17237_v56 = vld [vmem:[%s22162_s2 + $0x18c] ss:$24 sps:$4 sm:$0xff] (!%p14768_p11)  }
 0x560   : > { %13844 = vmatprep.subr.bf16.mxu0 (!%p14768_p11), %v17156_v40  ;;  %13885 = vmatprep.subr.bf16.mxu1 (!%p14768_p11), %v17158_v10  ;;  %v17240_v40 = vld [vmem:[%s22162_s2 + $0x48c] ss:$24 sps:$4 sm:$0xff] (!%p14768_p11)   ;;  %v17235_v10 = vld [vmem:[%s22162_s2 + $0x188] ss:$24 sps:$4 sm:$0xff] (!%p14768_p11)  }
 0x609   : > { %v12280_v27 = vpop.f32.mrb[0].mxu0  ;;  %v12608_v11 = vpop.f32.mrb[0].mxu1 }
 0x60a   : > { %v12282_v47 = vpop.f32.mrb[1].mxu0  ;;  %v12610_v50 = vpop.f32.mrb[1].mxu1 }
 0x60b   : > { %v12619_v60 = vcombine.low %v12280_v27, %v12282_v47  ;;  %v12620_v52 = vcombine.low %v12608_v11, %v12610_v50  ;;  %v12284_v54 = vpop.f32.mrb[2].mxu0  ;;  %v12612_v19 = vpop.f32.mrb[2].mxu1  ;;  %v17160_v27 = vld [vmem:[%s22162_s2 + $0x210] ss:$24 sps:$4 sm:$0xff] (!%p14768_p11)   ;;  %v17162_v50 = vld [vmem:[%s22162_s2 + $0x244] ss:$24 sps:$4 sm:$0xff] (!%p14768_p11)  }
 0x60c   : > { %v12285_v36 = vpop.f32.mrb[3].mxu0  ;;  %v12613_v26 = vpop.f32.mrb[3].mxu1  ;;  %v17161_v47 = vld [vmem:[%s22162_s2 + $0x510] ss:$24 sps:$4 sm:$0xff] (!%p14768_p11)   ;;  %v17166_v19 = vld [vmem:[%s22162_s2 + $0x240] ss:$24 sps:$4 sm:$0xff] (!%p14768_p11)   ;;  %13845 = vmatpush1.bf16.msra.mxu0 (!%p14768_p11), %v17160_v27 }
 0x60d   : > { %v12627_v23 = vrot.slane %v12619_v60, %v21502_v12  ;;  %v12634_v49 = vrot.slane %v12620_v52, %v21502_v12  ;;  %12642 = sbr.rel (%p14768_p11) target bundleno = 1922 (0x782), region = 85  ;;  %v17164_v60 = vld [vmem:[%s22162_s2 + $0x544] ss:$24 sps:$4 sm:$0xff] (!%p14768_p11)   ;;  %13886 = vmatpush1.bf16.msra.mxu1 (!%p14768_p11), %v17161_v47  ;;  %13846 = vmatprep.subr.bf16.mxu0 (!%p14768_p11), %v17162_v50  ;;  %v17244_v47 = vld [vmem:[%s22162_s2 + $0x4b8] ss:$24 sps:$4 sm:$0xff] (!%p14768_p11)  }
 0x60e   : > { %13887 = vmatprep.subr.bf16.mxu1 (!%p14768_p11), %v17164_v60  ;;  %v17243_v27 = vld [vmem:[%s22162_s2 + $0x1bc] ss:$24 sps:$4 sm:$0xff] (!%p14768_p11)   ;;  %v17249_v50 = vld [vmem:[%s22162_s2 + $0x1ec] ss:$24 sps:$4 sm:$0xff] (!%p14768_p11)  }
 0x60f   : > { %v12635_v41 = vcombine.low %v12627_v23, %v12634_v49  ;;  %v17167_v23 = vld [vmem:[%s22162_s2 + $0x540] ss:$24 sps:$4 sm:$0xff] (!%p14768_p11)   ;;  %v17168_v49 = vld [vmem:[%s22162_s2 + $0x274] ss:$24 sps:$4 sm:$0xff] (!%p14768_p11)  }
 0x610   : > { %13847 = vmatpush1.bf16.msra.mxu0 (!%p14768_p11), %v17166_v19  ;;  %v17252_v60 = vld [vmem:[%s22162_s2 + $0x4ec] ss:$24 sps:$4 sm:$0xff] (!%p14768_p11)   ;;  %v17255_v19 = vld [vmem:[%s22162_s2 + $0x21c] ss:$24 sps:$4 sm:$0xff] (!%p14768_p11)  }
 0x611   : > { %v12637_v57 = vadd.f32 %v12635_v41, %v5354_v58  ;;  %v17170_v58 = vld [vmem:[%s22162_s2 + $0x574] ss:$24 sps:$4 sm:$0xff] (!%p14768_p11)   ;;  %13888 = vmatpush1.bf16.msra.mxu1 (!%p14768_p11), %v17167_v23  ;;  %13848 = vmatprep.subr.bf16.mxu0 (!%p14768_p11), %v17168_v49  ;;  %v17253_v23 = vld [vmem:[%s22162_s2 + $0x218] ss:$24 sps:$4 sm:$0xff] (!%p14768_p11)  }
 0x612   : > { %13889 = vmatprep.subr.bf16.mxu1 (!%p14768_p11), %v17170_v58  ;;  %v17256_v49 = vld [vmem:[%s22162_s2 + $0x518] ss:$24 sps:$4 sm:$0xff] (!%p14768_p11)   ;;  %v17261_v58 = vld [vmem:[%s22162_s2 + $0x24c] ss:$24 sps:$4 sm:$0xff] (!%p14768_p11)  }
 0x613   : > { %12638 = vst [vmem:[#allocation2] sm:$0xff] %v12637_v57  ;;  %v17172_v57 = vld [vmem:[%s22162_s2 + $0x270] ss:$24 sps:$4 sm:$0xff] (!%p14768_p11)  }
 0x614   : > { %13849 = vmatpush1.bf16.msra.mxu0 %v17172_v57  ;;  %v17264_v57 = vld [vmem:[%s22162_s2 + $0x54c] ss:$24 sps:$4 sm:$0xff]  }
 0x615   : > { %13890 = vmatpush1.bf16.msra.mxu1 %v17173_v25  ;;  %13850 = vmatprep.subr.bf16.mxu0 %v17174_v5  ;;  %v17259_v25 = vld [vmem:[%s22162_s2 + $0x248] ss:$24 sps:$4 sm:$0xff]  }
 0x616   : > { %13891 = vmatprep.subr.bf16.mxu1 %v17176_v16  ;;  %v17262_v5 = vld [vmem:[%s22162_s2 + $0x548] ss:$24 sps:$4 sm:$0xff]   ;;  %v17267_v16 = vld [vmem:[%s22162_s2 + $0x27c] ss:$24 sps:$4 sm:$0xff]  }
 0x618   : > { %13851 = vmatpush1.bf16.msra.mxu0 %v17178_v20  ;;  %v17270_v20 = vld [vmem:[%s22162_s2 + $0x57c] ss:$24 sps:$4 sm:$0xff]  }
 0x619   : > { %13892 = vmatpush1.bf16.msra.mxu1 %v17179_v48  ;;  %13852 = vmatprep.subr.bf16.mxu0 %v17180_v33  ;;  %v17265_v48 = vld [vmem:[%s22162_s2 + $0x278] ss:$24 sps:$4 sm:$0xff]  }
 0x61a   : > { %v12643_v55 = vld [vmem:[#allocation2] sm:$0xff]  ;;  %13893 = vmatprep.subr.bf16.mxu1 %v17182_v45  ;;  %v17268_v33 = vld [vmem:[%s22162_s2 + $0x578] ss:$24 sps:$4 sm:$0xff]  }
 0x61b   : > { %v12652_v11 = vrot.slane %v12643_v55, %v21502_v12  ;;  %v12645_v61 = vcombine.high %v12643_v55, %v12643_v55  ;;  %v17238_v55 = vld [vmem:[%s22162_s2 + $0x488] ss:$24 sps:$4 sm:$0xff]   ;;  %v17273_v45 = vld [vmem:[%s22162_s2 + $0x2ac] ss:$24 sps:$4 sm:$0xff]  }
 0x61c   : > { %13853 = vmatpush1.bf16.msra.mxu0 %v17184_v17  ;;  %v17276_v17 = vld [vmem:[%s22162_s2 + $0x5ac] ss:$24 sps:$4 sm:$0xff]  }
 0x61d   : > { %v12660_v52 = vcombine.high %v12652_v11, %v12652_v11  ;;  %v12659_v54 = vrot.slane %v12645_v61, %v21502_v12  ;;  %v21713_v14 = vpack.c.bf16 %v12652_v11, %v12652_v11  ;;  %13894 = vmatpush1.bf16.msra.mxu1 %v17185_v53  ;;  %13904 = vmatprep.subr.bf16.mxu0 %v17189_v18  ;;  %v17246_v11 = vld [vmem:[%s22162_s2 + $0x4bc] ss:$24 sps:$4 sm:$0xff]   ;;  %v17241_v61 = vld [vmem:[%s22162_s2 + $0x1b8] ss:$24 sps:$4 sm:$0xff]   ;;  %v17271_v53 = vld [vmem:[%s22162_s2 + $0x2a8] ss:$24 sps:$4 sm:$0xff]  }
 0x61e   : > { %13945 = vmatprep.subr.bf16.mxu1 %v17192_v0  ;;  %v17274_v18 = vld [vmem:[%s22162_s2 + $0x5a8] ss:$24 sps:$4 sm:$0xff]   ;;  %v17279_v0 = vld [vmem:[%s22162_s2 + $0x2dc] ss:$24 sps:$4 sm:$0xff]  }
 0x61f   : > { %v21662_v36 = vpack.c.bf16 %v12660_v52, %v12660_v52  ;;  %v12661_v26 = vcombine.high %v12659_v54, %v12659_v54  ;;  %v21715_v28 = vpack.c.bf16 %v12659_v54, %v12659_v54  ;;  %v17247_v52 = vld [vmem:[%s22162_s2 + $0x1e8] ss:$24 sps:$4 sm:$0xff]  }
 0x620   : > { %v17250_v54 = vld [vmem:[%s22162_s2 + $0x4e8] ss:$24 sps:$4 sm:$0xff]  }
 0x621   : > { %v21673_v41 = vpack.c.bf16 %v12661_v26, %v12661_v26  ;;  %13854 = vmatprep.mubr.bf16.mxu0 %v21662_v36  ;;  %v17258_v26 = vld [vmem:[%s22162_s2 + $0x51c] ss:$24 sps:$4 sm:$0xff]  }
 0x622   : > { %13855 = vmatmul.mubr.bf16.vlgmr.msra.gmra.mrb[0].mxu0 %v21713_v14 }
 0x623   : > { %13895 = vmatprep.mubr.bf16.mxu1 %v21673_v41  ;;  %13905 = vmatpush1.bf16.msra.mxu0 %v17187_v43  ;;  %v17282_v43 = vld [vmem:[%s22162_s2 + $0x5dc] ss:$24 sps:$4 sm:$0xff]  }
 0x624   : > { %13896 = vmatmul.mubr.bf16.vlgmr.msra.gmra.mrb[0].mxu1 %v21715_v28  ;;  %13906 = vmatprep.subr.bf16.mxu0 %v17195_v1  ;;  %v17280_v1 = vld [vmem:[%s22162_s2 + $0x5d8] ss:$24 sps:$4 sm:$0xff]  }
 0x625   : > { %13946 = vmatpush1.bf16.msra.mxu1 %v17190_v3  ;;  %13936 = vmatprep.mubr.bf16.mxu0 %v21662_v36  ;;  %v17277_v3 = vld [vmem:[%s22162_s2 + $0x2d8] ss:$24 sps:$4 sm:$0xff]  }
 0x626   : > { %13947 = vmatprep.subr.bf16.mxu1 %v17198_v34  ;;  %13977 = vmatprep.mubr.bf16.mxu1 %v21673_v41  ;;  %v17285_v34 = vld [vmem:[%s22162_s2 + $0x14] ss:$24 sps:$4 sm:$0xff]  }
 0x627   : > { %13907 = vmatpush1.bf16.msra.mxu0 %v17193_v6  ;;  %v17288_v6 = vld [vmem:[%s22162_s2 + $0x314] ss:$24 sps:$4 sm:$0xff]  }
 0x628   : > { %13908 = vmatprep.subr.bf16.mxu0 %v17201_v29  ;;  %v17286_v29 = vld [vmem:[%s22162_s2 + $0x310] ss:$24 sps:$4 sm:$0xff]  }
 0x629   : > { %13948 = vmatpush1.bf16.msra.mxu1 %v17196_v35  ;;  %v17283_v35 = vld [vmem:[%s22162_s2 + $0x10] ss:$24 sps:$4 sm:$0xff]  }
 0x62a   : > { %13949 = vmatprep.subr.bf16.mxu1 %v17204_v21  ;;  %v17291_v21 = vld [vmem:[%s22162_s2 + $0x44] ss:$24 sps:$4 sm:$0xff]  }
 0x62b   : > { %13909 = vmatpush1.bf16.msra.mxu0 %v17199_v44  ;;  %v17294_v44 = vld [vmem:[%s22162_s2 + $0x344] ss:$24 sps:$4 sm:$0xff]  }
 0x62c   : > { %13910 = vmatprep.subr.bf16.mxu0 %v17207_v59  ;;  %v17292_v59 = vld [vmem:[%s22162_s2 + $0x340] ss:$24 sps:$4 sm:$0xff]  }
 0x62d   : > { %13950 = vmatpush1.bf16.msra.mxu1 %v17202_v7  ;;  %v17289_v7 = vld [vmem:[%s22162_s2 + $0x40] ss:$24 sps:$4 sm:$0xff]  }
 0x62e   : > { %13951 = vmatprep.subr.bf16.mxu1 %v17210_v8  ;;  %v17297_v8 = vld [vmem:[%s22162_s2 + $0x74] ss:$24 sps:$4 sm:$0xff]  }
 0x62f   : > { %13911 = vmatpush1.bf16.msra.mxu0 %v17205_v46  ;;  %v17300_v46 = vld [vmem:[%s22162_s2 + $0x374] ss:$24 sps:$4 sm:$0xff]  }
 0x630   : > { %13912 = vmatprep.subr.bf16.mxu0 %v17213_v24  ;;  %v17298_v24 = vld [vmem:[%s22162_s2 + $0x370] ss:$24 sps:$4 sm:$0xff]  }
 0x631   : > { %13952 = vmatpush1.bf16.msra.mxu1 %v17208_v30  ;;  %v17295_v30 = vld [vmem:[%s22162_s2 + $0x70] ss:$24 sps:$4 sm:$0xff]  }
 0x632   : > { %13953 = vmatprep.subr.bf16.mxu1 %v17216_v62  ;;  %v17303_v62 = vld [vmem:[%s22162_s2 + $0xa4] ss:$24 sps:$4 sm:$0xff]  }
 0x633   : > { %13913 = vmatpush1.bf16.msra.mxu0 %v17211_v51  ;;  %v17304_v51 = vld [vmem:[%s22162_s2 + $0x3a0] ss:$24 sps:$4 sm:$0xff]  }
 0x634   : > { %13914 = vmatprep.subr.bf16.mxu0 %v17219_v22  ;;  %v17312_v22 = vld [vmem:[%s22162_s2 + $0x3d4] ss:$24 sps:$4 sm:$0xff]  }
 0x635   : > { %13954 = vmatpush1.bf16.msra.mxu1 %v17214_v2  ;;  %v17309_v2 = vld [vmem:[%s22162_s2 + $0xd4] ss:$24 sps:$4 sm:$0xff]  }
 0x636   : > { %13955 = vmatprep.subr.bf16.mxu1 %v17222_v9  ;;  %v17307_v9 = vld [vmem:[%s22162_s2 + $0xd0] ss:$24 sps:$4 sm:$0xff]  }
 0x637   : > { %13915 = vmatpush1.bf16.msra.mxu0 %v17217_v31  ;;  %v17310_v31 = vld [vmem:[%s22162_s2 + $0x3d0] ss:$24 sps:$4 sm:$0xff]  }
 0x638   : > { %13916 = vmatprep.subr.bf16.mxu0 %v17225_v39  ;;  %v17318_v39 = vld [vmem:[%s22162_s2 + $0x404] ss:$24 sps:$4 sm:$0xff]  }
 0x639   : > { %13956 = vmatpush1.bf16.msra.mxu1 %v17220_v63  ;;  %v17315_v63 = vld [vmem:[%s22162_s2 + $0x104] ss:$24 sps:$4 sm:$0xff]  }
 0x63a   : > { %13957 = vmatprep.subr.bf16.mxu1 %v17228_v38  ;;  %v17313_v38 = vld [vmem:[%s22162_s2 + $0x100] ss:$24 sps:$4 sm:$0xff]  }
 0x63b   : > { %13917 = vmatpush1.bf16.msra.mxu0 %v17223_v32  ;;  %v17316_v32 = vld [vmem:[%s22162_s2 + $0x400] ss:$24 sps:$4 sm:$0xff]  }
 0x63c   : > { %13918 = vmatprep.subr.bf16.mxu0 %v17231_v15  ;;  %v17324_v15 = vld [vmem:[%s22162_s2 + $0x434] ss:$24 sps:$4 sm:$0xff]  }
 0x63d   : > { %13958 = vmatpush1.bf16.msra.mxu1 %v17226_v4  ;;  %v17321_v4 = vld [vmem:[%s22162_s2 + $0x134] ss:$24 sps:$4 sm:$0xff]  }
 0x63e   : > { %13959 = vmatprep.subr.bf16.mxu1 %v17234_v42  ;;  %v17319_v42 = vld [vmem:[%s22162_s2 + $0x130] ss:$24 sps:$4 sm:$0xff]  }
 0x63f   : > { %13919 = vmatpush1.bf16.msra.mxu0 %v17229_v37  ;;  %v17322_v37 = vld [vmem:[%s22162_s2 + $0x430] ss:$24 sps:$4 sm:$0xff]  }
 0x640   : > { %13920 = vmatprep.subr.bf16.mxu0 %v17237_v56  ;;  %v17330_v56 = vld [vmem:[%s22162_s2 + $0x464] ss:$24 sps:$4 sm:$0xff]  }
 0x641   : > { %13960 = vmatpush1.bf16.msra.mxu1 %v17232_v13  ;;  %v17327_v13 = vld [vmem:[%s22162_s2 + $0x164] ss:$24 sps:$4 sm:$0xff]  }
 0x642   : > { %13961 = vmatprep.subr.bf16.mxu1 %v17240_v40  ;;  %v17325_v40 = vld [vmem:[%s22162_s2 + $0x160] ss:$24 sps:$4 sm:$0xff]  }
 0x643   : > { %13921 = vmatpush1.bf16.msra.mxu0 %v17235_v10  ;;  %v17328_v10 = vld [vmem:[%s22162_s2 + $0x460] ss:$24 sps:$4 sm:$0xff]  }
 0x644   : > { %13922 = vmatprep.subr.bf16.mxu0 %v17243_v27  ;;  %v17336_v27 = vld [vmem:[%s22162_s2 + $0x494] ss:$24 sps:$4 sm:$0xff]  }
 0x645   : > { %13962 = vmatpush1.bf16.msra.mxu1 %v17238_v55  ;;  %v17333_v55 = vld [vmem:[%s22162_s2 + $0x194] ss:$24 sps:$4 sm:$0xff]  }
 0x646   : > { %13963 = vmatprep.subr.bf16.mxu1 %v17246_v11  ;;  %v17331_v11 = vld [vmem:[%s22162_s2 + $0x190] ss:$24 sps:$4 sm:$0xff]  }
 0x647   : > { %13923 = vmatpush1.bf16.msra.mxu0 %v17241_v61  ;;  %v17334_v61 = vld [vmem:[%s22162_s2 + $0x490] ss:$24 sps:$4 sm:$0xff]  }
 0x648   : > { %13924 = vmatprep.subr.bf16.mxu0 %v17249_v50  ;;  %v17342_v50 = vld [vmem:[%s22162_s2 + $0x4c4] ss:$24 sps:$4 sm:$0xff]  }
 0x649   : > { %13964 = vmatpush1.bf16.msra.mxu1 %v17244_v47  ;;  %v17339_v47 = vld [vmem:[%s22162_s2 + $0x1c4] ss:$24 sps:$4 sm:$0xff]  }
 0x64a   : > { %13965 = vmatprep.subr.bf16.mxu1 %v17252_v60  ;;  %v17337_v60 = vld [vmem:[%s22162_s2 + $0x1c0] ss:$24 sps:$4 sm:$0xff]  }
 0x64b   : > { %13925 = vmatpush1.bf16.msra.mxu0 %v17247_v52  ;;  %v17340_v52 = vld [vmem:[%s22162_s2 + $0x4c0] ss:$24 sps:$4 sm:$0xff]  }
 0x64c   : > { %13926 = vmatprep.subr.bf16.mxu0 %v17255_v19  ;;  %v17348_v19 = vld [vmem:[%s22162_s2 + $0x4f4] ss:$24 sps:$4 sm:$0xff]  }
 0x64d   : > { %13966 = vmatpush1.bf16.msra.mxu1 %v17250_v54  ;;  %v17345_v54 = vld [vmem:[%s22162_s2 + $0x1f4] ss:$24 sps:$4 sm:$0xff]  }
 0x64e   : > { %13967 = vmatprep.subr.bf16.mxu1 %v17258_v26  ;;  %v17343_v26 = vld [vmem:[%s22162_s2 + $0x1f0] ss:$24 sps:$4 sm:$0xff]  }
 0x64f   : > { %13927 = vmatpush1.bf16.msra.mxu0 %v17253_v23  ;;  %v17346_v23 = vld [vmem:[%s22162_s2 + $0x4f0] ss:$24 sps:$4 sm:$0xff]  }
 0x650   : > { %13928 = vmatprep.subr.bf16.mxu0 %v17261_v58  ;;  %v17354_v58 = vld [vmem:[%s22162_s2 + $0x524] ss:$24 sps:$4 sm:$0xff]  }
 0x651   : > { %13968 = vmatpush1.bf16.msra.mxu1 %v17256_v49  ;;  %v17351_v49 = vld [vmem:[%s22162_s2 + $0x224] ss:$24 sps:$4 sm:$0xff]  }
 0x652   : > { %13969 = vmatprep.subr.bf16.mxu1 %v17264_v57  ;;  %v17349_v57 = vld [vmem:[%s22162_s2 + $0x220] ss:$24 sps:$4 sm:$0xff]  }
 0x653   : > { %13929 = vmatpush1.bf16.msra.mxu0 %v17259_v25  ;;  %v17352_v25 = vld [vmem:[%s22162_s2 + $0x520] ss:$24 sps:$4 sm:$0xff]  }
 0x654   : > { %13930 = vmatprep.subr.bf16.mxu0 %v17267_v16  ;;  %v17360_v16 = vld [vmem:[%s22162_s2 + $0x554] ss:$24 sps:$4 sm:$0xff]  }
 0x655   : > { %13970 = vmatpush1.bf16.msra.mxu1 %v17262_v5  ;;  %v17357_v5 = vld [vmem:[%s22162_s2 + $0x254] ss:$24 sps:$4 sm:$0xff]  }
 0x656   : > { %13971 = vmatprep.subr.bf16.mxu1 %v17270_v20  ;;  %v17355_v20 = vld [vmem:[%s22162_s2 + $0x250] ss:$24 sps:$4 sm:$0xff]  }
 0x657   : > { %13931 = vmatpush1.bf16.msra.mxu0 %v17265_v48  ;;  %v17358_v48 = vld [vmem:[%s22162_s2 + $0x550] ss:$24 sps:$4 sm:$0xff]  }
 0x658   : > { %13932 = vmatprep.subr.bf16.mxu0 %v17273_v45  ;;  %v17366_v45 = vld [vmem:[%s22162_s2 + $0x584] ss:$24 sps:$4 sm:$0xff]  }
 0x659   : > { %13972 = vmatpush1.bf16.msra.mxu1 %v17268_v33  ;;  %v17363_v33 = vld [vmem:[%s22162_s2 + $0x284] ss:$24 sps:$4 sm:$0xff]  }
 0x65a   : > { %13973 = vmatprep.subr.bf16.mxu1 %v17276_v17  ;;  %v17361_v17 = vld [vmem:[%s22162_s2 + $0x280] ss:$24 sps:$4 sm:$0xff]  }
 0x65b   : > { %13933 = vmatpush1.bf16.msra.mxu0 %v17271_v53  ;;  %v17364_v53 = vld [vmem:[%s22162_s2 + $0x580] ss:$24 sps:$4 sm:$0xff]  }
 0x65c   : > { %13934 = vmatprep.subr.bf16.mxu0 %v17279_v0  ;;  %v17372_v0 = vld [vmem:[%s22162_s2 + $0x5b4] ss:$24 sps:$4 sm:$0xff]  }
 0x65d   : > { %13974 = vmatpush1.bf16.msra.mxu1 %v17274_v18  ;;  %v17369_v18 = vld [vmem:[%s22162_s2 + $0x2b4] ss:$24 sps:$4 sm:$0xff]  }
 0x65e   : > { %13975 = vmatprep.subr.bf16.mxu1 %v17282_v43  ;;  %v17367_v43 = vld [vmem:[%s22162_s2 + $0x2b0] ss:$24 sps:$4 sm:$0xff]  }
 0x65f   : > { %13935 = vmatpush1.bf16.msra.mxu0 %v17277_v3  ;;  %v17370_v3 = vld [vmem:[%s22162_s2 + $0x5b0] ss:$24 sps:$4 sm:$0xff]  }
 0x660   : > { %13986 = vmatprep.subr.bf16.mxu0 %v17285_v34  ;;  %v17378_v34 = vld [vmem:[%s22162_s2 + $0x5e4] ss:$24 sps:$4 sm:$0xff]  }
 0x661   : > { %13976 = vmatpush1.bf16.msra.mxu1 %v17280_v1  ;;  %v17375_v1 = vld [vmem:[%s22162_s2 + $0x2e4] ss:$24 sps:$4 sm:$0xff]  }
 0x662   : > { %14027 = vmatprep.subr.bf16.mxu1 %v17288_v6  ;;  %13937 = vmatmul.mubr.bf16.vlgmr.msra.gmra.mrb[4].mxu0 %v21713_v14  ;;  %v17373_v6 = vld [vmem:[%s22162_s2 + $0x2e0] ss:$24 sps:$4 sm:$0xff]  }
 0x663   : > { %13987 = vmatpush1.bf16.msra.mxu0 %v17283_v35  ;;  %14018 = vmatprep.mubr.bf16.mxu0 %v21662_v36  ;;  %v17306_v36 = vld [vmem:[%s22162_s2 + $0x3a4] ss:$24 sps:$4 sm:$0xff]   ;;  %v17376_v35 = vld [vmem:[%s22162_s2 + $0x5e0] ss:$24 sps:$4 sm:$0xff]  }
 0x664   : > { %13978 = vmatmul.mubr.bf16.vlgmr.msra.gmra.mrb[4].mxu1 %v21715_v28  ;;  %13988 = vmatprep.subr.bf16.mxu0 %v17291_v21 }
 0x665   : > { %14028 = vmatpush1.bf16.msra.mxu1 %v17286_v29  ;;  %14059 = vmatprep.mubr.bf16.mxu1 %v21673_v41  ;;  %v17301_v41 = vld [vmem:[%s22162_s2 + $0xa0] ss:$24 sps:$4 sm:$0xff]  }
 0x666   : > { %14029 = vmatprep.subr.bf16.mxu1 %v17294_v44  ;;  %v22315_v29 = vld [vmem:[#allocation7_spill] sm:$0xff]  ;;  %v14069_v44 = vld [vmem:[%s22163_s3] sm:$0x3f] }
 0x667   : > { %13989 = vmatpush1.bf16.msra.mxu0 %v17289_v7  ;;  %v14073_v21 = vsub.s32 0, %v22315_v29  ;;  %v14077_v7 = vsub.s32 1, %v22315_v29 }
 0x668   : > { %13990 = vmatprep.subr.bf16.mxu0 %v17297_v8 }
 0x669   : > { %14030 = vmatpush1.bf16.msra.mxu1 %v17292_v59  ;;  %v14074_v59 = vrot.slane %v14069_v44, %v14073_v21 }
 0x66a   : > { %14031 = vmatprep.subr.bf16.mxu1 %v17300_v46 }
 0x66b   : > { %13991 = vmatpush1.bf16.msra.mxu0 %v17295_v30  ;;  %v14078_v30 = vrot.slane %v14069_v44, %v14077_v7 }
 0x66c   : > { %13992 = vmatprep.subr.bf16.mxu0 %v17303_v62 }
 0x66d   : > { %14032 = vmatpush1.bf16.msra.mxu1 %v17298_v24 }
 0x66e   : > { %14033 = vmatprep.subr.bf16.mxu1 %v17306_v36 }
 0x66f   : > { %13993 = vmatpush1.bf16.msra.mxu0 %v17301_v41 }
 0x670   : > { %13994 = vmatprep.subr.bf16.mxu0 %v17309_v2 }
 0x671   : > { %14034 = vmatpush1.bf16.msra.mxu1 %v17304_v51 }
 0x672   : > { %14035 = vmatprep.subr.bf16.mxu1 %v17312_v22 }
 0x673   : > { %13995 = vmatpush1.bf16.msra.mxu0 %v17307_v9 }
 0x674   : > { %13996 = vmatprep.subr.bf16.mxu0 %v17315_v63  ;;  %v14081_v63 = vsub.s32 2, %v22315_v29 }
 0x675   : > { %14036 = vmatpush1.bf16.msra.mxu1 %v17310_v31 }
 0x676   : > { %14037 = vmatprep.subr.bf16.mxu1 %v17318_v39  ;;  %v14085_v39 = vsub.s32 3, %v22315_v29 }
 0x677   : > { %13997 = vmatpush1.bf16.msra.mxu0 %v17313_v38  ;;  %v14082_v38 = vrot.slane %v14069_v44, %v14081_v63 }
 0x678   : > { %13998 = vmatprep.subr.bf16.mxu0 %v17321_v4 }
 0x679   : > { %14038 = vmatpush1.bf16.msra.mxu1 %v17316_v32 }
 0x67a   : > { %14039 = vmatprep.subr.bf16.mxu1 %v17324_v15  ;;  %v14086_v15 = vrot.slane %v14069_v44, %v14085_v39 }
 0x67b   : > { %13999 = vmatpush1.bf16.msra.mxu0 %v17319_v42 }
 0x67c   : > { %14000 = vmatprep.subr.bf16.mxu0 %v17327_v13 }
 0x67d   : > { %14040 = vmatpush1.bf16.msra.mxu1 %v17322_v37 }
 0x67e   : > { %14041 = vmatprep.subr.bf16.mxu1 %v17330_v56 }
 0x67f   : > { %14001 = vmatpush1.bf16.msra.mxu0 %v17325_v40 }
 0x680   : > { %14002 = vmatprep.subr.bf16.mxu0 %v17333_v55 }
 0x681   : > { %14042 = vmatpush1.bf16.msra.mxu1 %v17328_v10 }
 0x682   : > { %14043 = vmatprep.subr.bf16.mxu1 %v17336_v27 }
 0x683   : > { %14003 = vmatpush1.bf16.msra.mxu0 %v17331_v11 }
 0x684   : > { %14004 = vmatprep.subr.bf16.mxu0 %v17339_v47 }
 0x685   : > { %14044 = vmatpush1.bf16.msra.mxu1 %v17334_v61 }
 0x686   : > { %14045 = vmatprep.subr.bf16.mxu1 %v17342_v50 }
 0x687   : > { %14005 = vmatpush1.bf16.msra.mxu0 %v17337_v60 }
 0x688   : > { %14006 = vmatprep.subr.bf16.mxu0 %v17345_v54  ;;  %v14089_v54 = vsub.s32 4, %v22315_v29 }
 0x689   : > { %14046 = vmatpush1.bf16.msra.mxu1 %v17340_v52 }
 0x68a   : > { %14047 = vmatprep.subr.bf16.mxu1 %v17348_v19  ;;  %v14093_v19 = vsub.s32 5, %v22315_v29 }
 0x68b   : > { %14007 = vmatpush1.bf16.msra.mxu0 %v17343_v26  ;;  %v14090_v26 = vrot.slane %v14069_v44, %v14089_v54 }
 0x68c   : > { %14008 = vmatprep.subr.bf16.mxu0 %v17351_v49 }
 0x68d   : > { %14048 = vmatpush1.bf16.msra.mxu1 %v17346_v23 }
 0x68e   : > { %14049 = vmatprep.subr.bf16.mxu1 %v17354_v58  ;;  %v14094_v58 = vrot.slane %v14069_v44, %v14093_v19 }
 0x68f   : > { %14009 = vmatpush1.bf16.msra.mxu0 %v17349_v57 }
 0x690   : > { %14010 = vmatprep.subr.bf16.mxu0 %v17357_v5 }
 0x691   : > { %14050 = vmatpush1.bf16.msra.mxu1 %v17352_v25 }
 0x692   : > { %14051 = vmatprep.subr.bf16.mxu1 %v17360_v16 }
 0x693   : > { %14011 = vmatpush1.bf16.msra.mxu0 %v17355_v20 }
 0x694   : > { %14012 = vmatprep.subr.bf16.mxu0 %v17363_v33 }
 0x695   : > { %14052 = vmatpush1.bf16.msra.mxu1 %v17358_v48 }
 0x696   : > { %14053 = vmatprep.subr.bf16.mxu1 %v17366_v45 }
 0x697   : > { %14013 = vmatpush1.bf16.msra.mxu0 %v17361_v17 }
 0x698   : > { %14014 = vmatprep.subr.bf16.mxu0 %v17369_v18 }
 0x699   : > { %14054 = vmatpush1.bf16.msra.mxu1 %v17364_v53 }
 0x69a   : > { %14055 = vmatprep.subr.bf16.mxu1 %v17372_v0 }
 0x69b   : > { %14015 = vmatpush1.bf16.msra.mxu0 %v17367_v43 }
 0x69c   : > { %14016 = vmatprep.subr.bf16.mxu0 %v17375_v1 }
 0x69d   : > { %14056 = vmatpush1.bf16.msra.mxu1 %v17370_v3 }
 0x69e   : > { %14057 = vmatprep.subr.bf16.mxu1 %v17378_v34 }
 0x69f   : > { %14017 = vmatpush1.bf16.msra.mxu0 %v17373_v6 }
 0x6a1   : > { %14058 = vmatpush1.bf16.msra.mxu1 %v17376_v35 }
 0x6a2   : > { %14019 = vmatmul.mubr.bf16.vlgmr.msra.gmra.mrb[8].mxu0 %v21713_v14 }
 0x6a4   : > { %14060 = vmatmul.mubr.bf16.vlgmr.msra.gmra.mrb[8].mxu1 %v21715_v28 }
 0x6f5   : > { %v13856_v8 = vpop.f32.mrb[0].mxu0 }
 0x6f6   : > { %v13858_v62 = vpop.f32.mrb[1].mxu0 }
 0x6f7   : > { %v13897_v46 = vpop.f32.mrb[0].mxu1  ;;  %v13860_v51 = vpop.f32.mrb[2].mxu0 }
 0x6f8   : > { %v13898_v24 = vadd.f32 %v13897_v46, %v13856_v8  ;;  %v13899_v36 = vpop.f32.mrb[1].mxu1  ;;  %v13861_v28 = vpop.f32.mrb[3].mxu0 }
 0x6f9   : > { %v13900_v41 = vadd.f32 %v13899_v36, %v13858_v62  ;;  %v13901_v14 = vpop.f32.mrb[2].mxu1 }
 0x6fa   : > { %v14101_v2 = vadd.f32 %v14074_v59, %v13898_v24  ;;  %v13902_v22 = vpop.f32.mrb[3].mxu1 }
 0x6fb   : > { %v14102_v9 = vadd.f32 %v14078_v30, %v13900_v41 }
 0x6fd   : > { %v14122_v31 = vcombine.low %v14101_v2, %v14102_v9 }
 0x6ff   : > { %v14130_v50 = vrot.slane %v14122_v31, %v21502_v12 }
 0x735   : > { %v13938_v32 = vpop.f32.mrb[4].mxu0 }
 0x736   : > { %v13940_v37 = vpop.f32.mrb[5].mxu0 }
 0x737   : > { %v13979_v4 = vpop.f32.mrb[4].mxu1  ;;  %v13942_v40 = vpop.f32.mrb[6].mxu0 }
 0x738   : > { %v13980_v42 = vadd.f32 %v13979_v4, %v13938_v32  ;;  %v13981_v13 = vpop.f32.mrb[5].mxu1  ;;  %v13943_v27 = vpop.f32.mrb[7].mxu0 }
 0x739   : > { %v13982_v56 = vadd.f32 %v13981_v13, %v13940_v37  ;;  %v13983_v10 = vpop.f32.mrb[6].mxu1 }
 0x73a   : > { %v14103_v55 = vadd.f32 %v14082_v38, %v13980_v42  ;;  %v13984_v11 = vpop.f32.mrb[7].mxu1 }
 0x73b   : > { %v14104_v61 = vadd.f32 %v14086_v15, %v13982_v56 }
 0x73d   : > { %v14123_v47 = vcombine.low %v14103_v55, %v14104_v61 }
 0x73f   : > { %v14137_v60 = vrot.slane %v14123_v47, %v21502_v12 }
 0x741   : > { %v14138_v52 = vcombine.low %v14130_v50, %v14137_v60 }
 0x743   : > { %14149 = vst [vmem:[#allocation4] sm:$0xff] %v14138_v52 }
 0x775   : > { %v14020_v23 = vpop.f32.mrb[8].mxu0 }
 0x776   : > { %v14022_v25 = vpop.f32.mrb[9].mxu0 }
 0x777   : > { %v14061_v49 = vpop.f32.mrb[8].mxu1  ;;  %v14024_v20 = vpop.f32.mrb[10].mxu0 }
 0x778   : > { %v14062_v57 = vadd.f32 %v14061_v49, %v14020_v23  ;;  %v14063_v5 = vpop.f32.mrb[9].mxu1  ;;  %v14025_v45 = vpop.f32.mrb[11].mxu0 }
 0x779   : > { %v14064_v16 = vadd.f32 %v14063_v5, %v14022_v25  ;;  %v14065_v48 = vpop.f32.mrb[10].mxu1 }
 0x77a   : > { %v14105_v33 = vadd.f32 %v14090_v26, %v14062_v57  ;;  %v14066_v17 = vpop.f32.mrb[11].mxu1 }
 0x77b   : > { %v14106_v53 = vadd.f32 %v14094_v58, %v14064_v16 }
 0x77d   : > { %v14139_v18 = vcombine.low %v14105_v33, %v14106_v53 }
 0x77f   : > { %v14146_v0 = vrot.slane %v14139_v18, %v21502_v12 }
 0x781   : > { %14153 = vst.msk [vmem:[#allocation4 + $0x8] sm:$0xf] %vm14152_vm11, %v14146_v0 }
 0x782 PF: > { %p22119_p12 = scmp.eq.s32.totalorder %s14253_s20, 1  ;;  %s17451_s28 = smov [#allocation4]  }
 0x783   : > { %s14164_s17 = sshll.u32 %s17451_s28, 4  ;;  %s14165_s17 = int_to_ptr.vmem [resolvable:$true] %s14164_s17 }
 0x784   : > { %s17379_s29 = scalar_lea.vmem %s14165_s17, 192  ;;  %p17386_p2 = scmp.lt.s32.totalorder %s14165_s17, %s14165_s17 }
 0x785   : > { %p17380_p13 = scmp.ne.s32.totalorder %s14165_s17, %s17379_s29  ;;  %p17387_p3 = scmp.lt.s32.totalorder %s17379_s29, %s17379_s29 }
 0x787   : > { %p17381_p0 = pnand %p17380_p13, %p22119_p12  ;;  %p17388_p4 = por %p17387_p3, %p17386_p2 }
 0x789   : > { %p17382_p1 = pneg %p17381_p0 }
 0x78b   : > { %p17389_p5 = pnand %p17388_p4, %p17382_p1 }
 0x78d   : > { %17392 = shalt.err (!%p17389_p5)
}
 0x78e   : > { %s17393_s20 = scalar_lea.hbm %s22164_s4, 192 }
 0x78f   : > { %p17394_p6 = scmp.ne.s32.totalorder %s22164_s4, %s17393_s20  ;;  %p17399_p9 = scmp.lt.u32.totalorder %s17393_s20, %s22164_s4 }
 0x791   : > { %p17395_p7 = pnand %p17394_p6, %p22119_p12 }
 0x793   : > { %p17396_p8 = pneg %p17395_p7 }
 0x795   : > { %p17401_p10 = pnand %p17399_p9, %p17396_p8 }
 0x797   : > { %17404 = shalt.err (!%p17401_p10)
}
 0x798   : > { %16285 = dma.vmem_to_hbm [thread:$0]  (%p22119_p12), %s14165_s17, 192, %s22164_s4, [#allocation5]  }
 0x799   : > { %17426 = dma.done.wait (%p22119_p12), [#allocation5], 192  }
 0x79a   : > { %17428 = vsyncadd (%p22119_p12), [#allocation5], 4294967104 }
 0x79b PF: > { %s15_s19 = sadd.s32 1, %s17447_s19   ;;  %s22317_s15 = smov %s17435_s16 }
 0x79c   : > { %p12_p11 = scmp.ge.s32.totalorder %s15_s19, 4   ;;  %s22318_s16 = smov %s17513_s24 }
 0x79d   : > { %s22319_s17 = smov %s17443_s18  ;;  %s22320_s18 = smov %s22322_s21 }
 0x79e   :  { %14 = sbr.rel (!%p12_p11) target bundleno = 3 (0x3), region = 124 }
 0x7a5   :  { %14177 = vsyncpa [#allocation5], 1 }
 0x7a6   :  { %14179 = vsyncpa [#allocation5 + $0x1], 1 }

</bundles_post_ra>
